<compile_context>
chip_gen: v7x
topology: tpu7x:2x2x1
jax: 0.10.0
libtpu: 0.0.40
codegen_flags: <defaults>
</compile_context>

<pallas_src>
import functools
import numpy as np
import jax
import jax.numpy as jnp
from jax.experimental import pallas as pl
from jax.experimental.pallas import tpu as pltpu

F32 = jnp.float32
VMEM_SPEC = pl.BlockSpec(memory_space=pltpu.MemorySpace.VMEM)


def _round_up(v, m):
    return ((v + m - 1) // m) * m


# --------------------------------------------------------------------------
# DFT branch: log(1 + |fftshift(fft2(x_c))|) for every (batch, channel) image.
# Images are kept in natural (N*H, W) layout; per grid step G images are
# processed as one (G*H, W) sublane stack:
#     Y  = X_stack @ Fw_shift              (shared (W,W) column DFT)
#     Z  = kron(I_G, Fh_shift) @ Y         (per-image row DFT, G is a small
#                                            batch-independent constant)
#     out = log(1 + |Z|)
# fftshift is baked into Fh / Fw (even H, W).
# --------------------------------------------------------------------------
def _dft_kernel(x_ref, ar_ref, ai_ref, fwr_ref, fwi_ref, o_ref):
    x = x_ref[...]                                           # (G*H, W) real
    cr = jnp.dot(x, fwr_ref[...], preferred_element_type=F32)
    ci = jnp.dot(x, fwi_ref[...], preferred_element_type=F32)
    re = (jnp.dot(ar_ref[...], cr, preferred_element_type=F32)
          - jnp.dot(ai_ref[...], ci, preferred_element_type=F32))
    im = (jnp.dot(ar_ref[...], ci, preferred_element_type=F32)
          + jnp.dot(ai_ref[...], cr, preferred_element_type=F32))
    o_ref[...] = jnp.log(1.0 + jnp.sqrt(re * re + im * im))


def _pick_dft_group(n_images, h):
    """Images per grid step: ~128-256 sublanes/step, divides N, 8-aligned."""
    target = max(1, 256 // h)
    for g in range(min(target, n_images), 0, -1):
        if n_images % g == 0 and (g * h) % 8 == 0:
            return g
    return n_images          # single grid step; block == full dims (always legal)


def dft_pallas(x):
    """x: (B, 3, H, W) -> log(1 + |fftshift(fft2(x))|), same shape."""
    B, C, H, W = x.shape
    assert C == 3 and H % 2 == 0 and W % 2 == 0
    N = B * C
    G = _pick_dft_group(N, H)

    n = np.arange(H)
    Fh = np.exp(-2j * np.pi * np.outer(n, n) / H)
    Fh = Fh[(n + H // 2) % H, :]                             # bake row fftshift
    m = np.arange(W)
    Fw = np.exp(-2j * np.pi * np.outer(m, m) / W)
    Fw = Fw[:, (m + W // 2) % W]                             # bake col fftshift

    A = np.kron(np.eye(G), Fh)                               # (G*H, G*H), batch-independent
    ar = jnp.asarray(A.real, F32)
    ai = jnp.asarray(A.imag, F32)
    fwr = jnp.asarray(Fw.real, F32)
    fwi = jnp.asarray(Fw.imag, F32)

    x2 = x.reshape(N * H, W)                                 # free row-major reshape

    out = pl.pallas_call(
        _dft_kernel,
        out_shape=jax.ShapeDtypeStruct((N * H, W), F32),
        grid=(N // G,),
        in_specs=[
            pl.BlockSpec((G * H, W), lambda i: (i, 0)),
            pl.BlockSpec((G * H, G * H), lambda i: (0, 0)),
            pl.BlockSpec((G * H, G * H), lambda i: (0, 0)),
            pl.BlockSpec((W, W), lambda i: (0, 0)),
            pl.BlockSpec((W, W), lambda i: (0, 0)),
        ],
        out_specs=pl.BlockSpec((G * H, W), lambda i: (i, 0)),
        compiler_params=pltpu.CompilerParams(
            dimension_semantics=("parallel",)),
    )(x2, ar, ai, fwr, fwi)

    return out.reshape(B, C, H, W)                           # free reshape back


# --------------------------------------------------------------------------
# Fused "backbone" chain for BOTH branches at once:
#   y = relu( (x_stacked @ res_w + res_b) @ fc1_w + fc1_b )
# x_stacked is (2B, C*H*W).  K = C*H*W is tiled (128-multiple tiles, zero
# padded) with a VMEM f32 accumulator.  Tile size / VMEM limit are chip-aware
# (v5e/v6e 128 MiB VMEM -> tk<=2048; v7x 64 MiB -> tk<=1024).
# --------------------------------------------------------------------------
def _backbone_fc1_kernel(x_ref, rw_ref, rb_ref, f1w_ref, f1b_ref, o_ref, acc_ref):
    @pl.when(pl.program_id(0) == 0)
    def _():
        acc_ref[...] = jnp.zeros_like(acc_ref)

    acc_ref[...] += jnp.dot(x_ref[...], rw_ref[...], preferred_element_type=F32)

    @pl.when(pl.program_id(0) == pl.num_programs(0) - 1)
    def _():
        h = acc_ref[...] + rb_ref[...]
        o_ref[...] = jnp.maximum(
            jnp.dot(h, f1w_ref[...], preferred_element_type=F32) + f1b_ref[...],
            0.0)


def _backbone_tile_cfg():
    try:
        cap = int(pltpu.get_tpu_info().vmem_capacity_bytes)
    except Exception:
        cap = 64 * 1024 * 1024                               # be conservative (v7x)
    if cap >= 100 * 1024 * 1024:                             # v5e / v6e (128 MiB VMEM)
        return 2048, 96 * 1024 * 1024
    return 1024, 48 * 1024 * 1024                            # v7x (64 MiB VMEM)


def backbone_fc1_pallas(x2b, res_w, res_b, fc1_w, fc1_b):
    M, K = x2b.shape
    Nr = res_w.shape[1]                                      # 2048
    Nf = fc1_w.shape[1]                                      # 128
    tk_cap, vmem_limit = _backbone_tile_cfg()
    tk = min(tk_cap, _round_up(K, 128))                      # 128-multiple tiles
    Kp = _round_up(K, tk)
    if Kp != K:                                              # zero-pad contraction
        x2b = jnp.pad(x2b, ((0, 0), (0, Kp - K)))
        res_w = jnp.pad(res_w, ((0, Kp - K), (0, 0)))

    # TODO(synk): res_w could be streamed as bf16 for ~2x on this HBM-bound
    # kernel; kept f32 to preserve strict weight dtype semantics.
    return pl.pallas_call(
        _backbone_fc1_kernel,
        out_shape=jax.ShapeDtypeStruct((M, Nf), F32),
        grid=(Kp // tk,),
        in_specs=[
            pl.BlockSpec((M, tk), lambda k: (0, k)),
            pl.BlockSpec((tk, Nr), lambda k: (k, 0)),
            pl.BlockSpec((1, Nr), lambda k: (0, 0)),
            pl.BlockSpec((Nr, Nf), lambda k: (0, 0)),
            pl.BlockSpec((1, Nf), lambda k: (0, 0)),
        ],
        out_specs=pl.BlockSpec((M, Nf), lambda k: (0, 0)),
        scratch_shapes=[pltpu.VMEM((M, Nr), F32)],
        compiler_params=pltpu.CompilerParams(
            dimension_semantics=("arbitrary",),
            vmem_limit_bytes=vmem_limit),
    )(x2b, res_w, res_b, fc1_w, fc1_b)


# --------------------------------------------------------------------------
# CrossAttentionModule attention part: ONE pallas_call for all batch elements.
#   enhanced_a = MHA(a, b, b); enhanced_b = MHA(b, a, a)
# q/k/v weights are pre-split per head host-side (no in-kernel lane slicing);
# all B batch elements are processed together with a block-diagonal additive
# attention bias (each token only attends within its own batch element).
# This is O((B*S)^2) per head, which is the cheapest formulation for small
# B*S; for very large batches switch to per-batch score blocks.
# --------------------------------------------------------------------------
def _cross_attn_kernel(a_ref, b_ref, bias_ref,
                       w_ab_ref, bi_ab_ref, ow_ab_ref, ob_ab_ref,
                       w_ba_ref, bi_ba_ref, ow_ba_ref, ob_ba_ref,
                       ea_ref, eb_ref, *, num_heads, scale):
    a = a_ref[...]                                           # (B*S, E)
    b = b_ref[...]
    attn_bias = bias_ref[...]                                # (B*S, B*S): 0 / -1e30

    def mha(xq, xkv, w_ref, bi_ref, ow_ref, ob_ref):
        acc = None
        for h in range(num_heads):                           # static unroll (4)
            q = jnp.dot(xq, w_ref[h], preferred_element_type=F32) + bi_ref[h]
            k = jnp.dot(xkv, w_ref[num_heads + h],
                        preferred_element_type=F32) + bi_ref[num_heads + h]
            v = jnp.dot(xkv, w_ref[2 * num_heads + h],
                        preferred_element_type=F32) + bi_ref[2 * num_heads + h]
            s = jnp.dot(q, k.T, preferred_element_type=F32) * scale + attn_bias
            s = s - jnp.max(s, axis=-1, keepdims=True)
            p = jnp.exp(s)
            p = p / jnp.sum(p, axis=-1, keepdims=True)
            o_h = jnp.dot(p, v, preferred_element_type=F32)          # (B*S, hd)
            c = jnp.dot(o_h, ow_ref[h], preferred_element_type=F32)  # (B*S, E)
            acc = c if acc is None else acc + c
        return acc + ob_ref[...]

    ea_ref[...] = mha(a, b, w_ab_ref, bi_ab_ref, ow_ab_ref, ob_ab_ref)
    eb_ref[...] = mha(b, a, w_ba_ref, bi_ba_ref, ow_ba_ref, ob_ba_ref)


def _split_heads(inw, inb, ow, num_heads):
    """(3,E,E)/(3,1,E)/(E,E) -> per-head layouts (q heads, k heads, v heads)."""
    _, E, _ = inw.shape
    hd = E // num_heads
    w_h = (inw.reshape(3, E, num_heads, hd)
              .transpose(0, 2, 1, 3)
              .reshape(3 * num_heads, E, hd))
    b_h = inb.reshape(3 * num_heads, 1, hd)
    ow_h = ow.reshape(num_heads, hd, E)
    return w_h, b_h, ow_h


def cross_attn_pallas(a2, b2, p, *, num_heads, seq):
    BS, E = a2.shape
    hd = E // num_heads
    scale = 1.0 / float(np.sqrt(hd))

    # block-diagonal additive bias (built host-side, batch-size-linear memory)
    bias_np = np.full((BS, BS), -1e30, np.float32)
    for i in range(BS // seq):
        bias_np[i * seq:(i + 1) * seq, i * seq:(i + 1) * seq] = 0.0
    attn_bias = jnp.asarray(bias_np)

    w_ab, bi_ab, ow_ab = _split_heads(p["inw_ab"], p["inb_ab"], p["ow_ab"], num_heads)
    w_ba, bi_ba, ow_ba = _split_heads(p["inw_ba"], p["inb_ba"], p["ow_ba"], num_heads)

    args = (a2, b2, attn_bias,
            w_ab, bi_ab, ow_ab, p["ob_ab"],
            w_ba, bi_ba, ow_ba, p["ob_ba"])
    ea, eb = pl.pallas_call(
        functools.partial(_cross_attn_kernel, num_heads=num_heads, scale=scale),
        out_shape=(jax.ShapeDtypeStruct((BS, E), F32),
                   jax.ShapeDtypeStruct((BS, E), F32)),
        in_specs=[VMEM_SPEC] * len(args),
        out_specs=(VMEM_SPEC, VMEM_SPEC),
    )(*args)
    return ea, eb


# --------------------------------------------------------------------------
# CrossAttentionModule MLP head, batched across B (M = B rows, lane-dense
# intermediates): relu(fc1) -> relu(fc2) -> fc3.
# --------------------------------------------------------------------------
def _mlp_head_kernel(x_ref, w1_ref, b1_ref, w2_ref, b2_ref, w3_ref, b3_ref, o_ref):
    h1 = jnp.maximum(
        jnp.dot(x_ref[...], w1_ref[...], preferred_element_type=F32) + b1_ref[...],
        0.0)
    h2 = jnp.maximum(
        jnp.dot(h1, w2_ref[...], preferred_element_type=F32) + b2_ref[...],
        0.0)
    o_ref[...] = jnp.dot(h2, w3_ref[...], preferred_element_type=F32) + b3_ref[...]


def mlp_head_pallas(flat, p):
    B = flat.shape[0]
    args = (flat, p["mfc1_w"], p["mfc1_b"], p["mfc2_w"], p["mfc2_b"],
            p["mfc3_w"], p["mfc3_b"])
    return pl.pallas_call(
        _mlp_head_kernel,
        out_shape=jax.ShapeDtypeStruct((B, 1), F32),
        in_specs=[VMEM_SPEC] * len(args),
        out_specs=VMEM_SPEC,
    )(*args)


# --------------------------------------------------------------------------
# Full xxmodel forward
# --------------------------------------------------------------------------
def xxmodel_forward(x, params, *, num_heads=4):
    B, C, H, W = x.shape
    S, E = 4, 32                                             # x.view(-1, 4, 32)

    x_dft = dft_pallas(x)                                    # DFT(x)

    # TODO(synk): patch_generator.smash_n_reconstruct is an external, undefined
    # dependency; the local branch passes the raw image through unchanged.
    x_local = x

    # TODO(synk): pretrained ResNet-50 backbone is not reproduced; a
    # deterministic linear projection to 2048 features stands in.
    stacked = jnp.concatenate([x_dft.reshape(B, C * H * W),
                               x_local.reshape(B, C * H * W)], axis=0)   # (2B, CHW)
    feats = backbone_fc1_pallas(stacked, params["res_w"], params["res_b"],
                                params["fc1_w"], params["fc1_b"])        # (2B, 128)

    a2 = feats[:B].reshape(B * S, E)                         # free reshapes
    b2 = feats[B:].reshape(B * S, E)

    ea, eb = cross_attn_pallas(a2, b2, params, num_heads=num_heads, seq=S)
    flat = jnp.concatenate([ea.reshape(B, S * E), eb.reshape(B, S * E)], axis=1)
    return mlp_head_pallas(flat, params)                     # (B, 1)


# --------------------------------------------------------------------------
# Deterministic parameter initialization (config: seq_len=8, embed_dim=32,
# num_heads=4  ->  2 * 4 * 32 = 256 flattened features into the module's fc1).
# --------------------------------------------------------------------------
def init_params(key, H, W):
    E, S_half = 32, 4

    def lin(k, fi, fo):
        k1, k2 = jax.random.split(k)
        bound = 1.0 / np.sqrt(fi)
        return (jax.random.uniform(k1, (fi, fo), F32, -bound, bound),
                jax.random.uniform(k2, (1, fo), F32, -bound, bound))

    keys = jax.random.split(key, 9)
    p = {}
    p["res_w"], p["res_b"] = lin(keys[0], 3 * H * W, 2048)    # ResNet stand-in
    p["fc1_w"], p["fc1_b"] = lin(keys[1], 2048, 128)          # xxmodel.fc1
    for tag, ka, kb in (("ab", keys[2], keys[3]), ("ba", keys[4], keys[5])):
        kw, kbi = jax.random.split(ka)
        bound = 1.0 / np.sqrt(E)
        p[f"inw_{tag}"] = jax.random.uniform(kw, (3, E, E), F32, -bound, bound)
        p[f"inb_{tag}"] = jax.random.uniform(kbi, (3, 1, E), F32, -bound, bound)
        p[f"ow_{tag}"], p[f"ob_{tag}"] = lin(kb, E, E)
    p["mfc1_w"], p["mfc1_b"] = lin(keys[6], 2 * S_half * E, 512)
    p["mfc2_w"], p["mfc2_b"] = lin(keys[7], 512, 256)
    p["mfc3_w"], p["mfc3_b"] = lin(keys[8], 256, 1)
    return p


if __name__ == "__main__":
    key = jax.random.PRNGKey(0)
    kx, kp = jax.random.split(key)
    B, C, H, W = 2, 3, 16, 16
    x = jax.random.normal(kx, (B, C, H, W), F32)
    params = init_params(kp, H, W)

    forward = jax.jit(functools.partial(xxmodel_forward, num_heads=4))
    out = forward(x, params)
    out = jax.block_until_ready(out)
    assert out.shape == (B, 1) and out.dtype == F32
    print("KERNEL_OK")
</pallas_src>

<mosaic_0001>
module attributes {stable_mosaic.version = 11 : i64} {
  func.func @_dft_kernel(%arg0: i32, %arg1: memref<96x16xf32, #tpu.memory_space<vmem>>, %arg2: memref<96x96xf32, #tpu.memory_space<vmem>>, %arg3: memref<96x96xf32, #tpu.memory_space<vmem>>, %arg4: memref<16x16xf32, #tpu.memory_space<vmem>>, %arg5: memref<16x16xf32, #tpu.memory_space<vmem>>, %arg6: memref<96x16xf32, #tpu.memory_space<vmem>>) attributes {dimension_semantics = [#tpu.dimension_semantics<parallel>], iteration_bounds = array<i64: 1>, scalar_prefetch = 0 : i64, scratch_operands = 0 : i64, tpu.core_type = #tpu.core_type<tc>, window_params = [{transform_indices = @transform_0, window_bounds = array<i64: 96, 16>}, {pipeline_mode = #tpu.pipeline_mode<synchronous>, transform_indices = @transform_1, window_bounds = array<i64: 96, 96>}, {pipeline_mode = #tpu.pipeline_mode<synchronous>, transform_indices = @transform_2, window_bounds = array<i64: 96, 96>}, {pipeline_mode = #tpu.pipeline_mode<synchronous>, transform_indices = @transform_3, window_bounds = array<i64: 16, 16>}, {pipeline_mode = #tpu.pipeline_mode<synchronous>, transform_indices = @transform_4, window_bounds = array<i64: 16, 16>}, {transform_indices = @transform_5, window_bounds = array<i64: 96, 16>}]} {
    %c0 = arith.constant 0 : index
    %c0_0 = arith.constant 0 : index
    %0 = vector.load %arg1[%c0, %c0_0] : memref<96x16xf32, #tpu.memory_space<vmem>>, vector<96x16xf32>
    %c0_1 = arith.constant 0 : index
    %c0_2 = arith.constant 0 : index
    %1 = vector.load %arg4[%c0_1, %c0_2] : memref<16x16xf32, #tpu.memory_space<vmem>>, vector<16x16xf32>
    %cst = arith.constant dense<0.000000e+00> : vector<96x16xf32>
    %2 = tpu.matmul %0, %1, %cst {dimension_numbers = #tpu.dot_dimension_numbers<[1], [0], [0], [1], [0, 0, 1, 1], [], []>} : vector<96x16xf32>, vector<16x16xf32>, vector<96x16xf32> -> vector<96x16xf32>
    %c0_3 = arith.constant 0 : index
    %c0_4 = arith.constant 0 : index
    %3 = vector.load %arg5[%c0_3, %c0_4] : memref<16x16xf32, #tpu.memory_space<vmem>>, vector<16x16xf32>
    %cst_5 = arith.constant dense<0.000000e+00> : vector<96x16xf32>
    %4 = tpu.matmul %0, %3, %cst_5 {dimension_numbers = #tpu.dot_dimension_numbers<[1], [0], [0], [1], [0, 0, 1, 1], [], []>} : vector<96x16xf32>, vector<16x16xf32>, vector<96x16xf32> -> vector<96x16xf32>
    %c0_6 = arith.constant 0 : index
    %c0_7 = arith.constant 0 : index
    %5 = vector.load %arg2[%c0_6, %c0_7] : memref<96x96xf32, #tpu.memory_space<vmem>>, vector<96x96xf32>
    %cst_8 = arith.constant dense<0.000000e+00> : vector<96x16xf32>
    %6 = tpu.matmul %5, %2, %cst_8 {dimension_numbers = #tpu.dot_dimension_numbers<[1], [0], [0], [1], [0, 0, 1, 1], [], []>} : vector<96x96xf32>, vector<96x16xf32>, vector<96x16xf32> -> vector<96x16xf32>
    %c0_9 = arith.constant 0 : index
    %c0_10 = arith.constant 0 : index
    %7 = vector.load %arg3[%c0_9, %c0_10] : memref<96x96xf32, #tpu.memory_space<vmem>>, vector<96x96xf32>
    %cst_11 = arith.constant dense<0.000000e+00> : vector<96x16xf32>
    %8 = tpu.matmul %7, %4, %cst_11 {dimension_numbers = #tpu.dot_dimension_numbers<[1], [0], [0], [1], [0, 0, 1, 1], [], []>} : vector<96x96xf32>, vector<96x16xf32>, vector<96x16xf32> -> vector<96x16xf32>
    %9 = arith.subf %6, %8 : vector<96x16xf32>
    %c0_12 = arith.constant 0 : index
    %c0_13 = arith.constant 0 : index
    %10 = vector.load %arg2[%c0_12, %c0_13] : memref<96x96xf32, #tpu.memory_space<vmem>>, vector<96x96xf32>
    %cst_14 = arith.constant dense<0.000000e+00> : vector<96x16xf32>
    %11 = tpu.matmul %10, %4, %cst_14 {dimension_numbers = #tpu.dot_dimension_numbers<[1], [0], [0], [1], [0, 0, 1, 1], [], []>} : vector<96x96xf32>, vector<96x16xf32>, vector<96x16xf32> -> vector<96x16xf32>
    %c0_15 = arith.constant 0 : index
    %c0_16 = arith.constant 0 : index
    %12 = vector.load %arg3[%c0_15, %c0_16] : memref<96x96xf32, #tpu.memory_space<vmem>>, vector<96x96xf32>
    %cst_17 = arith.constant dense<0.000000e+00> : vector<96x16xf32>
    %13 = tpu.matmul %12, %2, %cst_17 {dimension_numbers = #tpu.dot_dimension_numbers<[1], [0], [0], [1], [0, 0, 1, 1], [], []>} : vector<96x96xf32>, vector<96x16xf32>, vector<96x16xf32> -> vector<96x16xf32>
    %14 = arith.addf %11, %13 : vector<96x16xf32>
    %15 = arith.mulf %9, %9 : vector<96x16xf32>
    %16 = arith.mulf %14, %14 : vector<96x16xf32>
    %17 = arith.addf %15, %16 : vector<96x16xf32>
    %18 = math.sqrt %17 : vector<96x16xf32>
    %cst_18 = arith.constant 1.000000e+00 : f32
    %19 = vector.broadcast %cst_18 : f32 to vector<96x16xf32>
    %20 = arith.addf %19, %18 : vector<96x16xf32>
    %21 = math.log %20 : vector<96x16xf32>
    %c0_19 = arith.constant 0 : index
    %c0_20 = arith.constant 0 : index
    %22 = vector.load %arg6[%c0_19, %c0_20] : memref<96x16xf32, #tpu.memory_space<vmem>>, vector<96x16xf32>
    tpu.vector_store %arg6[%c0_19, %c0_20], %21 {strides = array<i32>} : memref<96x16xf32, #tpu.memory_space<vmem>>, vector<96x16xf32>,
    return
  }
  func.func @transform_0(%arg0: i32) -> (i32, i32) {
    %c0_i32 = arith.constant 0 : i32
    %c0_i32_0 = arith.constant 0 : i32
    return %arg0, %c0_i32 : i32, i32
  }
  func.func @transform_1(%arg0: i32) -> (i32, i32) {
    %c0_i32 = arith.constant 0 : i32
    %c0_i32_0 = arith.constant 0 : i32
    %c0_i32_1 = arith.constant 0 : i32
    return %c0_i32, %c0_i32_0 : i32, i32
  }
  func.func @transform_2(%arg0: i32) -> (i32, i32) {
    %c0_i32 = arith.constant 0 : i32
    %c0_i32_0 = arith.constant 0 : i32
    %c0_i32_1 = arith.constant 0 : i32
    return %c0_i32, %c0_i32_0 : i32, i32
  }
  func.func @transform_3(%arg0: i32) -> (i32, i32) {
    %c0_i32 = arith.constant 0 : i32
    %c0_i32_0 = arith.constant 0 : i32
    %c0_i32_1 = arith.constant 0 : i32
    return %c0_i32, %c0_i32_0 : i32, i32
  }
  func.func @transform_4(%arg0: i32) -> (i32, i32) {
    %c0_i32 = arith.constant 0 : i32
    %c0_i32_0 = arith.constant 0 : i32
    %c0_i32_1 = arith.constant 0 : i32
    return %c0_i32, %c0_i32_0 : i32, i32
  }
  func.func @transform_5(%arg0: i32) -> (i32, i32) {
    %c0_i32 = arith.constant 0 : i32
    %c0_i32_0 = arith.constant 0 : i32
    return %arg0, %c0_i32 : i32, i32
  }
}

module attributes {stable_mosaic.version = 11 : i64} {
  func.func @_backbone_fc1_kernel(%arg0: i32, %arg1: memref<4x768xf32, #tpu.memory_space<vmem>>, %arg2: memref<768x2048xf32, #tpu.memory_space<vmem>>, %arg3: memref<1x2048xf32, #tpu.memory_space<vmem>>, %arg4: memref<2048x128xf32, #tpu.memory_space<vmem>>, %arg5: memref<1x128xf32, #tpu.memory_space<vmem>>, %arg6: memref<4x128xf32, #tpu.memory_space<vmem>>, %arg7: memref<4x2048xf32, #tpu.memory_space<vmem>>) attributes {dimension_semantics = [#tpu.dimension_semantics<arbitrary>], iteration_bounds = array<i64: 1>, scalar_prefetch = 0 : i64, scratch_operands = 1 : i64, tpu.core_type = #tpu.core_type<tc>, window_params = [{transform_indices = @transform_0, window_bounds = array<i64: 4, 768>}, {transform_indices = @transform_1, window_bounds = array<i64: 768, 2048>}, {pipeline_mode = #tpu.pipeline_mode<synchronous>, transform_indices = @transform_2, window_bounds = array<i64: 1, 2048>}, {pipeline_mode = #tpu.pipeline_mode<synchronous>, transform_indices = @transform_3, window_bounds = array<i64: 2048, 128>}, {pipeline_mode = #tpu.pipeline_mode<synchronous>, transform_indices = @transform_4, window_bounds = array<i64: 1, 128>}, {pipeline_mode = #tpu.pipeline_mode<synchronous>, transform_indices = @transform_5, window_bounds = array<i64: 4, 128>}]} {
    %c0_i32 = arith.constant 0 : i32
    %0 = arith.cmpi eq, %arg0, %c0_i32 : i32
    %1 = arith.extui %0 : i1 to i32
    %c0_i32_0 = arith.constant 0 : i32
    %2 = arith.cmpi ne, %1, %c0_i32_0 : i32
    scf.if %2 {
      %cst_10 = arith.constant 0.000000e+00 : f32
      %12 = vector.broadcast %cst_10 : f32 to vector<4x2048xf32>
      %c0_11 = arith.constant 0 : index
      %c0_12 = arith.constant 0 : index
      %13 = vector.load %arg7[%c0_11, %c0_12] : memref<4x2048xf32, #tpu.memory_space<vmem>>, vector<4x2048xf32>
      tpu.vector_store %arg7[%c0_11, %c0_12], %12 {strides = array<i32>} : memref<4x2048xf32, #tpu.memory_space<vmem>>, vector<4x2048xf32>,
    } else {
    }
    %c0 = arith.constant 0 : index
    %c0_1 = arith.constant 0 : index
    %3 = vector.load %arg7[%c0, %c0_1] : memref<4x2048xf32, #tpu.memory_space<vmem>>, vector<4x2048xf32>
    %c0_2 = arith.constant 0 : index
    %c0_3 = arith.constant 0 : index
    %4 = vector.load %arg1[%c0_2, %c0_3] : memref<4x768xf32, #tpu.memory_space<vmem>>, vector<4x768xf32>
    %c0_4 = arith.constant 0 : index
    %c0_5 = arith.constant 0 : index
    %5 = vector.load %arg2[%c0_4, %c0_5] : memref<768x2048xf32, #tpu.memory_space<vmem>>, vector<768x2048xf32>
    %cst = arith.constant dense<0.000000e+00> : vector<4x2048xf32>
    %6 = tpu.matmul %4, %5, %cst {dimension_numbers = #tpu.dot_dimension_numbers<[1], [0], [0], [1], [0, 0, 1, 1], [], []>} : vector<4x768xf32>, vector<768x2048xf32>, vector<4x2048xf32> -> vector<4x2048xf32>
    %7 = arith.addf %3, %6 : vector<4x2048xf32>
    %c0_6 = arith.constant 0 : index
    %c0_7 = arith.constant 0 : index
    %8 = vector.load %arg7[%c0_6, %c0_7] : memref<4x2048xf32, #tpu.memory_space<vmem>>, vector<4x2048xf32>
    tpu.vector_store %arg7[%c0_6, %c0_7], %7 {strides = array<i32>} : memref<4x2048xf32, #tpu.memory_space<vmem>>, vector<4x2048xf32>,
    %c0_i32_8 = arith.constant 0 : i32
    %9 = arith.cmpi eq, %arg0, %c0_i32_8 : i32
    %10 = arith.extui %9 : i1 to i32
    %c0_i32_9 = arith.constant 0 : i32
    %11 = arith.cmpi ne, %10, %c0_i32_9 : i32
    scf.if %11 {
      %c0_10 = arith.constant 0 : index
      %c0_11 = arith.constant 0 : index
      %12 = vector.load %arg7[%c0_10, %c0_11] : memref<4x2048xf32, #tpu.memory_space<vmem>>, vector<4x2048xf32>
      %c0_12 = arith.constant 0 : index
      %c0_13 = arith.constant 0 : index
      %13 = vector.load %arg3[%c0_12, %c0_13] : memref<1x2048xf32, #tpu.memory_space<vmem>>, vector<1x2048xf32>
      %14 = vector.broadcast %13 : vector<1x2048xf32> to vector<4x2048xf32>
      %15 = arith.addf %12, %14 : vector<4x2048xf32>
      %c0_14 = arith.constant 0 : index
      %c0_15 = arith.constant 0 : index
      %16 = vector.load %arg4[%c0_14, %c0_15] : memref<2048x128xf32, #tpu.memory_space<vmem>>, vector<2048x128xf32>
      %cst_16 = arith.constant dense<0.000000e+00> : vector<4x128xf32>
      %17 = tpu.matmul %15, %16, %cst_16 {dimension_numbers = #tpu.dot_dimension_numbers<[1], [0], [0], [1], [0, 0, 1, 1], [], []>} : vector<4x2048xf32>, vector<2048x128xf32>, vector<4x128xf32> -> vector<4x128xf32>
      %c0_17 = arith.constant 0 : index
      %c0_18 = arith.constant 0 : index
      %18 = vector.load %arg5[%c0_17, %c0_18] : memref<1x128xf32, #tpu.memory_space<vmem>>, vector<1x128xf32>
      %19 = vector.broadcast %18 : vector<1x128xf32> to vector<4x128xf32>
      %20 = arith.addf %17, %19 : vector<4x128xf32>
      %cst_19 = arith.constant 0.000000e+00 : f32
      %21 = vector.broadcast %cst_19 : f32 to vector<4x128xf32>
      %22 = arith.maximumf %20, %21 : vector<4x128xf32>
      %c0_20 = arith.constant 0 : index
      %c0_21 = arith.constant 0 : index
      %23 = vector.load %arg6[%c0_20, %c0_21] : memref<4x128xf32, #tpu.memory_space<vmem>>, vector<4x128xf32>
      tpu.vector_store %arg6[%c0_20, %c0_21], %22 {strides = array<i32>} : memref<4x128xf32, #tpu.memory_space<vmem>>, vector<4x128xf32>,
    } else {
    }
    return
  }
  func.func @transform_0(%arg0: i32) -> (i32, i32) {
    %c0_i32 = arith.constant 0 : i32
    %c0_i32_0 = arith.constant 0 : i32
    return %c0_i32, %arg0 : i32, i32
  }
  func.func @transform_1(%arg0: i32) -> (i32, i32) {
    %c0_i32 = arith.constant 0 : i32
    %c0_i32_0 = arith.constant 0 : i32
    return %arg0, %c0_i32 : i32, i32
  }
  func.func @transform_2(%arg0: i32) -> (i32, i32) {
    %c0_i32 = arith.constant 0 : i32
    %c0_i32_0 = arith.constant 0 : i32
    %c0_i32_1 = arith.constant 0 : i32
    return %c0_i32, %c0_i32_0 : i32, i32
  }
  func.func @transform_3(%arg0: i32) -> (i32, i32) {
    %c0_i32 = arith.constant 0 : i32
    %c0_i32_0 = arith.constant 0 : i32
    %c0_i32_1 = arith.constant 0 : i32
    return %c0_i32, %c0_i32_0 : i32, i32
  }
  func.func @transform_4(%arg0: i32) -> (i32, i32) {
    %c0_i32 = arith.constant 0 : i32
    %c0_i32_0 = arith.constant 0 : i32
    %c0_i32_1 = arith.constant 0 : i32
    return %c0_i32, %c0_i32_0 : i32, i32
  }
  func.func @transform_5(%arg0: i32) -> (i32, i32) {
    %c0_i32 = arith.constant 0 : i32
    %c0_i32_0 = arith.constant 0 : i32
    %c0_i32_1 = arith.constant 0 : i32
    return %c0_i32, %c0_i32_0 : i32, i32
  }
}

module attributes {stable_mosaic.version = 11 : i64} {
  func.func @_cross_attn_kernel(%arg0: memref<8x32xf32, #tpu.memory_space<vmem>>, %arg1: memref<8x32xf32, #tpu.memory_space<vmem>>, %arg2: memref<8x8xf32, #tpu.memory_space<vmem>>, %arg3: memref<12x32x8xf32, #tpu.memory_space<vmem>>, %arg4: memref<12x1x8xf32, #tpu.memory_space<vmem>>, %arg5: memref<4x8x32xf32, #tpu.memory_space<vmem>>, %arg6: memref<1x32xf32, #tpu.memory_space<vmem>>, %arg7: memref<12x32x8xf32, #tpu.memory_space<vmem>>, %arg8: memref<12x1x8xf32, #tpu.memory_space<vmem>>, %arg9: memref<4x8x32xf32, #tpu.memory_space<vmem>>, %arg10: memref<1x32xf32, #tpu.memory_space<vmem>>, %arg11: memref<8x32xf32, #tpu.memory_space<vmem>>, %arg12: memref<8x32xf32, #tpu.memory_space<vmem>>) attributes {dimension_semantics = [], scalar_prefetch = 0 : i64, scratch_operands = 0 : i64, tpu.core_type = #tpu.core_type<tc>} {
    %c0 = arith.constant 0 : index
    %c0_0 = arith.constant 0 : index
    %0 = vector.load %arg0[%c0, %c0_0] : memref<8x32xf32, #tpu.memory_space<vmem>>, vector<8x32xf32>
    %c0_1 = arith.constant 0 : index
    %c0_2 = arith.constant 0 : index
    %1 = vector.load %arg1[%c0_1, %c0_2] : memref<8x32xf32, #tpu.memory_space<vmem>>, vector<8x32xf32>
    %c0_3 = arith.constant 0 : index
    %c0_4 = arith.constant 0 : index
    %2 = vector.load %arg2[%c0_3, %c0_4] : memref<8x8xf32, #tpu.memory_space<vmem>>, vector<8x8xf32>
    %c0_5 = arith.constant 0 : index
    %c0_6 = arith.constant 0 : index
    %c0_7 = arith.constant 0 : index
    %3 = vector.load %arg3[%c0_5, %c0_6, %c0_7] : memref<12x32x8xf32, #tpu.memory_space<vmem>>, vector<1x32x8xf32>
    %4 = vector.shape_cast %3 : vector<1x32x8xf32> to vector<32x8xf32>
    %cst = arith.constant dense<0.000000e+00> : vector<8x8xf32>
    %5 = tpu.matmul %0, %4, %cst {dimension_numbers = #tpu.dot_dimension_numbers<[1], [0], [0], [1], [0, 0, 1, 1], [], []>} : vector<8x32xf32>, vector<32x8xf32>, vector<8x8xf32> -> vector<8x8xf32>
    %c0_8 = arith.constant 0 : index
    %c0_9 = arith.constant 0 : index
    %c0_10 = arith.constant 0 : index
    %6 = vector.load %arg4[%c0_8, %c0_9, %c0_10] : memref<12x1x8xf32, #tpu.memory_space<vmem>>, vector<1x1x8xf32>
    %7 = vector.shape_cast %6 : vector<1x1x8xf32> to vector<1x8xf32>
    %8 = vector.broadcast %7 : vector<1x8xf32> to vector<8x8xf32>
    %9 = arith.addf %5, %8 : vector<8x8xf32>
    %c4 = arith.constant 4 : index
    %c0_11 = arith.constant 0 : index
    %c0_12 = arith.constant 0 : index
    %10 = vector.load %arg3[%c4, %c0_11, %c0_12] : memref<12x32x8xf32, #tpu.memory_space<vmem>>, vector<1x32x8xf32>
    %11 = vector.shape_cast %10 : vector<1x32x8xf32> to vector<32x8xf32>
    %cst_13 = arith.constant dense<0.000000e+00> : vector<8x8xf32>
    %12 = tpu.matmul %1, %11, %cst_13 {dimension_numbers = #tpu.dot_dimension_numbers<[1], [0], [0], [1], [0, 0, 1, 1], [], []>} : vector<8x32xf32>, vector<32x8xf32>, vector<8x8xf32> -> vector<8x8xf32>
    %c4_14 = arith.constant 4 : index
    %c0_15 = arith.constant 0 : index
    %c0_16 = arith.constant 0 : index
    %13 = vector.load %arg4[%c4_14, %c0_15, %c0_16] : memref<12x1x8xf32, #tpu.memory_space<vmem>>, vector<1x1x8xf32>
    %14 = vector.shape_cast %13 : vector<1x1x8xf32> to vector<1x8xf32>
    %15 = vector.broadcast %14 : vector<1x8xf32> to vector<8x8xf32>
    %16 = arith.addf %12, %15 : vector<8x8xf32>
    %c8 = arith.constant 8 : index
    %c0_17 = arith.constant 0 : index
    %c0_18 = arith.constant 0 : index
    %17 = vector.load %arg3[%c8, %c0_17, %c0_18] : memref<12x32x8xf32, #tpu.memory_space<vmem>>, vector<1x32x8xf32>
    %18 = vector.shape_cast %17 : vector<1x32x8xf32> to vector<32x8xf32>
    %cst_19 = arith.constant dense<0.000000e+00> : vector<8x8xf32>
    %19 = tpu.matmul %1, %18, %cst_19 {dimension_numbers = #tpu.dot_dimension_numbers<[1], [0], [0], [1], [0, 0, 1, 1], [], []>} : vector<8x32xf32>, vector<32x8xf32>, vector<8x8xf32> -> vector<8x8xf32>
    %c8_20 = arith.constant 8 : index
    %c0_21 = arith.constant 0 : index
    %c0_22 = arith.constant 0 : index
    %20 = vector.load %arg4[%c8_20, %c0_21, %c0_22] : memref<12x1x8xf32, #tpu.memory_space<vmem>>, vector<1x1x8xf32>
    %21 = vector.shape_cast %20 : vector<1x1x8xf32> to vector<1x8xf32>
    %22 = vector.broadcast %21 : vector<1x8xf32> to vector<8x8xf32>
    %23 = arith.addf %19, %22 : vector<8x8xf32>
    %24 = tpu.transpose %16, [1, 0] : vector<8x8xf32> -> vector<8x8xf32>
    %cst_23 = arith.constant dense<0.000000e+00> : vector<8x8xf32>
    %25 = tpu.matmul %9, %24, %cst_23 {dimension_numbers = #tpu.dot_dimension_numbers<[1], [0], [0], [1], [0, 0, 1, 1], [], []>} : vector<8x8xf32>, vector<8x8xf32>, vector<8x8xf32> -> vector<8x8xf32>
    %cst_24 = arith.constant 0.353553385 : f32
    %26 = vector.broadcast %cst_24 : f32 to vector<8x8xf32>
    %27 = arith.mulf %25, %26 : vector<8x8xf32>
    %28 = arith.addf %27, %2 : vector<8x8xf32>
    %cst_25 = arith.constant dense<0xFF800000> : vector<8xf32>
    %29 = vector.multi_reduction <maximumf>, %28, %cst_25 [1] : vector<8x8xf32> to vector<8xf32>
    %30 = vector.shape_cast %29 : vector<8xf32> to vector<8x1xf32>
    %31 = vector.broadcast %30 : vector<8x1xf32> to vector<8x8xf32>
    %32 = arith.subf %28, %31 : vector<8x8xf32>
    %33 = math.exp %32 : vector<8x8xf32>
    %cst_26 = arith.constant dense<0.000000e+00> : vector<8xf32>
    %34 = vector.multi_reduction <add>, %33, %cst_26 [1] : vector<8x8xf32> to vector<8xf32>
    %35 = vector.shape_cast %34 : vector<8xf32> to vector<8x1xf32>
    %36 = vector.broadcast %35 : vector<8x1xf32> to vector<8x8xf32>
    %37 = arith.divf %33, %36 : vector<8x8xf32>
    %cst_27 = arith.constant dense<0.000000e+00> : vector<8x8xf32>
    %38 = tpu.matmul %37, %23, %cst_27 {dimension_numbers = #tpu.dot_dimension_numbers<[1], [0], [0], [1], [0, 0, 1, 1], [], []>} : vector<8x8xf32>, vector<8x8xf32>, vector<8x8xf32> -> vector<8x8xf32>
    %c0_28 = arith.constant 0 : index
    %c0_29 = arith.constant 0 : index
    %c0_30 = arith.constant 0 : index
    %39 = vector.load %arg5[%c0_28, %c0_29, %c0_30] : memref<4x8x32xf32, #tpu.memory_space<vmem>>, vector<1x8x32xf32>
    %40 = vector.shape_cast %39 : vector<1x8x32xf32> to vector<8x32xf32>
    %cst_31 = arith.constant dense<0.000000e+00> : vector<8x32xf32>
    %41 = tpu.matmul %38, %40, %cst_31 {dimension_numbers = #tpu.dot_dimension_numbers<[1], [0], [0], [1], [0, 0, 1, 1], [], []>} : vector<8x8xf32>, vector<8x32xf32>, vector<8x32xf32> -> vector<8x32xf32>
    %c1 = arith.constant 1 : index
    %c0_32 = arith.constant 0 : index
    %c0_33 = arith.constant 0 : index
    %42 = vector.load %arg3[%c1, %c0_32, %c0_33] : memref<12x32x8xf32, #tpu.memory_space<vmem>>, vector<1x32x8xf32>
    %43 = vector.shape_cast %42 : vector<1x32x8xf32> to vector<32x8xf32>
    %cst_34 = arith.constant dense<0.000000e+00> : vector<8x8xf32>
    %44 = tpu.matmul %0, %43, %cst_34 {dimension_numbers = #tpu.dot_dimension_numbers<[1], [0], [0], [1], [0, 0, 1, 1], [], []>} : vector<8x32xf32>, vector<32x8xf32>, vector<8x8xf32> -> vector<8x8xf32>
    %c1_35 = arith.constant 1 : index
    %c0_36 = arith.constant 0 : index
    %c0_37 = arith.constant 0 : index
    %45 = vector.load %arg4[%c1_35, %c0_36, %c0_37] : memref<12x1x8xf32, #tpu.memory_space<vmem>>, vector<1x1x8xf32>
    %46 = vector.shape_cast %45 : vector<1x1x8xf32> to vector<1x8xf32>
    %47 = vector.broadcast %46 : vector<1x8xf32> to vector<8x8xf32>
    %48 = arith.addf %44, %47 : vector<8x8xf32>
    %c5 = arith.constant 5 : index
    %c0_38 = arith.constant 0 : index
    %c0_39 = arith.constant 0 : index
    %49 = vector.load %arg3[%c5, %c0_38, %c0_39] : memref<12x32x8xf32, #tpu.memory_space<vmem>>, vector<1x32x8xf32>
    %50 = vector.shape_cast %49 : vector<1x32x8xf32> to vector<32x8xf32>
    %cst_40 = arith.constant dense<0.000000e+00> : vector<8x8xf32>
    %51 = tpu.matmul %1, %50, %cst_40 {dimension_numbers = #tpu.dot_dimension_numbers<[1], [0], [0], [1], [0, 0, 1, 1], [], []>} : vector<8x32xf32>, vector<32x8xf32>, vector<8x8xf32> -> vector<8x8xf32>
    %c5_41 = arith.constant 5 : index
    %c0_42 = arith.constant 0 : index
    %c0_43 = arith.constant 0 : index
    %52 = vector.load %arg4[%c5_41, %c0_42, %c0_43] : memref<12x1x8xf32, #tpu.memory_space<vmem>>, vector<1x1x8xf32>
    %53 = vector.shape_cast %52 : vector<1x1x8xf32> to vector<1x8xf32>
    %54 = vector.broadcast %53 : vector<1x8xf32> to vector<8x8xf32>
    %55 = arith.addf %51, %54 : vector<8x8xf32>
    %c9 = arith.constant 9 : index
    %c0_44 = arith.constant 0 : index
    %c0_45 = arith.constant 0 : index
    %56 = vector.load %arg3[%c9, %c0_44, %c0_45] : memref<12x32x8xf32, #tpu.memory_space<vmem>>, vector<1x32x8xf32>
    %57 = vector.shape_cast %56 : vector<1x32x8xf32> to vector<32x8xf32>
    %cst_46 = arith.constant dense<0.000000e+00> : vector<8x8xf32>
    %58 = tpu.matmul %1, %57, %cst_46 {dimension_numbers = #tpu.dot_dimension_numbers<[1], [0], [0], [1], [0, 0, 1, 1], [], []>} : vector<8x32xf32>, vector<32x8xf32>, vector<8x8xf32> -> vector<8x8xf32>
    %c9_47 = arith.constant 9 : index
    %c0_48 = arith.constant 0 : index
    %c0_49 = arith.constant 0 : index
    %59 = vector.load %arg4[%c9_47, %c0_48, %c0_49] : memref<12x1x8xf32, #tpu.memory_space<vmem>>, vector<1x1x8xf32>
    %60 = vector.shape_cast %59 : vector<1x1x8xf32> to vector<1x8xf32>
    %61 = vector.broadcast %60 : vector<1x8xf32> to vector<8x8xf32>
    %62 = arith.addf %58, %61 : vector<8x8xf32>
    %63 = tpu.transpose %55, [1, 0] : vector<8x8xf32> -> vector<8x8xf32>
    %cst_50 = arith.constant dense<0.000000e+00> : vector<8x8xf32>
    %64 = tpu.matmul %48, %63, %cst_50 {dimension_numbers = #tpu.dot_dimension_numbers<[1], [0], [0], [1], [0, 0, 1, 1], [], []>} : vector<8x8xf32>, vector<8x8xf32>, vector<8x8xf32> -> vector<8x8xf32>
    %cst_51 = arith.constant 0.353553385 : f32
    %65 = vector.broadcast %cst_51 : f32 to vector<8x8xf32>
    %66 = arith.mulf %64, %65 : vector<8x8xf32>
    %67 = arith.addf %66, %2 : vector<8x8xf32>
    %cst_52 = arith.constant dense<0xFF800000> : vector<8xf32>
    %68 = vector.multi_reduction <maximumf>, %67, %cst_52 [1] : vector<8x8xf32> to vector<8xf32>
    %69 = vector.shape_cast %68 : vector<8xf32> to vector<8x1xf32>
    %70 = vector.broadcast %69 : vector<8x1xf32> to vector<8x8xf32>
    %71 = arith.subf %67, %70 : vector<8x8xf32>
    %72 = math.exp %71 : vector<8x8xf32>
    %cst_53 = arith.constant dense<0.000000e+00> : vector<8xf32>
    %73 = vector.multi_reduction <add>, %72, %cst_53 [1] : vector<8x8xf32> to vector<8xf32>
    %74 = vector.shape_cast %73 : vector<8xf32> to vector<8x1xf32>
    %75 = vector.broadcast %74 : vector<8x1xf32> to vector<8x8xf32>
    %76 = arith.divf %72, %75 : vector<8x8xf32>
    %cst_54 = arith.constant dense<0.000000e+00> : vector<8x8xf32>
    %77 = tpu.matmul %76, %62, %cst_54 {dimension_numbers = #tpu.dot_dimension_numbers<[1], [0], [0], [1], [0, 0, 1, 1], [], []>} : vector<8x8xf32>, vector<8x8xf32>, vector<8x8xf32> -> vector<8x8xf32>
    %c1_55 = arith.constant 1 : index
    %c0_56 = arith.constant 0 : index
    %c0_57 = arith.constant 0 : index
    %78 = vector.load %arg5[%c1_55, %c0_56, %c0_57] : memref<4x8x32xf32, #tpu.memory_space<vmem>>, vector<1x8x32xf32>
    %79 = vector.shape_cast %78 : vector<1x8x32xf32> to vector<8x32xf32>
    %cst_58 = arith.constant dense<0.000000e+00> : vector<8x32xf32>
    %80 = tpu.matmul %77, %79, %cst_58 {dimension_numbers = #tpu.dot_dimension_numbers<[1], [0], [0], [1], [0, 0, 1, 1], [], []>} : vector<8x8xf32>, vector<8x32xf32>, vector<8x32xf32> -> vector<8x32xf32>
    %81 = arith.addf %41, %80 : vector<8x32xf32>
    %c2 = arith.constant 2 : index
    %c0_59 = arith.constant 0 : index
    %c0_60 = arith.constant 0 : index
    %82 = vector.load %arg3[%c2, %c0_59, %c0_60] : memref<12x32x8xf32, #tpu.memory_space<vmem>>, vector<1x32x8xf32>
    %83 = vector.shape_cast %82 : vector<1x32x8xf32> to vector<32x8xf32>
    %cst_61 = arith.constant dense<0.000000e+00> : vector<8x8xf32>
    %84 = tpu.matmul %0, %83, %cst_61 {dimension_numbers = #tpu.dot_dimension_numbers<[1], [0], [0], [1], [0, 0, 1, 1], [], []>} : vector<8x32xf32>, vector<32x8xf32>, vector<8x8xf32> -> vector<8x8xf32>
    %c2_62 = arith.constant 2 : index
    %c0_63 = arith.constant 0 : index
    %c0_64 = arith.constant 0 : index
    %85 = vector.load %arg4[%c2_62, %c0_63, %c0_64] : memref<12x1x8xf32, #tpu.memory_space<vmem>>, vector<1x1x8xf32>
    %86 = vector.shape_cast %85 : vector<1x1x8xf32> to vector<1x8xf32>
    %87 = vector.broadcast %86 : vector<1x8xf32> to vector<8x8xf32>
    %88 = arith.addf %84, %87 : vector<8x8xf32>
    %c6 = arith.constant 6 : index
    %c0_65 = arith.constant 0 : index
    %c0_66 = arith.constant 0 : index
    %89 = vector.load %arg3[%c6, %c0_65, %c0_66] : memref<12x32x8xf32, #tpu.memory_space<vmem>>, vector<1x32x8xf32>
    %90 = vector.shape_cast %89 : vector<1x32x8xf32> to vector<32x8xf32>
    %cst_67 = arith.constant dense<0.000000e+00> : vector<8x8xf32>
    %91 = tpu.matmul %1, %90, %cst_67 {dimension_numbers = #tpu.dot_dimension_numbers<[1], [0], [0], [1], [0, 0, 1, 1], [], []>} : vector<8x32xf32>, vector<32x8xf32>, vector<8x8xf32> -> vector<8x8xf32>
    %c6_68 = arith.constant 6 : index
    %c0_69 = arith.constant 0 : index
    %c0_70 = arith.constant 0 : index
    %92 = vector.load %arg4[%c6_68, %c0_69, %c0_70] : memref<12x1x8xf32, #tpu.memory_space<vmem>>, vector<1x1x8xf32>
    %93 = vector.shape_cast %92 : vector<1x1x8xf32> to vector<1x8xf32>
    %94 = vector.broadcast %93 : vector<1x8xf32> to vector<8x8xf32>
    %95 = arith.addf %91, %94 : vector<8x8xf32>
    %c10 = arith.constant 10 : index
    %c0_71 = arith.constant 0 : index
    %c0_72 = arith.constant 0 : index
    %96 = vector.load %arg3[%c10, %c0_71, %c0_72] : memref<12x32x8xf32, #tpu.memory_space<vmem>>, vector<1x32x8xf32>
    %97 = vector.shape_cast %96 : vector<1x32x8xf32> to vector<32x8xf32>
    %cst_73 = arith.constant dense<0.000000e+00> : vector<8x8xf32>
    %98 = tpu.matmul %1, %97, %cst_73 {dimension_numbers = #tpu.dot_dimension_numbers<[1], [0], [0], [1], [0, 0, 1, 1], [], []>} : vector<8x32xf32>, vector<32x8xf32>, vector<8x8xf32> -> vector<8x8xf32>
    %c10_74 = arith.constant 10 : index
    %c0_75 = arith.constant 0 : index
    %c0_76 = arith.constant 0 : index
    %99 = vector.load %arg4[%c10_74, %c0_75, %c0_76] : memref<12x1x8xf32, #tpu.memory_space<vmem>>, vector<1x1x8xf32>
    %100 = vector.shape_cast %99 : vector<1x1x8xf32> to vector<1x8xf32>
    %101 = vector.broadcast %100 : vector<1x8xf32> to vector<8x8xf32>
    %102 = arith.addf %98, %101 : vector<8x8xf32>
    %103 = tpu.transpose %95, [1, 0] : vector<8x8xf32> -> vector<8x8xf32>
    %cst_77 = arith.constant dense<0.000000e+00> : vector<8x8xf32>
    %104 = tpu.matmul %88, %103, %cst_77 {dimension_numbers = #tpu.dot_dimension_numbers<[1], [0], [0], [1], [0, 0, 1, 1], [], []>} : vector<8x8xf32>, vector<8x8xf32>, vector<8x8xf32> -> vector<8x8xf32>
    %cst_78 = arith.constant 0.353553385 : f32
    %105 = vector.broadcast %cst_78 : f32 to vector<8x8xf32>
    %106 = arith.mulf %104, %105 : vector<8x8xf32>
    %107 = arith.addf %106, %2 : vector<8x8xf32>
    %cst_79 = arith.constant dense<0xFF800000> : vector<8xf32>
    %108 = vector.multi_reduction <maximumf>, %107, %cst_79 [1] : vector<8x8xf32> to vector<8xf32>
    %109 = vector.shape_cast %108 : vector<8xf32> to vector<8x1xf32>
    %110 = vector.broadcast %109 : vector<8x1xf32> to vector<8x8xf32>
    %111 = arith.subf %107, %110 : vector<8x8xf32>
    %112 = math.exp %111 : vector<8x8xf32>
    %cst_80 = arith.constant dense<0.000000e+00> : vector<8xf32>
    %113 = vector.multi_reduction <add>, %112, %cst_80 [1] : vector<8x8xf32> to vector<8xf32>
    %114 = vector.shape_cast %113 : vector<8xf32> to vector<8x1xf32>
    %115 = vector.broadcast %114 : vector<8x1xf32> to vector<8x8xf32>
    %116 = arith.divf %112, %115 : vector<8x8xf32>
    %cst_81 = arith.constant dense<0.000000e+00> : vector<8x8xf32>
    %117 = tpu.matmul %116, %102, %cst_81 {dimension_numbers = #tpu.dot_dimension_numbers<[1], [0], [0], [1], [0, 0, 1, 1], [], []>} : vector<8x8xf32>, vector<8x8xf32>, vector<8x8xf32> -> vector<8x8xf32>
    %c2_82 = arith.constant 2 : index
    %c0_83 = arith.constant 0 : index
    %c0_84 = arith.constant 0 : index
    %118 = vector.load %arg5[%c2_82, %c0_83, %c0_84] : memref<4x8x32xf32, #tpu.memory_space<vmem>>, vector<1x8x32xf32>
    %119 = vector.shape_cast %118 : vector<1x8x32xf32> to vector<8x32xf32>
    %cst_85 = arith.constant dense<0.000000e+00> : vector<8x32xf32>
    %120 = tpu.matmul %117, %119, %cst_85 {dimension_numbers = #tpu.dot_dimension_numbers<[1], [0], [0], [1], [0, 0, 1, 1], [], []>} : vector<8x8xf32>, vector<8x32xf32>, vector<8x32xf32> -> vector<8x32xf32>
    %121 = arith.addf %81, %120 : vector<8x32xf32>
    %c3 = arith.constant 3 : index
    %c0_86 = arith.constant 0 : index
    %c0_87 = arith.constant 0 : index
    %122 = vector.load %arg3[%c3, %c0_86, %c0_87] : memref<12x32x8xf32, #tpu.memory_space<vmem>>, vector<1x32x8xf32>
    %123 = vector.shape_cast %122 : vector<1x32x8xf32> to vector<32x8xf32>
    %cst_88 = arith.constant dense<0.000000e+00> : vector<8x8xf32>
    %124 = tpu.matmul %0, %123, %cst_88 {dimension_numbers = #tpu.dot_dimension_numbers<[1], [0], [0], [1], [0, 0, 1, 1], [], []>} : vector<8x32xf32>, vector<32x8xf32>, vector<8x8xf32> -> vector<8x8xf32>
    %c3_89 = arith.constant 3 : index
    %c0_90 = arith.constant 0 : index
    %c0_91 = arith.constant 0 : index
    %125 = vector.load %arg4[%c3_89, %c0_90, %c0_91] : memref<12x1x8xf32, #tpu.memory_space<vmem>>, vector<1x1x8xf32>
    %126 = vector.shape_cast %125 : vector<1x1x8xf32> to vector<1x8xf32>
    %127 = vector.broadcast %126 : vector<1x8xf32> to vector<8x8xf32>
    %128 = arith.addf %124, %127 : vector<8x8xf32>
    %c7 = arith.constant 7 : index
    %c0_92 = arith.constant 0 : index
    %c0_93 = arith.constant 0 : index
    %129 = vector.load %arg3[%c7, %c0_92, %c0_93] : memref<12x32x8xf32, #tpu.memory_space<vmem>>, vector<1x32x8xf32>
    %130 = vector.shape_cast %129 : vector<1x32x8xf32> to vector<32x8xf32>
    %cst_94 = arith.constant dense<0.000000e+00> : vector<8x8xf32>
    %131 = tpu.matmul %1, %130, %cst_94 {dimension_numbers = #tpu.dot_dimension_numbers<[1], [0], [0], [1], [0, 0, 1, 1], [], []>} : vector<8x32xf32>, vector<32x8xf32>, vector<8x8xf32> -> vector<8x8xf32>
    %c7_95 = arith.constant 7 : index
    %c0_96 = arith.constant 0 : index
    %c0_97 = arith.constant 0 : index
    %132 = vector.load %arg4[%c7_95, %c0_96, %c0_97] : memref<12x1x8xf32, #tpu.memory_space<vmem>>, vector<1x1x8xf32>
    %133 = vector.shape_cast %132 : vector<1x1x8xf32> to vector<1x8xf32>
    %134 = vector.broadcast %133 : vector<1x8xf32> to vector<8x8xf32>
    %135 = arith.addf %131, %134 : vector<8x8xf32>
    %c11 = arith.constant 11 : index
    %c0_98 = arith.constant 0 : index
    %c0_99 = arith.constant 0 : index
    %136 = vector.load %arg3[%c11, %c0_98, %c0_99] : memref<12x32x8xf32, #tpu.memory_space<vmem>>, vector<1x32x8xf32>
    %137 = vector.shape_cast %136 : vector<1x32x8xf32> to vector<32x8xf32>
    %cst_100 = arith.constant dense<0.000000e+00> : vector<8x8xf32>
    %138 = tpu.matmul %1, %137, %cst_100 {dimension_numbers = #tpu.dot_dimension_numbers<[1], [0], [0], [1], [0, 0, 1, 1], [], []>} : vector<8x32xf32>, vector<32x8xf32>, vector<8x8xf32> -> vector<8x8xf32>
    %c11_101 = arith.constant 11 : index
    %c0_102 = arith.constant 0 : index
    %c0_103 = arith.constant 0 : index
    %139 = vector.load %arg4[%c11_101, %c0_102, %c0_103] : memref<12x1x8xf32, #tpu.memory_space<vmem>>, vector<1x1x8xf32>
    %140 = vector.shape_cast %139 : vector<1x1x8xf32> to vector<1x8xf32>
    %141 = vector.broadcast %140 : vector<1x8xf32> to vector<8x8xf32>
    %142 = arith.addf %138, %141 : vector<8x8xf32>
    %143 = tpu.transpose %135, [1, 0] : vector<8x8xf32> -> vector<8x8xf32>
    %cst_104 = arith.constant dense<0.000000e+00> : vector<8x8xf32>
    %144 = tpu.matmul %128, %143, %cst_104 {dimension_numbers = #tpu.dot_dimension_numbers<[1], [0], [0], [1], [0, 0, 1, 1], [], []>} : vector<8x8xf32>, vector<8x8xf32>, vector<8x8xf32> -> vector<8x8xf32>
    %cst_105 = arith.constant 0.353553385 : f32
    %145 = vector.broadcast %cst_105 : f32 to vector<8x8xf32>
    %146 = arith.mulf %144, %145 : vector<8x8xf32>
    %147 = arith.addf %146, %2 : vector<8x8xf32>
    %cst_106 = arith.constant dense<0xFF800000> : vector<8xf32>
    %148 = vector.multi_reduction <maximumf>, %147, %cst_106 [1] : vector<8x8xf32> to vector<8xf32>
    %149 = vector.shape_cast %148 : vector<8xf32> to vector<8x1xf32>
    %150 = vector.broadcast %149 : vector<8x1xf32> to vector<8x8xf32>
    %151 = arith.subf %147, %150 : vector<8x8xf32>
    %152 = math.exp %151 : vector<8x8xf32>
    %cst_107 = arith.constant dense<0.000000e+00> : vector<8xf32>
    %153 = vector.multi_reduction <add>, %152, %cst_107 [1] : vector<8x8xf32> to vector<8xf32>
    %154 = vector.shape_cast %153 : vector<8xf32> to vector<8x1xf32>
    %155 = vector.broadcast %154 : vector<8x1xf32> to vector<8x8xf32>
    %156 = arith.divf %152, %155 : vector<8x8xf32>
    %cst_108 = arith.constant dense<0.000000e+00> : vector<8x8xf32>
    %157 = tpu.matmul %156, %142, %cst_108 {dimension_numbers = #tpu.dot_dimension_numbers<[1], [0], [0], [1], [0, 0, 1, 1], [], []>} : vector<8x8xf32>, vector<8x8xf32>, vector<8x8xf32> -> vector<8x8xf32>
    %c3_109 = arith.constant 3 : index
    %c0_110 = arith.constant 0 : index
    %c0_111 = arith.constant 0 : index
    %158 = vector.load %arg5[%c3_109, %c0_110, %c0_111] : memref<4x8x32xf32, #tpu.memory_space<vmem>>, vector<1x8x32xf32>
    %159 = vector.shape_cast %158 : vector<1x8x32xf32> to vector<8x32xf32>
    %cst_112 = arith.constant dense<0.000000e+00> : vector<8x32xf32>
    %160 = tpu.matmul %157, %159, %cst_112 {dimension_numbers = #tpu.dot_dimension_numbers<[1], [0], [0], [1], [0, 0, 1, 1], [], []>} : vector<8x8xf32>, vector<8x32xf32>, vector<8x32xf32> -> vector<8x32xf32>
    %161 = arith.addf %121, %160 : vector<8x32xf32>
    %c0_113 = arith.constant 0 : index
    %c0_114 = arith.constant 0 : index
    %162 = vector.load %arg6[%c0_113, %c0_114] : memref<1x32xf32, #tpu.memory_space<vmem>>, vector<1x32xf32>
    %163 = vector.broadcast %162 : vector<1x32xf32> to vector<8x32xf32>
    %164 = arith.addf %161, %163 : vector<8x32xf32>
    %c0_115 = arith.constant 0 : index
    %c0_116 = arith.constant 0 : index
    %165 = vector.load %arg11[%c0_115, %c0_116] : memref<8x32xf32, #tpu.memory_space<vmem>>, vector<8x32xf32>
    tpu.vector_store %arg11[%c0_115, %c0_116], %164 {strides = array<i32>} : memref<8x32xf32, #tpu.memory_space<vmem>>, vector<8x32xf32>,
    %c0_117 = arith.constant 0 : index
    %c0_118 = arith.constant 0 : index
    %c0_119 = arith.constant 0 : index
    %166 = vector.load %arg7[%c0_117, %c0_118, %c0_119] : memref<12x32x8xf32, #tpu.memory_space<vmem>>, vector<1x32x8xf32>
    %167 = vector.shape_cast %166 : vector<1x32x8xf32> to vector<32x8xf32>
    %cst_120 = arith.constant dense<0.000000e+00> : vector<8x8xf32>
    %168 = tpu.matmul %1, %167, %cst_120 {dimension_numbers = #tpu.dot_dimension_numbers<[1], [0], [0], [1], [0, 0, 1, 1], [], []>} : vector<8x32xf32>, vector<32x8xf32>, vector<8x8xf32> -> vector<8x8xf32>
    %c0_121 = arith.constant 0 : index
    %c0_122 = arith.constant 0 : index
    %c0_123 = arith.constant 0 : index
    %169 = vector.load %arg8[%c0_121, %c0_122, %c0_123] : memref<12x1x8xf32, #tpu.memory_space<vmem>>, vector<1x1x8xf32>
    %170 = vector.shape_cast %169 : vector<1x1x8xf32> to vector<1x8xf32>
    %171 = vector.broadcast %170 : vector<1x8xf32> to vector<8x8xf32>
    %172 = arith.addf %168, %171 : vector<8x8xf32>
    %c4_124 = arith.constant 4 : index
    %c0_125 = arith.constant 0 : index
    %c0_126 = arith.constant 0 : index
    %173 = vector.load %arg7[%c4_124, %c0_125, %c0_126] : memref<12x32x8xf32, #tpu.memory_space<vmem>>, vector<1x32x8xf32>
    %174 = vector.shape_cast %173 : vector<1x32x8xf32> to vector<32x8xf32>
    %cst_127 = arith.constant dense<0.000000e+00> : vector<8x8xf32>
    %175 = tpu.matmul %0, %174, %cst_127 {dimension_numbers = #tpu.dot_dimension_numbers<[1], [0], [0], [1], [0, 0, 1, 1], [], []>} : vector<8x32xf32>, vector<32x8xf32>, vector<8x8xf32> -> vector<8x8xf32>
    %c4_128 = arith.constant 4 : index
    %c0_129 = arith.constant 0 : index
    %c0_130 = arith.constant 0 : index
    %176 = vector.load %arg8[%c4_128, %c0_129, %c0_130] : memref<12x1x8xf32, #tpu.memory_space<vmem>>, vector<1x1x8xf32>
    %177 = vector.shape_cast %176 : vector<1x1x8xf32> to vector<1x8xf32>
    %178 = vector.broadcast %177 : vector<1x8xf32> to vector<8x8xf32>
    %179 = arith.addf %175, %178 : vector<8x8xf32>
    %c8_131 = arith.constant 8 : index
    %c0_132 = arith.constant 0 : index
    %c0_133 = arith.constant 0 : index
    %180 = vector.load %arg7[%c8_131, %c0_132, %c0_133] : memref<12x32x8xf32, #tpu.memory_space<vmem>>, vector<1x32x8xf32>
    %181 = vector.shape_cast %180 : vector<1x32x8xf32> to vector<32x8xf32>
    %cst_134 = arith.constant dense<0.000000e+00> : vector<8x8xf32>
    %182 = tpu.matmul %0, %181, %cst_134 {dimension_numbers = #tpu.dot_dimension_numbers<[1], [0], [0], [1], [0, 0, 1, 1], [], []>} : vector<8x32xf32>, vector<32x8xf32>, vector<8x8xf32> -> vector<8x8xf32>
    %c8_135 = arith.constant 8 : index
    %c0_136 = arith.constant 0 : index
    %c0_137 = arith.constant 0 : index
    %183 = vector.load %arg8[%c8_135, %c0_136, %c0_137] : memref<12x1x8xf32, #tpu.memory_space<vmem>>, vector<1x1x8xf32>
    %184 = vector.shape_cast %183 : vector<1x1x8xf32> to vector<1x8xf32>
    %185 = vector.broadcast %184 : vector<1x8xf32> to vector<8x8xf32>
    %186 = arith.addf %182, %185 : vector<8x8xf32>
    %187 = tpu.transpose %179, [1, 0] : vector<8x8xf32> -> vector<8x8xf32>
    %cst_138 = arith.constant dense<0.000000e+00> : vector<8x8xf32>
    %188 = tpu.matmul %172, %187, %cst_138 {dimension_numbers = #tpu.dot_dimension_numbers<[1], [0], [0], [1], [0, 0, 1, 1], [], []>} : vector<8x8xf32>, vector<8x8xf32>, vector<8x8xf32> -> vector<8x8xf32>
    %cst_139 = arith.constant 0.353553385 : f32
    %189 = vector.broadcast %cst_139 : f32 to vector<8x8xf32>
    %190 = arith.mulf %188, %189 : vector<8x8xf32>
    %191 = arith.addf %190, %2 : vector<8x8xf32>
    %cst_140 = arith.constant dense<0xFF800000> : vector<8xf32>
    %192 = vector.multi_reduction <maximumf>, %191, %cst_140 [1] : vector<8x8xf32> to vector<8xf32>
    %193 = vector.shape_cast %192 : vector<8xf32> to vector<8x1xf32>
    %194 = vector.broadcast %193 : vector<8x1xf32> to vector<8x8xf32>
    %195 = arith.subf %191, %194 : vector<8x8xf32>
    %196 = math.exp %195 : vector<8x8xf32>
    %cst_141 = arith.constant dense<0.000000e+00> : vector<8xf32>
    %197 = vector.multi_reduction <add>, %196, %cst_141 [1] : vector<8x8xf32> to vector<8xf32>
    %198 = vector.shape_cast %197 : vector<8xf32> to vector<8x1xf32>
    %199 = vector.broadcast %198 : vector<8x1xf32> to vector<8x8xf32>
    %200 = arith.divf %196, %199 : vector<8x8xf32>
    %cst_142 = arith.constant dense<0.000000e+00> : vector<8x8xf32>
    %201 = tpu.matmul %200, %186, %cst_142 {dimension_numbers = #tpu.dot_dimension_numbers<[1], [0], [0], [1], [0, 0, 1, 1], [], []>} : vector<8x8xf32>, vector<8x8xf32>, vector<8x8xf32> -> vector<8x8xf32>
    %c0_143 = arith.constant 0 : index
    %c0_144 = arith.constant 0 : index
    %c0_145 = arith.constant 0 : index
    %202 = vector.load %arg9[%c0_143, %c0_144, %c0_145] : memref<4x8x32xf32, #tpu.memory_space<vmem>>, vector<1x8x32xf32>
    %203 = vector.shape_cast %202 : vector<1x8x32xf32> to vector<8x32xf32>
    %cst_146 = arith.constant dense<0.000000e+00> : vector<8x32xf32>
    %204 = tpu.matmul %201, %203, %cst_146 {dimension_numbers = #tpu.dot_dimension_numbers<[1], [0], [0], [1], [0, 0, 1, 1], [], []>} : vector<8x8xf32>, vector<8x32xf32>, vector<8x32xf32> -> vector<8x32xf32>
    %c1_147 = arith.constant 1 : index
    %c0_148 = arith.constant 0 : index
    %c0_149 = arith.constant 0 : index
    %205 = vector.load %arg7[%c1_147, %c0_148, %c0_149] : memref<12x32x8xf32, #tpu.memory_space<vmem>>, vector<1x32x8xf32>
    %206 = vector.shape_cast %205 : vector<1x32x8xf32> to vector<32x8xf32>
    %cst_150 = arith.constant dense<0.000000e+00> : vector<8x8xf32>
    %207 = tpu.matmul %1, %206, %cst_150 {dimension_numbers = #tpu.dot_dimension_numbers<[1], [0], [0], [1], [0, 0, 1, 1], [], []>} : vector<8x32xf32>, vector<32x8xf32>, vector<8x8xf32> -> vector<8x8xf32>
    %c1_151 = arith.constant 1 : index
    %c0_152 = arith.constant 0 : index
    %c0_153 = arith.constant 0 : index
    %208 = vector.load %arg8[%c1_151, %c0_152, %c0_153] : memref<12x1x8xf32, #tpu.memory_space<vmem>>, vector<1x1x8xf32>
    %209 = vector.shape_cast %208 : vector<1x1x8xf32> to vector<1x8xf32>
    %210 = vector.broadcast %209 : vector<1x8xf32> to vector<8x8xf32>
    %211 = arith.addf %207, %210 : vector<8x8xf32>
    %c5_154 = arith.constant 5 : index
    %c0_155 = arith.constant 0 : index
    %c0_156 = arith.constant 0 : index
    %212 = vector.load %arg7[%c5_154, %c0_155, %c0_156] : memref<12x32x8xf32, #tpu.memory_space<vmem>>, vector<1x32x8xf32>
    %213 = vector.shape_cast %212 : vector<1x32x8xf32> to vector<32x8xf32>
    %cst_157 = arith.constant dense<0.000000e+00> : vector<8x8xf32>
    %214 = tpu.matmul %0, %213, %cst_157 {dimension_numbers = #tpu.dot_dimension_numbers<[1], [0], [0], [1], [0, 0, 1, 1], [], []>} : vector<8x32xf32>, vector<32x8xf32>, vector<8x8xf32> -> vector<8x8xf32>
    %c5_158 = arith.constant 5 : index
    %c0_159 = arith.constant 0 : index
    %c0_160 = arith.constant 0 : index
    %215 = vector.load %arg8[%c5_158, %c0_159, %c0_160] : memref<12x1x8xf32, #tpu.memory_space<vmem>>, vector<1x1x8xf32>
    %216 = vector.shape_cast %215 : vector<1x1x8xf32> to vector<1x8xf32>
    %217 = vector.broadcast %216 : vector<1x8xf32> to vector<8x8xf32>
    %218 = arith.addf %214, %217 : vector<8x8xf32>
    %c9_161 = arith.constant 9 : index
    %c0_162 = arith.constant 0 : index
    %c0_163 = arith.constant 0 : index
    %219 = vector.load %arg7[%c9_161, %c0_162, %c0_163] : memref<12x32x8xf32, #tpu.memory_space<vmem>>, vector<1x32x8xf32>
    %220 = vector.shape_cast %219 : vector<1x32x8xf32> to vector<32x8xf32>
    %cst_164 = arith.constant dense<0.000000e+00> : vector<8x8xf32>
    %221 = tpu.matmul %0, %220, %cst_164 {dimension_numbers = #tpu.dot_dimension_numbers<[1], [0], [0], [1], [0, 0, 1, 1], [], []>} : vector<8x32xf32>, vector<32x8xf32>, vector<8x8xf32> -> vector<8x8xf32>
    %c9_165 = arith.constant 9 : index
    %c0_166 = arith.constant 0 : index
    %c0_167 = arith.constant 0 : index
    %222 = vector.load %arg8[%c9_165, %c0_166, %c0_167] : memref<12x1x8xf32, #tpu.memory_space<vmem>>, vector<1x1x8xf32>
    %223 = vector.shape_cast %222 : vector<1x1x8xf32> to vector<1x8xf32>
    %224 = vector.broadcast %223 : vector<1x8xf32> to vector<8x8xf32>
    %225 = arith.addf %221, %224 : vector<8x8xf32>
    %226 = tpu.transpose %218, [1, 0] : vector<8x8xf32> -> vector<8x8xf32>
    %cst_168 = arith.constant dense<0.000000e+00> : vector<8x8xf32>
    %227 = tpu.matmul %211, %226, %cst_168 {dimension_numbers = #tpu.dot_dimension_numbers<[1], [0], [0], [1], [0, 0, 1, 1], [], []>} : vector<8x8xf32>, vector<8x8xf32>, vector<8x8xf32> -> vector<8x8xf32>
    %cst_169 = arith.constant 0.353553385 : f32
    %228 = vector.broadcast %cst_169 : f32 to vector<8x8xf32>
    %229 = arith.mulf %227, %228 : vector<8x8xf32>
    %230 = arith.addf %229, %2 : vector<8x8xf32>
    %cst_170 = arith.constant dense<0xFF800000> : vector<8xf32>
    %231 = vector.multi_reduction <maximumf>, %230, %cst_170 [1] : vector<8x8xf32> to vector<8xf32>
    %232 = vector.shape_cast %231 : vector<8xf32> to vector<8x1xf32>
    %233 = vector.broadcast %232 : vector<8x1xf32> to vector<8x8xf32>
    %234 = arith.subf %230, %233 : vector<8x8xf32>
    %235 = math.exp %234 : vector<8x8xf32>
    %cst_171 = arith.constant dense<0.000000e+00> : vector<8xf32>
    %236 = vector.multi_reduction <add>, %235, %cst_171 [1] : vector<8x8xf32> to vector<8xf32>
    %237 = vector.shape_cast %236 : vector<8xf32> to vector<8x1xf32>
    %238 = vector.broadcast %237 : vector<8x1xf32> to vector<8x8xf32>
    %239 = arith.divf %235, %238 : vector<8x8xf32>
    %cst_172 = arith.constant dense<0.000000e+00> : vector<8x8xf32>
    %240 = tpu.matmul %239, %225, %cst_172 {dimension_numbers = #tpu.dot_dimension_numbers<[1], [0], [0], [1], [0, 0, 1, 1], [], []>} : vector<8x8xf32>, vector<8x8xf32>, vector<8x8xf32> -> vector<8x8xf32>
    %c1_173 = arith.constant 1 : index
    %c0_174 = arith.constant 0 : index
    %c0_175 = arith.constant 0 : index
    %241 = vector.load %arg9[%c1_173, %c0_174, %c0_175] : memref<4x8x32xf32, #tpu.memory_space<vmem>>, vector<1x8x32xf32>
    %242 = vector.shape_cast %241 : vector<1x8x32xf32> to vector<8x32xf32>
    %cst_176 = arith.constant dense<0.000000e+00> : vector<8x32xf32>
    %243 = tpu.matmul %240, %242, %cst_176 {dimension_numbers = #tpu.dot_dimension_numbers<[1], [0], [0], [1], [0, 0, 1, 1], [], []>} : vector<8x8xf32>, vector<8x32xf32>, vector<8x32xf32> -> vector<8x32xf32>
    %244 = arith.addf %204, %243 : vector<8x32xf32>
    %c2_177 = arith.constant 2 : index
    %c0_178 = arith.constant 0 : index
    %c0_179 = arith.constant 0 : index
    %245 = vector.load %arg7[%c2_177, %c0_178, %c0_179] : memref<12x32x8xf32, #tpu.memory_space<vmem>>, vector<1x32x8xf32>
    %246 = vector.shape_cast %245 : vector<1x32x8xf32> to vector<32x8xf32>
    %cst_180 = arith.constant dense<0.000000e+00> : vector<8x8xf32>
    %247 = tpu.matmul %1, %246, %cst_180 {dimension_numbers = #tpu.dot_dimension_numbers<[1], [0], [0], [1], [0, 0, 1, 1], [], []>} : vector<8x32xf32>, vector<32x8xf32>, vector<8x8xf32> -> vector<8x8xf32>
    %c2_181 = arith.constant 2 : index
    %c0_182 = arith.constant 0 : index
    %c0_183 = arith.constant 0 : index
    %248 = vector.load %arg8[%c2_181, %c0_182, %c0_183] : memref<12x1x8xf32, #tpu.memory_space<vmem>>, vector<1x1x8xf32>
    %249 = vector.shape_cast %248 : vector<1x1x8xf32> to vector<1x8xf32>
    %250 = vector.broadcast %249 : vector<1x8xf32> to vector<8x8xf32>
    %251 = arith.addf %247, %250 : vector<8x8xf32>
    %c6_184 = arith.constant 6 : index
    %c0_185 = arith.constant 0 : index
    %c0_186 = arith.constant 0 : index
    %252 = vector.load %arg7[%c6_184, %c0_185, %c0_186] : memref<12x32x8xf32, #tpu.memory_space<vmem>>, vector<1x32x8xf32>
    %253 = vector.shape_cast %252 : vector<1x32x8xf32> to vector<32x8xf32>
    %cst_187 = arith.constant dense<0.000000e+00> : vector<8x8xf32>
    %254 = tpu.matmul %0, %253, %cst_187 {dimension_numbers = #tpu.dot_dimension_numbers<[1], [0], [0], [1], [0, 0, 1, 1], [], []>} : vector<8x32xf32>, vector<32x8xf32>, vector<8x8xf32> -> vector<8x8xf32>
    %c6_188 = arith.constant 6 : index
    %c0_189 = arith.constant 0 : index
    %c0_190 = arith.constant 0 : index
    %255 = vector.load %arg8[%c6_188, %c0_189, %c0_190] : memref<12x1x8xf32, #tpu.memory_space<vmem>>, vector<1x1x8xf32>
    %256 = vector.shape_cast %255 : vector<1x1x8xf32> to vector<1x8xf32>
    %257 = vector.broadcast %256 : vector<1x8xf32> to vector<8x8xf32>
    %258 = arith.addf %254, %257 : vector<8x8xf32>
    %c10_191 = arith.constant 10 : index
    %c0_192 = arith.constant 0 : index
    %c0_193 = arith.constant 0 : index
    %259 = vector.load %arg7[%c10_191, %c0_192, %c0_193] : memref<12x32x8xf32, #tpu.memory_space<vmem>>, vector<1x32x8xf32>
    %260 = vector.shape_cast %259 : vector<1x32x8xf32> to vector<32x8xf32>
    %cst_194 = arith.constant dense<0.000000e+00> : vector<8x8xf32>
    %261 = tpu.matmul %0, %260, %cst_194 {dimension_numbers = #tpu.dot_dimension_numbers<[1], [0], [0], [1], [0, 0, 1, 1], [], []>} : vector<8x32xf32>, vector<32x8xf32>, vector<8x8xf32> -> vector<8x8xf32>
    %c10_195 = arith.constant 10 : index
    %c0_196 = arith.constant 0 : index
    %c0_197 = arith.constant 0 : index
    %262 = vector.load %arg8[%c10_195, %c0_196, %c0_197] : memref<12x1x8xf32, #tpu.memory_space<vmem>>, vector<1x1x8xf32>
    %263 = vector.shape_cast %262 : vector<1x1x8xf32> to vector<1x8xf32>
    %264 = vector.broadcast %263 : vector<1x8xf32> to vector<8x8xf32>
    %265 = arith.addf %261, %264 : vector<8x8xf32>
    %266 = tpu.transpose %258, [1, 0] : vector<8x8xf32> -> vector<8x8xf32>
    %cst_198 = arith.constant dense<0.000000e+00> : vector<8x8xf32>
    %267 = tpu.matmul %251, %266, %cst_198 {dimension_numbers = #tpu.dot_dimension_numbers<[1], [0], [0], [1], [0, 0, 1, 1], [], []>} : vector<8x8xf32>, vector<8x8xf32>, vector<8x8xf32> -> vector<8x8xf32>
    %cst_199 = arith.constant 0.353553385 : f32
    %268 = vector.broadcast %cst_199 : f32 to vector<8x8xf32>
    %269 = arith.mulf %267, %268 : vector<8x8xf32>
    %270 = arith.addf %269, %2 : vector<8x8xf32>
    %cst_200 = arith.constant dense<0xFF800000> : vector<8xf32>
    %271 = vector.multi_reduction <maximumf>, %270, %cst_200 [1] : vector<8x8xf32> to vector<8xf32>
    %272 = vector.shape_cast %271 : vector<8xf32> to vector<8x1xf32>
    %273 = vector.broadcast %272 : vector<8x1xf32> to vector<8x8xf32>
    %274 = arith.subf %270, %273 : vector<8x8xf32>
    %275 = math.exp %274 : vector<8x8xf32>
    %cst_201 = arith.constant dense<0.000000e+00> : vector<8xf32>
    %276 = vector.multi_reduction <add>, %275, %cst_201 [1] : vector<8x8xf32> to vector<8xf32>
    %277 = vector.shape_cast %276 : vector<8xf32> to vector<8x1xf32>
    %278 = vector.broadcast %277 : vector<8x1xf32> to vector<8x8xf32>
    %279 = arith.divf %275, %278 : vector<8x8xf32>
    %cst_202 = arith.constant dense<0.000000e+00> : vector<8x8xf32>
    %280 = tpu.matmul %279, %265, %cst_202 {dimension_numbers = #tpu.dot_dimension_numbers<[1], [0], [0], [1], [0, 0, 1, 1], [], []>} : vector<8x8xf32>, vector<8x8xf32>, vector<8x8xf32> -> vector<8x8xf32>
    %c2_203 = arith.constant 2 : index
    %c0_204 = arith.constant 0 : index
    %c0_205 = arith.constant 0 : index
    %281 = vector.load %arg9[%c2_203, %c0_204, %c0_205] : memref<4x8x32xf32, #tpu.memory_space<vmem>>, vector<1x8x32xf32>
    %282 = vector.shape_cast %281 : vector<1x8x32xf32> to vector<8x32xf32>
    %cst_206 = arith.constant dense<0.000000e+00> : vector<8x32xf32>
    %283 = tpu.matmul %280, %282, %cst_206 {dimension_numbers = #tpu.dot_dimension_numbers<[1], [0], [0], [1], [0, 0, 1, 1], [], []>} : vector<8x8xf32>, vector<8x32xf32>, vector<8x32xf32> -> vector<8x32xf32>
    %284 = arith.addf %244, %283 : vector<8x32xf32>
    %c3_207 = arith.constant 3 : index
    %c0_208 = arith.constant 0 : index
    %c0_209 = arith.constant 0 : index
    %285 = vector.load %arg7[%c3_207, %c0_208, %c0_209] : memref<12x32x8xf32, #tpu.memory_space<vmem>>, vector<1x32x8xf32>
    %286 = vector.shape_cast %285 : vector<1x32x8xf32> to vector<32x8xf32>
    %cst_210 = arith.constant dense<0.000000e+00> : vector<8x8xf32>
    %287 = tpu.matmul %1, %286, %cst_210 {dimension_numbers = #tpu.dot_dimension_numbers<[1], [0], [0], [1], [0, 0, 1, 1], [], []>} : vector<8x32xf32>, vector<32x8xf32>, vector<8x8xf32> -> vector<8x8xf32>
    %c3_211 = arith.constant 3 : index
    %c0_212 = arith.constant 0 : index
    %c0_213 = arith.constant 0 : index
    %288 = vector.load %arg8[%c3_211, %c0_212, %c0_213] : memref<12x1x8xf32, #tpu.memory_space<vmem>>, vector<1x1x8xf32>
    %289 = vector.shape_cast %288 : vector<1x1x8xf32> to vector<1x8xf32>
    %290 = vector.broadcast %289 : vector<1x8xf32> to vector<8x8xf32>
    %291 = arith.addf %287, %290 : vector<8x8xf32>
    %c7_214 = arith.constant 7 : index
    %c0_215 = arith.constant 0 : index
    %c0_216 = arith.constant 0 : index
    %292 = vector.load %arg7[%c7_214, %c0_215, %c0_216] : memref<12x32x8xf32, #tpu.memory_space<vmem>>, vector<1x32x8xf32>
    %293 = vector.shape_cast %292 : vector<1x32x8xf32> to vector<32x8xf32>
    %cst_217 = arith.constant dense<0.000000e+00> : vector<8x8xf32>
    %294 = tpu.matmul %0, %293, %cst_217 {dimension_numbers = #tpu.dot_dimension_numbers<[1], [0], [0], [1], [0, 0, 1, 1], [], []>} : vector<8x32xf32>, vector<32x8xf32>, vector<8x8xf32> -> vector<8x8xf32>
    %c7_218 = arith.constant 7 : index
    %c0_219 = arith.constant 0 : index
    %c0_220 = arith.constant 0 : index
    %295 = vector.load %arg8[%c7_218, %c0_219, %c0_220] : memref<12x1x8xf32, #tpu.memory_space<vmem>>, vector<1x1x8xf32>
    %296 = vector.shape_cast %295 : vector<1x1x8xf32> to vector<1x8xf32>
    %297 = vector.broadcast %296 : vector<1x8xf32> to vector<8x8xf32>
    %298 = arith.addf %294, %297 : vector<8x8xf32>
    %c11_221 = arith.constant 11 : index
    %c0_222 = arith.constant 0 : index
    %c0_223 = arith.constant 0 : index
    %299 = vector.load %arg7[%c11_221, %c0_222, %c0_223] : memref<12x32x8xf32, #tpu.memory_space<vmem>>, vector<1x32x8xf32>
    %300 = vector.shape_cast %299 : vector<1x32x8xf32> to vector<32x8xf32>
    %cst_224 = arith.constant dense<0.000000e+00> : vector<8x8xf32>
    %301 = tpu.matmul %0, %300, %cst_224 {dimension_numbers = #tpu.dot_dimension_numbers<[1], [0], [0], [1], [0, 0, 1, 1], [], []>} : vector<8x32xf32>, vector<32x8xf32>, vector<8x8xf32> -> vector<8x8xf32>
    %c11_225 = arith.constant 11 : index
    %c0_226 = arith.constant 0 : index
    %c0_227 = arith.constant 0 : index
    %302 = vector.load %arg8[%c11_225, %c0_226, %c0_227] : memref<12x1x8xf32, #tpu.memory_space<vmem>>, vector<1x1x8xf32>
    %303 = vector.shape_cast %302 : vector<1x1x8xf32> to vector<1x8xf32>
    %304 = vector.broadcast %303 : vector<1x8xf32> to vector<8x8xf32>
    %305 = arith.addf %301, %304 : vector<8x8xf32>
    %306 = tpu.transpose %298, [1, 0] : vector<8x8xf32> -> vector<8x8xf32>
    %cst_228 = arith.constant dense<0.000000e+00> : vector<8x8xf32>
    %307 = tpu.matmul %291, %306, %cst_228 {dimension_numbers = #tpu.dot_dimension_numbers<[1], [0], [0], [1], [0, 0, 1, 1], [], []>} : vector<8x8xf32>, vector<8x8xf32>, vector<8x8xf32> -> vector<8x8xf32>
    %cst_229 = arith.constant 0.353553385 : f32
    %308 = vector.broadcast %cst_229 : f32 to vector<8x8xf32>
    %309 = arith.mulf %307, %308 : vector<8x8xf32>
    %310 = arith.addf %309, %2 : vector<8x8xf32>
    %cst_230 = arith.constant dense<0xFF800000> : vector<8xf32>
    %311 = vector.multi_reduction <maximumf>, %310, %cst_230 [1] : vector<8x8xf32> to vector<8xf32>
    %312 = vector.shape_cast %311 : vector<8xf32> to vector<8x1xf32>
    %313 = vector.broadcast %312 : vector<8x1xf32> to vector<8x8xf32>
    %314 = arith.subf %310, %313 : vector<8x8xf32>
    %315 = math.exp %314 : vector<8x8xf32>
    %cst_231 = arith.constant dense<0.000000e+00> : vector<8xf32>
    %316 = vector.multi_reduction <add>, %315, %cst_231 [1] : vector<8x8xf32> to vector<8xf32>
    %317 = vector.shape_cast %316 : vector<8xf32> to vector<8x1xf32>
    %318 = vector.broadcast %317 : vector<8x1xf32> to vector<8x8xf32>
    %319 = arith.divf %315, %318 : vector<8x8xf32>
    %cst_232 = arith.constant dense<0.000000e+00> : vector<8x8xf32>
    %320 = tpu.matmul %319, %305, %cst_232 {dimension_numbers = #tpu.dot_dimension_numbers<[1], [0], [0], [1], [0, 0, 1, 1], [], []>} : vector<8x8xf32>, vector<8x8xf32>, vector<8x8xf32> -> vector<8x8xf32>
    %c3_233 = arith.constant 3 : index
    %c0_234 = arith.constant 0 : index
    %c0_235 = arith.constant 0 : index
    %321 = vector.load %arg9[%c3_233, %c0_234, %c0_235] : memref<4x8x32xf32, #tpu.memory_space<vmem>>, vector<1x8x32xf32>
    %322 = vector.shape_cast %321 : vector<1x8x32xf32> to vector<8x32xf32>
    %cst_236 = arith.constant dense<0.000000e+00> : vector<8x32xf32>
    %323 = tpu.matmul %320, %322, %cst_236 {dimension_numbers = #tpu.dot_dimension_numbers<[1], [0], [0], [1], [0, 0, 1, 1], [], []>} : vector<8x8xf32>, vector<8x32xf32>, vector<8x32xf32> -> vector<8x32xf32>
    %324 = arith.addf %284, %323 : vector<8x32xf32>
    %c0_237 = arith.constant 0 : index
    %c0_238 = arith.constant 0 : index
    %325 = vector.load %arg10[%c0_237, %c0_238] : memref<1x32xf32, #tpu.memory_space<vmem>>, vector<1x32xf32>
    %326 = vector.broadcast %325 : vector<1x32xf32> to vector<8x32xf32>
    %327 = arith.addf %324, %326 : vector<8x32xf32>
    %c0_239 = arith.constant 0 : index
    %c0_240 = arith.constant 0 : index
    %328 = vector.load %arg12[%c0_239, %c0_240] : memref<8x32xf32, #tpu.memory_space<vmem>>, vector<8x32xf32>
    tpu.vector_store %arg12[%c0_239, %c0_240], %327 {strides = array<i32>} : memref<8x32xf32, #tpu.memory_space<vmem>>, vector<8x32xf32>,
    return
  }
}

module attributes {stable_mosaic.version = 11 : i64} {
  func.func @_mlp_head_kernel(%arg0: memref<2x256xf32, #tpu.memory_space<vmem>>, %arg1: memref<256x512xf32, #tpu.memory_space<vmem>>, %arg2: memref<1x512xf32, #tpu.memory_space<vmem>>, %arg3: memref<512x256xf32, #tpu.memory_space<vmem>>, %arg4: memref<1x256xf32, #tpu.memory_space<vmem>>, %arg5: memref<256x1xf32, #tpu.memory_space<vmem>>, %arg6: memref<1x1xf32, #tpu.memory_space<vmem>>, %arg7: memref<2x1xf32, #tpu.memory_space<vmem>>) attributes {dimension_semantics = [], scalar_prefetch = 0 : i64, scratch_operands = 0 : i64, tpu.core_type = #tpu.core_type<tc>} {
    %c0 = arith.constant 0 : index
    %c0_0 = arith.constant 0 : index
    %0 = vector.load %arg0[%c0, %c0_0] : memref<2x256xf32, #tpu.memory_space<vmem>>, vector<2x256xf32>
    %c0_1 = arith.constant 0 : index
    %c0_2 = arith.constant 0 : index
    %1 = vector.load %arg1[%c0_1, %c0_2] : memref<256x512xf32, #tpu.memory_space<vmem>>, vector<256x512xf32>
    %cst = arith.constant dense<0.000000e+00> : vector<2x512xf32>
    %2 = tpu.matmul %0, %1, %cst {dimension_numbers = #tpu.dot_dimension_numbers<[1], [0], [0], [1], [0, 0, 1, 1], [], []>} : vector<2x256xf32>, vector<256x512xf32>, vector<2x512xf32> -> vector<2x512xf32>
    %c0_3 = arith.constant 0 : index
    %c0_4 = arith.constant 0 : index
    %3 = vector.load %arg2[%c0_3, %c0_4] : memref<1x512xf32, #tpu.memory_space<vmem>>, vector<1x512xf32>
    %4 = vector.broadcast %3 : vector<1x512xf32> to vector<2x512xf32>
    %5 = arith.addf %2, %4 : vector<2x512xf32>
    %cst_5 = arith.constant 0.000000e+00 : f32
    %6 = vector.broadcast %cst_5 : f32 to vector<2x512xf32>
    %7 = arith.maximumf %5, %6 : vector<2x512xf32>
    %c0_6 = arith.constant 0 : index
    %c0_7 = arith.constant 0 : index
    %8 = vector.load %arg3[%c0_6, %c0_7] : memref<512x256xf32, #tpu.memory_space<vmem>>, vector<512x256xf32>
    %cst_8 = arith.constant dense<0.000000e+00> : vector<2x256xf32>
    %9 = tpu.matmul %7, %8, %cst_8 {dimension_numbers = #tpu.dot_dimension_numbers<[1], [0], [0], [1], [0, 0, 1, 1], [], []>} : vector<2x512xf32>, vector<512x256xf32>, vector<2x256xf32> -> vector<2x256xf32>
    %c0_9 = arith.constant 0 : index
    %c0_10 = arith.constant 0 : index
    %10 = vector.load %arg4[%c0_9, %c0_10] : memref<1x256xf32, #tpu.memory_space<vmem>>, vector<1x256xf32>
    %11 = vector.broadcast %10 : vector<1x256xf32> to vector<2x256xf32>
    %12 = arith.addf %9, %11 : vector<2x256xf32>
    %cst_11 = arith.constant 0.000000e+00 : f32
    %13 = vector.broadcast %cst_11 : f32 to vector<2x256xf32>
    %14 = arith.maximumf %12, %13 : vector<2x256xf32>
    %c0_12 = arith.constant 0 : index
    %c0_13 = arith.constant 0 : index
    %15 = vector.load %arg5[%c0_12, %c0_13] : memref<256x1xf32, #tpu.memory_space<vmem>>, vector<256x1xf32>
    %cst_14 = arith.constant dense<0.000000e+00> : vector<2x1xf32>
    %16 = tpu.matmul %14, %15, %cst_14 {dimension_numbers = #tpu.dot_dimension_numbers<[1], [0], [0], [1], [0, 0, 1, 1], [], []>} : vector<2x256xf32>, vector<256x1xf32>, vector<2x1xf32> -> vector<2x1xf32>
    %c0_15 = arith.constant 0 : index
    %c0_16 = arith.constant 0 : index
    %17 = vector.load %arg6[%c0_15, %c0_16] : memref<1x1xf32, #tpu.memory_space<vmem>>, vector<1x1xf32>
    %18 = vector.broadcast %17 : vector<1x1xf32> to vector<2x1xf32>
    %19 = arith.addf %16, %18 : vector<2x1xf32>
    %c0_17 = arith.constant 0 : index
    %c0_18 = arith.constant 0 : index
    %20 = vector.load %arg7[%c0_17, %c0_18] : memref<2x1xf32, #tpu.memory_space<vmem>>, vector<2x1xf32>
    tpu.vector_store %arg7[%c0_17, %c0_18], %19 {strides = array<i32>} : memref<2x1xf32, #tpu.memory_space<vmem>>, vector<2x1xf32>,
    return
  }
}

</mosaic_0001>

<bundles_post_ra>
// kernel: xxmodel_forward.4
= control target key start
LH: loop header
LB: loop body
LE: loop exit
PB: predicated region body
PF: predicated region fallthrough
CT: control target
= control target key end

     0   :  { %10 = vsyncpa [#allocation3], 0  ;;  %s2286_s0 = inlined_call_operand.hbm [shape: f32[96,16], index: 0, kind: input, shape index: {}]   ;;  %s2287_s1 = inlined_call_operand.hbm [shape: f32[96,96], index: 1, kind: input, shape index: {}]   ;;  %s2288_s2 = inlined_call_operand.hbm [shape: f32[96,96], index: 2, kind: input, shape index: {}]   ;;  %s2289_s3 = inlined_call_operand.hbm [shape: f32[16,16], index: 3, kind: input, shape index: {}]   ;;  %s2290_s4 = inlined_call_operand.hbm [shape: f32[16,16], index: 4, kind: input, shape index: {}]   ;;  %s2291_s5 = inlined_call_operand.vmem [shape: f32[96,16], index: 5, kind: output, shape index: {}]  }
   0x1   :  { %11 = vsyncpa [#allocation5], 0 }
   0x2   :  { %12 = vsyncpa [#allocation8], 0  ;;  %s1870_s18 = smov [#allocation4]   ;;  %s1871_s20 = smov [#allocation7]  }
   0x3   :  { %s30_s19 = sshll.u32 %s1870_s18, 4  ;;  %s54_s21 = sshll.u32 %s1871_s20, 4  ;;  %s31_s19 = int_to_ptr.vmem [resolvable:$true] %s30_s19  ;;  %s1907_s21 = int_to_ptr.vmem [resolvable:$true] %s54_s21 }
   0x4   :  { %s1754_s24 = scalar_lea.hbm %s2287_s1, 1536 }
   0x5   :  { %p1755_p0 = scmp.ne.s32.totalorder %s2287_s1, %s1754_s24  ;;  %p1758_p1 = scmp.lt.u32.totalorder %s1754_s24, %s2287_s1 }
   0x7   :  { %p1760_p2 = pnand %p1758_p1, %p1755_p0 }
   0x9   :  { %1763 = shalt.err (!%p1760_p2)
}
   0xa   :  { %s1764_s29 = scalar_lea.vmem %s31_s19, 1536  ;;  %p1769_p4 = scmp.lt.s32.totalorder %s31_s19, %s31_s19 }
   0xb   :  { %p1765_p3 = scmp.ne.s32.totalorder %s31_s19, %s1764_s29  ;;  %p1770_p5 = scmp.lt.s32.totalorder %s1764_s29, %s1764_s29 }
   0xd   :  { %p1771_p6 = por %p1770_p5, %p1769_p4 }
   0xf   :  { %p1772_p7 = pnand %p1771_p6, %p1765_p3 }
  0x11   :  { %1775 = shalt.err (!%p1772_p7)
}
  0x12   :  { %s1872_s30 = smov 128   ;;  %s1873_s6 = smov 8  }
  0x13   :  { %36 = dma.hbm_to_vmem [thread:$0]  %s2287_s1, 1536, %s31_s19, [#allocation5], %s1872_s30, %s1872_s30, %s1873_s6  }
  0x14   :  { %s1776_s11 = scalar_lea.hbm %s2289_s3, 256 }
  0x15   :  { %p1777_p8 = scmp.ne.s32.totalorder %s2289_s3, %s1776_s11  ;;  %p1780_p9 = scmp.lt.u32.totalorder %s1776_s11, %s2289_s3 }
  0x17   :  { %p1782_p10 = pnand %p1780_p9, %p1777_p8 }
  0x19   :  { %1785 = shalt.err (!%p1782_p10)
}
  0x1a   :  { %s1786_s16 = scalar_lea.vmem %s1907_s21, 256  ;;  %p1791_p12 = scmp.lt.s32.totalorder %s1907_s21, %s1907_s21 }
  0x1b   :  { %p1787_p11 = scmp.ne.s32.totalorder %s1907_s21, %s1786_s16  ;;  %p1792_p13 = scmp.lt.s32.totalorder %s1786_s16, %s1786_s16 }
  0x1d   :  { %p1793_p0 = por %p1792_p13, %p1791_p12 }
  0x1f   :  { %p1794_p1 = pnand %p1793_p0, %p1787_p11 }
  0x21   :  { %1797 = shalt.err (!%p1794_p1)
}
  0x22   :  { %60 = dma.hbm_to_vmem [thread:$0]  %s2289_s3, 256, %s1907_s21, [#allocation8], %s1872_s30, %s1872_s30, %s1873_s6  }
  0x23   :  { %s1874_s18 = smov [#allocation2]   ;;  %s1875_s20 = smov [#allocation6]  }
  0x24   :  { %s18_s19 = sshll.u32 %s1874_s18, 4  ;;  %s42_s22 = sshll.u32 %s1875_s20, 4  ;;  %s19_s19 = int_to_ptr.vmem [resolvable:$true] %s18_s19  ;;  %s1944_s22 = int_to_ptr.vmem [resolvable:$true] %s42_s22 }
  0x25   :  { %s1798_s25 = scalar_lea.hbm %s2286_s0, 1536 }
  0x26   :  { %p1799_p2 = scmp.ne.s32.totalorder %s2286_s0, %s1798_s25  ;;  %p1802_p3 = scmp.lt.u32.totalorder %s1798_s25, %s2286_s0 }
  0x28   :  { %p1804_p4 = pnand %p1802_p3, %p1799_p2 }
  0x2a   :  { %1807 = shalt.err (!%p1804_p4)
}
  0x2b   :  { %s1808_s3 = scalar_lea.vmem %s19_s19, 1536  ;;  %p1813_p6 = scmp.lt.s32.totalorder %s19_s19, %s19_s19 }
  0x2c   :  { %p1809_p5 = scmp.ne.s32.totalorder %s19_s19, %s1808_s3  ;;  %p1814_p7 = scmp.lt.s32.totalorder %s1808_s3, %s1808_s3 }
  0x2e   :  { %p1815_p8 = por %p1814_p7, %p1813_p6 }
  0x30   :  { %p1816_p9 = pnand %p1815_p8, %p1809_p5 }
  0x32   :  { %1819 = shalt.err (!%p1816_p9)
}
  0x33   :  { %24 = dma.hbm_to_vmem [thread:$0]  %s2286_s0, 1536, %s19_s19, [#allocation3], %s1872_s30, %s1872_s30, %s1873_s6  }
  0x34   :  { %s1820_s10 = scalar_lea.hbm %s2288_s2, 1536 }
  0x35   :  { %p1821_p10 = scmp.ne.s32.totalorder %s2288_s2, %s1820_s10  ;;  %p1824_p11 = scmp.lt.u32.totalorder %s1820_s10, %s2288_s2 }
  0x37   :  { %p1826_p12 = pnand %p1824_p11, %p1821_p10 }
  0x39   :  { %1829 = shalt.err (!%p1826_p12)
}
  0x3a   :  { %s1830_s15 = scalar_lea.vmem %s1944_s22, 1536  ;;  %p1835_p0 = scmp.lt.s32.totalorder %s1944_s22, %s1944_s22 }
  0x3b   :  { %p1831_p13 = scmp.ne.s32.totalorder %s1944_s22, %s1830_s15  ;;  %p1836_p1 = scmp.lt.s32.totalorder %s1830_s15, %s1830_s15 }
  0x3d   :  { %p1837_p2 = por %p1836_p1, %p1835_p0 }
  0x3f   :  { %p1838_p3 = pnand %p1837_p2, %p1831_p13 }
  0x41   :  { %1841 = shalt.err (!%p1838_p3)
}
  0x42   :  { %48 = dma.hbm_to_vmem [thread:$0]  %s2288_s2, 1536, %s1944_s22, [#allocation5], %s1872_s30, %s1872_s30, %s1873_s6  }
  0x43   :  { %s1876_s1 = smov [#allocation9]   ;;  %s1842_s20 = scalar_lea.hbm %s2290_s4, 256 }
  0x44   :  { %s66_s17 = sshll.u32 %s1876_s1, 4  ;;  %p1843_p4 = scmp.ne.s32.totalorder %s2290_s4, %s1842_s20  ;;  %s67_s17 = int_to_ptr.vmem [resolvable:$true] %s66_s17 }
  0x45   :  { %p1846_p5 = scmp.lt.u32.totalorder %s1842_s20, %s2290_s4 }
  0x47   :  { %p1848_p6 = pnand %p1846_p5, %p1843_p4 }
  0x49   :  { %1851 = shalt.err (!%p1848_p6)
}
  0x4a   :  { %s1852_s27 = scalar_lea.vmem %s67_s17, 256  ;;  %p1857_p8 = scmp.lt.s32.totalorder %s67_s17, %s67_s17 }
  0x4b   :  { %p1853_p7 = scmp.ne.s32.totalorder %s67_s17, %s1852_s27  ;;  %p1858_p9 = scmp.lt.s32.totalorder %s1852_s27, %s1852_s27 }
  0x4d   :  { %p1859_p10 = por %p1858_p9, %p1857_p8 }
  0x4f   :  { %p1860_p11 = pnand %p1859_p10, %p1853_p7 }
  0x51   :  { %1863 = shalt.err (!%p1860_p11)
}
  0x52   :  { %72 = dma.hbm_to_vmem [thread:$0]  %s2290_s4, 256, %s67_s17, [#allocation8], %s1872_s30, %s1872_s30, %s1873_s6  }
  0x53   :  { %1864 = dma.done.wait [#allocation3], 1536  }
  0x54   :  { %1865 = vsyncadd [#allocation3], 4294965760 }
  0x55   :  { %1866 = dma.done.wait [#allocation5], 3072  }
  0x56   :  { %1867 = vsyncadd [#allocation5], 4294964224 }
  0x57   :  { %1868 = dma.done.wait [#allocation8], 512  }
  0x58   :  { %1869 = vsyncadd [#allocation8], 4294966784  ;;  %vm102_vm0 = vcmask 130048   ;;  %v100_v0 = vld [vmem:[#allocation7] sm:$0xff]  ;;  %v101_v1 = vld [vmem:[#allocation7 + $0x8] sm:$0xff]  ;;  %vm403_vm1 = vcmask 785408  }
  0x59   :  { %v88_v2 = vld [vmem:[#allocation2] sm:$0xff]  ;;  %v1583_v3 = vpack.c.bf16 %v101_v1, %v100_v0  ;;  %v89_v4 = vld [vmem:[#allocation2 + $0x8] sm:$0xff]  ;;  %v264_v5 = vld [vmem:[#allocation9] sm:$0xff] }
  0x5a   :  { %1375 = vmatprep.mubr.msk.f32.mxu0 %vm102_vm0, %v88_v2  ;;  %1397 = vmatprep.mubr.msk.f32.mxu1 %vm102_vm0, %v88_v2  ;;  %v265_v6 = vld [vmem:[#allocation9 + $0x8] sm:$0xff]  ;;  %v90_v7 = vld [vmem:[#allocation2 + $0x10] sm:$0xff]  ;;  %v92_v10 = vld [vmem:[#allocation2 + $0x20] sm:$0xff] }
  0x5b   :  { %1584 = vmatprep.subr.bf16.mxu0 %v1583_v3  ;;  %v1587_v8 = vpack.c.bf16 %v265_v6, %v264_v5  ;;  %v91_v9 = vld [vmem:[#allocation2 + $0x18] sm:$0xff]  ;;  %v93_v11 = vld [vmem:[#allocation2 + $0x28] sm:$0xff]  ;;  %v94_v12 = vld [vmem:[#allocation2 + $0x30] sm:$0xff] }
  0x5c   :  { %1586 = vmatpush3.bf16.msra.mxu0 %v1583_v3  ;;  %v95_v13 = vld [vmem:[#allocation2 + $0x38] sm:$0xff]  ;;  %v96_v14 = vld [vmem:[#allocation2 + $0x40] sm:$0xff]  ;;  %v97_v15 = vld [vmem:[#allocation2 + $0x48] sm:$0xff] }
  0x5d   :  { %1588 = vmatprep.subr.bf16.mxu1 %v1587_v8  ;;  %v98_v16 = vld [vmem:[#allocation2 + $0x50] sm:$0xff]  ;;  %v99_v17 = vld [vmem:[#allocation2 + $0x58] sm:$0xff]  ;;  %v2020_v18 = vld [vmem:[#allocation4] sm:$0xff] }
  0x5e   :  { %1590 = vmatpush3.bf16.msra.mxu1 %v1587_v8  ;;  %v2024_v19 = vld [vmem:[#allocation6] sm:$0xff]  ;;  %v2030_v54 = vld [vmem:[#allocation4 + $0x8] sm:$0xff]  ;;  %v2036_v58 = vld [vmem:[#allocation4 + $0x10] sm:$0xff] }
  0x5f   :  { %1376 = vmatmul.mubr.msk.f32.vlgmr.msra.gmra.mrb[0].mxu0 %vm102_vm0, %v89_v4  ;;  %v2032_v55 = vld [vmem:[#allocation6 + $0x8] sm:$0xff]  ;;  %v2042_v59 = vld [vmem:[#allocation6 + $0x10] sm:$0xff]  ;;  %v2044_v60 = vld [vmem:[#allocation4 + $0x18] sm:$0xff] }
  0x60   :  { %1378 = vmatprep.mubr.msk.f32.mxu0 %vm102_vm0, %v90_v7  ;;  %v2046_v61 = vld [vmem:[#allocation6 + $0x18] sm:$0xff]  ;;  %v395_v62 = vld [vmem:[#allocation4 + $0x20] sm:$0xff]  ;;  %v396_v0 = vld [vmem:[#allocation4 + $0x28] sm:$0xff] }
  0x61   :  { %1398 = vmatmul.mubr.msk.f32.vlgmr.msra.gmra.mrb[0].mxu1 %vm102_vm0, %v89_v4  ;;  %v569_v63 = vld [vmem:[#allocation6 + $0x20] sm:$0xff]  ;;  %v570_v1 = vld [vmem:[#allocation6 + $0x28] sm:$0xff]  ;;  %v397_v2 = vld [vmem:[#allocation4 + $0x30] sm:$0xff] }
  0x62   :  { %1400 = vmatprep.mubr.msk.f32.mxu1 %vm102_vm0, %v90_v7  ;;  %v571_v3 = vld [vmem:[#allocation6 + $0x30] sm:$0xff]  ;;  %v398_v4 = vld [vmem:[#allocation4 + $0x38] sm:$0xff]  ;;  %v399_v6 = vld [vmem:[#allocation4 + $0x40] sm:$0xff] }
  0x63   :  { %1379 = vmatmul.mubr.msk.f32.gmra.mrb[2].mxu0 %vm102_vm0, %v91_v9  ;;  %v572_v5 = vld [vmem:[#allocation6 + $0x38] sm:$0xff]  ;;  %v573_v7 = vld [vmem:[#allocation6 + $0x40] sm:$0xff]  ;;  %v400_v8 = vld [vmem:[#allocation4 + $0x48] sm:$0xff] }
  0x64   :  { %1381 = vmatprep.mubr.msk.f32.mxu0 %vm102_vm0, %v92_v10 }
  0x65   :  { %1401 = vmatmul.mubr.msk.f32.gmra.mrb[2].mxu1 %vm102_vm0, %v91_v9  ;;  %v574_v9 = vld [vmem:[#allocation6 + $0x48] sm:$0xff] }
  0x66   :  { %1403 = vmatprep.mubr.msk.f32.mxu1 %vm102_vm0, %v92_v10  ;;  %v401_v10 = vld [vmem:[#allocation4 + $0x50] sm:$0xff] }
  0x67   :  { %1382 = vmatmul.mubr.msk.f32.gmra.mrb[4].mxu0 %vm102_vm0, %v93_v11 }
  0x68   :  { %1384 = vmatprep.mubr.msk.f32.mxu0 %vm102_vm0, %v94_v12 }
  0x69   :  { %1404 = vmatmul.mubr.msk.f32.gmra.mrb[4].mxu1 %vm102_vm0, %v93_v11  ;;  %v575_v11 = vld [vmem:[#allocation6 + $0x50] sm:$0xff] }
  0x6a   :  { %1406 = vmatprep.mubr.msk.f32.mxu1 %vm102_vm0, %v94_v12  ;;  %v402_v12 = vld [vmem:[#allocation4 + $0x58] sm:$0xff] }
  0x6b   :  { %1385 = vmatmul.mubr.msk.f32.gmra.mrb[6].mxu0 %vm102_vm0, %v95_v13 }
  0x6c   :  { %1387 = vmatprep.mubr.msk.f32.mxu0 %vm102_vm0, %v96_v14 }
  0x6d   :  { %1407 = vmatmul.mubr.msk.f32.gmra.mrb[6].mxu1 %vm102_vm0, %v95_v13  ;;  %v576_v13 = vld [vmem:[#allocation6 + $0x58] sm:$0xff] }
  0x6e   :  { %1409 = vmatprep.mubr.msk.f32.mxu1 %vm102_vm0, %v96_v14 }
  0x6f   :  { %1388 = vmatmul.mubr.msk.f32.gmra.mrb[8].mxu0 %vm102_vm0, %v97_v15 }
  0x70   :  { %1390 = vmatprep.mubr.msk.f32.mxu0 %vm102_vm0, %v98_v16 }
  0x71   :  { %1410 = vmatmul.mubr.msk.f32.gmra.mrb[8].mxu1 %vm102_vm0, %v97_v15 }
  0x72   :  { %1412 = vmatprep.mubr.msk.f32.mxu1 %vm102_vm0, %v98_v16 }
  0x73   :  { %1391 = vmatmul.mubr.msk.f32.gmra.mrb[10].mxu0 %vm102_vm0, %v99_v17 }
  0x74   :  { %1523 = vmatprep.mubr.msk.f32.mxu0 %vm403_vm1, %v2024_v19 }
  0x75   :  { %1413 = vmatmul.mubr.msk.f32.gmra.mrb[10].mxu1 %vm102_vm0, %v99_v17 }
  0x76   :  { %1439 = vmatprep.mubr.msk.f32.mxu1 %vm403_vm1, %v2020_v18 }
 0x132   :  { %v1377_v20 = vpop.f32.mrb[0].mxu0 }
 0x133   :  { %v205_v21 = vpop.f32.mrb[1].mxu0 }
 0x134   :  { %v1591_v22 = vpack.c.bf16 %v1377_v20, %v205_v21  ;;  %v1399_v24 = vpop.f32.mrb[0].mxu1 }
 0x135   :  { %v332_v26 = vpop.f32.mrb[1].mxu1 }
 0x136   :  { %v1380_v23 = vpop.f32.mrb[2].mxu0  ;;  %1592 = vmatprep.subr.bf16.mxu1 %v1591_v22  ;;  %1640 = vmatprep.subr.bf16.mxu0 %v1591_v22  ;;  %v1615_v28 = vpack.c.bf16 %v1399_v24, %v332_v26 }
 0x137   :  { %v215_v25 = vpop.f32.mrb[3].mxu0  ;;  %1594 = vmatpush3.bf16.msra.mxu1 %v1591_v22  ;;  %1642 = vmatpush3.bf16.msra.mxu0 %v1591_v22 }
 0x138   :  { %v1595_v27 = vpack.c.bf16 %v1380_v23, %v215_v25  ;;  %v1402_v30 = vpop.f32.mrb[2].mxu1 }
 0x139   :  { %v342_v32 = vpop.f32.mrb[3].mxu1 }
 0x13a   :  { %v1383_v29 = vpop.f32.mrb[4].mxu0  ;;  %1596 = vmatprep.subr.bf16.mxu1 %v1595_v27  ;;  %1644 = vmatprep.subr.bf16.mxu0 %v1595_v27  ;;  %v1619_v34 = vpack.c.bf16 %v1402_v30, %v342_v32 }
 0x13b   :  { %v225_v31 = vpop.f32.mrb[5].mxu0  ;;  %1598 = vmatpush3.bf16.msra.mxu1 %v1595_v27  ;;  %1646 = vmatpush3.bf16.msra.mxu0 %v1595_v27 }
 0x13c   :  { %v1599_v33 = vpack.c.bf16 %v1383_v29, %v225_v31  ;;  %v1405_v36 = vpop.f32.mrb[4].mxu1 }
 0x13d   :  { %v352_v38 = vpop.f32.mrb[5].mxu1 }
 0x13e   :  { %v1386_v35 = vpop.f32.mrb[6].mxu0  ;;  %1600 = vmatprep.subr.bf16.mxu1 %v1599_v33  ;;  %1648 = vmatprep.subr.bf16.mxu0 %v1599_v33  ;;  %v1623_v40 = vpack.c.bf16 %v1405_v36, %v352_v38 }
 0x13f   :  { %v235_v37 = vpop.f32.mrb[7].mxu0  ;;  %1602 = vmatpush3.bf16.msra.mxu1 %v1599_v33  ;;  %1650 = vmatpush3.bf16.msra.mxu0 %v1599_v33 }
 0x140   :  { %v1603_v39 = vpack.c.bf16 %v1386_v35, %v235_v37  ;;  %v1408_v42 = vpop.f32.mrb[6].mxu1 }
 0x141   :  { %v362_v44 = vpop.f32.mrb[7].mxu1 }
 0x142   :  { %v1389_v41 = vpop.f32.mrb[8].mxu0  ;;  %1604 = vmatprep.subr.bf16.mxu1 %v1603_v39  ;;  %1652 = vmatprep.subr.bf16.mxu0 %v1603_v39  ;;  %v1627_v46 = vpack.c.bf16 %v1408_v42, %v362_v44 }
 0x143   :  { %v245_v43 = vpop.f32.mrb[9].mxu0  ;;  %1606 = vmatpush3.bf16.msra.mxu1 %v1603_v39  ;;  %1654 = vmatpush3.bf16.msra.mxu0 %v1603_v39 }
 0x144   :  { %v1607_v45 = vpack.c.bf16 %v1389_v41, %v245_v43  ;;  %v1411_v48 = vpop.f32.mrb[8].mxu1 }
 0x145   :  { %v372_v50 = vpop.f32.mrb[9].mxu1 }
 0x146   :  { %v1392_v47 = vpop.f32.mrb[10].mxu0  ;;  %1608 = vmatprep.subr.bf16.mxu1 %v1607_v45  ;;  %1656 = vmatprep.subr.bf16.mxu0 %v1607_v45  ;;  %v2028_v52 = vpack.c.bf16 %v1411_v48, %v372_v50 }
 0x147   :  { %v255_v49 = vpop.f32.mrb[11].mxu0  ;;  %1610 = vmatpush3.bf16.msra.mxu1 %v1607_v45  ;;  %1658 = vmatpush3.bf16.msra.mxu0 %v1607_v45 }
 0x148   :  { %v1611_v51 = vpack.c.bf16 %v1392_v47, %v255_v49  ;;  %v1414_v53 = vpop.f32.mrb[10].mxu1 }
 0x149   :  { %v382_v56 = vpop.f32.mrb[11].mxu1 }
 0x14a   :  { %1612 = vmatprep.subr.bf16.mxu1 %v1611_v51  ;;  %1660 = vmatprep.subr.bf16.mxu0 %v1611_v51  ;;  %v2034_v57 = vpack.c.bf16 %v1414_v53, %v382_v56 }
 0x14b   :  { %1614 = vmatpush3.bf16.msra.mxu1 %v1611_v51  ;;  %1662 = vmatpush3.bf16.msra.mxu0 %v1611_v51 }
 0x14c   :  { %1616 = vmatprep.subr.bf16.mxu1 %v1615_v28  ;;  %1664 = vmatprep.subr.bf16.mxu0 %v1615_v28 }
 0x14e   :  { %1440 = vmatmul.mubr.msk.f32.vlgmr.msra.gmra.mrb[12].mxu1 %vm403_vm1, %v2030_v54  ;;  %1524 = vmatmul.mubr.msk.f32.vlgmr.msra.gmra.mrb[12].mxu0 %vm403_vm1, %v2032_v55 }
 0x14f   :  { %1618 = vmatpush3.bf16.msra.mxu1 %v1615_v28  ;;  %1666 = vmatpush3.bf16.msra.mxu0 %v1615_v28 }
 0x150   :  { %1442 = vmatprep.mubr.msk.f32.mxu1 %vm403_vm1, %v2036_v58  ;;  %1620 = vmatprep.subr.bf16.mxu1 %v1619_v34 }
 0x151   :  { %1526 = vmatprep.mubr.msk.f32.mxu0 %vm403_vm1, %v2042_v59  ;;  %1668 = vmatprep.subr.bf16.mxu0 %v1619_v34 }
 0x152   :  { %1443 = vmatmul.mubr.msk.f32.gmra.mrb[14].mxu1 %vm403_vm1, %v2044_v60  ;;  %1527 = vmatmul.mubr.msk.f32.gmra.mrb[14].mxu0 %vm403_vm1, %v2046_v61 }
 0x153   :  { %1622 = vmatpush3.bf16.msra.mxu1 %v1619_v34  ;;  %1670 = vmatpush3.bf16.msra.mxu0 %v1619_v34 }
 0x154   :  { %1445 = vmatprep.mubr.msk.f32.mxu1 %vm403_vm1, %v395_v62  ;;  %1624 = vmatprep.subr.bf16.mxu1 %v1623_v40 }
 0x155   :  { %1529 = vmatprep.mubr.msk.f32.mxu0 %vm403_vm1, %v569_v63  ;;  %1672 = vmatprep.subr.bf16.mxu0 %v1623_v40 }
 0x156   :  { %1446 = vmatmul.mubr.msk.f32.gmra.mrb[16].mxu1 %vm403_vm1, %v396_v0  ;;  %1530 = vmatmul.mubr.msk.f32.gmra.mrb[16].mxu0 %vm403_vm1, %v570_v1 }
 0x157   :  { %1626 = vmatpush3.bf16.msra.mxu1 %v1623_v40  ;;  %1674 = vmatpush3.bf16.msra.mxu0 %v1623_v40 }
 0x158   :  { %1448 = vmatprep.mubr.msk.f32.mxu1 %vm403_vm1, %v397_v2  ;;  %1628 = vmatprep.subr.bf16.mxu1 %v1627_v46 }
 0x159   :  { %1532 = vmatprep.mubr.msk.f32.mxu0 %vm403_vm1, %v571_v3  ;;  %1676 = vmatprep.subr.bf16.mxu0 %v1627_v46 }
 0x15a   :  { %1449 = vmatmul.mubr.msk.f32.gmra.mrb[18].mxu1 %vm403_vm1, %v398_v4  ;;  %1533 = vmatmul.mubr.msk.f32.gmra.mrb[18].mxu0 %vm403_vm1, %v572_v5 }
 0x15b   :  { %1630 = vmatpush3.bf16.msra.mxu1 %v1627_v46  ;;  %1678 = vmatpush3.bf16.msra.mxu0 %v1627_v46 }
 0x15c   :  { %1451 = vmatprep.mubr.msk.f32.mxu1 %vm403_vm1, %v399_v6  ;;  %1632 = vmatprep.subr.bf16.mxu1 %v2028_v52 }
 0x15d   :  { %1535 = vmatprep.mubr.msk.f32.mxu0 %vm403_vm1, %v573_v7  ;;  %1680 = vmatprep.subr.bf16.mxu0 %v2028_v52 }
 0x15e   :  { %1452 = vmatmul.mubr.msk.f32.gmra.mrb[20].mxu1 %vm403_vm1, %v400_v8  ;;  %1536 = vmatmul.mubr.msk.f32.gmra.mrb[20].mxu0 %vm403_vm1, %v574_v9 }
 0x15f   :  { %1634 = vmatpush3.bf16.msra.mxu1 %v2028_v52  ;;  %1682 = vmatpush3.bf16.msra.mxu0 %v2028_v52 }
 0x160   :  { %1454 = vmatprep.mubr.msk.f32.mxu1 %vm403_vm1, %v401_v10  ;;  %1636 = vmatprep.subr.bf16.mxu1 %v2034_v57 }
 0x161   :  { %1538 = vmatprep.mubr.msk.f32.mxu0 %vm403_vm1, %v575_v11  ;;  %1684 = vmatprep.subr.bf16.mxu0 %v2034_v57 }
 0x162   :  { %1455 = vmatmul.mubr.msk.f32.gmra.mrb[22].mxu1 %vm403_vm1, %v402_v12  ;;  %1539 = vmatmul.mubr.msk.f32.gmra.mrb[22].mxu0 %vm403_vm1, %v576_v13 }
 0x163   :  { %1638 = vmatpush3.bf16.msra.mxu1 %v2034_v57  ;;  %1686 = vmatpush3.bf16.msra.mxu0 %v2034_v57 }
 0x164   :  { %1481 = vmatprep.mubr.msk.f32.mxu1 %vm403_vm1, %v2024_v19  ;;  %1565 = vmatprep.mubr.msk.f32.mxu0 %vm403_vm1, %v2020_v18 }
 0x166   :  { %1482 = vmatmul.mubr.msk.f32.vlgmr.msra.gmra.mrb[24].mxu1 %vm403_vm1, %v2032_v55  ;;  %1566 = vmatmul.mubr.msk.f32.vlgmr.msra.gmra.mrb[12].mxu0 %vm403_vm1, %v2030_v54 }
 0x167   :  { %1484 = vmatprep.mubr.msk.f32.mxu1 %vm403_vm1, %v2042_v59  ;;  %1568 = vmatprep.mubr.msk.f32.mxu0 %vm403_vm1, %v2036_v58 }
 0x16a   :  { %1485 = vmatmul.mubr.msk.f32.gmra.mrb[26].mxu1 %vm403_vm1, %v2046_v61  ;;  %1569 = vmatmul.mubr.msk.f32.gmra.mrb[14].mxu0 %vm403_vm1, %v2044_v60 }
 0x16b   :  { %1487 = vmatprep.mubr.msk.f32.mxu1 %vm403_vm1, %v569_v63  ;;  %1571 = vmatprep.mubr.msk.f32.mxu0 %vm403_vm1, %v395_v62 }
 0x16e   :  { %1488 = vmatmul.mubr.msk.f32.gmra.mrb[28].mxu1 %vm403_vm1, %v570_v1  ;;  %1572 = vmatmul.mubr.msk.f32.gmra.mrb[16].mxu0 %vm403_vm1, %v396_v0 }
 0x16f   :  { %1490 = vmatprep.mubr.msk.f32.mxu1 %vm403_vm1, %v571_v3  ;;  %1574 = vmatprep.mubr.msk.f32.mxu0 %vm403_vm1, %v397_v2 }
 0x172   :  { %1491 = vmatmul.mubr.msk.f32.gmra.mrb[30].mxu1 %vm403_vm1, %v572_v5  ;;  %1575 = vmatmul.mubr.msk.f32.gmra.mrb[18].mxu0 %vm403_vm1, %v398_v4 }
 0x173   :  { %1493 = vmatprep.mubr.msk.f32.mxu1 %vm403_vm1, %v573_v7  ;;  %1577 = vmatprep.mubr.msk.f32.mxu0 %vm403_vm1, %v399_v6 }
 0x176   :  { %1494 = vmatmul.mubr.msk.f32.gmra.mrb[32].mxu1 %vm403_vm1, %v574_v9  ;;  %1578 = vmatmul.mubr.msk.f32.gmra.mrb[20].mxu0 %vm403_vm1, %v400_v8 }
 0x177   :  { %1496 = vmatprep.mubr.msk.f32.mxu1 %vm403_vm1, %v575_v11  ;;  %1580 = vmatprep.mubr.msk.f32.mxu0 %vm403_vm1, %v401_v10 }
 0x17a   :  { %1497 = vmatmul.mubr.msk.f32.gmra.mrb[34].mxu1 %vm403_vm1, %v576_v13  ;;  %1581 = vmatmul.mubr.msk.f32.gmra.mrb[22].mxu0 %vm403_vm1, %v402_v12 }
 0x221   :  { %v1441_v14 = vpop.f32.mrb[12].mxu1 }
 0x222   :  { %v506_v15 = vpop.f32.mrb[13].mxu1 }
 0x225   :  { %v1444_v16 = vpop.f32.mrb[14].mxu1 }
 0x226   :  { %v516_v17 = vpop.f32.mrb[15].mxu1 }
 0x229   :  { %v1447_v18 = vpop.f32.mrb[16].mxu1 }
 0x22a   :  { %v526_v19 = vpop.f32.mrb[17].mxu1 }
 0x22d   :  { %v1450_v20 = vpop.f32.mrb[18].mxu1 }
 0x22e   :  { %v536_v21 = vpop.f32.mrb[19].mxu1 }
 0x231   :  { %v2112_v22 = vpop.f32.mrb[20].mxu1 }
 0x232   :  { %v2114_v23 = vpop.f32.mrb[21].mxu1 }
 0x235   :  { %v2116_v24 = vpop.f32.mrb[22].mxu1 }
 0x236   :  { %v2118_v25 = vpop.f32.mrb[23].mxu1 }
 0x239   :  { %v1483_v26 = vpop.f32.mrb[24].mxu1  ;;  %v1567_v27 = vpop.f32.mrb[12].mxu0 }
 0x23a   :  { %v739_v28 = vsub.f32 %v1441_v14, %v1483_v26  ;;  %v679_v29 = vpop.f32.mrb[25].mxu1  ;;  %v941_v30 = vpop.f32.mrb[13].mxu0  ;;  %v1013_v33 = vmul.f32 %v1567_v27, %v1567_v27 }
 0x23b   :  { %v738_v31 = vsub.f32 %v506_v15, %v679_v29  ;;  %v1012_v35 = vmul.f32 %v941_v30, %v941_v30 }
 0x23c   :  { %v1001_v32 = vmul.f32 %v739_v28, %v739_v28 }
 0x23d   :  { %v1000_v34 = vmul.f32 %v738_v31, %v738_v31  ;;  %v1486_v36 = vpop.f32.mrb[26].mxu1  ;;  %v1570_v37 = vpop.f32.mrb[14].mxu0 }
 0x23e   :  { %v2120_v38 = vadd.f32 %v1013_v33, %v1001_v32  ;;  %v741_v39 = vsub.f32 %v1444_v16, %v1486_v36  ;;  %v689_v40 = vpop.f32.mrb[27].mxu1  ;;  %v951_v41 = vpop.f32.mrb[15].mxu0  ;;  %v1015_v44 = vmul.f32 %v1570_v37, %v1570_v37 }
 0x23f   :  { %v2122_v42 = vadd.f32 %v1012_v35, %v1000_v34  ;;  %v740_v43 = vsub.f32 %v516_v17, %v689_v40  ;;  %v1014_v49 = vmul.f32 %v951_v41, %v951_v41 }
 0x240   :  { %1706 = vrsqrt.f32 %v2120_v38  ;;  %v1003_v47 = vmul.f32 %v741_v39, %v741_v39  ;;  %vm1045_vm2 = vcmp.eq.f32.partialorder %v2120_v38, inf  ;;  %vm1047_vm3 = vcmp.eq.f32.partialorder %v2120_v38, 0.0 }
 0x241   :  { %1708 = vrsqrt.f32 %v2122_v42  ;;  %v1489_v45 = vpop.f32.mrb[28].mxu1  ;;  %v1573_v46 = vpop.f32.mrb[16].mxu0  ;;  %v1002_v48 = vmul.f32 %v740_v43, %v740_v43  ;;  %v1048_v3 = vand.u32 2147483648, %v2120_v38  ;;  %vm1038_vm4 = vcmp.eq.f32.partialorder %v2122_v42, inf }
 0x242   :  { %v743_v50 = vsub.f32 %v1447_v18, %v1489_v45  ;;  %v699_v51 = vpop.f32.mrb[29].mxu1  ;;  %v961_v52 = vpop.f32.mrb[17].mxu0  ;;  %v2126_v54 = vadd.f32 %v1015_v44, %v1003_v47  ;;  %v1017_v60 = vmul.f32 %v1573_v46, %v1573_v46  ;;  %vm1040_vm5 = vcmp.eq.f32.partialorder %v2122_v42, 0.0 }
 0x243   :  { %v742_v53 = vsub.f32 %v526_v19, %v699_v51  ;;  %v2128_v55 = vadd.f32 %v1014_v49, %v1002_v48  ;;  %v1016_v61 = vmul.f32 %v961_v52, %v961_v52  ;;  %v1041_v8 = vand.u32 2147483648, %v2122_v42 }
 0x244   :  { %v1005_v56 = vmul.f32 %v743_v50, %v743_v50  ;;  %1710 = vrsqrt.f32 %v2126_v54  ;;  %vm1059_vm6 = vcmp.eq.f32.partialorder %v2126_v54, inf  ;;  %vm1061_vm7 = vcmp.eq.f32.partialorder %v2126_v54, 0.0 }
 0x245   :  { %v1004_v57 = vmul.f32 %v742_v53, %v742_v53  ;;  %v1492_v58 = vpop.f32.mrb[30].mxu1  ;;  %v1576_v59 = vpop.f32.mrb[18].mxu0  ;;  %1712 = vrsqrt.f32 %v2128_v55  ;;  %v1062_v13 = vand.u32 2147483648, %v2126_v54  ;;  %vm1052_vm8 = vcmp.eq.f32.partialorder %v2128_v55, inf }
 0x246   :  { %v709_v62 = vpop.f32.mrb[31].mxu1  ;;  %v971_v63 = vpop.f32.mrb[19].mxu0  ;;  %v2133_v0 = vadd.f32 %v1017_v60, %v1005_v56  ;;  %v745_v2 = vsub.f32 %v1450_v20, %v1492_v58  ;;  %v1019_v14 = vmul.f32 %v1576_v59, %v1576_v59  ;;  %vm1054_vm9 = vcmp.eq.f32.partialorder %v2128_v55, 0.0 }
 0x247   :  { %v2135_v1 = vadd.f32 %v1016_v61, %v1004_v57  ;;  %v744_v4 = vsub.f32 %v536_v21, %v709_v62  ;;  %v1018_v18 = vmul.f32 %v971_v63, %v971_v63  ;;  %v1055_v37 = vand.u32 2147483648, %v2128_v55 }
 0x248   :  { %1714 = vrsqrt.f32 %v2133_v0  ;;  %v1007_v16 = vmul.f32 %v745_v2, %v745_v2  ;;  %vm1073_vm10 = vcmp.eq.f32.partialorder %v2133_v0, inf  ;;  %vm1075_vm11 = vcmp.eq.f32.partialorder %v2133_v0, 0.0 }
 0x249   :  { %v1495_v5 = vpop.f32.mrb[32].mxu1  ;;  %v1579_v6 = vpop.f32.mrb[20].mxu0  ;;  %1716 = vrsqrt.f32 %v2135_v1  ;;  %v1006_v17 = vmul.f32 %v744_v4, %v744_v4  ;;  %vm1066_vm12 = vcmp.eq.f32.partialorder %v2135_v1, inf  ;;  %vm1068_vm13 = vcmp.eq.f32.partialorder %v2135_v1, 0.0 }
 0x24a   :  { %v1707_v7 = vpop.eup %1706  ;;  %v719_v9 = vpop.f32.mrb[33].mxu1  ;;  %v747_v20 = vsub.f32 %v2112_v22, %v1495_v5  ;;  %v2160_v30 = vadd.f32 %v1019_v14, %v1007_v16  ;;  %v1021_v40 = vmul.f32 %v1579_v6, %v1579_v6  ;;  %v1069_v58 = vand.u32 2147483648, %v2135_v1 }
 0x24b   :  { %v981_v10 = vpop.f32.mrb[21].mxu0  ;;  %v1709_v11 = vpop.eup %1708  ;;  %v1044_v12 = vmul.f32 %v1707_v7, %v2120_v38  ;;  %v746_v21 = vsub.f32 %v2114_v23, %v719_v9  ;;  %v2162_v31 = vadd.f32 %v1018_v18, %v1006_v17 }
 0x24c   :  { %v1037_v15 = vmul.f32 %v1709_v11, %v2122_v42  ;;  %v1009_v23 = vmul.f32 %v747_v20, %v747_v20  ;;  %1718 = vrsqrt.f32 %v2160_v30  ;;  %v1020_v49 = vmul.f32 %v981_v10, %v981_v10 }
 0x24d   :  { %v1046_v19 = vsel %vm1045_vm2, %v2120_v38, %v1044_v12  ;;  %v1498_v26 = vpop.f32.mrb[34].mxu1  ;;  %v1582_v27 = vpop.f32.mrb[22].mxu0  ;;  %v1008_v45 = vmul.f32 %v746_v21, %v746_v21  ;;  %vm1087_vm14 = vcmp.eq.f32.partialorder %v2160_v30, inf  ;;  %vm1089_vm15 = vcmp.eq.f32.partialorder %v2160_v30, 0.0 }
 0x24e   :  { %v1049_v28 = vsel %vm1047_vm3, %v1048_v3, %v1046_v19  ;;  %v1039_v29 = vsel %vm1038_vm4, %v2122_v42, %v1037_v15  ;;  %v729_v32 = vpop.f32.mrb[35].mxu1  ;;  %v2164_v33 = vpop.f32.mrb[23].mxu0  ;;  %v1076_v42 = vand.u32 2147483648, %v2133_v0  ;;  %v2181_v44 = vadd.f32 %v1021_v40, %v1009_v23 }
 0x24f   :  { %v1121_v34 = vadd.f32 1.0, %v1049_v28  ;;  %v1042_v22 = vsel %vm1040_vm5, %v1041_v8, %v1039_v29  ;;  %v1711_v35 = vpop.eup %1710  ;;  %v749_v50 = vsub.f32 %v2116_v24, %v1498_v26  ;;  %v2199_v59 = vadd.f32 %v1020_v49, %v1008_v45 }
 0x250   :  { %v1120_v36 = vadd.f32 1.0, %v1042_v22  ;;  %v1713_v38 = vpop.eup %1712  ;;  %v1058_v39 = vmul.f32 %v1711_v35, %v2126_v54  ;;  %v1022_v15 = vmul.f32 %v2164_v33, %v2164_v33  ;;  %vm1080_vm1 = vcmp.eq.f32.partialorder %v2162_v31, inf }
 0x251   :  { %1720 = vlog2.f32 %v1121_v34  ;;  %v1051_v41 = vmul.f32 %v1713_v38, %v2128_v55  ;;  %v1011_v62 = vmul.f32 %v749_v50, %v749_v50  ;;  %vm1082_vm2 = vcmp.eq.f32.partialorder %v2162_v31, 0.0 }
 0x252   :  { %1722 = vlog2.f32 %v1120_v36  ;;  %v1060_v43 = vsel %vm1059_vm6, %v2126_v54, %v1058_v39  ;;  %v1715_v46 = vpop.eup %1714  ;;  %v1083_v18 = vand.u32 2147483648, %v2162_v31  ;;  %vm1101_vm3 = vcmp.eq.f32.partialorder %v2181_v44, inf }
 0x253   :  { %1724 = vrsqrt.f32 %v2162_v31  ;;  %v1063_v47 = vsel %vm1061_vm7, %v1062_v13, %v1060_v43  ;;  %v1053_v48 = vsel %vm1052_vm8, %v2128_v55, %v1051_v41  ;;  %v1717_v51 = vpop.eup %1716  ;;  %v1072_v56 = vmul.f32 %v1715_v46, %v2133_v0 }
 0x254   :  { %v1123_v52 = vadd.f32 1.0, %v1063_v47  ;;  %v1056_v53 = vsel %vm1054_vm9, %v1055_v37, %v1053_v48  ;;  %1726 = vrsqrt.f32 %v2181_v44  ;;  %v1065_v54 = vmul.f32 %v1717_v51, %v2135_v1 }
 0x255   :  { %v1122_v57 = vadd.f32 1.0, %v1056_v53  ;;  %v1074_v24 = vsel %vm1073_vm10, %v2133_v0, %v1072_v56  ;;  %v1023_v55 = vmul.f32 %v1582_v27, %v1582_v27  ;;  %v748_v0 = vsub.f32 %v2118_v25, %v729_v32 }
 0x256   :  { %1728 = vlog2.f32 %v1123_v52  ;;  %v1077_v60 = vsel %vm1075_vm11, %v1076_v42, %v1074_v24  ;;  %v1067_v61 = vsel %vm1066_vm12, %v2135_v1, %v1065_v54  ;;  %v1719_v3 = vpop.eup %1718  ;;  %v1090_v1 = vand.u32 2147483648, %v2160_v30 }
 0x257   :  { %1730 = vlog2.f32 %v1122_v57  ;;  %v1125_v63 = vadd.f32 1.0, %v1077_v60  ;;  %v1070_v2 = vsel %vm1068_vm13, %v1069_v58, %v1067_v61  ;;  %v2207_v5 = vadd.f32 %v1023_v55, %v1011_v62 }
 0x258   :  { %1732 = vrsqrt.f32 %v2199_v59  ;;  %v1124_v4 = vadd.f32 1.0, %v1070_v2  ;;  %v1086_v7 = vmul.f32 %v1719_v3, %v2160_v30  ;;  %v1010_v14 = vmul.f32 %v748_v0, %v748_v0 }
 0x259   :  { %1734 = vlog2.f32 %v1125_v63  ;;  %vm1103_vm4 = vcmp.eq.f32.partialorder %v2181_v44, 0.0  ;;  %v1104_v28 = vand.u32 2147483648, %v2181_v44  ;;  %vm1094_vm5 = vcmp.eq.f32.partialorder %v2199_v59, inf }
 0x25a   :  { %1736 = vlog2.f32 %v1124_v4  ;;  %v1088_v12 = vsel %vm1087_vm14, %v2160_v30, %v1086_v7  ;;  %v1034_v21 = vadd.f32 %v1022_v15, %v1010_v14  ;;  %v1097_v37 = vand.u32 2147483648, %v2199_v59 }
 0x25b   :  { %v1721_v6 = vpop.eup %1720  ;;  %1738 = vrsqrt.f32 %v2207_v5  ;;  %v1091_v25 = vsel %vm1089_vm15, %v1090_v1, %v1088_v12  ;;  %vm1096_vm6 = vcmp.eq.f32.partialorder %v2199_v59, 0.0  ;;  %vm1115_vm7 = vcmp.eq.f32.partialorder %v2207_v5, inf }
 0x25c   :  { %v1723_v8 = vpop.eup %1722  ;;  %v1135_v9 = vmul.f32 0.6931472, %v1721_v6  ;;  %v1127_v17 = vadd.f32 1.0, %v1091_v25  ;;  %v1118_v46 = vand.u32 2147483648, %v2207_v5  ;;  %vm1117_vm8 = vcmp.eq.f32.partialorder %v2207_v5, 0.0 }
 0x25d   :  { %v1725_v10 = vpop.eup %1724  ;;  %v1133_v11 = vmul.f32 0.6931472, %v1723_v8  ;;  %vm1108_vm9 = vcmp.eq.f32.partialorder %v1034_v21, inf  ;;  %v1111_v57 = vand.u32 2147483648, %v1034_v21  ;;  %vm1110_vm10 = vcmp.eq.f32.partialorder %v1034_v21, 0.0 }
 0x25e   :  { %1157 = vst.msk [vmem:[%s2291_s5 + $0x8] sm:$0xff] %vm102_vm0, %v1135_v9  ;;  %v1079_v13 = vmul.f32 %v1725_v10, %v2162_v31  ;;  %v1727_v16 = vpop.eup %1726  ;;  %1740 = vlog2.f32 %v1127_v17 }
 0x25f   :  { %1156 = vst.msk [vmem:[%s2291_s5] sm:$0xff] %vm102_vm0, %v1133_v11  ;;  %v1100_v20 = vmul.f32 %v1727_v16, %v2181_v44  ;;  %1742 = vrsqrt.f32 %v1034_v21 }
 0x260   :  { %v1081_v19 = vsel %vm1080_vm1, %v2162_v31, %v1079_v13  ;;  %v1729_v26 = vpop.eup %1728 }
 0x261   :  { %v1084_v27 = vsel %vm1082_vm2, %v1083_v18, %v1081_v19  ;;  %v1731_v29 = vpop.eup %1730  ;;  %v1139_v30 = vmul.f32 0.6931472, %v1729_v26  ;;  %v1102_v33 = vsel %vm1101_vm3, %v2181_v44, %v1100_v20 }
 0x262   :  { %v1126_v32 = vadd.f32 1.0, %v1084_v27  ;;  %v1733_v34 = vpop.eup %1732  ;;  %v1137_v31 = vmul.f32 0.6931472, %v1731_v29  ;;  %v1105_v22 = vsel %vm1103_vm4, %v1104_v28, %v1102_v33 }
 0x263   :  { %1159 = vst.msk [vmem:[%s2291_s5 + $0x18] sm:$0xff] %vm102_vm0, %v1139_v30  ;;  %v1129_v23 = vadd.f32 1.0, %v1105_v22  ;;  %v1093_v35 = vmul.f32 %v1733_v34, %v2199_v59  ;;  %v1735_v36 = vpop.eup %1734 }
 0x264   :  { %1744 = vlog2.f32 %v1126_v32  ;;  %1158 = vst.msk [vmem:[%s2291_s5 + $0x10] sm:$0xff] %vm102_vm0, %v1137_v31  ;;  %v1737_v38 = vpop.eup %1736  ;;  %v1143_v39 = vmul.f32 0.6931472, %v1735_v36 }
 0x265   :  { %1746 = vlog2.f32 %v1129_v23  ;;  %v1095_v40 = vsel %vm1094_vm5, %v2199_v59, %v1093_v35  ;;  %v1739_v41 = vpop.eup %1738  ;;  %v1141_v42 = vmul.f32 0.6931472, %v1737_v38 }
 0x266   :  { %v1098_v43 = vsel %vm1096_vm6, %v1097_v37, %v1095_v40  ;;  %1161 = vst.msk [vmem:[%s2291_s5 + $0x28] sm:$0xff] %vm102_vm0, %v1143_v39  ;;  %v1114_v45 = vmul.f32 %v1739_v41, %v2207_v5 }
 0x267   :  { %v1128_v44 = vadd.f32 1.0, %v1098_v43  ;;  %1160 = vst.msk [vmem:[%s2291_s5 + $0x20] sm:$0xff] %vm102_vm0, %v1141_v42 }
 0x268   :  { %v1116_v47 = vsel %vm1115_vm7, %v2207_v5, %v1114_v45  ;;  %v1741_v48 = vpop.eup %1740 }
 0x269   :  { %1748 = vlog2.f32 %v1128_v44  ;;  %v1119_v49 = vsel %vm1117_vm8, %v1118_v46, %v1116_v47  ;;  %v1743_v50 = vpop.eup %1742  ;;  %v1147_v51 = vmul.f32 0.6931472, %v1741_v48 }
 0x26a   :  { %v1131_v52 = vadd.f32 1.0, %v1119_v49  ;;  %v1107_v53 = vmul.f32 %v1743_v50, %v1034_v21 }
 0x26b   :  { %1163 = vst.msk [vmem:[%s2291_s5 + $0x38] sm:$0xff] %vm102_vm0, %v1147_v51 }
 0x26c   :  { %1750 = vlog2.f32 %v1131_v52  ;;  %v1109_v58 = vsel %vm1108_vm9, %v1034_v21, %v1107_v53 }
 0x26d   :  { %v1112_v59 = vsel %vm1110_vm10, %v1111_v57, %v1109_v58 }
 0x26e   :  { %v1745_v56 = vpop.eup %1744  ;;  %v1130_v60 = vadd.f32 1.0, %v1112_v59 }
 0x26f   :  { %v1145_v54 = vmul.f32 0.6931472, %v1745_v56  ;;  %v1747_v24 = vpop.eup %1746 }
 0x270   :  { %v1151_v55 = vmul.f32 0.6931472, %v1747_v24  ;;  %1752 = vlog2.f32 %v1130_v60 }
 0x271   :  { %1162 = vst.msk [vmem:[%s2291_s5 + $0x30] sm:$0xff] %vm102_vm0, %v1145_v54 }
 0x272   :  { %1165 = vst.msk [vmem:[%s2291_s5 + $0x48] sm:$0xff] %vm102_vm0, %v1151_v55 }
 0x273   :  { %v1749_v61 = vpop.eup %1748 }
 0x274   :  { %v1149_v62 = vmul.f32 0.6931472, %v1749_v61 }
 0x276   :  { %1164 = vst.msk [vmem:[%s2291_s5 + $0x40] sm:$0xff] %vm102_vm0, %v1149_v62  ;;  %v1751_v63 = vpop.eup %1750 }
 0x277   :  { %v1155_v2 = vmul.f32 0.6931472, %v1751_v63 }
 0x279   :  { %1167 = vst.msk [vmem:[%s2291_s5 + $0x58] sm:$0xff] %vm102_vm0, %v1155_v2 }
 0x27a   :  { %v1753_v3 = vpop.eup %1752 }
 0x27b   :  { %v1153_v4 = vmul.f32 0.6931472, %v1753_v3 }
 0x27d   :  { %1166 = vst.msk [vmem:[%s2291_s5 + $0x50] sm:$0xff] %vm102_vm0, %v1153_v4 }
 0x27e   :  { %1172 = vsyncpa [#allocation3], 1 }
 0x27f   :  { %1173 = vsyncpa [#allocation5], 1 }
 0x280   :  { %1174 = vsyncpa [#allocation8], 1 }

// kernel: xxmodel_forward.7
= control target key start
LH: loop header
LB: loop body
LE: loop exit
PB: predicated region body
PF: predicated region fallthrough
CT: control target
= control target key end

     0   :  { %vm729_vm0 = vcmask 1024   ;;  %s2013_s1 = inlined_call_operand.vmem [shape: f32[256,512], index: 1, kind: input, shape index: {}]   ;;  %s2014_s0 = inlined_call_operand.vmem [shape: f32[2,256], index: 0, kind: input, shape index: {}]   ;;  %s2015_s3 = inlined_call_operand.vmem [shape: f32[512,256], index: 3, kind: input, shape index: {}]   ;;  %s2016_s5 = inlined_call_operand.vmem [shape: f32[256,1], index: 5, kind: input, shape index: {}]   ;;  %s2017_s2 = inlined_call_operand.vmem [shape: f32[1,512], index: 2, kind: input, shape index: {}]   ;;  %s2018_s4 = inlined_call_operand.vmem [shape: f32[1,256], index: 4, kind: input, shape index: {}]   ;;  %s2019_s6 = inlined_call_operand.<no memory space> [shape: f32[1,1], index: 6, kind: input, shape index: {}]   ;;  %s2020_s7 = inlined_call_operand.vmem [shape: f32[2,1], index: 7, kind: output, shape index: {}]  }
   0x1   :  { %v30_v0 = vld [vmem:[%s2013_s1 + $0x8] sm:$0xff]  ;;  %v29_v2 = vld [vmem:[%s2013_s1] sm:$0xff] }
   0x2   :  { %v34_v1 = vld [vmem:[%s2013_s1 + $0x28] sm:$0xff]  ;;  %v33_v4 = vld [vmem:[%s2013_s1 + $0x20] sm:$0xff] }
   0x3   :  { %v772_v3 = vpack.c.bf16 %v34_v1, %v30_v0  ;;  %v38_v5 = vld [vmem:[%s2013_s1 + $0x48] sm:$0xff]  ;;  %v774_v7 = vpack.c.bf16 %v33_v4, %v29_v2  ;;  %v37_v9 = vld [vmem:[%s2013_s1 + $0x40] sm:$0xff] }
   0x4   :  { %v42_v6 = vld [vmem:[%s2013_s1 + $0x68] sm:$0xff]  ;;  %v41_v10 = vld [vmem:[%s2013_s1 + $0x60] sm:$0xff] }
   0x5   :  { %v776_v8 = vpack.c.bf16 %v42_v6, %v38_v5  ;;  %v46_v11 = vld [vmem:[%s2013_s1 + $0x88] sm:$0xff]  ;;  %773 = vmatprep.subr.bf16.mxu1 %v772_v3  ;;  %v778_v13 = vpack.c.bf16 %v41_v10, %v37_v9  ;;  %v45_v15 = vld [vmem:[%s2013_s1 + $0x80] sm:$0xff] }
   0x6   :  { %v50_v12 = vld [vmem:[%s2013_s1 + $0xa8] sm:$0xff]  ;;  %775 = vmatpush1.bf16.msra.mxu1 %v774_v7  ;;  %v49_v16 = vld [vmem:[%s2013_s1 + $0xa0] sm:$0xff] }
   0x7   :  { %777 = vmatprep.subr.bf16.mxu1 %v776_v8  ;;  %v780_v14 = vpack.c.bf16 %v50_v12, %v46_v11  ;;  %v54_v17 = vld [vmem:[%s2013_s1 + $0xc8] sm:$0xff]  ;;  %v782_v19 = vpack.c.bf16 %v49_v16, %v45_v15  ;;  %v53_v21 = vld [vmem:[%s2013_s1 + $0xc0] sm:$0xff] }
   0x8   :  { %v58_v18 = vld [vmem:[%s2013_s1 + $0xe8] sm:$0xff]  ;;  %v57_v22 = vld [vmem:[%s2013_s1 + $0xe0] sm:$0xff] }
   0x9   :  { %v784_v20 = vpack.c.bf16 %v58_v18, %v54_v17  ;;  %v62_v23 = vld [vmem:[%s2013_s1 + $0x108] sm:$0xff]  ;;  %v786_v25 = vpack.c.bf16 %v57_v22, %v53_v21  ;;  %v61_v27 = vld [vmem:[%s2013_s1 + $0x100] sm:$0xff]  ;;  %v338_v18 = vld [vmem:[%s2015_s3 + $0x10] sm:$0xff] }
   0xa   :  { %779 = vmatpush1.bf16.msra.mxu1 %v778_v13  ;;  %v66_v24 = vld [vmem:[%s2013_s1 + $0x128] sm:$0xff]  ;;  %v65_v28 = vld [vmem:[%s2013_s1 + $0x120] sm:$0xff] }
   0xb   :  { %781 = vmatprep.subr.bf16.mxu1 %v780_v14  ;;  %v788_v26 = vpack.c.bf16 %v66_v24, %v62_v23  ;;  %v70_v29 = vld [vmem:[%s2013_s1 + $0x148] sm:$0xff]  ;;  %v790_v31 = vpack.c.bf16 %v65_v28, %v61_v27  ;;  %v69_v33 = vld [vmem:[%s2013_s1 + $0x140] sm:$0xff]  ;;  %v339_v14 = vld [vmem:[%s2015_s3 + $0x18] sm:$0xff] }
   0xc   :  { %v74_v30 = vld [vmem:[%s2013_s1 + $0x168] sm:$0xff]  ;;  %v73_v34 = vld [vmem:[%s2013_s1 + $0x160] sm:$0xff] }
   0xd   :  { %v792_v32 = vpack.c.bf16 %v74_v30, %v70_v29  ;;  %v78_v35 = vld [vmem:[%s2013_s1 + $0x188] sm:$0xff]  ;;  %v794_v37 = vpack.c.bf16 %v73_v34, %v69_v33  ;;  %v77_v39 = vld [vmem:[%s2013_s1 + $0x180] sm:$0xff]  ;;  %v347_v29 = vld [vmem:[%s2015_s3 + $0x58] sm:$0xff] }
   0xe   :  { %783 = vmatpush1.bf16.msra.mxu1 %v782_v19  ;;  %v82_v36 = vld [vmem:[%s2013_s1 + $0x1a8] sm:$0xff]  ;;  %v81_v40 = vld [vmem:[%s2013_s1 + $0x1a0] sm:$0xff] }
   0xf   :  { %785 = vmatprep.subr.bf16.mxu1 %v784_v20  ;;  %v796_v38 = vpack.c.bf16 %v82_v36, %v78_v35  ;;  %v1191_v41 = vld.sshfl [vmem:[%s2014_s0] sm:$0x33 pattern:$0x76325410]  ;;  %v86_v42 = vld [vmem:[%s2013_s1 + $0x1c8] sm:$0xff]  ;;  %v798_v45 = vpack.c.bf16 %v81_v40, %v77_v39  ;;  %v343_v20 = vld [vmem:[%s2015_s3 + $0x38] sm:$0xff] }
  0x10   :  { %v90_v43 = vld [vmem:[%s2013_s1 + $0x1e8] sm:$0xff]  ;;  %v1201_v44 = vcombine.high %v1191_v41, %v1191_v41  ;;  %v85_v47 = vld [vmem:[%s2013_s1 + $0x1c0] sm:$0xff]  ;;  %v346_v35 = vld [vmem:[%s2015_s3 + $0x50] sm:$0xff] }
  0x11   :  { %v800_v46 = vpack.c.bf16 %v90_v43, %v86_v42  ;;  %v89_v48 = vld [vmem:[%s2013_s1 + $0x1e0] sm:$0xff]  ;;  %v94_v49 = vld [vmem:[%s2013_s1 + $0x208] sm:$0xff]  ;;  %v351_v39 = vld [vmem:[%s2015_s3 + $0x78] sm:$0xff] }
  0x12   :  { %787 = vmatpush1.bf16.msra.mxu1 %v786_v25  ;;  %254 = vmatprep.mubr.f32.mxu1 %v1201_v44  ;;  %v98_v50 = vld [vmem:[%s2013_s1 + $0x228] sm:$0xff]  ;;  %v802_v51 = vpack.c.bf16 %v89_v48, %v85_v47  ;;  %v93_v53 = vld [vmem:[%s2013_s1 + $0x200] sm:$0xff]  ;;  %v342_v25 = vld [vmem:[%s2015_s3 + $0x30] sm:$0xff] }
  0x13   :  { %789 = vmatprep.subr.bf16.mxu1 %v788_v26  ;;  %v804_v52 = vpack.c.bf16 %v98_v50, %v94_v49  ;;  %v97_v54 = vld [vmem:[%s2013_s1 + $0x220] sm:$0xff]  ;;  %v102_v55 = vld [vmem:[%s2013_s1 + $0x248] sm:$0xff]  ;;  %v350_v49 = vld [vmem:[%s2015_s3 + $0x70] sm:$0xff] }
  0x14   :  { %v106_v56 = vld [vmem:[%s2013_s1 + $0x268] sm:$0xff]  ;;  %v806_v57 = vpack.c.bf16 %v97_v54, %v93_v53  ;;  %v101_v59 = vld [vmem:[%s2013_s1 + $0x240] sm:$0xff]  ;;  %v355_v53 = vld [vmem:[%s2015_s3 + $0x98] sm:$0xff] }
  0x15   :  { %v808_v58 = vpack.c.bf16 %v106_v56, %v102_v55  ;;  %v105_v60 = vld [vmem:[%s2013_s1 + $0x260] sm:$0xff]  ;;  %v110_v61 = vld [vmem:[%s2013_s1 + $0x288] sm:$0xff] }
  0x16   :  { %791 = vmatpush1.bf16.msra.mxu1 %v790_v31  ;;  %v114_v62 = vld [vmem:[%s2013_s1 + $0x2a8] sm:$0xff]  ;;  %v810_v63 = vpack.c.bf16 %v105_v60, %v101_v59  ;;  %v109_v1 = vld [vmem:[%s2013_s1 + $0x280] sm:$0xff] }
  0x17   :  { %793 = vmatprep.subr.bf16.mxu1 %v792_v32  ;;  %v812_v0 = vpack.c.bf16 %v114_v62, %v110_v61  ;;  %v113_v2 = vld [vmem:[%s2013_s1 + $0x2a0] sm:$0xff]  ;;  %v118_v3 = vld [vmem:[%s2013_s1 + $0x2c8] sm:$0xff]  ;;  %v354_v61 = vld [vmem:[%s2015_s3 + $0x90] sm:$0xff] }
  0x18   :  { %v122_v4 = vld [vmem:[%s2013_s1 + $0x2e8] sm:$0xff]  ;;  %v814_v5 = vpack.c.bf16 %v113_v2, %v109_v1  ;;  %v117_v7 = vld [vmem:[%s2013_s1 + $0x2c0] sm:$0xff]  ;;  %v359_v1 = vld [vmem:[%s2015_s3 + $0xb8] sm:$0xff] }
  0x19   :  { %v816_v6 = vpack.c.bf16 %v122_v4, %v118_v3  ;;  %v121_v8 = vld [vmem:[%s2013_s1 + $0x2e0] sm:$0xff]  ;;  %v126_v9 = vld [vmem:[%s2013_s1 + $0x308] sm:$0xff]  ;;  %v32_v2 = vld [vmem:[%s2013_s1 + $0x18] sm:$0xff] }
  0x1a   :  { %795 = vmatpush1.bf16.msra.mxu1 %v794_v37  ;;  %v130_v10 = vld [vmem:[%s2013_s1 + $0x328] sm:$0xff]  ;;  %v125_v11 = vld [vmem:[%s2013_s1 + $0x300] sm:$0xff]  ;;  %v818_v16 = vpack.c.bf16 %v121_v8, %v117_v7  ;;  %v36_v3 = vld [vmem:[%s2013_s1 + $0x38] sm:$0xff] }
  0x1b   :  { %797 = vmatprep.subr.bf16.mxu1 %v796_v38  ;;  %v129_v12 = vld [vmem:[%s2013_s1 + $0x320] sm:$0xff]  ;;  %v337_v13 = vld [vmem:[%s2015_s3 + $0x8] sm:$0xff]  ;;  %v820_v21 = vpack.c.bf16 %v130_v10, %v126_v9  ;;  %v358_v8 = vld [vmem:[%s2015_s3 + $0xb0] sm:$0xff]  ;;  %v836_v9 = vpack.c.bf16 %v36_v3, %v32_v2 }
  0x1c   :  { %v336_v15 = vld [vmem:[%s2015_s3] sm:$0xff]  ;;  %v900_v17 = vpack.c.bf16 %v339_v14, %v337_v13  ;;  %v341_v19 = vld [vmem:[%s2015_s3 + $0x28] sm:$0xff]  ;;  %v822_v31 = vpack.c.bf16 %v129_v12, %v125_v11  ;;  %v31_v10 = vld [vmem:[%s2013_s1 + $0x10] sm:$0xff] }
  0x1d   :  { %v902_v22 = vpack.c.bf16 %v338_v18, %v336_v15  ;;  %v904_v23 = vpack.c.bf16 %v343_v20, %v341_v19  ;;  %v340_v24 = vld [vmem:[%s2015_s3 + $0x20] sm:$0xff]  ;;  %v345_v26 = vld [vmem:[%s2015_s3 + $0x48] sm:$0xff]  ;;  %v35_v11 = vld [vmem:[%s2013_s1 + $0x30] sm:$0xff] }
  0x1e   :  { %799 = vmatpush1.bf16.msra.mxu1 %v798_v45  ;;  %v134_v27 = vld [vmem:[%s2013_s1 + $0x348] sm:$0xff]  ;;  %901 = vmatprep.subr.bf16.mxu0 %v900_v17  ;;  %v906_v30 = vpack.c.bf16 %v342_v25, %v340_v24  ;;  %v133_v32 = vld [vmem:[%s2013_s1 + $0x340] sm:$0xff]  ;;  %v908_v33 = vpack.c.bf16 %v347_v29, %v345_v26  ;;  %v40_v12 = vld [vmem:[%s2013_s1 + $0x58] sm:$0xff]  ;;  %v838_v17 = vpack.c.bf16 %v35_v11, %v31_v10 }
  0x1f   :  { %801 = vmatprep.subr.bf16.mxu1 %v800_v46  ;;  %v138_v28 = vld [vmem:[%s2013_s1 + $0x368] sm:$0xff]  ;;  %903 = vmatpush1.bf16.msra.mxu0 %v902_v22  ;;  %v344_v34 = vld [vmem:[%s2015_s3 + $0x40] sm:$0xff]  ;;  %v44_v13 = vld [vmem:[%s2013_s1 + $0x78] sm:$0xff] }
  0x20   :  { %905 = vmatprep.subr.bf16.mxu0 %v904_v23  ;;  %v824_v36 = vpack.c.bf16 %v138_v28, %v134_v27  ;;  %v137_v37 = vld [vmem:[%s2013_s1 + $0x360] sm:$0xff]  ;;  %v349_v38 = vld [vmem:[%s2015_s3 + $0x68] sm:$0xff]  ;;  %v910_v43 = vpack.c.bf16 %v346_v35, %v344_v34  ;;  %v363_v15 = vld [vmem:[%s2015_s3 + $0xd8] sm:$0xff] }
  0x21   :  { %v142_v40 = vld [vmem:[%s2013_s1 + $0x388] sm:$0xff]  ;;  %v826_v45 = vpack.c.bf16 %v137_v37, %v133_v32  ;;  %v141_v46 = vld [vmem:[%s2013_s1 + $0x380] sm:$0xff]  ;;  %v912_v47 = vpack.c.bf16 %v351_v39, %v349_v38  ;;  %v39_v18 = vld [vmem:[%s2013_s1 + $0x50] sm:$0xff] }
  0x22   :  { %803 = vmatpush1.bf16.msra.mxu1 %v802_v51  ;;  %v146_v42 = vld [vmem:[%s2013_s1 + $0x3a8] sm:$0xff]  ;;  %v348_v48 = vld [vmem:[%s2015_s3 + $0x60] sm:$0xff]  ;;  %v362_v20 = vld [vmem:[%s2015_s3 + $0xd0] sm:$0xff] }
  0x23   :  { %805 = vmatprep.subr.bf16.mxu1 %v804_v52  ;;  %907 = vmatpush1.bf16.msra.mxu0 %v906_v30  ;;  %v828_v50 = vpack.c.bf16 %v146_v42, %v142_v40  ;;  %v145_v51 = vld [vmem:[%s2013_s1 + $0x3a0] sm:$0xff]  ;;  %v353_v52 = vld [vmem:[%s2015_s3 + $0x88] sm:$0xff]  ;;  %v914_v56 = vpack.c.bf16 %v350_v49, %v348_v48  ;;  %v43_v22 = vld [vmem:[%s2013_s1 + $0x70] sm:$0xff] }
  0x24   :  { %909 = vmatprep.subr.bf16.mxu0 %v908_v33  ;;  %v150_v54 = vld [vmem:[%s2013_s1 + $0x3c8] sm:$0xff]  ;;  %v916_v59 = vpack.c.bf16 %v355_v53, %v353_v52  ;;  %v352_v60 = vld [vmem:[%s2015_s3 + $0x80] sm:$0xff]  ;;  %v367_v25 = vld [vmem:[%s2015_s3 + $0xf8] sm:$0xff]  ;;  %v842_v29 = vpack.c.bf16 %v43_v22, %v39_v18 }
  0x25   :  { %v154_v55 = vld [vmem:[%s2013_s1 + $0x3e8] sm:$0xff]  ;;  %v918_v4 = vpack.c.bf16 %v354_v61, %v352_v60  ;;  %v356_v7 = vld [vmem:[%s2015_s3 + $0xa0] sm:$0xff]  ;;  %v48_v26 = vld [vmem:[%s2013_s1 + $0x98] sm:$0xff] }
  0x26   :  { %807 = vmatpush1.bf16.msra.mxu1 %v806_v57  ;;  %v830_v57 = vpack.c.bf16 %v145_v51, %v141_v46  ;;  %v832_v62 = vpack.c.bf16 %v154_v55, %v150_v54  ;;  %v361_v14 = vld [vmem:[%s2015_s3 + $0xc8] sm:$0xff]  ;;  %v360_v19 = vld [vmem:[%s2015_s3 + $0xc0] sm:$0xff]  ;;  %v52_v27 = vld [vmem:[%s2013_s1 + $0xb8] sm:$0xff] }
  0x27   :  { %809 = vmatprep.subr.bf16.mxu1 %v808_v58  ;;  %911 = vmatpush1.bf16.msra.mxu0 %v910_v43  ;;  %v149_v58 = vld [vmem:[%s2013_s1 + $0x3c0] sm:$0xff]  ;;  %v924_v23 = vpack.c.bf16 %v363_v15, %v361_v14  ;;  %v365_v24 = vld [vmem:[%s2015_s3 + $0xe8] sm:$0xff]  ;;  %v926_v28 = vpack.c.bf16 %v362_v20, %v360_v19  ;;  %v47_v30 = vld [vmem:[%s2013_s1 + $0x90] sm:$0xff]  ;;  %v844_v34 = vpack.c.bf16 %v52_v27, %v48_v26 }
  0x28   :  { %913 = vmatprep.subr.bf16.mxu0 %v912_v47  ;;  %v364_v32 = vld [vmem:[%s2015_s3 + $0xe0] sm:$0xff]  ;;  %v366_v33 = vld [vmem:[%s2015_s3 + $0xf0] sm:$0xff]  ;;  %v56_v37 = vld [vmem:[%s2013_s1 + $0xd8] sm:$0xff] }
  0x29   :  { %v51_v35 = vld [vmem:[%s2013_s1 + $0xb0] sm:$0xff]  ;;  %v60_v38 = vld [vmem:[%s2013_s1 + $0xf8] sm:$0xff]  ;;  %v930_v39 = vpack.c.bf16 %v366_v33, %v364_v32  ;;  %v373_v49 = vld [vmem:[%s2015_s3 + $0x128] sm:$0xff] }
  0x2a   :  { %811 = vmatpush1.bf16.msra.mxu1 %v810_v63  ;;  %v153_v63 = vld [vmem:[%s2013_s1 + $0x3e0] sm:$0xff]  ;;  %v846_v40 = vpack.c.bf16 %v51_v35, %v47_v30  ;;  %v55_v42 = vld [vmem:[%s2013_s1 + $0xd0] sm:$0xff]  ;;  %v848_v47 = vpack.c.bf16 %v60_v38, %v56_v37  ;;  %v64_v51 = vld [vmem:[%s2013_s1 + $0x118] sm:$0xff] }
  0x2b   :  { %813 = vmatprep.subr.bf16.mxu1 %v812_v0  ;;  %v357_v0 = vld [vmem:[%s2015_s3 + $0xa8] sm:$0xff]  ;;  %915 = vmatpush1.bf16.msra.mxu0 %v914_v56  ;;  %v370_v46 = vld [vmem:[%s2015_s3 + $0x110] sm:$0xff]  ;;  %v68_v52 = vld [vmem:[%s2013_s1 + $0x138] sm:$0xff] }
  0x2c   :  { %917 = vmatprep.subr.bf16.mxu0 %v916_v59  ;;  %v59_v48 = vld [vmem:[%s2013_s1 + $0xf0] sm:$0xff]  ;;  %v852_v59 = vpack.c.bf16 %v68_v52, %v64_v51  ;;  %v377_v61 = vld [vmem:[%s2015_s3 + $0x148] sm:$0xff]  ;;  %v383_v10 = vld [vmem:[%s2015_s3 + $0x178] sm:$0xff] }
  0x2d   :  { %v850_v54 = vpack.c.bf16 %v59_v48, %v55_v42  ;;  %v63_v55 = vld [vmem:[%s2013_s1 + $0x110] sm:$0xff]  ;;  %v80_v11 = vld [vmem:[%s2013_s1 + $0x198] sm:$0xff]  ;;  %v389_v33 = vld [vmem:[%s2015_s3 + $0x1a8] sm:$0xff] }
  0x2e   :  { %815 = vmatpush1.bf16.msra.mxu1 %v814_v5  ;;  %v834_v5 = vpack.c.bf16 %v153_v63, %v149_v58  ;;  %v374_v58 = vld [vmem:[%s2015_s3 + $0x130] sm:$0xff]  ;;  %v72_v63 = vld [vmem:[%s2013_s1 + $0x158] sm:$0xff] }
  0x2f   :  { %817 = vmatprep.subr.bf16.mxu1 %v816_v6  ;;  %v920_v6 = vpack.c.bf16 %v359_v1, %v357_v0  ;;  %919 = vmatpush1.bf16.msra.mxu0 %v918_v4  ;;  %v67_v60 = vld [vmem:[%s2013_s1 + $0x130] sm:$0xff]  ;;  %v76_v0 = vld [vmem:[%s2013_s1 + $0x178] sm:$0xff] }
  0x30   :  { %v854_v2 = vpack.c.bf16 %v67_v60, %v63_v55  ;;  %v71_v3 = vld [vmem:[%s2013_s1 + $0x150] sm:$0xff]  ;;  %v387_v22 = vld [vmem:[%s2015_s3 + $0x198] sm:$0xff] }
  0x31   :  { %921 = vmatprep.subr.bf16.mxu0 %v920_v6  ;;  %v378_v6 = vld [vmem:[%s2015_s3 + $0x150] sm:$0xff]  ;;  %v96_v35 = vld [vmem:[%s2013_s1 + $0x218] sm:$0xff] }
  0x32   :  { %819 = vmatpush1.bf16.msra.mxu1 %v818_v16  ;;  %v922_v16 = vpack.c.bf16 %v358_v8, %v356_v7  ;;  %v856_v7 = vpack.c.bf16 %v76_v0, %v72_v63  ;;  %v75_v8 = vld [vmem:[%s2013_s1 + $0x170] sm:$0xff]  ;;  %v104_v48 = vld [vmem:[%s2013_s1 + $0x258] sm:$0xff] }
  0x33   :  { %821 = vmatprep.subr.bf16.mxu1 %v820_v21  ;;  %v840_v21 = vpack.c.bf16 %v44_v13, %v40_v12  ;;  %v84_v12 = vld [vmem:[%s2013_s1 + $0x1b8] sm:$0xff]  ;;  %v858_v14 = vpack.c.bf16 %v75_v8, %v71_v3  ;;  %v79_v15 = vld [vmem:[%s2013_s1 + $0x190] sm:$0xff] }
  0x34   :  { %923 = vmatpush1.bf16.msra.mxu0 %v922_v16  ;;  %v382_v18 = vld [vmem:[%s2015_s3 + $0x170] sm:$0xff]  ;;  %v860_v19 = vpack.c.bf16 %v84_v12, %v80_v11  ;;  %v124_v63 = vld [vmem:[%s2013_s1 + $0x2f8] sm:$0xff] }
  0x35   :  { %925 = vmatprep.subr.bf16.mxu0 %v924_v23  ;;  %v83_v20 = vld [vmem:[%s2013_s1 + $0x1b0] sm:$0xff]  ;;  %v88_v23 = vld [vmem:[%s2013_s1 + $0x1d8] sm:$0xff] }
  0x36   :  { %823 = vmatpush1.bf16.msra.mxu1 %v822_v31  ;;  %v928_v31 = vpack.c.bf16 %v367_v25, %v365_v24  ;;  %v92_v24 = vld [vmem:[%s2013_s1 + $0x1f8] sm:$0xff]  ;;  %v862_v26 = vpack.c.bf16 %v83_v20, %v79_v15  ;;  %v87_v27 = vld [vmem:[%s2013_s1 + $0x1d0] sm:$0xff] }
  0x37   :  { %825 = vmatprep.subr.bf16.mxu1 %v824_v36  ;;  %v371_v36 = vld [vmem:[%s2015_s3 + $0x118] sm:$0xff]  ;;  %v386_v30 = vld [vmem:[%s2015_s3 + $0x190] sm:$0xff] }
  0x38   :  { %927 = vmatpush1.bf16.msra.mxu0 %v926_v28  ;;  %v91_v32 = vld [vmem:[%s2013_s1 + $0x1f0] sm:$0xff]  ;;  %v140_v11 = vld [vmem:[%s2013_s1 + $0x378] sm:$0xff] }
  0x39   :  { %929 = vmatprep.subr.bf16.mxu0 %v928_v31  ;;  %v864_v31 = vpack.c.bf16 %v92_v24, %v88_v23  ;;  %v866_v37 = vpack.c.bf16 %v91_v32, %v87_v27  ;;  %v95_v38 = vld [vmem:[%s2013_s1 + $0x210] sm:$0xff]  ;;  %v156_v23 = vld [vmem:[%s2013_s1 + $0x3f8] sm:$0xff]  ;;  %v397_v32 = vld [vmem:[%s2015_s3 + $0x1e8] sm:$0xff] }
  0x3a   :  { %827 = vmatpush1.bf16.msra.mxu1 %v826_v45  ;;  %v368_v45 = vld [vmem:[%s2015_s3 + $0x100] sm:$0xff]  ;;  %v390_v42 = vld [vmem:[%s2015_s3 + $0x1b0] sm:$0xff] }
  0x3b   :  { %829 = vmatprep.subr.bf16.mxu1 %v828_v50  ;;  %v375_v50 = vld [vmem:[%s2015_s3 + $0x138] sm:$0xff]  ;;  %v934_v53 = vpack.c.bf16 %v370_v46, %v368_v45  ;;  %v99_v45 = vld [vmem:[%s2013_s1 + $0x230] sm:$0xff]  ;;  %v393_v46 = vld [vmem:[%s2015_s3 + $0x1c8] sm:$0xff] }
  0x3c   :  { %931 = vmatpush1.bf16.msra.mxu0 %v930_v39  ;;  %v936_v56 = vpack.c.bf16 %v375_v50, %v373_v49  ;;  %v108_v49 = vld [vmem:[%s2013_s1 + $0x278] sm:$0xff]  ;;  %v870_v51 = vpack.c.bf16 %v99_v45, %v95_v38  ;;  %v107_v55 = vld [vmem:[%s2013_s1 + $0x270] sm:$0xff]  ;;  %v621_v45 = vld [vmem:[%s2016_s5 + $0x8] sm:$0xff] }
  0x3d   :  { %v111_v60 = vld [vmem:[%s2013_s1 + $0x290] sm:$0xff] }
  0x3e   :  { %831 = vmatpush1.bf16.msra.mxu1 %v830_v57  ;;  %v372_v57 = vld [vmem:[%s2015_s3 + $0x120] sm:$0xff]  ;;  %v123_v3 = vld [vmem:[%s2013_s1 + $0x2f0] sm:$0xff] }
  0x3f   :  { %833 = vmatprep.subr.bf16.mxu1 %v832_v62  ;;  %v379_v62 = vld [vmem:[%s2015_s3 + $0x158] sm:$0xff]  ;;  %v938_v1 = vpack.c.bf16 %v374_v58, %v372_v57  ;;  %v127_v8 = vld [vmem:[%s2013_s1 + $0x310] sm:$0xff] }
  0x40   :  { %v940_v4 = vpack.c.bf16 %v379_v62, %v377_v61  ;;  %v116_v57 = vld [vmem:[%s2013_s1 + $0x2b8] sm:$0xff]  ;;  %v115_v61 = vld [vmem:[%s2013_s1 + $0x2b0] sm:$0xff] }
  0x41   :  { %v120_v62 = vld [vmem:[%s2013_s1 + $0x2d8] sm:$0xff]  ;;  %v878_v0 = vpack.c.bf16 %v115_v61, %v111_v60  ;;  %v139_v15 = vld [vmem:[%s2013_s1 + $0x370] sm:$0xff] }
  0x42   :  { %835 = vmatpush1.bf16.msra.mxu1 %v834_v5  ;;  %v376_v5 = vld [vmem:[%s2015_s3 + $0x140] sm:$0xff]  ;;  %v143_v20 = vld [vmem:[%s2013_s1 + $0x390] sm:$0xff] }
  0x43   :  { %837 = vmatprep.subr.bf16.mxu1 %v836_v9  ;;  %v381_v9 = vld [vmem:[%s2015_s3 + $0x168] sm:$0xff]  ;;  %v942_v13 = vpack.c.bf16 %v378_v6, %v376_v5  ;;  %v132_v5 = vld [vmem:[%s2013_s1 + $0x338] sm:$0xff]  ;;  %v155_v27 = vld [vmem:[%s2013_s1 + $0x3f0] sm:$0xff] }
  0x44   :  { %v944_v16 = vpack.c.bf16 %v383_v10, %v381_v9  ;;  %v131_v9 = vld [vmem:[%s2013_s1 + $0x330] sm:$0xff]  ;;  %v136_v10 = vld [vmem:[%s2013_s1 + $0x358] sm:$0xff] }
  0x45   :  { %255 = vmatmul.mubr.f32.vlgmr.msra.gmra.mrb[0].mxu1 %v1191_v41  ;;  %v886_v12 = vpack.c.bf16 %v131_v9, %v127_v8 }
  0x46   :  { %839 = vmatpush1.bf16.msra.mxu1 %v838_v17  ;;  %325 = vmatprep.mubr.f32.mxu1 %v1201_v44  ;;  %v369_v44 = vld [vmem:[%s2015_s3 + $0x108] sm:$0xff]  ;;  %v380_v17 = vld [vmem:[%s2015_s3 + $0x160] sm:$0xff] }
  0x47   :  { %841 = vmatprep.subr.bf16.mxu1 %v840_v21  ;;  %v932_v43 = vpack.c.bf16 %v371_v36, %v369_v44  ;;  %v385_v21 = vld [vmem:[%s2015_s3 + $0x188] sm:$0xff]  ;;  %v946_v25 = vpack.c.bf16 %v382_v18, %v380_v17  ;;  %v100_v44 = vld [vmem:[%s2013_s1 + $0x238] sm:$0xff] }
  0x48   :  { %v948_v28 = vpack.c.bf16 %v387_v22, %v385_v21  ;;  %v148_v17 = vld [vmem:[%s2013_s1 + $0x3b8] sm:$0xff]  ;;  %v147_v21 = vld [vmem:[%s2013_s1 + $0x3b0] sm:$0xff] }
  0x49   :  { %933 = vmatprep.subr.bf16.mxu0 %v932_v43  ;;  %v868_v43 = vpack.c.bf16 %v100_v44, %v96_v35  ;;  %v152_v22 = vld [vmem:[%s2013_s1 + $0x3d8] sm:$0xff]  ;;  %v894_v24 = vpack.c.bf16 %v147_v21, %v143_v20  ;;  %v398_v35 = vld [vmem:[%s2015_s3 + $0x1f0] sm:$0xff] }
  0x4a   :  { %843 = vmatpush1.bf16.msra.mxu1 %v842_v29  ;;  %935 = vmatpush1.bf16.msra.mxu0 %v934_v53  ;;  %v384_v29 = vld [vmem:[%s2015_s3 + $0x180] sm:$0xff]  ;;  %v872_v53 = vpack.c.bf16 %v108_v49, %v104_v48 }
  0x4b   :  { %845 = vmatprep.subr.bf16.mxu1 %v844_v34  ;;  %937 = vmatprep.subr.bf16.mxu0 %v936_v56  ;;  %v391_v34 = vld [vmem:[%s2015_s3 + $0x1b8] sm:$0xff]  ;;  %v950_v36 = vpack.c.bf16 %v386_v30, %v384_v29  ;;  %v392_v29 = vld [vmem:[%s2015_s3 + $0x1c0] sm:$0xff]  ;;  %v394_v30 = vld [vmem:[%s2015_s3 + $0x1d0] sm:$0xff] }
  0x4c   :  { %v952_v39 = vpack.c.bf16 %v391_v34, %v389_v33  ;;  %v112_v56 = vld [vmem:[%s2013_s1 + $0x298] sm:$0xff] }
  0x4d   :  { %v399_v33 = vld [vmem:[%s2015_s3 + $0x1f8] sm:$0xff] }
  0x4e   :  { %847 = vmatpush1.bf16.msra.mxu1 %v846_v40  ;;  %939 = vmatpush1.bf16.msra.mxu0 %v938_v1  ;;  %v388_v40 = vld [vmem:[%s2015_s3 + $0x1a0] sm:$0xff]  ;;  %v880_v1 = vpack.c.bf16 %v124_v63, %v120_v62  ;;  %v960_v34 = vpack.c.bf16 %v399_v33, %v397_v32  ;;  %v626_v62 = vld [vmem:[%s2016_s5 + $0x30] sm:$0xff]  ;;  %v627_v63 = vld [vmem:[%s2016_s5 + $0x38] sm:$0xff] }
  0x4f   :  { %849 = vmatprep.subr.bf16.mxu1 %v848_v47  ;;  %941 = vmatprep.subr.bf16.mxu0 %v940_v4  ;;  %v395_v47 = vld [vmem:[%s2015_s3 + $0x1d8] sm:$0xff]  ;;  %v954_v50 = vpack.c.bf16 %v390_v42, %v388_v40  ;;  %v637_v40 = vld [vmem:[%s2016_s5 + $0x88] sm:$0xff]  ;;  %v620_v42 = vld [vmem:[%s2016_s5] sm:$0xff] }
  0x50   :  { %v956_v52 = vpack.c.bf16 %v395_v47, %v393_v46  ;;  %v128_v4 = vld [vmem:[%s2013_s1 + $0x318] sm:$0xff]  ;;  %v638_v46 = vld [vmem:[%s2016_s5 + $0x90] sm:$0xff]  ;;  %v1030_v48 = vpack.c.bf16 %v621_v45, %v620_v42  ;;  %v413_v42 = vld [vmem:[%s2015_s3 + $0x268] sm:$0xff] }
  0x51   :  { %v639_v47 = vld [vmem:[%s2016_s5 + $0x98] sm:$0xff] }
  0x52   :  { %851 = vmatpush1.bf16.msra.mxu1 %v850_v54  ;;  %943 = vmatpush1.bf16.msra.mxu0 %v942_v13  ;;  %v103_v54 = vld [vmem:[%s2013_s1 + $0x250] sm:$0xff]  ;;  %v888_v13 = vpack.c.bf16 %v140_v11, %v136_v10  ;;  %v1032_v49 = vpack.c.bf16 %v639_v47, %v638_v46  ;;  %v631_v11 = vld [vmem:[%s2016_s5 + $0x58] sm:$0xff]  ;;  %v412_v47 = vld [vmem:[%s2015_s3 + $0x260] sm:$0xff] }
  0x53   :  { %853 = vmatprep.subr.bf16.mxu1 %v852_v59  ;;  %945 = vmatprep.subr.bf16.mxu0 %v944_v16  ;;  %v874_v58 = vpack.c.bf16 %v107_v55, %v103_v54  ;;  %v876_v59 = vpack.c.bf16 %v116_v57, %v112_v56  ;;  %v144_v16 = vld [vmem:[%s2013_s1 + $0x398] sm:$0xff]  ;;  %v624_v56 = vld [vmem:[%s2016_s5 + $0x20] sm:$0xff]  ;;  %v625_v57 = vld [vmem:[%s2016_s5 + $0x28] sm:$0xff] }
  0x54   :  { %v1038_v60 = vpack.c.bf16 %v625_v57, %v624_v56  ;;  %v630_v10 = vld [vmem:[%s2016_s5 + $0x50] sm:$0xff]  ;;  %v423_v56 = vld [vmem:[%s2015_s3 + $0x2b8] sm:$0xff] }
  0x56   :  { %855 = vmatpush1.bf16.msra.mxu1 %v854_v2  ;;  %947 = vmatpush1.bf16.msra.mxu0 %v946_v25  ;;  %v119_v2 = vld [vmem:[%s2013_s1 + $0x2d0] sm:$0xff]  ;;  %v896_v25 = vpack.c.bf16 %v156_v23, %v152_v22 }
  0x57   :  { %857 = vmatprep.subr.bf16.mxu1 %v856_v7  ;;  %949 = vmatprep.subr.bf16.mxu0 %v948_v28  ;;  %v882_v6 = vpack.c.bf16 %v123_v3, %v119_v2  ;;  %v884_v7 = vpack.c.bf16 %v132_v5, %v128_v4  ;;  %v1042_v2 = vpack.c.bf16 %v627_v63, %v626_v62  ;;  %v628_v4 = vld [vmem:[%s2016_s5 + $0x40] sm:$0xff]  ;;  %v629_v5 = vld [vmem:[%s2016_s5 + $0x48] sm:$0xff]  ;;  %v427_v62 = vld [vmem:[%s2015_s3 + $0x2d8] sm:$0xff] }
  0x58   :  { %v1046_v8 = vpack.c.bf16 %v629_v5, %v628_v4  ;;  %v431_v4 = vld [vmem:[%s2015_s3 + $0x2f8] sm:$0xff] }
  0x5a   :  { %859 = vmatpush1.bf16.msra.mxu1 %v858_v14  ;;  %951 = vmatpush1.bf16.msra.mxu0 %v950_v36  ;;  %v135_v14 = vld [vmem:[%s2013_s1 + $0x350] sm:$0xff]  ;;  %v401_v36 = vld [vmem:[%s2015_s3 + $0x208] sm:$0xff] }
  0x5b   :  { %861 = vmatprep.subr.bf16.mxu1 %v860_v19  ;;  %953 = vmatprep.subr.bf16.mxu0 %v952_v39  ;;  %v890_v18 = vpack.c.bf16 %v139_v15, %v135_v14  ;;  %v892_v19 = vpack.c.bf16 %v148_v17, %v144_v16  ;;  %v636_v39 = vld [vmem:[%s2016_s5 + $0x80] sm:$0xff]  ;;  %v1050_v14 = vpack.c.bf16 %v631_v11, %v630_v10  ;;  %v159_v16 = vlaneseq  ;;  %v435_v10 = vld [vmem:[%s2015_s3 + $0x318] sm:$0xff] }
  0x5d   :  { %v1777_v17 = vshrl.u32 %v159_v16, 7  ;;  %v439_v16 = vld [vmem:[%s2015_s3 + $0x338] sm:$0xff] }
  0x5e   :  { %863 = vmatpush1.bf16.msra.mxu1 %v862_v26  ;;  %955 = vmatpush1.bf16.msra.mxu0 %v954_v50  ;;  %v151_v26 = vld [vmem:[%s2013_s1 + $0x3d0] sm:$0xff] }
  0x5f   :  { %865 = vmatprep.subr.bf16.mxu1 %v864_v31  ;;  %957 = vmatprep.subr.bf16.mxu0 %v956_v52  ;;  %v898_v28 = vpack.c.bf16 %v155_v27, %v151_v26  ;;  %v958_v31 = vpack.c.bf16 %v394_v30, %v392_v29  ;;  %v622_v50 = vld [vmem:[%s2016_s5 + $0x10] sm:$0xff]  ;;  %v640_v52 = vld [vmem:[%s2016_s5 + $0xa0] sm:$0xff]  ;;  %v165_v20 = vsub.s32 1, %v1777_v17  ;;  %v405_v29 = vld [vmem:[%s2015_s3 + $0x228] sm:$0xff] }
  0x60   :  { %v400_v26 = vld [vmem:[%s2015_s3 + $0x200] sm:$0xff]  ;;  %v402_v27 = vld [vmem:[%s2015_s3 + $0x210] sm:$0xff]  ;;  %v407_v30 = vld [vmem:[%s2015_s3 + $0x238] sm:$0xff] }
  0x61   :  { %v966_v33 = vpack.c.bf16 %v402_v27, %v400_v26  ;;  %v443_v26 = vld [vmem:[%s2015_s3 + $0x358] sm:$0xff] }
  0x62   :  { %867 = vmatpush1.bf16.msra.mxu1 %v866_v37  ;;  %959 = vmatpush1.bf16.msra.mxu0 %v958_v31  ;;  %v403_v37 = vld [vmem:[%s2015_s3 + $0x218] sm:$0xff] }
  0x63   :  { %869 = vmatprep.subr.bf16.mxu1 %v868_v43  ;;  %961 = vmatprep.subr.bf16.mxu0 %v960_v34  ;;  %v964_v38 = vpack.c.bf16 %v403_v37, %v401_v36  ;;  %v1028_v43 = vpack.c.bf16 %v637_v40, %v636_v39  ;;  %v968_v34 = vpack.c.bf16 %v407_v30, %v405_v29  ;;  %v411_v36 = vld [vmem:[%s2015_s3 + $0x258] sm:$0xff]  ;;  %v408_v39 = vld [vmem:[%s2015_s3 + $0x240] sm:$0xff]  ;;  %v410_v40 = vld [vmem:[%s2015_s3 + $0x250] sm:$0xff] }
  0x64   :  { %v974_v45 = vpack.c.bf16 %v410_v40, %v408_v39  ;;  %v440_v29 = vld [vmem:[%s2015_s3 + $0x340] sm:$0xff]  ;;  %v442_v30 = vld [vmem:[%s2015_s3 + $0x350] sm:$0xff] }
  0x65   :  { %v448_v39 = vld [vmem:[%s2015_s3 + $0x380] sm:$0xff]  ;;  %v450_v40 = vld [vmem:[%s2015_s3 + $0x390] sm:$0xff] }
  0x66   :  { %871 = vmatpush1.bf16.msra.mxu1 %v870_v51  ;;  %v623_v51 = vld [vmem:[%s2016_s5 + $0x18] sm:$0xff] }
  0x67   :  { %873 = vmatprep.subr.bf16.mxu1 %v872_v53  ;;  %v641_v53 = vld [vmem:[%s2016_s5 + $0xa8] sm:$0xff]  ;;  %v1034_v54 = vpack.c.bf16 %v623_v51, %v622_v50  ;;  %v419_v50 = vld [vmem:[%s2015_s3 + $0x298] sm:$0xff] }
  0x68   :  { %v1036_v55 = vpack.c.bf16 %v641_v53, %v640_v52  ;;  %v416_v53 = vld [vmem:[%s2015_s3 + $0x280] sm:$0xff] }
  0x6a   :  { %875 = vmatpush1.bf16.msra.mxu1 %v874_v58  ;;  %v642_v58 = vld [vmem:[%s2016_s5 + $0xb0] sm:$0xff] }
  0x6b   :  { %877 = vmatprep.subr.bf16.mxu1 %v876_v59  ;;  %v643_v59 = vld [vmem:[%s2016_s5 + $0xb8] sm:$0xff] }
  0x6c   :  { %v1040_v61 = vpack.c.bf16 %v643_v59, %v642_v58  ;;  %v420_v59 = vld [vmem:[%s2015_s3 + $0x2a0] sm:$0xff] }
  0x6e   :  { %879 = vmatpush1.bf16.msra.mxu1 %v878_v0  ;;  %v644_v0 = vld [vmem:[%s2016_s5 + $0xc0] sm:$0xff] }
  0x6f   :  { %881 = vmatprep.subr.bf16.mxu1 %v880_v1  ;;  %v645_v1 = vld [vmem:[%s2016_s5 + $0xc8] sm:$0xff] }
  0x70   :  { %v1044_v3 = vpack.c.bf16 %v645_v1, %v644_v0  ;;  %v424_v1 = vld [vmem:[%s2015_s3 + $0x2c0] sm:$0xff] }
  0x72   :  { %883 = vmatpush1.bf16.msra.mxu1 %v882_v6  ;;  %v646_v6 = vld [vmem:[%s2016_s5 + $0xd0] sm:$0xff] }
  0x73   :  { %885 = vmatprep.subr.bf16.mxu1 %v884_v7  ;;  %v647_v7 = vld [vmem:[%s2016_s5 + $0xd8] sm:$0xff] }
  0x74   :  { %v1048_v9 = vpack.c.bf16 %v647_v7, %v646_v6  ;;  %v428_v7 = vld [vmem:[%s2015_s3 + $0x2e0] sm:$0xff] }
  0x76   :  { %887 = vmatpush1.bf16.msra.mxu1 %v886_v12  ;;  %v648_v12 = vld [vmem:[%s2016_s5 + $0xe0] sm:$0xff] }
  0x77   :  { %889 = vmatprep.subr.bf16.mxu1 %v888_v13  ;;  %v649_v13 = vld [vmem:[%s2016_s5 + $0xe8] sm:$0xff] }
  0x78   :  { %v1052_v15 = vpack.c.bf16 %v649_v13, %v648_v12  ;;  %v432_v13 = vld [vmem:[%s2015_s3 + $0x300] sm:$0xff] }
  0x7a   :  { %891 = vmatpush1.bf16.msra.mxu1 %v890_v18  ;;  %v161_v18 = vsub.s32 0, %v1777_v17 }
  0x7b   :  { %893 = vmatprep.subr.bf16.mxu1 %v892_v19  ;;  %v1783_v19 = vld [vmem:[%s2017_s2] sm:$0xf] }
  0x7c   :  { %v162_v21 = vrot.slane %v1783_v19, %v161_v18  ;;  %v166_v22 = vrot.slane %v1783_v19, %v165_v20 }
  0x7e   :  { %895 = vmatpush1.bf16.msra.mxu1 %v894_v24 }
  0x7f   :  { %897 = vmatprep.subr.bf16.mxu1 %v896_v25 }
  0x82   :  { %899 = vmatpush1.bf16.msra.mxu1 %v898_v28 }
  0x83   :  { %1029 = vmatprep.subr.bf16.mxu1 %v1028_v43  ;;  %v415_v43 = vld [vmem:[%s2015_s3 + $0x278] sm:$0xff] }
  0x84   :  { %v976_v46 = vpack.c.bf16 %v415_v43, %v413_v42  ;;  %v453_v42 = vld [vmem:[%s2015_s3 + $0x3a8] sm:$0xff]  ;;  %v455_v43 = vld [vmem:[%s2015_s3 + $0x3b8] sm:$0xff] }
  0x85   :  { %326 = vmatmul.mubr.f32.vlgmr.msra.gmra.mrb[2].mxu1 %v1191_v41  ;;  %v396_v41 = vld [vmem:[%s2015_s3 + $0x1e0] sm:$0xff] }
  0x86   :  { %v962_v44 = vpack.c.bf16 %v398_v35, %v396_v41  ;;  %1031 = vmatpush3.bf16.msra.mxu1 %v1030_v48  ;;  %v404_v41 = vld [vmem:[%s2015_s3 + $0x220] sm:$0xff]  ;;  %v406_v35 = vld [vmem:[%s2015_s3 + $0x230] sm:$0xff] }
  0x87   :  { %1033 = vmatprep.subr.bf16.mxu1 %v1032_v49  ;;  %v970_v37 = vpack.c.bf16 %v406_v35, %v404_v41  ;;  %v414_v48 = vld [vmem:[%s2015_s3 + $0x270] sm:$0xff]  ;;  %v417_v49 = vld [vmem:[%s2015_s3 + $0x288] sm:$0xff]  ;;  %v444_v41 = vld [vmem:[%s2015_s3 + $0x360] sm:$0xff] }
  0x88   :  { %963 = vmatpush1.bf16.msra.mxu0 %v962_v44  ;;  %v409_v44 = vld [vmem:[%s2015_s3 + $0x248] sm:$0xff]  ;;  %v978_v51 = vpack.c.bf16 %v414_v48, %v412_v47  ;;  %v980_v52 = vpack.c.bf16 %v419_v50, %v417_v49  ;;  %v446_v35 = vld [vmem:[%s2015_s3 + $0x370] sm:$0xff]  ;;  %v452_v47 = vld [vmem:[%s2015_s3 + $0x3a0] sm:$0xff] }
  0x89   :  { %965 = vmatprep.subr.bf16.mxu0 %v964_v38  ;;  %v972_v38 = vpack.c.bf16 %v411_v36, %v409_v44  ;;  %v449_v44 = vld [vmem:[%s2015_s3 + $0x388] sm:$0xff]  ;;  %v451_v36 = vld [vmem:[%s2015_s3 + $0x398] sm:$0xff]  ;;  %v454_v48 = vld [vmem:[%s2015_s3 + $0x3b0] sm:$0xff] }
  0x8a   :  { %1035 = vmatpush3.bf16.msra.mxu1 %v1034_v54  ;;  %v418_v54 = vld [vmem:[%s2015_s3 + $0x290] sm:$0xff]  ;;  %v457_v49 = vld [vmem:[%s2015_s3 + $0x3c8] sm:$0xff]  ;;  %v459_v50 = vld [vmem:[%s2015_s3 + $0x3d8] sm:$0xff] }
  0x8b   :  { %1037 = vmatprep.subr.bf16.mxu1 %v1036_v55  ;;  %v421_v55 = vld [vmem:[%s2015_s3 + $0x2a8] sm:$0xff]  ;;  %v982_v57 = vpack.c.bf16 %v418_v54, %v416_v53  ;;  %v169_v53 = vsub.s32 2, %v1777_v17  ;;  %v456_v54 = vld [vmem:[%s2015_s3 + $0x3c0] sm:$0xff] }
  0x8c   :  { %v984_v58 = vpack.c.bf16 %v423_v56, %v421_v55  ;;  %v458_v55 = vld [vmem:[%s2015_s3 + $0x3d0] sm:$0xff]  ;;  %v173_v56 = vsub.s32 3, %v1777_v17 }
  0x8e   :  { %1039 = vmatpush3.bf16.msra.mxu1 %v1038_v60  ;;  %v422_v60 = vld [vmem:[%s2015_s3 + $0x2b0] sm:$0xff] }
  0x8f   :  { %1041 = vmatprep.subr.bf16.mxu1 %v1040_v61  ;;  %v425_v61 = vld [vmem:[%s2015_s3 + $0x2c8] sm:$0xff]  ;;  %v986_v63 = vpack.c.bf16 %v422_v60, %v420_v59  ;;  %v1022_v59 = vpack.c.bf16 %v458_v55, %v456_v54  ;;  %v170_v60 = vrot.slane %v1783_v19, %v169_v53 }
  0x90   :  { %v988_v0 = vpack.c.bf16 %v427_v62, %v425_v61  ;;  %v460_v62 = vld [vmem:[%s2015_s3 + $0x3e0] sm:$0xff] }
  0x92   :  { %1043 = vmatpush3.bf16.msra.mxu1 %v1042_v2  ;;  %v426_v2 = vld [vmem:[%s2015_s3 + $0x2d0] sm:$0xff] }
  0x93   :  { %1045 = vmatprep.subr.bf16.mxu1 %v1044_v3  ;;  %v429_v3 = vld [vmem:[%s2015_s3 + $0x2e8] sm:$0xff]  ;;  %v990_v5 = vpack.c.bf16 %v426_v2, %v424_v1 }
  0x94   :  { %v992_v6 = vpack.c.bf16 %v431_v4, %v429_v3 }
  0x96   :  { %1047 = vmatpush3.bf16.msra.mxu1 %v1046_v8  ;;  %v430_v8 = vld [vmem:[%s2015_s3 + $0x2f0] sm:$0xff] }
  0x97   :  { %1049 = vmatprep.subr.bf16.mxu1 %v1048_v9  ;;  %v433_v9 = vld [vmem:[%s2015_s3 + $0x308] sm:$0xff]  ;;  %v994_v11 = vpack.c.bf16 %v430_v8, %v428_v7  ;;  %v632_v8 = vld [vmem:[%s2016_s5 + $0x60] sm:$0xff] }
  0x98   :  { %v996_v12 = vpack.c.bf16 %v435_v10, %v433_v9  ;;  %v650_v10 = vld [vmem:[%s2016_s5 + $0xf0] sm:$0xff] }
  0x9a   :  { %1051 = vmatpush3.bf16.msra.mxu1 %v1050_v14  ;;  %v434_v14 = vld [vmem:[%s2015_s3 + $0x310] sm:$0xff] }
  0x9b   :  { %1053 = vmatprep.subr.bf16.mxu1 %v1052_v15  ;;  %v437_v15 = vld [vmem:[%s2015_s3 + $0x328] sm:$0xff] }
 0x118   :  { %v256_v23 = vpop.f32.mrb[0].mxu1 }
 0x119   :  { %v257_v24 = vadd.f32 %v256_v23, %v162_v21  ;;  %v258_v25 = vpop.f32.mrb[1].mxu1  ;;  %v998_v21 = vpack.c.bf16 %v434_v14, %v432_v13  ;;  %v436_v23 = vld [vmem:[%s2015_s3 + $0x320] sm:$0xff]  ;;  %v634_v13 = vld [vmem:[%s2016_s5 + $0x70] sm:$0xff]  ;;  %v635_v14 = vld [vmem:[%s2016_s5 + $0x78] sm:$0xff] }
 0x11a   :  { %v259_v28 = vadd.f32 %v258_v25, %v166_v22  ;;  %v1000_v22 = vpack.c.bf16 %v439_v16, %v437_v15  ;;  %v441_v25 = vld [vmem:[%s2015_s3 + $0x348] sm:$0xff]  ;;  %v1058_v15 = vpack.c.bf16 %v635_v14, %v634_v13  ;;  %v464_v16 = vld [vmem:[%s2018_s4] sm:$0x3] }
 0x11b   :  { %v332_v31 = vmax.f32 %v257_v24, 0.0  ;;  %v438_v24 = vld [vmem:[%s2015_s3 + $0x330] sm:$0xff] }
 0x11c   :  { %v333_v32 = vmax.f32 %v259_v28, 0.0  ;;  %v1002_v27 = vpack.c.bf16 %v438_v24, %v436_v23  ;;  %v1004_v28 = vpack.c.bf16 %v443_v26, %v441_v25 }
 0x11e   :  { %540 = vmatprep.mubr.f32.mxu0 %v333_v32  ;;  %v447_v32 = vld [vmem:[%s2015_s3 + $0x378] sm:$0xff] }
 0x11f   :  { %541 = vmatmul.mubr.f32.vlgmr.msra.gmra.mrb[0].mxu0 %v332_v31  ;;  %v445_v31 = vld [vmem:[%s2015_s3 + $0x368] sm:$0xff] }
 0x120   :  { %967 = vmatpush1.bf16.msra.mxu0 %v966_v33  ;;  %v1006_v33 = vpack.c.bf16 %v442_v30, %v440_v29  ;;  %v12_v29 = vstv %s2019_s6 }
 0x121   :  { %969 = vmatprep.subr.bf16.mxu0 %v968_v34  ;;  %v1008_v34 = vpack.c.bf16 %v447_v32, %v445_v31  ;;  %13 = vst [vmem:[#allocation2] sm:$0x1] %v12_v29 }
 0x124   :  { %971 = vmatpush1.bf16.msra.mxu0 %v970_v37  ;;  %v1010_v37 = vpack.c.bf16 %v446_v35, %v444_v41 }
 0x125   :  { %973 = vmatprep.subr.bf16.mxu0 %v972_v38  ;;  %v1012_v38 = vpack.c.bf16 %v451_v36, %v449_v44 }
 0x128   :  { %975 = vmatpush1.bf16.msra.mxu0 %v974_v45  ;;  %v1014_v45 = vpack.c.bf16 %v450_v40, %v448_v39  ;;  %v736_v31 = vld [vmem:[#allocation2] ss:$0 sm:$0xff] }
 0x129   :  { %977 = vmatprep.subr.bf16.mxu0 %v976_v46  ;;  %v1016_v46 = vpack.c.bf16 %v455_v43, %v453_v42 }
 0x12c   :  { %979 = vmatpush1.bf16.msra.mxu0 %v978_v51  ;;  %v1018_v51 = vpack.c.bf16 %v454_v48, %v452_v47 }
 0x12d   :  { %981 = vmatprep.subr.bf16.mxu0 %v980_v52  ;;  %v1020_v52 = vpack.c.bf16 %v459_v50, %v457_v49 }
 0x130   :  { %983 = vmatpush1.bf16.msra.mxu0 %v982_v57  ;;  %v461_v57 = vld [vmem:[%s2015_s3 + $0x3e8] sm:$0xff] }
 0x131   :  { %985 = vmatprep.subr.bf16.mxu0 %v984_v58  ;;  %v463_v58 = vld [vmem:[%s2015_s3 + $0x3f8] sm:$0xff] }
 0x132   :  { %v1024_v61 = vpack.c.bf16 %v463_v58, %v461_v57 }
 0x134   :  { %987 = vmatpush1.bf16.msra.mxu0 %v986_v63  ;;  %v462_v63 = vld [vmem:[%s2015_s3 + $0x3f0] sm:$0xff] }
 0x135   :  { %989 = vmatprep.subr.bf16.mxu0 %v988_v0  ;;  %v174_v0 = vrot.slane %v1783_v19, %v173_v56  ;;  %v1026_v2 = vpack.c.bf16 %v462_v63, %v460_v62  ;;  %v633_v19 = vld [vmem:[%s2016_s5 + $0x68] sm:$0xff] }
 0x136   :  { %v1054_v9 = vpack.c.bf16 %v633_v19, %v632_v8 }
 0x138   :  { %991 = vmatpush1.bf16.msra.mxu0 %v990_v5  ;;  %1055 = vmatpush3.bf16.msra.mxu1 %v1054_v9 }
 0x139   :  { %993 = vmatprep.subr.bf16.mxu0 %v992_v6 }
 0x13c   :  { %995 = vmatpush1.bf16.msra.mxu0 %v994_v11  ;;  %v651_v11 = vld [vmem:[%s2016_s5 + $0xf8] sm:$0xff] }
 0x13d   :  { %997 = vmatprep.subr.bf16.mxu0 %v996_v12  ;;  %v1056_v12 = vpack.c.bf16 %v651_v11, %v650_v10 }
 0x13f   :  { %1057 = vmatprep.subr.bf16.mxu1 %v1056_v12 }
 0x140   :  { %999 = vmatpush1.bf16.msra.mxu0 %v998_v21  ;;  %1059 = vmatpush3.bf16.msra.mxu1 %v1058_v15  ;;  %v469_v21 = vrot.slane %v464_v16, %v161_v18 }
 0x141   :  { %1001 = vmatprep.subr.bf16.mxu0 %v1000_v22  ;;  %v473_v22 = vrot.slane %v464_v16, %v165_v20 }
 0x144   :  { %1003 = vmatpush1.bf16.msra.mxu0 %v1002_v27 }
 0x145   :  { %1005 = vmatprep.subr.bf16.mxu0 %v1004_v28 }
 0x148   :  { %1007 = vmatpush1.bf16.msra.mxu0 %v1006_v33 }
 0x149   :  { %1009 = vmatprep.subr.bf16.mxu0 %v1008_v34 }
 0x14c   :  { %1011 = vmatpush1.bf16.msra.mxu0 %v1010_v37 }
 0x14d   :  { %1013 = vmatprep.subr.bf16.mxu0 %v1012_v38 }
 0x150   :  { %1015 = vmatpush1.bf16.msra.mxu0 %v1014_v45 }
 0x151   :  { %1017 = vmatprep.subr.bf16.mxu0 %v1016_v46 }
 0x154   :  { %1019 = vmatpush1.bf16.msra.mxu0 %v1018_v51 }
 0x155   :  { %1021 = vmatprep.subr.bf16.mxu0 %v1020_v52 }
 0x158   :  { %v327_v1 = vpop.f32.mrb[2].mxu1  ;;  %1023 = vmatpush1.bf16.msra.mxu0 %v1022_v59 }
 0x159   :  { %v328_v3 = vadd.f32 %v327_v1, %v170_v60  ;;  %v329_v4 = vpop.f32.mrb[3].mxu1  ;;  %1025 = vmatprep.subr.bf16.mxu0 %v1024_v61 }
 0x15a   :  { %v330_v5 = vadd.f32 %v329_v4, %v174_v0 }
 0x15b   :  { %v334_v7 = vmax.f32 %v328_v3, 0.0 }
 0x15c   :  { %v335_v6 = vmax.f32 %v330_v5, 0.0  ;;  %1027 = vmatpush1.bf16.msra.mxu0 %v1026_v2 }
 0x15e   :  { %611 = vmatprep.mubr.f32.mxu0 %v335_v6 }
 0x15f   :  { %612 = vmatmul.mubr.f32.vlgmr.msra.gmra.mrb[0].mxu0 %v334_v7 }
 0x232   :  { %v613_v23 = vpop.f32.mrb[0].mxu0 }
 0x233   :  { %v1060_v24 = vadd.f32 %v613_v23, %v469_v21  ;;  %v615_v25 = vpop.f32.mrb[1].mxu0 }
 0x234   :  { %v1061_v26 = vadd.f32 %v615_v25, %v473_v22 }
 0x235   :  { %v618_v28 = vmax.f32 %v1060_v24, 0.0 }
 0x236   :  { %v619_v27 = vmax.f32 %v1061_v26, 0.0 }
 0x238   :  { %723 = vmatprep.mubr.f32.mxu1 %v619_v27 }
 0x239   :  { %724 = vmatmul.mubr.f32.vlgmr.msra.gmra.mrb[4].mxu1 %v618_v28 }
 0x30c   :  { %v769_v30 = vpop.f32.mrb[4].mxu1 }
 0x30d   :  { %v770_v32 = vpop.f32.mrb[5].mxu1 }
 0x30e   :  { %v771_v18 = vadd.f32 %v770_v32, %v769_v30 }
 0x310   :  { %v726_v17 = vadd.f32 %v771_v18, %v736_v31 }
 0x312   :  { %730 = vst.msk [vmem:[%s2020_s7] sm:$0x3] %vm729_vm0, %v726_v17 }

// kernel: xxmodel_forward.6
= control target key start
LH: loop header
LB: loop body
LE: loop exit
PB: predicated region body
PF: predicated region fallthrough
CT: control target
= control target key end

     0   :  { %v4895_v0 = vmov 0.0|0.0   ;;  %vm4896_vm0 = vmmov 0   ;;  %v4897_v8 = vmov 0.0   ;;  %vm54_vm1 = vcmask 261120   ;;  %s5669_s3 = inlined_call_operand.vmem [shape: f32[12,32,8], index: 3, kind: input, shape index: {}]   ;;  %s5670_s1 = inlined_call_operand.vmem [shape: f32[8,32], index: 1, kind: input, shape index: {}]   ;;  %s5671_s0 = inlined_call_operand.vmem [shape: f32[8,32], index: 0, kind: input, shape index: {}]   ;;  %s5672_s4 = inlined_call_operand.vmem [shape: f32[12,1,8], index: 4, kind: input, shape index: {}]   ;;  %s5673_s2 = inlined_call_operand.vmem [shape: f32[8,8], index: 2, kind: input, shape index: {}]   ;;  %s5674_s5 = inlined_call_operand.vmem [shape: f32[4,8,32], index: 5, kind: input, shape index: {}]   ;;  %s5675_s7 = inlined_call_operand.vmem [shape: f32[12,32,8], index: 7, kind: input, shape index: {}]   ;;  %s5676_s6 = inlined_call_operand.vmem [shape: f32[1,32], index: 6, kind: input, shape index: {}]   ;;  %s5677_s11 = inlined_call_operand.vmem [shape: f32[8,32], index: 11, kind: output, shape index: {0}]   ;;  %s5678_s8 = inlined_call_operand.vmem [shape: f32[12,1,8], index: 8, kind: input, shape index: {}]   ;;  %s5679_s9 = inlined_call_operand.vmem [shape: f32[4,8,32], index: 9, kind: input, shape index: {}]   ;;  %s5680_s10 = inlined_call_operand.vmem [shape: f32[1,32], index: 10, kind: input, shape index: {}]   ;;  %s5681_s12 = inlined_call_operand.vmem [shape: f32[8,32], index: 12, kind: output, shape index: {1}]  }
   0x1   :  { %4719 = vmatprep.subr.bf16.mxu1 %v4895_v0  ;;  %v3965_v1 = vld [vmem:[%s5669_s3 + $0x80] sm:$0xff]  ;;  %v3966_v2 = vld [vmem:[%s5669_s3 + $0x88] sm:$0xff]  ;;  %4713 = vmatprep.subr.bf16.mxu0 %v4895_v0  ;;  %v3967_v6 = vld [vmem:[%s5669_s3 + $0x90] sm:$0xff]  ;;  %vm297_vm2 = vcmask 64512  }
   0x2   :  { %v43_v3 = vld [vmem:[%s5669_s3] sm:$0xff]  ;;  %v4720_v4 = vpack.c.bf16 %v3966_v2, %v3965_v1  ;;  %v44_v5 = vld [vmem:[%s5669_s3 + $0x8] sm:$0xff]  ;;  %v3968_v7 = vld [vmem:[%s5669_s3 + $0x98] sm:$0xff]  ;;  %4348 = vmatprep.mubr.msk.f32.mxu1 %vm4896_vm0, %v4897_v8  ;;  %4337 = vmatprep.mubr.msk.f32.mxu0 %vm4896_vm0, %v4897_v8 }
   0x3   :  { %v4714_v9 = vpack.c.bf16 %v44_v5, %v43_v3  ;;  %v45_v10 = vld [vmem:[%s5669_s3 + $0x10] sm:$0xff]  ;;  %v46_v11 = vld [vmem:[%s5669_s3 + $0x18] sm:$0xff]  ;;  %v4723_v12 = vpack.c.bf16 %v3968_v7, %v3967_v6  ;;  %v4998_v14 = vld [vmem:[%s5670_s1] sm:$0xff] }
   0x4   :  { %4721 = vmatpush3.bf16.msra.mxu1 %v4720_v4  ;;  %v4717_v13 = vpack.c.bf16 %v46_v11, %v45_v10  ;;  %v5003_v15 = vld [vmem:[%s5671_s0] sm:$0xff]  ;;  %v3973_v25 = vld [vmem:[%s5669_s3 + $0x108] sm:$0xff]  ;;  %v3974_v26 = vld [vmem:[%s5669_s3 + $0x110] sm:$0xff] }
   0x5   :  { %4715 = vmatpush3.bf16.msra.mxu0 %v4714_v9  ;;  %4722 = vmatprep.subr.bf16.mxu1 %v4895_v0  ;;  %v3970_v16 = vld [vmem:[%s5672_s4 + $0x4] ss:$0 sm:$0xff]  ;;  %v3963_v17 = vld [vmem:[%s5672_s4] ss:$0 sm:$0xff]  ;;  %v3975_v28 = vld [vmem:[%s5669_s3 + $0x118] sm:$0xff] }
   0x6   :  { %4716 = vmatprep.subr.bf16.mxu0 %v4895_v0  ;;  %v3972_v24 = vld [vmem:[%s5669_s3 + $0x100] sm:$0xff]  ;;  %v4729_v29 = vpack.c.bf16 %v3975_v28, %v3974_v26  ;;  %v3977_v42 = vld [vmem:[%s5672_s4 + $0x8] ss:$0 sm:$0xff]  ;;  %v3984_v48 = vld [vmem:[%s5669_s3 + $0x30] sm:$0xff] }
   0x7   :  { %v4726_v27 = vpack.c.bf16 %v3973_v25, %v3972_v24  ;;  %v5047_v31 = vld [vmem:[%s5673_s2] sm:$0xff]  ;;  %v3983_v46 = vld [vmem:[%s5669_s3 + $0x28] sm:$0xff]  ;;  %v3985_v49 = vld [vmem:[%s5669_s3 + $0x38] sm:$0xff] }
   0x8   :  { %4724 = vmatpush3.bf16.msra.mxu1 %v4723_v12  ;;  %v3982_v45 = vld [vmem:[%s5669_s3 + $0x20] sm:$0xff]  ;;  %v4735_v50 = vpack.c.bf16 %v3985_v49, %v3984_v48  ;;  %v3990_v53 = vld [vmem:[%s5669_s3 + $0xa8] sm:$0xff]  ;;  %v3991_v57 = vld [vmem:[%s5669_s3 + $0xb0] sm:$0xff] }
   0x9   :  { %4718 = vmatpush3.bf16.msra.mxu0 %v4717_v13  ;;  %4362 = vmatprep.subr.mxu1 %v4897_v8  ;;  %v4732_v47 = vpack.c.bf16 %v3983_v46, %v3982_v45  ;;  %v3989_v52 = vld [vmem:[%s5669_s3 + $0xa0] sm:$0xff]  ;;  %v3992_v58 = vld [vmem:[%s5669_s3 + $0xb8] sm:$0xff]  ;;  %v3997_v9 = vld [vmem:[%s5669_s3 + $0x128] sm:$0xff] }
   0xa   :  { %4725 = vmatprep.subr.bf16.mxu0 %v4895_v0  ;;  %v4738_v55 = vpack.c.bf16 %v3990_v53, %v3989_v52  ;;  %v4741_v59 = vpack.c.bf16 %v3992_v58, %v3991_v57  ;;  %v3994_v1 = vld [vmem:[%s5672_s4 + $0x5] ss:$0 sm:$0xff]  ;;  %v3987_v2 = vld [vmem:[%s5672_s4 + $0x1] ss:$0 sm:$0xff]  ;;  %v3998_v10 = vld [vmem:[%s5669_s3 + $0x130] sm:$0xff] }
   0xb   :  { %4349 = vmatmul.mubr.msk.f32.vlgmr.msra.gmra.mrb[0].mxu1 %vm54_vm1, %v4998_v14  ;;  %v3996_v7 = vld [vmem:[%s5669_s3 + $0x120] sm:$0xff]  ;;  %v3999_v12 = vld [vmem:[%s5669_s3 + $0x138] sm:$0xff]  ;;  %v4011_v45 = vld [vmem:[%s5669_s3 + $0x50] sm:$0xff] }
   0xc   :  { %4338 = vmatmul.mubr.msk.f32.vlgmr.msra.gmra.mrb[0].mxu0 %vm54_vm1, %v5003_v15  ;;  %4364 = vmatprep.mubr.msk.f32.mxu1 %vm4896_vm0, %v4897_v8  ;;  %v4744_v11 = vpack.c.bf16 %v3997_v9, %v3996_v7  ;;  %v4747_v13 = vpack.c.bf16 %v3999_v12, %v3998_v10  ;;  %v4012_v46 = vld [vmem:[%s5669_s3 + $0x58] sm:$0xff]  ;;  %v4021_v52 = vld [vmem:[%s5672_s4 + $0x6] ss:$0 sm:$0xff] }
   0xd   :  { %4359 = vmatprep.mubr.msk.f32.mxu0 %vm4896_vm0, %v4897_v8  ;;  %4727 = vmatpush3.bf16.msra.mxu0 %v4726_v27  ;;  %v4001_v27 = vld [vmem:[%s5672_s4 + $0x9] ss:$0 sm:$0xff]  ;;  %v4753_v49 = vpack.c.bf16 %v4012_v46, %v4011_v45 }
   0xe   :  { %4728 = vmatprep.subr.bf16.mxu0 %v4895_v0 }
  0x11   :  { %4730 = vmatpush3.bf16.msra.mxu0 %v4729_v29 }
  0x12   :  { %4731 = vmatprep.subr.bf16.mxu0 %v4895_v0 }
  0x14   :  { %4360 = vmatmul.mubr.msk.f32.vlgmr.msra.gmra.mrb[2].mxu0 %vm54_vm1, %v4998_v14 }
  0x15   :  { %4380 = vmatprep.mubr.msk.f32.mxu0 %vm4896_vm0, %v4897_v8  ;;  %4733 = vmatpush3.bf16.msra.mxu0 %v4732_v47 }
  0x16   :  { %4734 = vmatprep.subr.bf16.mxu0 %v4895_v0 }
  0x19   :  { %4736 = vmatpush3.bf16.msra.mxu0 %v4735_v50 }
  0x1a   :  { %4743 = vmatprep.subr.bf16.mxu0 %v4895_v0 }
  0x1c   :  { %4381 = vmatmul.mubr.msk.f32.vlgmr.msra.gmra.mrb[4].mxu0 %vm54_vm1, %v5003_v15 }
  0x1d   :  { %4402 = vmatprep.mubr.msk.f32.mxu0 %vm4896_vm0, %v4897_v8  ;;  %4745 = vmatpush3.bf16.msra.mxu0 %v4744_v11 }
  0x1e   :  { %4746 = vmatprep.subr.bf16.mxu0 %v4895_v0 }
  0x21   :  { %4748 = vmatpush3.bf16.msra.mxu0 %v4747_v13 }
  0x22   :  { %4415 = vmatprep.subr.mxu0 %v4897_v8 }
  0x24   :  { %4403 = vmatmul.mubr.msk.f32.vlgmr.msra.gmra.mrb[6].mxu0 %vm54_vm1, %v4998_v14 }
  0x25   :  { %4417 = vmatprep.mubr.msk.f32.mxu0 %vm4896_vm0, %v4897_v8 }
  0xde   :  { %v210_v18 = vpop.f32.mrb[0].mxu1 }
  0xdf   :  { %v211_v19 = vadd.f32 %v3970_v16, %v210_v18  ;;  %v4350_v20 = vpop.f32.mrb[1].mxu1  ;;  %v124_v21 = vpop.f32.mrb[0].mxu0 }
  0xe0   :  { %v125_v22 = vadd.f32 %v3963_v17, %v124_v21  ;;  %v4339_v23 = vpop.f32.mrb[1].mxu0 }
  0xe1   :  { %4363 = vmatpush3.xpose.msk.msra.mxu1 %vm297_vm2, %v211_v19 }
  0xe2   :  { %4367 = vmatprep.subr.mxu1 %v4897_v8 }
  0xe4   :  { %4365 = vmatmul.mubr.msk.f32.vlgmr.msra.gmra.mrb[2].mxu1 %vm297_vm2, %v125_v22 }
  0xe5   :  { %4369 = vmatprep.mubr.msk.f32.mxu1 %vm4896_vm0, %v4897_v8 }
  0xe7   :  { %v293_v41 = vpop.f32.mrb[2].mxu0 }
  0xe8   :  { %v4361_v43 = vpop.f32.mrb[3].mxu0  ;;  %v294_v44 = vadd.f32 %v3977_v42, %v293_v41  ;;  %v4009_v42 = vld [vmem:[%s5669_s3 + $0x40] sm:$0xff] }
  0xe9   :  { %v4010_v43 = vld [vmem:[%s5669_s3 + $0x48] sm:$0xff] }
  0xea   :  { %4368 = vmatpush3.msra.mxu1 %v294_v44  ;;  %v4750_v44 = vpack.c.bf16 %v4010_v43, %v4009_v42 }
  0xeb   :  { %4737 = vmatprep.subr.bf16.mxu1 %v4895_v0 }
  0xef   :  { %v540_v60 = vpop.f32.mrb[4].mxu0 }
  0xf0   :  { %v4382_v61 = vpop.f32.mrb[5].mxu0  ;;  %v541_v6 = vadd.f32 %v3987_v2, %v540_v60  ;;  %v4025_v2 = vld [vmem:[%s5669_s3 + $0x150] sm:$0xff] }
  0xf7   :  { %v706_v26 = vpop.f32.mrb[6].mxu0 }
  0xf8   :  { %v4404_v28 = vpop.f32.mrb[7].mxu0  ;;  %v707_v29 = vadd.f32 %v4001_v27, %v706_v26  ;;  %v4035_v27 = vld [vmem:[%s5669_s3 + $0x60] sm:$0xff] }
  0xf9   :  { %v4036_v28 = vld [vmem:[%s5669_s3 + $0x68] sm:$0xff] }
 0x1b7   :  { %v370_v30 = vpop.f32.mrb[2].mxu1 }
 0x1b8   :  { %v374_v32 = vmul.f32 0.35355338, %v370_v30  ;;  %v4366_v33 = vpop.f32.mrb[3].mxu1  ;;  %v4006_v30 = vld [vmem:[%s5674_s5 + $0x8] sm:$0xff] }
 0x1b9   :  { %4416 = vmatpush3.msra.mxu0 %v4006_v30  ;;  %v4037_v30 = vld [vmem:[%s5669_s3 + $0x70] sm:$0xff] }
 0x1ba   :  { %v375_v34 = vadd.f32 %v374_v32, %v5047_v31  ;;  %4749 = vmatprep.subr.bf16.mxu0 %v4895_v0 }
 0x1bc   :  { %v376_v35 = vsel %vm297_vm2, %v375_v34, -inf }
 0x1bd   :  { %377 = vmax.xlane.f32.xlu0 %v376_v35  ;;  %v460_v35 = vld [vmem:[%s5674_s5] sm:$0xff] }
 0x24a   :  { %v378_v36 = vpop.xlane.xlu0 %377 }
 0x24b   :  { %v379_v37 = vsub.f32 %v375_v34, %v378_v36  ;;  %v4016_v36 = vld [vmem:[%s5669_s3 + $0xc0] sm:$0xff] }
 0x24d   :  { %v380_v38 = vmul.f32 1.442695, %v379_v37  ;;  %v4017_v37 = vld [vmem:[%s5669_s3 + $0xc8] sm:$0xff] }
 0x24f   :  { %4860 = vpow2.f32 %v380_v38  ;;  %v4756_v38 = vpack.c.bf16 %v4017_v37, %v4016_v36  ;;  %v4044_v37 = vld [vmem:[%s5669_s3 + $0xf0] sm:$0xff] }
 0x259   :  { %v4861_v39 = vpop.eup %4860 }
 0x25a   :  { %v382_v40 = vsel %vm297_vm2, %v4861_v39, 0.0 }
 0x25b   :  { %383 = vadd.xlane.f32.xlu0 %v382_v40  ;;  %v4019_v40 = vld [vmem:[%s5669_s3 + $0xd8] sm:$0xff] }
 0x2e8   :  { %v384_v51 = vpop.xlane.xlu0 %383 }
 0x2e9   :  { %4862 = vrcp.f32 %v384_v51 }
 0x2f3   :  { %v4863_v54 = vpop.eup %4862 }
 0x2f4   :  { %v386_v56 = vmul.f32 %v4863_v54, %v4861_v39  ;;  %v4018_v39 = vld [vmem:[%s5669_s3 + $0xd0] sm:$0xff] }
 0x2f5   :  { %v4759_v41 = vpack.c.bf16 %v4019_v40, %v4018_v39 }
 0x2f6   :  { %4370 = vmatmul.mubr.msk.f32.vlgmr.msra.gmra.mrb[4].mxu1 %vm297_vm2, %v386_v56 }
 0x2f7   :  { %4739 = vmatpush3.bf16.msra.mxu1 %v4738_v55  ;;  %4391 = vmatprep.mubr.msk.f32.mxu1 %vm4896_vm0, %v4897_v8 }
 0x2f8   :  { %4740 = vmatprep.subr.bf16.mxu1 %v4895_v0 }
 0x2fb   :  { %4742 = vmatpush3.bf16.msra.mxu1 %v4741_v59  ;;  %v4014_v59 = vld [vmem:[%s5672_s4 + $0x2] ss:$0 sm:$0xff] }
 0x2fc   :  { %4405 = vmatprep.subr.mxu1 %v4897_v8 }
 0x2fe   :  { %4392 = vmatmul.mubr.msk.f32.vlgmr.msra.gmra.mrb[6].mxu1 %vm54_vm1, %v4998_v14 }
 0x2ff   :  { %4407 = vmatprep.mubr.msk.f32.mxu1 %vm4896_vm0, %v4897_v8 }
 0x3c9   :  { %v456_v62 = vpop.f32.mrb[4].mxu1 }
 0x3ca   :  { %v4371_v63 = vpop.f32.mrb[5].mxu1 }
 0x3cb   :  { %v4023_v63 = vld [vmem:[%s5669_s3 + $0x140] sm:$0xff] }
 0x3d1   :  { %v623_v3 = vpop.f32.mrb[6].mxu1 }
 0x3d2   :  { %v624_v4 = vadd.f32 %v3994_v1, %v623_v3  ;;  %v4393_v5 = vpop.f32.mrb[7].mxu1  ;;  %v4024_v1 = vld [vmem:[%s5669_s3 + $0x148] sm:$0xff] }
 0x3d3   :  { %v4762_v3 = vpack.c.bf16 %v4024_v1, %v4023_v63 }
 0x3d4   :  { %4406 = vmatpush3.xpose.msk.msra.mxu1 %vm297_vm2, %v624_v4  ;;  %v4026_v4 = vld [vmem:[%s5669_s3 + $0x158] sm:$0xff] }
 0x3d5   :  { %4410 = vmatprep.subr.mxu1 %v4897_v8  ;;  %v4765_v5 = vpack.c.bf16 %v4026_v4, %v4025_v2 }
 0x3d7   :  { %4408 = vmatmul.mubr.msk.f32.vlgmr.msra.gmra.mrb[8].mxu1 %vm297_vm2, %v541_v6 }
 0x3d8   :  { %4412 = vmatprep.mubr.msk.f32.mxu1 %vm4896_vm0, %v4897_v8  ;;  %4411 = vmatpush3.msra.mxu1 %v707_v29  ;;  %v4768_v29 = vpack.c.bf16 %v4036_v28, %v4035_v27  ;;  %v4067_v27 = vld [vmem:[%s5675_s7 + $0x98] sm:$0xff] }
 0x3d9   :  { %4420 = vmatprep.subr.mxu1 %v4897_v8 }
 0x4aa   :  { %v782_v16 = vpop.f32.mrb[8].mxu1 }
 0x4ab   :  { %v786_v17 = vmul.f32 0.35355338, %v782_v16  ;;  %v4409_v18 = vpop.f32.mrb[9].mxu1 }
 0x4ad   :  { %v787_v19 = vadd.f32 %v786_v17, %v5047_v31 }
 0x4af   :  { %v788_v20 = vsel %vm297_vm2, %v787_v19, -inf }
 0x4b0   :  { %789 = vmax.xlane.f32.xlu1 %v788_v20  ;;  %v4028_v20 = vld [vmem:[%s5672_s4 + $0xa] ss:$0 sm:$0xff] }
 0x53d   :  { %v790_v21 = vpop.xlane.xlu1 %789 }
 0x53e   :  { %v791_v22 = vsub.f32 %v787_v19, %v790_v21 }
 0x540   :  { %v792_v23 = vmul.f32 1.442695, %v791_v22 }
 0x542   :  { %4864 = vpow2.f32 %v792_v23  ;;  %v4033_v23 = vld [vmem:[%s5674_s5 + $0x10] sm:$0xff] }
 0x54c   :  { %v4865_v24 = vpop.eup %4864 }
 0x54d   :  { %v794_v25 = vsel %vm297_vm2, %v4865_v24, 0.0 }
 0x54e   :  { %795 = vadd.xlane.f32.xlu1 %v794_v25 }
 0x5db   :  { %v796_v32 = vpop.xlane.xlu1 %795 }
 0x5dc   :  { %4866 = vrcp.f32 %v796_v32  ;;  %v4038_v32 = vld [vmem:[%s5669_s3 + $0x78] sm:$0xff] }
 0x5e6   :  { %v4867_v33 = vpop.eup %4866 }
 0x5e7   :  { %v798_v34 = vmul.f32 %v4867_v33, %v4865_v24  ;;  %v4771_v33 = vpack.c.bf16 %v4038_v32, %v4037_v30 }
 0x5e9   :  { %4413 = vmatmul.mubr.msk.f32.vlgmr.msra.gmra.mrb[10].mxu1 %vm297_vm2, %v798_v34  ;;  %v4042_v34 = vld [vmem:[%s5669_s3 + $0xe0] sm:$0xff] }
 0x5ea   :  { %4421 = vmatpush3.msra.mxu1 %v460_v35  ;;  %4422 = vmatprep.mubr.msk.f32.mxu1 %vm4896_vm0, %v4897_v8  ;;  %v4043_v35 = vld [vmem:[%s5669_s3 + $0xe8] sm:$0xff] }
 0x5eb   :  { %4755 = vmatprep.subr.bf16.mxu1 %v4895_v0  ;;  %v4774_v36 = vpack.c.bf16 %v4043_v35, %v4042_v34  ;;  %v4061_v35 = vld [vmem:[%s5676_s6] ss:$0 sm:$0xff] }
 0x5ed   :  { %4423 = vmatmul.mubr.msk.f32.vlgmr.msra.gmra.mrb[12].mxu1 %vm297_vm2, %v456_v62 }
 0x5ee   :  { %4757 = vmatpush3.bf16.msra.mxu1 %v4756_v38  ;;  %4444 = vmatprep.mubr.msk.f32.mxu1 %vm4896_vm0, %v4897_v8  ;;  %v4045_v38 = vld [vmem:[%s5669_s3 + $0xf8] sm:$0xff] }
 0x5ef   :  { %4758 = vmatprep.subr.bf16.mxu1 %v4895_v0 }
 0x5f2   :  { %4760 = vmatpush3.bf16.msra.mxu1 %v4759_v41  ;;  %v4777_v41 = vpack.c.bf16 %v4045_v38, %v4044_v37 }
 0x5f3   :  { %4458 = vmatprep.subr.mxu1 %v4897_v8 }
 0x5f5   :  { %4445 = vmatmul.mubr.msk.f32.vlgmr.msra.gmra.mrb[14].mxu1 %vm54_vm1, %v4998_v14 }
 0x5f6   :  { %4460 = vmatprep.mubr.msk.f32.mxu1 %vm4896_vm0, %v4897_v8 }
 0x6bc   :  { %v868_v47 = vpop.f32.mrb[10].mxu1 }
 0x6bd   :  { %v4414_v48 = vpop.f32.mrb[11].mxu1  ;;  %4418 = vmatmul.mubr.msk.f32.vlgmr.msra.gmra.mrb[8].mxu0 %vm297_vm2, %v868_v47  ;;  %v4047_v47 = vld [vmem:[%s5672_s4 + $0x7] ss:$0 sm:$0xff] }
 0x6be   :  { %4751 = vmatpush3.bf16.msra.mxu0 %v4750_v44  ;;  %4433 = vmatprep.mubr.msk.f32.mxu0 %vm4896_vm0, %v4897_v8  ;;  %v4040_v48 = vld [vmem:[%s5672_s4 + $0x3] ss:$0 sm:$0xff] }
 0x6bf   :  { %4752 = vmatprep.subr.bf16.mxu0 %v4895_v0 }
 0x6c0   :  { %v1016_v50 = vpop.f32.mrb[12].mxu1 }
 0x6c1   :  { %v4424_v51 = vpop.f32.mrb[13].mxu1 }
 0x6c2   :  { %4754 = vmatpush3.bf16.msra.mxu0 %v4753_v49 }
 0x6c3   :  { %4761 = vmatprep.subr.bf16.mxu0 %v4895_v0 }
 0x6c5   :  { %4434 = vmatmul.mubr.msk.f32.vlgmr.msra.gmra.mrb[10].mxu0 %vm54_vm1, %v5003_v15 }
 0x6c6   :  { %4455 = vmatprep.mubr.msk.f32.mxu0 %vm4896_vm0, %v4897_v8  ;;  %4763 = vmatpush3.bf16.msra.mxu0 %v4762_v3 }
 0x6c7   :  { %4764 = vmatprep.subr.bf16.mxu0 %v4895_v0 }
 0x6c8   :  { %v1182_v53 = vpop.f32.mrb[14].mxu1 }
 0x6c9   :  { %v1183_v54 = vadd.f32 %v4021_v52, %v1182_v53  ;;  %v4446_v55 = vpop.f32.mrb[15].mxu1  ;;  %v4049_v53 = vld [vmem:[%s5669_s3 + $0x160] sm:$0xff] }
 0x6ca   :  { %4766 = vmatpush3.bf16.msra.mxu0 %v4765_v5  ;;  %v4051_v55 = vld [vmem:[%s5669_s3 + $0x170] sm:$0xff] }
 0x6cb   :  { %4459 = vmatpush3.xpose.msk.msra.mxu1 %vm297_vm2, %v1183_v54  ;;  %4468 = vmatprep.subr.mxu0 %v4897_v8  ;;  %v4050_v54 = vld [vmem:[%s5669_s3 + $0x168] sm:$0xff] }
 0x6cc   :  { %4463 = vmatprep.subr.mxu1 %v4897_v8 }
 0x6cd   :  { %4456 = vmatmul.mubr.msk.f32.vlgmr.msra.gmra.mrb[12].mxu0 %vm54_vm1, %v4998_v14 }
 0x6ce   :  { %4470 = vmatprep.mubr.msk.f32.mxu0 %vm4896_vm0, %v4897_v8  ;;  %4469 = vmatpush3.msra.mxu0 %v4033_v23  ;;  %v4064_v23 = vld [vmem:[%s5675_s7 + $0x80] sm:$0xff] }
 0x6cf   :  { %4773 = vmatprep.subr.bf16.mxu0 %v4895_v0 }
 0x790   :  { %v943_v56 = vpop.f32.mrb[8].mxu0 }
 0x791   :  { %v5189_v57 = vadd.f32 %v1016_v50, %v943_v56  ;;  %v4419_v58 = vpop.f32.mrb[9].mxu0  ;;  %v4780_v56 = vpack.c.bf16 %v4050_v54, %v4049_v53 }
 0x798   :  { %v1099_v60 = vpop.f32.mrb[10].mxu0 }
 0x799   :  { %v1100_v61 = vadd.f32 %v4014_v59, %v1099_v60  ;;  %v4435_v62 = vpop.f32.mrb[11].mxu0 }
 0x79b   :  { %4461 = vmatmul.mubr.msk.f32.vlgmr.msra.gmra.mrb[16].mxu1 %vm297_vm2, %v1100_v61 }
 0x79c   :  { %4465 = vmatprep.mubr.msk.f32.mxu1 %vm4896_vm0, %v4897_v8 }
 0x7a0   :  { %v1265_v19 = vpop.f32.mrb[12].mxu0 }
 0x7a1   :  { %v4457_v21 = vpop.f32.mrb[13].mxu0  ;;  %v1266_v22 = vadd.f32 %v4028_v20, %v1265_v19  ;;  %v2005_v20 = vld [vmem:[%s5675_s7 + $0x10] sm:$0xff] }
 0x7a2   :  { %v2006_v21 = vld [vmem:[%s5675_s7 + $0x18] sm:$0xff] }
 0x7a3   :  { %4464 = vmatpush3.msra.mxu1 %v1266_v22  ;;  %v4789_v22 = vpack.c.bf16 %v2006_v21, %v2005_v20 }
 0x7a4   :  { %4767 = vmatprep.subr.bf16.mxu1 %v4895_v0 }
 0x86e   :  { %v1341_v6 = vpop.f32.mrb[16].mxu1 }
 0x86f   :  { %v1345_v7 = vmul.f32 0.35355338, %v1341_v6  ;;  %v4462_v9 = vpop.f32.mrb[17].mxu1 }
 0x871   :  { %v1346_v10 = vadd.f32 %v1345_v7, %v5047_v31  ;;  %v4054_v7 = vld [vmem:[%s5672_s4 + $0xb] ss:$0 sm:$0xff] }
 0x873   :  { %v1347_v11 = vsel %vm297_vm2, %v1346_v10, -inf }
 0x874   :  { %1348 = vmax.xlane.f32.xlu0 %v1347_v11  ;;  %v4059_v11 = vld [vmem:[%s5674_s5 + $0x18] sm:$0xff] }
 0x901   :  { %v1349_v12 = vpop.xlane.xlu0 %1348 }
 0x902   :  { %v1350_v13 = vsub.f32 %v1346_v10, %v1349_v12 }
 0x904   :  { %v1351_v16 = vmul.f32 1.442695, %v1350_v13 }
 0x906   :  { %4868 = vpow2.f32 %v1351_v16 }
 0x910   :  { %v4869_v17 = vpop.eup %4868 }
 0x911   :  { %v1353_v18 = vsel %vm297_vm2, %v4869_v17, 0.0 }
 0x912   :  { %1354 = vadd.xlane.f32.xlu1 %v1353_v18  ;;  %v2004_v18 = vld [vmem:[%s5675_s7 + $0x8] sm:$0xff] }
 0x99f   :  { %v1355_v24 = vpop.xlane.xlu1 %1354 }
 0x9a0   :  { %4870 = vrcp.f32 %v1355_v24  ;;  %v4065_v24 = vld [vmem:[%s5675_s7 + $0x88] sm:$0xff] }
 0x9aa   :  { %v4871_v25 = vpop.eup %4870 }
 0x9ab   :  { %v1357_v26 = vmul.f32 %v4871_v25, %v4869_v17  ;;  %v2003_v17 = vld [vmem:[%s5675_s7] sm:$0xff]  ;;  %v4792_v25 = vpack.c.bf16 %v4065_v24, %v4064_v23 }
 0x9ac   :  { %v4786_v19 = vpack.c.bf16 %v2004_v18, %v2003_v17  ;;  %v4091_v17 = vld [vmem:[%s5675_s7 + $0xb8] sm:$0xff]  ;;  %v4093_v23 = vld [vmem:[%s5678_s8 + $0x5] ss:$0 sm:$0xff]  ;;  %v4086_v24 = vld [vmem:[%s5678_s8 + $0x1] ss:$0 sm:$0xff] }
 0x9ad   :  { %4466 = vmatmul.mubr.msk.f32.vlgmr.msra.gmra.mrb[18].mxu1 %vm297_vm2, %v1357_v26  ;;  %v4066_v26 = vld [vmem:[%s5675_s7 + $0x90] sm:$0xff] }
 0x9ae   :  { %4481 = vmatprep.mubr.msk.f32.mxu1 %vm4896_vm0, %v4897_v8  ;;  %4769 = vmatpush3.bf16.msra.mxu1 %v4768_v29  ;;  %v4795_v30 = vpack.c.bf16 %v4067_v27, %v4066_v26 }
 0x9af   :  { %4770 = vmatprep.subr.bf16.mxu1 %v4895_v0 }
 0x9b2   :  { %4772 = vmatpush3.bf16.msra.mxu1 %v4771_v33 }
 0x9b3   :  { %4779 = vmatprep.subr.bf16.mxu1 %v4895_v0 }
 0x9b5   :  { %4482 = vmatmul.mubr.msk.f32.vlgmr.msra.gmra.mrb[20].mxu1 %vm54_vm1, %v5003_v15 }
 0x9b6   :  { %4503 = vmatprep.mubr.msk.f32.mxu1 %vm4896_vm0, %v4897_v8  ;;  %4781 = vmatpush3.bf16.msra.mxu1 %v4780_v56 }
 0x9b7   :  { %4782 = vmatprep.subr.bf16.mxu1 %v4895_v0 }
 0xa80   :  { %v1427_v39 = vpop.f32.mrb[18].mxu1 }
 0xa81   :  { %v4467_v40 = vpop.f32.mrb[19].mxu1  ;;  %4471 = vmatmul.mubr.msk.f32.vlgmr.msra.gmra.mrb[14].mxu0 %vm297_vm2, %v1427_v39  ;;  %v4069_v39 = vld [vmem:[%s5678_s8 + $0x4] ss:$0 sm:$0xff] }
 0xa82   :  { %4775 = vmatpush3.bf16.msra.mxu0 %v4774_v36  ;;  %4492 = vmatprep.mubr.msk.f32.mxu0 %vm4896_vm0, %v4897_v8  ;;  %v4062_v40 = vld [vmem:[%s5678_s8] ss:$0 sm:$0xff] }
 0xa83   :  { %4776 = vmatprep.subr.bf16.mxu0 %v4895_v0 }
 0xa86   :  { %4778 = vmatpush3.bf16.msra.mxu0 %v4777_v41 }
 0xa87   :  { %4506 = vmatprep.subr.mxu0 %v4897_v8 }
 0xa88   :  { %v1586_v42 = vpop.f32.mrb[20].mxu1 }
 0xa89   :  { %4493 = vmatmul.mubr.msk.f32.vlgmr.msra.gmra.mrb[16].mxu0 %vm54_vm1, %v4998_v14  ;;  %v4483_v43 = vpop.f32.mrb[21].mxu1  ;;  %v1587_v52 = vadd.f32 %v4040_v48, %v1586_v42 }
 0xa8a   :  { %4508 = vmatprep.mubr.msk.f32.mxu0 %vm4896_vm0, %v4897_v8 }
 0xb54   :  { %v1502_v44 = vpop.f32.mrb[14].mxu0 }
 0xb55   :  { %v5269_v45 = vadd.f32 %v1502_v44, %v5189_v57  ;;  %v4472_v46 = vpop.f32.mrb[15].mxu0  ;;  %v4052_v57 = vld [vmem:[%s5669_s3 + $0x178] sm:$0xff] }
 0xb56   :  { %v4783_v58 = vpack.c.bf16 %v4052_v57, %v4051_v55  ;;  %v4072_v46 = vld [vmem:[%s5675_s7 + $0x108] sm:$0xff] }
 0xb58   :  { %4784 = vmatpush3.bf16.msra.mxu1 %v4783_v58 }
 0xb59   :  { %4516 = vmatprep.subr.mxu1 %v4897_v8 }
 0xb5b   :  { %4504 = vmatmul.mubr.msk.f32.vlgmr.msra.gmra.mrb[22].mxu1 %vm54_vm1, %v4998_v14 }
 0xb5c   :  { %v1669_v49 = vpop.f32.mrb[16].mxu0  ;;  %4518 = vmatprep.mubr.msk.f32.mxu1 %vm4896_vm0, %v4897_v8  ;;  %4517 = vmatpush3.msra.mxu1 %v4059_v11  ;;  %v4089_v11 = vld [vmem:[%s5675_s7 + $0xa8] sm:$0xff] }
 0xb5d   :  { %v1670_v50 = vadd.f32 %v4047_v47, %v1669_v49  ;;  %v4494_v51 = vpop.f32.mrb[17].mxu0  ;;  %4791 = vmatprep.subr.bf16.mxu1 %v4895_v0  ;;  %v4073_v47 = vld [vmem:[%s5675_s7 + $0x110] sm:$0xff]  ;;  %v4074_v49 = vld [vmem:[%s5675_s7 + $0x118] sm:$0xff] }
 0xb5f   :  { %4507 = vmatpush3.xpose.msk.msra.mxu0 %vm297_vm2, %v1670_v50  ;;  %v4801_v50 = vpack.c.bf16 %v4074_v49, %v4073_v47  ;;  %v4100_v47 = vld [vmem:[%s5678_s8 + $0x9] ss:$0 sm:$0xff] }
 0xb60   :  { %4511 = vmatprep.subr.mxu0 %v4897_v8 }
 0xb62   :  { %4509 = vmatmul.mubr.msk.f32.vlgmr.msra.gmra.mrb[18].mxu0 %vm297_vm2, %v1587_v52 }
 0xb63   :  { %4513 = vmatprep.mubr.msk.f32.mxu0 %vm4896_vm0, %v4897_v8 }
 0xc2e   :  { %v1752_v6 = vpop.f32.mrb[22].mxu1 }
 0xc2f   :  { %v4505_v9 = vpop.f32.mrb[23].mxu1  ;;  %v1753_v10 = vadd.f32 %v4054_v7, %v1752_v6  ;;  %v4084_v6 = vld [vmem:[%s5675_s7 + $0x38] sm:$0xff] }
 0xc31   :  { %4512 = vmatpush3.msra.mxu0 %v1753_v10  ;;  %v4088_v10 = vld [vmem:[%s5675_s7 + $0xa0] sm:$0xff] }
 0xc32   :  { %4785 = vmatprep.subr.bf16.mxu0 %v4895_v0 }
 0xc35   :  { %v1828_v59 = vpop.f32.mrb[18].mxu0 }
 0xc36   :  { %v1832_v60 = vmul.f32 0.35355338, %v1828_v59  ;;  %v4510_v61 = vpop.f32.mrb[19].mxu0 }
 0xc38   :  { %v1833_v62 = vadd.f32 %v1832_v60, %v5047_v31 }
 0xc3a   :  { %v1834_v63 = vsel %vm297_vm2, %v1833_v62, -inf }
 0xc3b   :  { %1835 = vmax.xlane.f32.xlu0 %v1834_v63 }
 0xcc8   :  { %v1836_v1 = vpop.xlane.xlu0 %1835 }
 0xcc9   :  { %v1837_v2 = vsub.f32 %v1833_v62, %v1836_v1  ;;  %v4076_v62 = vld [vmem:[%s5678_s8 + $0x8] ss:$0 sm:$0xff] }
 0xccb   :  { %v1838_v3 = vmul.f32 1.442695, %v1837_v2  ;;  %v4081_v2 = vld [vmem:[%s5675_s7 + $0x20] sm:$0xff] }
 0xccd   :  { %4872 = vpow2.f32 %v1838_v3  ;;  %v4082_v3 = vld [vmem:[%s5675_s7 + $0x28] sm:$0xff] }
 0xcd7   :  { %v4873_v4 = vpop.eup %4872 }
 0xcd8   :  { %v1840_v5 = vsel %vm297_vm2, %v4873_v4, 0.0 }
 0xcd9   :  { %1841 = vadd.xlane.f32.xlu1 %v1840_v5  ;;  %v4083_v5 = vld [vmem:[%s5675_s7 + $0x30] sm:$0xff] }
 0xcda   :  { %v4807_v7 = vpack.c.bf16 %v4084_v6, %v4083_v5 }
 0xd66   :  { %v1842_v12 = vpop.xlane.xlu1 %1841 }
 0xd67   :  { %4874 = vrcp.f32 %v1842_v12 }
 0xd71   :  { %v4875_v13 = vpop.eup %4874 }
 0xd72   :  { %v1844_v16 = vmul.f32 %v4875_v13, %v4873_v4  ;;  %v4804_v4 = vpack.c.bf16 %v4082_v3, %v4081_v2  ;;  %v4810_v13 = vpack.c.bf16 %v4089_v11, %v4088_v10 }
 0xd74   :  { %4514 = vmatmul.mubr.msk.f32.vlgmr.msra.gmra.mrb[20].mxu0 %vm297_vm2, %v1844_v16 }
 0xd75   :  { %4529 = vmatprep.mubr.msk.f32.mxu0 %vm4896_vm0, %v4897_v8  ;;  %4787 = vmatpush3.bf16.msra.mxu0 %v4786_v19 }
 0xd76   :  { %4788 = vmatprep.subr.bf16.mxu0 %v4895_v0 }
 0xd79   :  { %4790 = vmatpush3.bf16.msra.mxu0 %v4789_v22 }
 0xd7a   :  { %4797 = vmatprep.subr.bf16.mxu0 %v4895_v0 }
 0xd7c   :  { %4530 = vmatmul.mubr.msk.f32.vlgmr.msra.gmra.mrb[22].mxu0 %vm54_vm1, %v4998_v14 }
 0xd7d   :  { %4551 = vmatprep.mubr.msk.f32.mxu0 %vm4896_vm0, %v4897_v8 }
 0xe47   :  { %v1914_v28 = vpop.f32.mrb[20].mxu0 }
 0xe48   :  { %v4515_v29 = vpop.f32.mrb[21].mxu0  ;;  %4519 = vmatmul.mubr.msk.f32.vlgmr.msra.gmra.mrb[24].mxu1 %vm297_vm2, %v1914_v28 }
 0xe49   :  { %4793 = vmatpush3.bf16.msra.mxu1 %v4792_v25  ;;  %4540 = vmatprep.mubr.msk.f32.mxu1 %vm4896_vm0, %v4897_v8  ;;  %v4095_v29 = vld [vmem:[%s5675_s7 + $0x120] sm:$0xff] }
 0xe4a   :  { %4794 = vmatprep.subr.bf16.mxu1 %v4895_v0 }
 0xe4d   :  { %4796 = vmatpush3.bf16.msra.mxu1 %v4795_v30  ;;  %v4096_v30 = vld [vmem:[%s5675_s7 + $0x128] sm:$0xff] }
 0xe4e   :  { %4554 = vmatprep.subr.mxu1 %v4897_v8 }
 0xe4f   :  { %v2080_v32 = vpop.f32.mrb[22].mxu0 }
 0xe50   :  { %4541 = vmatmul.mubr.msk.f32.vlgmr.msra.gmra.mrb[26].mxu1 %vm54_vm1, %v5003_v15  ;;  %v4531_v33 = vpop.f32.mrb[23].mxu0  ;;  %v2081_v44 = vadd.f32 %v4062_v40, %v2080_v32  ;;  %v4097_v32 = vld [vmem:[%s5675_s7 + $0x130] sm:$0xff] }
 0xe51   :  { %4556 = vmatprep.mubr.msk.f32.mxu1 %vm4896_vm0, %v4897_v8  ;;  %v4816_v33 = vpack.c.bf16 %v4096_v30, %v4095_v29 }
 0xf1b   :  { %v1989_v34 = vpop.f32.mrb[24].mxu1 }
 0xf1c   :  { %v1993_v36 = vadd.f32 %v1989_v34, %v5269_v45  ;;  %v4520_v37 = vpop.f32.mrb[25].mxu1  ;;  %v4071_v45 = vld [vmem:[%s5675_s7 + $0x100] sm:$0xff]  ;;  %v4098_v34 = vld [vmem:[%s5675_s7 + $0x138] sm:$0xff] }
 0xf1d   :  { %v4798_v48 = vpack.c.bf16 %v4072_v46, %v4071_v45 }
 0xf1e   :  { %v2001_v38 = vadd.f32 %v4061_v35, %v1993_v36  ;;  %v4819_v35 = vpack.c.bf16 %v4098_v34, %v4097_v32 }
 0xf1f   :  { %4799 = vmatpush3.bf16.msra.mxu0 %v4798_v48 }
 0xf20   :  { %2002 = vst.msk [vmem:[%s5677_s11] sm:$0xff] %vm54_vm1, %v2001_v38  ;;  %4800 = vmatprep.subr.bf16.mxu0 %v4895_v0 }
 0xf23   :  { %v2163_v41 = vpop.f32.mrb[26].mxu1  ;;  %4802 = vmatpush3.bf16.msra.mxu0 %v4801_v50  ;;  %v4105_v50 = vld [vmem:[%s5679_s9 + $0x8] sm:$0xff] }
 0xf24   :  { %v2164_v42 = vadd.f32 %v4069_v39, %v2163_v41  ;;  %v4542_v43 = vpop.f32.mrb[27].mxu1  ;;  %4803 = vmatprep.subr.bf16.mxu0 %v4895_v0 }
 0xf26   :  { %4555 = vmatpush3.xpose.msk.msra.mxu1 %vm297_vm2, %v2164_v42  ;;  %4552 = vmatmul.mubr.msk.f32.vlgmr.msra.gmra.mrb[24].mxu0 %vm54_vm1, %v5003_v15 }
 0xf27   :  { %4559 = vmatprep.subr.mxu1 %v4897_v8  ;;  %4572 = vmatprep.mubr.msk.f32.mxu0 %vm4896_vm0, %v4897_v8 }
 0xf28   :  { %4805 = vmatpush3.bf16.msra.mxu0 %v4804_v4 }
 0xf29   :  { %4557 = vmatmul.mubr.msk.f32.vlgmr.msra.gmra.mrb[28].mxu1 %vm297_vm2, %v2081_v44  ;;  %4806 = vmatprep.subr.bf16.mxu0 %v4895_v0 }
 0xf2a   :  { %4561 = vmatprep.mubr.msk.f32.mxu1 %vm4896_vm0, %v4897_v8 }
 0xf2c   :  { %4808 = vmatpush3.bf16.msra.mxu0 %v4807_v7  ;;  %v5524_v7 = vld [vmem:[%s5670_s1] sm:$0xff] }
 0xf2d   :  { %4815 = vmatprep.subr.bf16.mxu0 %v4895_v0 }
 0xf2f   :  { %4573 = vmatmul.mubr.msk.f32.vlgmr.msra.gmra.mrb[26].mxu0 %vm54_vm1, %v4998_v14  ;;  %v4090_v14 = vld [vmem:[%s5675_s7 + $0xb0] sm:$0xff] }
 0xf30   :  { %4594 = vmatprep.mubr.msk.f32.mxu0 %vm4896_vm0, %v4897_v8  ;;  %v4813_v18 = vpack.c.bf16 %v4091_v17, %v4090_v14  ;;  %4817 = vmatpush3.bf16.msra.mxu0 %v4816_v33  ;;  %v4113_v17 = vld [vmem:[%s5678_s8 + $0x2] ss:$0 sm:$0xff] }
 0xf31   :  { %4818 = vmatprep.subr.bf16.mxu0 %v4895_v0 }
 0xf34   :  { %4820 = vmatpush3.bf16.msra.mxu0 %v4819_v35 }
 0xf35   :  { %4607 = vmatprep.subr.mxu0 %v4897_v8 }
 0xf37   :  { %4595 = vmatmul.mubr.msk.f32.vlgmr.msra.gmra.mrb[28].mxu0 %vm54_vm1, %v5003_v15 }
 0xf38   :  { %4609 = vmatprep.mubr.msk.f32.mxu0 %vm4896_vm0, %v4897_v8  ;;  %4608 = vmatpush3.msra.mxu0 %v4105_v50  ;;  %v4137_v50 = vld [vmem:[%s5675_s7 + $0x78] sm:$0xff] }
 0xf39   :  { %4821 = vmatprep.subr.bf16.mxu0 %v4895_v0 }
 0xff9   :  { %v2246_v61 = vpop.f32.mrb[24].mxu0 }
 0xffa   :  { %v4553_v63 = vpop.f32.mrb[25].mxu0  ;;  %v2247_v1 = vadd.f32 %v4076_v62, %v2246_v61  ;;  %v4108_v61 = vld [vmem:[%s5675_s7 + $0x40] sm:$0xff]  ;;  %v4109_v62 = vld [vmem:[%s5675_s7 + $0x48] sm:$0xff] }
 0xffb   :  { %v4822_v63 = vpack.c.bf16 %v4109_v62, %v4108_v61 }
 0xffc   :  { %v2322_v51 = vpop.f32.mrb[28].mxu1  ;;  %4560 = vmatpush3.msra.mxu1 %v2247_v1  ;;  %v4110_v1 = vld [vmem:[%s5675_s7 + $0x50] sm:$0xff] }
 0xffd   :  { %v2326_v52 = vmul.f32 0.35355338, %v2322_v51  ;;  %v4558_v53 = vpop.f32.mrb[29].mxu1  ;;  %4809 = vmatprep.subr.bf16.mxu1 %v4895_v0 }
 0xfff   :  { %v2327_v54 = vadd.f32 %v2326_v52, %v5047_v31 }
0x1001   :  { %v2328_v55 = vsel %vm297_vm2, %v2327_v54, -inf }
0x1002   :  { %2329 = vmax.xlane.f32.xlu0 %v2328_v55  ;;  %v2492_v19 = vpop.f32.mrb[26].mxu0  ;;  %v4115_v55 = vld [vmem:[%s5675_s7 + $0xc0] sm:$0xff] }
0x1003   :  { %v4574_v20 = vpop.f32.mrb[27].mxu0  ;;  %v2493_v28 = vadd.f32 %v4086_v24, %v2492_v19 }
0x100a   :  { %v2658_v46 = vpop.f32.mrb[28].mxu0 }
0x100b   :  { %v4596_v48 = vpop.f32.mrb[29].mxu0  ;;  %v2659_v49 = vadd.f32 %v4100_v47, %v2658_v46  ;;  %v4134_v46 = vld [vmem:[%s5675_s7 + $0x60] sm:$0xff]  ;;  %v4135_v47 = vld [vmem:[%s5675_s7 + $0x68] sm:$0xff] }
0x100c   :  { %v4840_v48 = vpack.c.bf16 %v4135_v47, %v4134_v46 }
0x108f   :  { %v2330_v56 = vpop.xlane.xlu0 %2329 }
0x1090   :  { %v2331_v57 = vsub.f32 %v2327_v54, %v2330_v56  ;;  %v2412_v54 = vld [vmem:[%s5679_s9] sm:$0xff]  ;;  %v4116_v56 = vld [vmem:[%s5675_s7 + $0xc8] sm:$0xff] }
0x1092   :  { %v2332_v58 = vmul.f32 1.442695, %v2331_v57  ;;  %v4828_v57 = vpack.c.bf16 %v4116_v56, %v4115_v55  ;;  %v4143_v55 = vld [vmem:[%s5675_s7 + $0xf0] sm:$0xff]  ;;  %v4144_v56 = vld [vmem:[%s5675_s7 + $0xf8] sm:$0xff] }
0x1094   :  { %4876 = vpow2.f32 %v2332_v58  ;;  %v4117_v58 = vld [vmem:[%s5675_s7 + $0xd0] sm:$0xff] }
0x109e   :  { %v4877_v59 = vpop.eup %4876 }
0x109f   :  { %v2334_v60 = vsel %vm297_vm2, %v4877_v59, 0.0 }
0x10a0   :  { %2335 = vadd.xlane.f32.xlu1 %v2334_v60 }
0x112d   :  { %v2336_v9 = vpop.xlane.xlu1 %2335 }
0x112e   :  { %4878 = vrcp.f32 %v2336_v9  ;;  %v4120_v9 = vld [vmem:[%s5678_s8 + $0x6] ss:$0 sm:$0xff] }
0x1138   :  { %v4879_v12 = vpop.eup %4878 }
0x1139   :  { %v2338_v16 = vmul.f32 %v4879_v12, %v4877_v59  ;;  %v4118_v59 = vld [vmem:[%s5675_s7 + $0xd8] sm:$0xff] }
0x113a   :  { %v4831_v60 = vpack.c.bf16 %v4118_v59, %v4117_v58  ;;  %v4849_v59 = vpack.c.bf16 %v4144_v56, %v4143_v55 }
0x113b   :  { %4562 = vmatmul.mubr.msk.f32.vlgmr.msra.gmra.mrb[30].mxu1 %vm297_vm2, %v2338_v16 }
0x113c   :  { %4811 = vmatpush3.bf16.msra.mxu1 %v4810_v13  ;;  %4583 = vmatprep.mubr.msk.f32.mxu1 %vm4896_vm0, %v4897_v8 }
0x113d   :  { %4812 = vmatprep.subr.bf16.mxu1 %v4895_v0 }
0x1140   :  { %4814 = vmatpush3.bf16.msra.mxu1 %v4813_v18 }
0x1141   :  { %4597 = vmatprep.subr.mxu1 %v4897_v8 }
0x1143   :  { %4584 = vmatmul.mubr.msk.f32.vlgmr.msra.gmra.mrb[32].mxu1 %vm54_vm1, %v5003_v15 }
0x1144   :  { %4599 = vmatprep.mubr.msk.f32.mxu1 %vm4896_vm0, %v4897_v8 }
0x120e   :  { %v2408_v21 = vpop.f32.mrb[30].mxu1 }
0x120f   :  { %v4563_v22 = vpop.f32.mrb[31].mxu1 }
0x1210   :  { %v4123_v22 = vld [vmem:[%s5675_s7 + $0x148] sm:$0xff] }
0x1216   :  { %v2575_v25 = vpop.f32.mrb[32].mxu1 }
0x1217   :  { %v2576_v26 = vadd.f32 %v4093_v23, %v2575_v25  ;;  %v4585_v27 = vpop.f32.mrb[33].mxu1  ;;  %v4124_v23 = vld [vmem:[%s5675_s7 + $0x150] sm:$0xff]  ;;  %v4125_v25 = vld [vmem:[%s5675_s7 + $0x158] sm:$0xff] }
0x1218   :  { %v5560_v27 = vld [vmem:[%s5671_s0] sm:$0xff] }
0x1219   :  { %4598 = vmatpush3.xpose.msk.msra.mxu1 %vm297_vm2, %v2576_v26  ;;  %v4837_v26 = vpack.c.bf16 %v4125_v25, %v4124_v23  ;;  %v4153_v25 = vld [vmem:[%s5678_s8 + $0xb] ss:$0 sm:$0xff] }
0x121a   :  { %4602 = vmatprep.subr.mxu1 %v4897_v8 }
0x121c   :  { %4600 = vmatmul.mubr.msk.f32.vlgmr.msra.gmra.mrb[34].mxu1 %vm297_vm2, %v2493_v28 }
0x121d   :  { %4604 = vmatprep.mubr.msk.f32.mxu1 %vm4896_vm0, %v4897_v8  ;;  %4603 = vmatpush3.msra.mxu1 %v2659_v49  ;;  %v4136_v49 = vld [vmem:[%s5675_s7 + $0x70] sm:$0xff] }
0x121e   :  { %4612 = vmatprep.subr.mxu1 %v4897_v8 }
0x12ef   :  { %v2734_v36 = vpop.f32.mrb[34].mxu1 }
0x12f0   :  { %v2738_v37 = vmul.f32 0.35355338, %v2734_v36  ;;  %v4601_v38 = vpop.f32.mrb[35].mxu1 }
0x12f2   :  { %v2739_v39 = vadd.f32 %v2738_v37, %v5047_v31 }
0x12f4   :  { %v2740_v40 = vsel %vm297_vm2, %v2739_v39, -inf }
0x12f5   :  { %2741 = vmax.xlane.f32.xlu0 %v2740_v40  ;;  %v4127_v40 = vld [vmem:[%s5678_s8 + $0xa] ss:$0 sm:$0xff] }
0x1382   :  { %v2742_v41 = vpop.xlane.xlu0 %2741 }
0x1383   :  { %v2743_v42 = vsub.f32 %v2739_v39, %v2742_v41 }
0x1385   :  { %v2744_v43 = vmul.f32 1.442695, %v2743_v42 }
0x1387   :  { %4880 = vpow2.f32 %v2744_v43 }
0x1391   :  { %v4881_v44 = vpop.eup %4880 }
0x1392   :  { %v2746_v45 = vsel %vm297_vm2, %v4881_v44, 0.0 }
0x1393   :  { %2747 = vadd.xlane.f32.xlu1 %v2746_v45 }
0x1420   :  { %v2748_v51 = vpop.xlane.xlu1 %2747 }
0x1421   :  { %4882 = vrcp.f32 %v2748_v51  ;;  %v4843_v51 = vpack.c.bf16 %v4137_v50, %v4136_v49 }
0x142b   :  { %v4883_v52 = vpop.eup %4882 }
0x142c   :  { %v2750_v53 = vmul.f32 %v4883_v52, %v4881_v44  ;;  %v4141_v52 = vld [vmem:[%s5675_s7 + $0xe0] sm:$0xff] }
0x142e   :  { %4605 = vmatmul.mubr.msk.f32.vlgmr.msra.gmra.mrb[36].mxu1 %vm297_vm2, %v2750_v53  ;;  %v4142_v53 = vld [vmem:[%s5675_s7 + $0xe8] sm:$0xff] }
0x142f   :  { %4613 = vmatpush3.msra.mxu1 %v2412_v54  ;;  %4614 = vmatprep.mubr.msk.f32.mxu1 %vm4896_vm0, %v4897_v8  ;;  %v4846_v54 = vpack.c.bf16 %v4142_v53, %v4141_v52 }
0x1430   :  { %4827 = vmatprep.subr.bf16.mxu1 %v4895_v0 }
0x1432   :  { %4615 = vmatmul.mubr.msk.f32.vlgmr.msra.gmra.mrb[38].mxu1 %vm297_vm2, %v2408_v21  ;;  %v4122_v21 = vld [vmem:[%s5675_s7 + $0x140] sm:$0xff] }
0x1433   :  { %4829 = vmatpush3.bf16.msra.mxu1 %v4828_v57  ;;  %4636 = vmatprep.mubr.msk.f32.mxu1 %vm4896_vm0, %v4897_v8  ;;  %v4834_v24 = vpack.c.bf16 %v4123_v22, %v4122_v21 }
0x1434   :  { %4830 = vmatprep.subr.bf16.mxu1 %v4895_v0 }
0x1437   :  { %4832 = vmatpush3.bf16.msra.mxu1 %v4831_v60 }
0x1438   :  { %4650 = vmatprep.subr.mxu1 %v4897_v8 }
0x143a   :  { %4637 = vmatmul.mubr.msk.f32.vlgmr.msra.gmra.mrb[40].mxu1 %vm54_vm1, %v5003_v15  ;;  %v4111_v15 = vld [vmem:[%s5675_s7 + $0x58] sm:$0xff] }
0x143b   :  { %4652 = vmatprep.mubr.msk.f32.mxu1 %vm4896_vm0, %v4897_v8  ;;  %v4825_v4 = vpack.c.bf16 %v4111_v15, %v4110_v1  ;;  %v4146_v15 = vld [vmem:[%s5678_s8 + $0x7] ss:$0 sm:$0xff] }
0x1501   :  { %v2820_v2 = vpop.f32.mrb[36].mxu1 }
0x1502   :  { %v4606_v3 = vpop.f32.mrb[37].mxu1  ;;  %4610 = vmatmul.mubr.msk.f32.vlgmr.msra.gmra.mrb[30].mxu0 %vm297_vm2, %v2820_v2  ;;  %v4139_v2 = vld [vmem:[%s5678_s8 + $0x3] ss:$0 sm:$0xff] }
0x1503   :  { %4823 = vmatpush3.bf16.msra.mxu0 %v4822_v63  ;;  %4625 = vmatprep.mubr.msk.f32.mxu0 %vm4896_vm0, %v4897_v8 }
0x1504   :  { %4824 = vmatprep.subr.bf16.mxu0 %v4895_v0 }
0x1505   :  { %v2968_v5 = vpop.f32.mrb[38].mxu1 }
0x1506   :  { %v4616_v6 = vpop.f32.mrb[39].mxu1 }
0x1507   :  { %4826 = vmatpush3.bf16.msra.mxu0 %v4825_v4 }
0x1508   :  { %4833 = vmatprep.subr.bf16.mxu0 %v4895_v0 }
0x150a   :  { %4626 = vmatmul.mubr.msk.f32.vlgmr.msra.gmra.mrb[32].mxu0 %vm54_vm1, %v5524_v7 }
0x150b   :  { %4647 = vmatprep.mubr.msk.f32.mxu0 %vm4896_vm0, %v4897_v8  ;;  %4835 = vmatpush3.bf16.msra.mxu0 %v4834_v24 }
0x150c   :  { %4836 = vmatprep.subr.bf16.mxu0 %v4895_v0 }
0x150d   :  { %v3134_v10 = vpop.f32.mrb[40].mxu1 }
0x150e   :  { %v3135_v11 = vadd.f32 %v4120_v9, %v3134_v10  ;;  %v4638_v12 = vpop.f32.mrb[41].mxu1  ;;  %v4149_v9 = vld [vmem:[%s5675_s7 + $0x168] sm:$0xff]  ;;  %v4150_v10 = vld [vmem:[%s5675_s7 + $0x170] sm:$0xff] }
0x150f   :  { %4838 = vmatpush3.bf16.msra.mxu0 %v4837_v26  ;;  %v4151_v12 = vld [vmem:[%s5675_s7 + $0x178] sm:$0xff] }
0x1510   :  { %4651 = vmatpush3.xpose.msk.msra.mxu1 %vm297_vm2, %v3135_v11  ;;  %4660 = vmatprep.subr.mxu0 %v4897_v8 }
0x1511   :  { %4655 = vmatprep.subr.mxu1 %v4897_v8 }
0x1512   :  { %4648 = vmatmul.mubr.msk.f32.vlgmr.msra.gmra.mrb[34].mxu0 %vm54_vm1, %v5560_v27 }
0x1513   :  { %4662 = vmatprep.mubr.msk.f32.mxu0 %vm4896_vm0, %v4897_v8 }
0x15d5   :  { %v2895_v13 = vpop.f32.mrb[30].mxu0 }
0x15d6   :  { %v5535_v16 = vadd.f32 %v2968_v5, %v2895_v13  ;;  %v4611_v14 = vpop.f32.mrb[31].mxu0  ;;  %v4855_v13 = vpack.c.bf16 %v4151_v12, %v4150_v10 }
0x15dd   :  { %v3051_v18 = vpop.f32.mrb[32].mxu0 }
0x15de   :  { %v3052_v19 = vadd.f32 %v4113_v17, %v3051_v18  ;;  %v4627_v20 = vpop.f32.mrb[33].mxu0  ;;  %v4894_v18 = vld [vmem:[%s5673_s2] sm:$0xff] }
0x15e0   :  { %4653 = vmatmul.mubr.msk.f32.vlgmr.msra.gmra.mrb[42].mxu1 %vm297_vm2, %v3052_v19 }
0x15e1   :  { %4657 = vmatprep.mubr.msk.f32.mxu1 %vm4896_vm0, %v4897_v8 }
0x15e5   :  { %v3217_v39 = vpop.f32.mrb[34].mxu0 }
0x15e6   :  { %v4649_v41 = vpop.f32.mrb[35].mxu0  ;;  %v3218_v42 = vadd.f32 %v4127_v40, %v3217_v39 }
0x15e8   :  { %4656 = vmatpush3.msra.mxu1 %v3218_v42 }
0x15e9   :  { %4839 = vmatprep.subr.bf16.mxu1 %v4895_v0 }
0x16b3   :  { %v3293_v28 = vpop.f32.mrb[42].mxu1 }
0x16b4   :  { %v3297_v29 = vmul.f32 0.35355338, %v3293_v28  ;;  %v4654_v30 = vpop.f32.mrb[43].mxu1  ;;  %v4158_v28 = vld [vmem:[%s5679_s9 + $0x18] sm:$0xff] }
0x16b6   :  { %v3298_v32 = vadd.f32 %v3297_v29, %v5047_v31  ;;  %v4132_v31 = vld [vmem:[%s5679_s9 + $0x10] sm:$0xff] }
0x16b7   :  { %4661 = vmatpush3.msra.mxu0 %v4132_v31 }
0x16b8   :  { %v3299_v33 = vsel %vm297_vm2, %v3298_v32, -inf  ;;  %4845 = vmatprep.subr.bf16.mxu0 %v4895_v0 }
0x16b9   :  { %3300 = vmax.xlane.f32.xlu0 %v3299_v33 }
0x1746   :  { %v3301_v34 = vpop.xlane.xlu0 %3300 }
0x1747   :  { %v3302_v35 = vsub.f32 %v3298_v32, %v3301_v34 }
0x1749   :  { %v3303_v36 = vmul.f32 1.442695, %v3302_v35 }
0x174b   :  { %4884 = vpow2.f32 %v3303_v36  ;;  %v4160_v36 = vld [vmem:[%s5680_s10] ss:$0 sm:$0xff] }
0x1755   :  { %v4885_v37 = vpop.eup %4884 }
0x1756   :  { %v3305_v38 = vsel %vm297_vm2, %v4885_v37, 0.0 }
0x1757   :  { %3306 = vadd.xlane.f32.xlu1 %v3305_v38 }
0x17e4   :  { %v3307_v43 = vpop.xlane.xlu1 %3306 }
0x17e5   :  { %4886 = vrcp.f32 %v3307_v43 }
0x17ef   :  { %v4887_v44 = vpop.eup %4886 }
0x17f0   :  { %v3309_v45 = vmul.f32 %v4887_v44, %v4885_v37 }
0x17f2   :  { %4658 = vmatmul.mubr.msk.f32.vlgmr.msra.gmra.mrb[44].mxu1 %vm297_vm2, %v3309_v45 }
0x17f3   :  { %4673 = vmatprep.mubr.msk.f32.mxu1 %vm4896_vm0, %v4897_v8  ;;  %4841 = vmatpush3.bf16.msra.mxu1 %v4840_v48 }
0x17f4   :  { %4842 = vmatprep.subr.bf16.mxu1 %v4895_v0 }
0x17f7   :  { %4844 = vmatpush3.bf16.msra.mxu1 %v4843_v51 }
0x17f8   :  { %4851 = vmatprep.subr.bf16.mxu1 %v4895_v0 }
0x17fa   :  { %4674 = vmatmul.mubr.msk.f32.vlgmr.msra.gmra.mrb[46].mxu1 %vm54_vm1, %v5524_v7  ;;  %v4148_v7 = vld [vmem:[%s5675_s7 + $0x160] sm:$0xff] }
0x17fb   :  { %4695 = vmatprep.mubr.msk.f32.mxu1 %vm4896_vm0, %v4897_v8  ;;  %v4852_v11 = vpack.c.bf16 %v4149_v9, %v4148_v7 }
0x17fd   :  { %4853 = vmatpush3.bf16.msra.mxu1 %v4852_v11 }
0x17fe   :  { %4854 = vmatprep.subr.bf16.mxu1 %v4895_v0 }
0x1801   :  { %4856 = vmatpush3.bf16.msra.mxu1 %v4855_v13 }
0x1802   :  { %4708 = vmatprep.subr.mxu1 %v4897_v8 }
0x1804   :  { %4696 = vmatmul.mubr.msk.f32.vlgmr.msra.gmra.mrb[48].mxu1 %vm54_vm1, %v5560_v27 }
0x1805   :  { %4710 = vmatprep.mubr.msk.f32.mxu1 %vm4896_vm0, %v4897_v8  ;;  %4709 = vmatpush3.msra.mxu1 %v4158_v28 }
0x18c5   :  { %v3379_v57 = vpop.f32.mrb[44].mxu1 }
0x18c6   :  { %v4659_v58 = vpop.f32.mrb[45].mxu1  ;;  %4663 = vmatmul.mubr.msk.f32.vlgmr.msra.gmra.mrb[36].mxu0 %vm297_vm2, %v3379_v57 }
0x18c7   :  { %4847 = vmatpush3.bf16.msra.mxu0 %v4846_v54  ;;  %4684 = vmatprep.mubr.msk.f32.mxu0 %vm4896_vm0, %v4897_v8 }
0x18c8   :  { %4848 = vmatprep.subr.bf16.mxu0 %v4895_v0 }
0x18cb   :  { %4850 = vmatpush3.bf16.msra.mxu0 %v4849_v59 }
0x18cc   :  { %4698 = vmatprep.subr.mxu0 %v4897_v8 }
0x18cd   :  { %v3538_v60 = vpop.f32.mrb[46].mxu1 }
0x18ce   :  { %4685 = vmatmul.mubr.msk.f32.vlgmr.msra.gmra.mrb[38].mxu0 %vm54_vm1, %v5560_v27  ;;  %v4675_v61 = vpop.f32.mrb[47].mxu1  ;;  %v3539_v6 = vadd.f32 %v4139_v2, %v3538_v60 }
0x18cf   :  { %4700 = vmatprep.mubr.msk.f32.mxu0 %vm4896_vm0, %v4897_v8 }
0x1999   :  { %v3454_v62 = vpop.f32.mrb[36].mxu0 }
0x199a   :  { %v3458_v63 = vadd.f32 %v3454_v62, %v5535_v16  ;;  %v4664_v1 = vpop.f32.mrb[37].mxu0 }
0x19a1   :  { %v3621_v3 = vpop.f32.mrb[38].mxu0 }
0x19a2   :  { %v3622_v4 = vadd.f32 %v4146_v15, %v3621_v3  ;;  %v4686_v5 = vpop.f32.mrb[39].mxu0 }
0x19a4   :  { %4699 = vmatpush3.xpose.msk.msra.mxu0 %vm297_vm2, %v3622_v4 }
0x19a5   :  { %4703 = vmatprep.subr.mxu0 %v4897_v8 }
0x19a7   :  { %4701 = vmatmul.mubr.msk.f32.vlgmr.msra.gmra.mrb[40].mxu0 %vm297_vm2, %v3539_v6 }
0x19a8   :  { %4705 = vmatprep.mubr.msk.f32.mxu0 %vm4896_vm0, %v4897_v8  ;;  %v3704_v8 = vpop.f32.mrb[48].mxu1 }
0x19a9   :  { %v4697_v26 = vpop.f32.mrb[49].mxu1  ;;  %v3705_v27 = vadd.f32 %v4153_v25, %v3704_v8 }
0x19ab   :  { %4704 = vmatpush3.msra.mxu0 %v3705_v27 }
0x1a7a   :  { %v3780_v16 = vpop.f32.mrb[40].mxu0 }
0x1a7b   :  { %v3784_v14 = vmul.f32 0.35355338, %v3780_v16  ;;  %v4702_v17 = vpop.f32.mrb[41].mxu0 }
0x1a7d   :  { %v3785_v19 = vadd.f32 %v4894_v18, %v3784_v14 }
0x1a7f   :  { %v3786_v20 = vsel %vm297_vm2, %v3785_v19, -inf }
0x1a80   :  { %3787 = vmax.xlane.f32.xlu0 %v3786_v20 }
0x1b0d   :  { %v3788_v0 = vpop.xlane.xlu0 %3787 }
0x1b0e   :  { %v3789_v21 = vsub.f32 %v3785_v19, %v3788_v0 }
0x1b10   :  { %v3790_v22 = vmul.f32 1.442695, %v3789_v21 }
0x1b12   :  { %4888 = vpow2.f32 %v3790_v22 }
0x1b1c   :  { %v4889_v23 = vpop.eup %4888 }
0x1b1d   :  { %v3792_v24 = vsel %vm297_vm2, %v4889_v23, 0.0 }
0x1b1e   :  { %3793 = vadd.xlane.f32.xlu1 %v3792_v24 }
0x1bab   :  { %v3794_v29 = vpop.xlane.xlu1 %3793 }
0x1bac   :  { %4890 = vrcp.f32 %v3794_v29 }
0x1bb6   :  { %v4891_v30 = vpop.eup %4890 }
0x1bb7   :  { %v3796_v32 = vmul.f32 %v4891_v30, %v4889_v23 }
0x1bb9   :  { %4706 = vmatmul.mubr.msk.f32.vlgmr.msra.gmra.mrb[42].mxu0 %vm297_vm2, %v3796_v32 }
0x1c8c   :  { %v3866_v33 = vpop.f32.mrb[42].mxu0 }
0x1c8d   :  { %v4707_v34 = vpop.f32.mrb[43].mxu0  ;;  %4711 = vmatmul.mubr.msk.f32.vlgmr.msra.gmra.mrb[50].mxu1 %vm297_vm2, %v3866_v33 }
0x1d60   :  { %v3941_v35 = vpop.f32.mrb[50].mxu1 }
0x1d61   :  { %v3945_v37 = vadd.f32 %v3941_v35, %v3458_v63  ;;  %v4712_v38 = vpop.f32.mrb[51].mxu1 }
0x1d63   :  { %v3953_v39 = vadd.f32 %v4160_v36, %v3945_v37 }
0x1d65   :  { %3954 = vst.msk [vmem:[%s5681_s12] sm:$0xff] %vm54_vm1, %v3953_v39 }

// kernel: xxmodel_forward.5
= control target key start
LH: loop header
LB: loop body
LE: loop exit
PB: predicated region body
PF: predicated region fallthrough
CT: control target
= control target key end

     0   :  { %10 = vsyncpa [#allocation4], 0  ;;  %s6884_s0 = inlined_call_operand.vmem [shape: f32[4,768], index: 0, kind: input, shape index: {}]   ;;  %s6885_s1 = inlined_call_operand.hbm [shape: f32[768,2048], index: 1, kind: input, shape index: {}]   ;;  %s6886_s2 = inlined_call_operand.hbm [shape: f32[1,2048], index: 2, kind: input, shape index: {}]   ;;  %s6887_s3 = inlined_call_operand.hbm [shape: f32[2048,128], index: 3, kind: input, shape index: {}]   ;;  %s6888_s4 = inlined_call_operand.hbm [shape: f32[1,128], index: 4, kind: input, shape index: {}]   ;;  %s6889_s5 = inlined_call_operand.vmem [shape: f32[4,128], index: 5, kind: output, shape index: {}]  }
   0x1   :  { %11 = vsyncpa [#allocation6], 0 }
   0x2   :  { %12 = vsyncpa [#allocation9], 0  ;;  %s6569_s18 = smov [#allocation5]   ;;  %s6570_s20 = smov [#allocation3]  }
   0x3   :  { %s33_s19 = sshll.u32 %s6569_s18, 4  ;;  %s20_s21 = sshll.u32 %s6570_s20, 4  ;;  %s34_s19 = int_to_ptr.vmem [resolvable:$true] %s33_s19  ;;  %s6606_s21 = int_to_ptr.vmem [resolvable:$true] %s20_s21 }
   0x4   :  { %s6475_s24 = scalar_lea.hbm %s6886_s2, 256 }
   0x5   :  { %p6476_p0 = scmp.ne.s32.totalorder %s6886_s2, %s6475_s24  ;;  %p6479_p1 = scmp.lt.u32.totalorder %s6475_s24, %s6886_s2 }
   0x7   :  { %p6481_p2 = pnand %p6479_p1, %p6476_p0 }
   0x9   :  { %6484 = shalt.err (!%p6481_p2)
}
   0xa   :  { %s6485_s29 = scalar_lea.vmem %s34_s19, 256  ;;  %p6490_p4 = scmp.lt.s32.totalorder %s34_s19, %s34_s19 }
   0xb   :  { %p6486_p3 = scmp.ne.s32.totalorder %s34_s19, %s6485_s29  ;;  %p6491_p5 = scmp.lt.s32.totalorder %s6485_s29, %s6485_s29 }
   0xd   :  { %p6492_p6 = por %p6491_p5, %p6490_p4 }
   0xf   :  { %p6493_p7 = pnand %p6492_p6, %p6486_p3 }
  0x11   :  { %6496 = shalt.err (!%p6493_p7)
}
  0x12   :  { %36 = dma.hbm_to_vmem [thread:$0]  %s6886_s2, 256, %s34_s19, [#allocation6]  }
  0x13   :  { %s6497_s9 = scalar_lea.hbm %s6885_s1, 196608 }
  0x14   :  { %p6498_p8 = scmp.ne.s32.totalorder %s6885_s1, %s6497_s9  ;;  %p6501_p9 = scmp.lt.u32.totalorder %s6497_s9, %s6885_s1 }
  0x16   :  { %p6503_p10 = pnand %p6501_p9, %p6498_p8 }
  0x18   :  { %6506 = shalt.err (!%p6503_p10)
}
  0x19   :  { %s6507_s14 = scalar_lea.vmem %s6606_s21, 196608  ;;  %p6512_p12 = scmp.lt.s32.totalorder %s6606_s21, %s6606_s21 }
  0x1a   :  { %p6508_p11 = scmp.ne.s32.totalorder %s6606_s21, %s6507_s14  ;;  %p6513_p13 = scmp.lt.s32.totalorder %s6507_s14, %s6507_s14 }
  0x1c   :  { %p6514_p0 = por %p6513_p13, %p6512_p12 }
  0x1e   :  { %p6515_p1 = pnand %p6514_p0, %p6508_p11 }
  0x20   :  { %6518 = shalt.err (!%p6515_p1)
}
  0x21   :  { %s6571_s2 = smov 2048   ;;  %s6572_s15 = smov 128  }
  0x22   :  { %26 = dma.hbm_to_vmem [thread:$0]  %s6885_s1, 196608, %s6606_s21, [#allocation4], %s6571_s2, %s6571_s2, %s6572_s15  }
  0x23   :  { %s6573_s18 = smov [#allocation7]   ;;  %s6574_s20 = smov [#allocation8]  }
  0x24   :  { %s42_s19 = sshll.u32 %s6573_s18, 4  ;;  %s55_s22 = sshll.u32 %s6574_s20, 4  ;;  %s43_s19 = int_to_ptr.vmem [resolvable:$true] %s42_s19  ;;  %s56_s22 = int_to_ptr.vmem [resolvable:$true] %s55_s22 }
  0x25   :  { %s6519_s25 = scalar_lea.hbm %s6887_s3, 32768 }
  0x26   :  { %p6520_p2 = scmp.ne.s32.totalorder %s6887_s3, %s6519_s25  ;;  %p6523_p3 = scmp.lt.u32.totalorder %s6519_s25, %s6887_s3 }
  0x28   :  { %p6525_p4 = pnand %p6523_p3, %p6520_p2 }
  0x2a   :  { %6528 = shalt.err (!%p6525_p4)
}
  0x2b   :  { %s6529_s1 = scalar_lea.vmem %s43_s19, 32768  ;;  %p6534_p6 = scmp.lt.s32.totalorder %s43_s19, %s43_s19 }
  0x2c   :  { %p6530_p5 = scmp.ne.s32.totalorder %s43_s19, %s6529_s1  ;;  %p6535_p7 = scmp.lt.s32.totalorder %s6529_s1, %s6529_s1 }
  0x2e   :  { %p6536_p8 = por %p6535_p7, %p6534_p6 }
  0x30   :  { %p6537_p9 = pnand %p6536_p8, %p6530_p5 }
  0x32   :  { %6540 = shalt.err (!%p6537_p9)
}
  0x33   :  { %s6575_s21 = smov 8   ;;  %s6541_s9 = scalar_lea.hbm %s6888_s4, 16 }
  0x34   :  { %48 = dma.hbm_to_vmem [thread:$0]  %s6887_s3, 32768, %s43_s19, [#allocation6], %s6572_s15, %s6572_s15, %s6575_s21  }
  0x35   :  { %p6542_p10 = scmp.ne.s32.totalorder %s6888_s4, %s6541_s9  ;;  %p6545_p11 = scmp.lt.u32.totalorder %s6541_s9, %s6888_s4 }
  0x37   :  { %p6547_p12 = pnand %p6545_p11, %p6542_p10 }
  0x39   :  { %6550 = shalt.err (!%p6547_p12)
}
  0x3a   :  { %s6551_s14 = scalar_lea.vmem %s56_s22, 16  ;;  %s6555_s2 = scalar_lea.vmem %s56_s22, 32 }
  0x3b   :  { %p6552_p13 = scmp.ne.s32.totalorder %s56_s22, %s6551_s14  ;;  %p6556_p0 = scmp.lt.s32.totalorder %s56_s22, %s56_s22 }
  0x3c   :  { %p6557_p1 = scmp.lt.s32.totalorder %s6555_s2, %s6551_s14 }
  0x3e   :  { %p6558_p2 = por %p6557_p1, %p6556_p0 }
  0x40   :  { %p6559_p3 = pnand %p6558_p2, %p6552_p13 }
  0x42   :  { %6562 = shalt.err (!%p6559_p3)
}
  0x43   :  { %58 = dma.hbm_to_vmem [thread:$0]  %s6888_s4, 16, %s56_s22, [#allocation9]  }
  0x44   :  { %6563 = dma.done.wait [#allocation4], 196608  }
  0x45   :  { %6564 = vsyncadd [#allocation4], 4294770688 }
  0x46   :  { %6565 = dma.done.wait [#allocation6], 33024  }
  0x47   :  { %6566 = vsyncadd [#allocation6], 4294934272 }
  0x48   :  { %6567 = dma.done.wait [#allocation9], 16  }
  0x49   :  { %6568 = vsyncadd [#allocation9], 4294967280  ;;  %v95_v0 = vld [vmem:[#allocation3 + $0x8] sm:$0xff]  ;;  %v97_v2 = vld [vmem:[#allocation3 + $0x18] sm:$0xff] }
  0x4a   :  { %v111_v1 = vld [vmem:[#allocation3 + $0x88] sm:$0xff]  ;;  %v113_v4 = vld [vmem:[#allocation3 + $0x98] sm:$0xff]  ;;  %v94_v5 = vld [vmem:[#allocation3] sm:$0xff] }
  0x4b   :  { %v4631_v3 = vpack.c.bf16 %v111_v1, %v95_v0  ;;  %v110_v6 = vld [vmem:[#allocation3 + $0x80] sm:$0xff]  ;;  %v4823_v7 = vpack.c.bf16 %v113_v4, %v97_v2  ;;  %v96_v9 = vld [vmem:[#allocation3 + $0x10] sm:$0xff]  ;;  %v127_v11 = vld [vmem:[#allocation3 + $0x108] sm:$0xff] }
  0x4c   :  { %v4633_v8 = vpack.c.bf16 %v110_v6, %v94_v5  ;;  %v112_v10 = vld [vmem:[#allocation3 + $0x90] sm:$0xff]  ;;  %v143_v13 = vld [vmem:[#allocation3 + $0x188] sm:$0xff]  ;;  %v129_v14 = vld [vmem:[#allocation3 + $0x118] sm:$0xff] }
  0x4d   :  { %4632 = vmatprep.subr.bf16.mxu0 %v4631_v3  ;;  %v4825_v12 = vpack.c.bf16 %v112_v10, %v96_v9  ;;  %v145_v15 = vld [vmem:[#allocation3 + $0x198] sm:$0xff]  ;;  %4824 = vmatprep.subr.bf16.mxu1 %v4823_v7  ;;  %v4635_v16 = vpack.c.bf16 %v143_v13, %v127_v11  ;;  %v126_v18 = vld [vmem:[#allocation3 + $0x100] sm:$0xff]  ;;  %v128_v20 = vld [vmem:[#allocation3 + $0x110] sm:$0xff] }
  0x4e   :  { %4634 = vmatpush1.bf16.msra.mxu0 %v4633_v8  ;;  %v4827_v17 = vpack.c.bf16 %v145_v15, %v129_v14  ;;  %v142_v19 = vld [vmem:[#allocation3 + $0x180] sm:$0xff]  ;;  %v144_v22 = vld [vmem:[#allocation3 + $0x190] sm:$0xff]  ;;  %v159_v23 = vld [vmem:[#allocation3 + $0x208] sm:$0xff] }
  0x4f   :  { %4826 = vmatpush1.bf16.msra.mxu1 %v4825_v12  ;;  %v4637_v21 = vpack.c.bf16 %v142_v19, %v126_v18  ;;  %v175_v24 = vld [vmem:[#allocation3 + $0x288] sm:$0xff]  ;;  %4636 = vmatprep.subr.bf16.mxu0 %v4635_v16  ;;  %v4829_v25 = vpack.c.bf16 %v144_v22, %v128_v20  ;;  %v161_v27 = vld [vmem:[#allocation3 + $0x218] sm:$0xff]  ;;  %v158_v29 = vld [vmem:[#allocation3 + $0x200] sm:$0xff] }
  0x50   :  { %4828 = vmatprep.subr.bf16.mxu1 %v4827_v17  ;;  %v4639_v26 = vpack.c.bf16 %v175_v24, %v159_v23  ;;  %v177_v28 = vld [vmem:[#allocation3 + $0x298] sm:$0xff]  ;;  %v174_v31 = vld [vmem:[#allocation3 + $0x280] sm:$0xff]  ;;  %v160_v32 = vld [vmem:[#allocation3 + $0x210] sm:$0xff] }
  0x51   :  { %v4831_v30 = vpack.c.bf16 %v177_v28, %v161_v27  ;;  %v176_v33 = vld [vmem:[#allocation3 + $0x290] sm:$0xff]  ;;  %v4641_v34 = vpack.c.bf16 %v174_v31, %v158_v29  ;;  %v191_v35 = vld [vmem:[#allocation3 + $0x308] sm:$0xff]  ;;  %v193_v37 = vld [vmem:[#allocation3 + $0x318] sm:$0xff] }
  0x52   :  { %4638 = vmatpush1.bf16.msra.mxu0 %v4637_v21  ;;  %v207_v36 = vld [vmem:[#allocation3 + $0x388] sm:$0xff]  ;;  %v4833_v38 = vpack.c.bf16 %v176_v33, %v160_v32  ;;  %v209_v40 = vld [vmem:[#allocation3 + $0x398] sm:$0xff]  ;;  %v190_v41 = vld [vmem:[#allocation3 + $0x300] sm:$0xff] }
  0x53   :  { %4830 = vmatpush1.bf16.msra.mxu1 %v4829_v25  ;;  %4640 = vmatprep.subr.bf16.mxu0 %v4639_v26  ;;  %v4643_v39 = vpack.c.bf16 %v207_v36, %v191_v35  ;;  %v206_v42 = vld [vmem:[#allocation3 + $0x380] sm:$0xff]  ;;  %v4835_v43 = vpack.c.bf16 %v209_v40, %v193_v37  ;;  %v192_v44 = vld [vmem:[#allocation3 + $0x310] sm:$0xff]  ;;  %v223_v46 = vld [vmem:[#allocation3 + $0x408] sm:$0xff] }
  0x54   :  { %4832 = vmatprep.subr.bf16.mxu1 %v4831_v30  ;;  %v208_v45 = vld [vmem:[#allocation3 + $0x390] sm:$0xff]  ;;  %v239_v47 = vld [vmem:[#allocation3 + $0x488] sm:$0xff]  ;;  %v225_v48 = vld [vmem:[#allocation3 + $0x418] sm:$0xff]  ;;  %v4645_v50 = vpack.c.bf16 %v206_v42, %v190_v41 }
  0x55   :  { %v241_v49 = vld [vmem:[#allocation3 + $0x498] sm:$0xff]  ;;  %v4837_v51 = vpack.c.bf16 %v208_v45, %v192_v44  ;;  %v4647_v52 = vpack.c.bf16 %v239_v47, %v223_v46  ;;  %v222_v53 = vld [vmem:[#allocation3 + $0x400] sm:$0xff]  ;;  %v224_v55 = vld [vmem:[#allocation3 + $0x410] sm:$0xff] }
  0x56   :  { %4642 = vmatpush1.bf16.msra.mxu0 %v4641_v34  ;;  %v238_v54 = vld [vmem:[#allocation3 + $0x480] sm:$0xff]  ;;  %v4839_v56 = vpack.c.bf16 %v241_v49, %v225_v48  ;;  %v240_v57 = vld [vmem:[#allocation3 + $0x490] sm:$0xff]  ;;  %v255_v58 = vld [vmem:[#allocation3 + $0x508] sm:$0xff] }
  0x57   :  { %4834 = vmatpush1.bf16.msra.mxu1 %v4833_v38  ;;  %4644 = vmatprep.subr.bf16.mxu0 %v4643_v39  ;;  %v271_v59 = vld [vmem:[#allocation3 + $0x588] sm:$0xff]  ;;  %v257_v60 = vld [vmem:[#allocation3 + $0x518] sm:$0xff]  ;;  %v4649_v62 = vpack.c.bf16 %v238_v54, %v222_v53  ;;  %v4841_v63 = vpack.c.bf16 %v240_v57, %v224_v55  ;;  %v254_v1 = vld [vmem:[#allocation3 + $0x500] sm:$0xff] }
  0x58   :  { %4836 = vmatprep.subr.bf16.mxu1 %v4835_v43  ;;  %v273_v61 = vld [vmem:[#allocation3 + $0x598] sm:$0xff]  ;;  %v4651_v0 = vpack.c.bf16 %v271_v59, %v255_v58  ;;  %v270_v2 = vld [vmem:[#allocation3 + $0x580] sm:$0xff]  ;;  %v256_v3 = vld [vmem:[#allocation3 + $0x510] sm:$0xff] }
  0x59   :  { %v4843_v4 = vpack.c.bf16 %v273_v61, %v257_v60  ;;  %v272_v5 = vld [vmem:[#allocation3 + $0x590] sm:$0xff]  ;;  %v287_v6 = vld [vmem:[#allocation3 + $0x608] sm:$0xff]  ;;  %v289_v8 = vld [vmem:[#allocation3 + $0x618] sm:$0xff]  ;;  %v4653_v10 = vpack.c.bf16 %v270_v2, %v254_v1 }
  0x5a   :  { %4646 = vmatpush1.bf16.msra.mxu0 %v4645_v50  ;;  %v303_v7 = vld [vmem:[#allocation3 + $0x688] sm:$0xff]  ;;  %v305_v9 = vld [vmem:[#allocation3 + $0x698] sm:$0xff]  ;;  %v4845_v11 = vpack.c.bf16 %v272_v5, %v256_v3  ;;  %v286_v13 = vld [vmem:[#allocation3 + $0x600] sm:$0xff] }
  0x5b   :  { %4838 = vmatpush1.bf16.msra.mxu1 %v4837_v51  ;;  %4648 = vmatprep.subr.bf16.mxu0 %v4647_v52  ;;  %v4655_v12 = vpack.c.bf16 %v303_v7, %v287_v6  ;;  %v302_v14 = vld [vmem:[#allocation3 + $0x680] sm:$0xff]  ;;  %v288_v15 = vld [vmem:[#allocation3 + $0x610] sm:$0xff]  ;;  %v4847_v16 = vpack.c.bf16 %v305_v9, %v289_v8  ;;  %v319_v18 = vld [vmem:[#allocation3 + $0x708] sm:$0xff] }
  0x5c   :  { %4840 = vmatprep.subr.bf16.mxu1 %v4839_v56  ;;  %v304_v17 = vld [vmem:[#allocation3 + $0x690] sm:$0xff]  ;;  %v335_v19 = vld [vmem:[#allocation3 + $0x788] sm:$0xff]  ;;  %v321_v20 = vld [vmem:[#allocation3 + $0x718] sm:$0xff]  ;;  %v4657_v22 = vpack.c.bf16 %v302_v14, %v286_v13 }
  0x5d   :  { %v337_v21 = vld [vmem:[#allocation3 + $0x798] sm:$0xff]  ;;  %v4849_v23 = vpack.c.bf16 %v304_v17, %v288_v15  ;;  %v4659_v24 = vpack.c.bf16 %v335_v19, %v319_v18  ;;  %v318_v25 = vld [vmem:[#allocation3 + $0x700] sm:$0xff]  ;;  %v320_v27 = vld [vmem:[#allocation3 + $0x710] sm:$0xff] }
  0x5e   :  { %4650 = vmatpush1.bf16.msra.mxu0 %v4649_v62  ;;  %v334_v26 = vld [vmem:[#allocation3 + $0x780] sm:$0xff]  ;;  %v4851_v28 = vpack.c.bf16 %v337_v21, %v321_v20  ;;  %v336_v29 = vld [vmem:[#allocation3 + $0x790] sm:$0xff]  ;;  %v351_v30 = vld [vmem:[#allocation3 + $0x808] sm:$0xff] }
  0x5f   :  { %4842 = vmatpush1.bf16.msra.mxu1 %v4841_v63  ;;  %4652 = vmatprep.subr.bf16.mxu0 %v4651_v0  ;;  %v367_v31 = vld [vmem:[#allocation3 + $0x888] sm:$0xff]  ;;  %v353_v32 = vld [vmem:[#allocation3 + $0x818] sm:$0xff]  ;;  %v4661_v34 = vpack.c.bf16 %v334_v26, %v318_v25  ;;  %v4853_v35 = vpack.c.bf16 %v336_v29, %v320_v27  ;;  %v350_v37 = vld [vmem:[#allocation3 + $0x800] sm:$0xff] }
  0x60   :  { %4844 = vmatprep.subr.bf16.mxu1 %v4843_v4  ;;  %v369_v33 = vld [vmem:[#allocation3 + $0x898] sm:$0xff]  ;;  %v4663_v36 = vpack.c.bf16 %v367_v31, %v351_v30  ;;  %v366_v38 = vld [vmem:[#allocation3 + $0x880] sm:$0xff]  ;;  %v352_v39 = vld [vmem:[#allocation3 + $0x810] sm:$0xff] }
  0x61   :  { %v4855_v40 = vpack.c.bf16 %v369_v33, %v353_v32  ;;  %v368_v41 = vld [vmem:[#allocation3 + $0x890] sm:$0xff]  ;;  %v383_v42 = vld [vmem:[#allocation3 + $0x908] sm:$0xff]  ;;  %v385_v44 = vld [vmem:[#allocation3 + $0x918] sm:$0xff]  ;;  %v4665_v46 = vpack.c.bf16 %v366_v38, %v350_v37 }
  0x62   :  { %4654 = vmatpush1.bf16.msra.mxu0 %v4653_v10  ;;  %v399_v43 = vld [vmem:[#allocation3 + $0x988] sm:$0xff]  ;;  %v401_v45 = vld [vmem:[#allocation3 + $0x998] sm:$0xff]  ;;  %v4857_v47 = vpack.c.bf16 %v368_v41, %v352_v39  ;;  %v382_v49 = vld [vmem:[#allocation3 + $0x900] sm:$0xff] }
  0x63   :  { %4846 = vmatpush1.bf16.msra.mxu1 %v4845_v11  ;;  %4656 = vmatprep.subr.bf16.mxu0 %v4655_v12  ;;  %v4667_v48 = vpack.c.bf16 %v399_v43, %v383_v42  ;;  %v398_v50 = vld [vmem:[#allocation3 + $0x980] sm:$0xff]  ;;  %v384_v51 = vld [vmem:[#allocation3 + $0x910] sm:$0xff]  ;;  %v4859_v52 = vpack.c.bf16 %v401_v45, %v385_v44  ;;  %v415_v54 = vld [vmem:[#allocation3 + $0xa08] sm:$0xff] }
  0x64   :  { %4848 = vmatprep.subr.bf16.mxu1 %v4847_v16  ;;  %v400_v53 = vld [vmem:[#allocation3 + $0x990] sm:$0xff]  ;;  %v431_v55 = vld [vmem:[#allocation3 + $0xa88] sm:$0xff]  ;;  %v417_v56 = vld [vmem:[#allocation3 + $0xa18] sm:$0xff]  ;;  %v4669_v58 = vpack.c.bf16 %v398_v50, %v382_v49 }
  0x65   :  { %v433_v57 = vld [vmem:[#allocation3 + $0xa98] sm:$0xff]  ;;  %v4861_v59 = vpack.c.bf16 %v400_v53, %v384_v51  ;;  %v4671_v60 = vpack.c.bf16 %v431_v55, %v415_v54  ;;  %v414_v61 = vld [vmem:[#allocation3 + $0xa00] sm:$0xff]  ;;  %v416_v63 = vld [vmem:[#allocation3 + $0xa10] sm:$0xff] }
  0x66   :  { %4658 = vmatpush1.bf16.msra.mxu0 %v4657_v22  ;;  %v430_v62 = vld [vmem:[#allocation3 + $0xa80] sm:$0xff]  ;;  %v4863_v0 = vpack.c.bf16 %v433_v57, %v417_v56  ;;  %v432_v1 = vld [vmem:[#allocation3 + $0xa90] sm:$0xff]  ;;  %v447_v2 = vld [vmem:[#allocation3 + $0xb08] sm:$0xff] }
  0x67   :  { %4850 = vmatpush1.bf16.msra.mxu1 %v4849_v23  ;;  %4660 = vmatprep.subr.bf16.mxu0 %v4659_v24  ;;  %v463_v3 = vld [vmem:[#allocation3 + $0xb88] sm:$0xff]  ;;  %v449_v4 = vld [vmem:[#allocation3 + $0xb18] sm:$0xff]  ;;  %v4673_v6 = vpack.c.bf16 %v430_v62, %v414_v61  ;;  %v446_v7 = vld [vmem:[#allocation3 + $0xb00] sm:$0xff]  ;;  %v4865_v8 = vpack.c.bf16 %v432_v1, %v416_v63 }
  0x68   :  { %4852 = vmatprep.subr.bf16.mxu1 %v4851_v28  ;;  %v465_v5 = vld [vmem:[#allocation3 + $0xb98] sm:$0xff]  ;;  %v4675_v9 = vpack.c.bf16 %v463_v3, %v447_v2  ;;  %v462_v10 = vld [vmem:[#allocation3 + $0xb80] sm:$0xff]  ;;  %v448_v11 = vld [vmem:[#allocation3 + $0xb10] sm:$0xff] }
  0x69   :  { %v464_v12 = vld [vmem:[#allocation3 + $0xb90] sm:$0xff]  ;;  %v4867_v13 = vpack.c.bf16 %v465_v5, %v449_v4  ;;  %v479_v14 = vld [vmem:[#allocation3 + $0xc08] sm:$0xff]  ;;  %v6664_v16 = vld [vmem:[%s6884_s0] sm:$0xff]  ;;  %v4677_v20 = vpack.c.bf16 %v462_v10, %v446_v7 }
  0x6a   :  { %4662 = vmatpush1.bf16.msra.mxu0 %v4661_v34  ;;  %v495_v15 = vld [vmem:[#allocation3 + $0xc88] sm:$0xff]  ;;  %v481_v17 = vld [vmem:[#allocation3 + $0xc18] sm:$0xff]  ;;  %v6668_v19 = vcombine.high %v6664_v16, %v6664_v16  ;;  %v4869_v21 = vpack.c.bf16 %v464_v12, %v448_v11  ;;  %v478_v23 = vld [vmem:[#allocation3 + $0xc00] sm:$0xff] }
  0x6b   :  { %4854 = vmatpush1.bf16.msra.mxu1 %v4853_v35  ;;  %4664 = vmatprep.subr.bf16.mxu0 %v4663_v36  ;;  %v497_v18 = vld [vmem:[#allocation3 + $0xc98] sm:$0xff]  ;;  %v4679_v22 = vpack.c.bf16 %v495_v15, %v479_v14  ;;  %v494_v24 = vld [vmem:[#allocation3 + $0xc80] sm:$0xff]  ;;  %v480_v25 = vld [vmem:[#allocation3 + $0xc10] sm:$0xff] }
  0x6c   :  { %4856 = vmatprep.subr.bf16.mxu1 %v4855_v40  ;;  %v4871_v26 = vpack.c.bf16 %v497_v18, %v481_v17  ;;  %v496_v27 = vld [vmem:[#allocation3 + $0xc90] sm:$0xff]  ;;  %v511_v28 = vld [vmem:[#allocation3 + $0xd08] sm:$0xff]  ;;  %1703 = vmatprep.mubr.f32.mxu0 %v6668_v19  ;;  %v513_v30 = vld [vmem:[#allocation3 + $0xd18] sm:$0xff]  ;;  %v4681_v32 = vpack.c.bf16 %v494_v24, %v478_v23 }
  0x6d   :  { %v527_v29 = vld [vmem:[#allocation3 + $0xd88] sm:$0xff]  ;;  %v529_v31 = vld [vmem:[#allocation3 + $0xd98] sm:$0xff]  ;;  %1916 = vmatprep.mubr.f32.mxu1 %v6668_v19  ;;  %v4873_v33 = vpack.c.bf16 %v496_v27, %v480_v25  ;;  %v510_v35 = vld [vmem:[#allocation3 + $0xd00] sm:$0xff] }
  0x6e   :  { %4666 = vmatpush1.bf16.msra.mxu0 %v4665_v46  ;;  %v4683_v34 = vpack.c.bf16 %v527_v29, %v511_v28  ;;  %v526_v36 = vld [vmem:[#allocation3 + $0xd80] sm:$0xff]  ;;  %v512_v37 = vld [vmem:[#allocation3 + $0xd10] sm:$0xff]  ;;  %v4875_v38 = vpack.c.bf16 %v529_v31, %v513_v30  ;;  %v543_v40 = vld [vmem:[#allocation3 + $0xe08] sm:$0xff] }
  0x6f   :  { %4858 = vmatpush1.bf16.msra.mxu1 %v4857_v47  ;;  %4668 = vmatprep.subr.bf16.mxu0 %v4667_v48  ;;  %v528_v39 = vld [vmem:[#allocation3 + $0xd90] sm:$0xff]  ;;  %v559_v41 = vld [vmem:[#allocation3 + $0xe88] sm:$0xff]  ;;  %v545_v42 = vld [vmem:[#allocation3 + $0xe18] sm:$0xff]  ;;  %v4685_v44 = vpack.c.bf16 %v526_v36, %v510_v35 }
  0x70   :  { %4860 = vmatprep.subr.bf16.mxu1 %v4859_v52  ;;  %v561_v43 = vld [vmem:[#allocation3 + $0xe98] sm:$0xff]  ;;  %v4877_v45 = vpack.c.bf16 %v528_v39, %v512_v37  ;;  %v4687_v46 = vpack.c.bf16 %v559_v41, %v543_v40  ;;  %v542_v47 = vld [vmem:[#allocation3 + $0xe00] sm:$0xff]  ;;  %v544_v49 = vld [vmem:[#allocation3 + $0xe10] sm:$0xff] }
  0x71   :  { %v558_v48 = vld [vmem:[#allocation3 + $0xe80] sm:$0xff]  ;;  %v4879_v50 = vpack.c.bf16 %v561_v43, %v545_v42  ;;  %v560_v51 = vld [vmem:[#allocation3 + $0xe90] sm:$0xff]  ;;  %v575_v52 = vld [vmem:[#allocation3 + $0xf08] sm:$0xff] }
  0x72   :  { %4670 = vmatpush1.bf16.msra.mxu0 %v4669_v58  ;;  %v591_v53 = vld [vmem:[#allocation3 + $0xf88] sm:$0xff]  ;;  %v577_v54 = vld [vmem:[#allocation3 + $0xf18] sm:$0xff]  ;;  %v4689_v56 = vpack.c.bf16 %v558_v48, %v542_v47  ;;  %v4881_v57 = vpack.c.bf16 %v560_v51, %v544_v49  ;;  %v576_v61 = vld [vmem:[#allocation3 + $0xf10] sm:$0xff] }
  0x73   :  { %4862 = vmatpush1.bf16.msra.mxu1 %v4861_v59  ;;  %4672 = vmatprep.subr.bf16.mxu0 %v4671_v60  ;;  %v593_v55 = vld [vmem:[#allocation3 + $0xf98] sm:$0xff]  ;;  %v4691_v58 = vpack.c.bf16 %v591_v53, %v575_v52  ;;  %v574_v59 = vld [vmem:[#allocation3 + $0xf00] sm:$0xff]  ;;  %v592_v63 = vld [vmem:[#allocation3 + $0xf90] sm:$0xff] }
  0x74   :  { %4864 = vmatprep.subr.bf16.mxu1 %v4863_v0  ;;  %v590_v60 = vld [vmem:[#allocation3 + $0xf80] sm:$0xff]  ;;  %v4883_v62 = vpack.c.bf16 %v593_v55, %v577_v54  ;;  %v607_v0 = vld [vmem:[#allocation3 + $0x1008] sm:$0xff]  ;;  %v609_v2 = vld [vmem:[#allocation3 + $0x1018] sm:$0xff]  ;;  %v4885_v5 = vpack.c.bf16 %v592_v63, %v576_v61 }
  0x75   :  { %v623_v1 = vld [vmem:[#allocation3 + $0x1088] sm:$0xff]  ;;  %v625_v3 = vld [vmem:[#allocation3 + $0x1098] sm:$0xff]  ;;  %v4693_v4 = vpack.c.bf16 %v590_v60, %v574_v59  ;;  %v606_v7 = vld [vmem:[#allocation3 + $0x1000] sm:$0xff] }
  0x76   :  { %4674 = vmatpush1.bf16.msra.mxu0 %v4673_v6  ;;  %v4695_v6 = vpack.c.bf16 %v623_v1, %v607_v0  ;;  %v4887_v10 = vpack.c.bf16 %v625_v3, %v609_v2  ;;  %v624_v11 = vld [vmem:[#allocation3 + $0x1090] sm:$0xff]  ;;  %v639_v12 = vld [vmem:[#allocation3 + $0x1108] sm:$0xff]  ;;  %v641_v14 = vld [vmem:[#allocation3 + $0x1118] sm:$0xff] }
  0x77   :  { %4866 = vmatpush1.bf16.msra.mxu1 %v4865_v8  ;;  %4676 = vmatprep.subr.bf16.mxu0 %v4675_v9  ;;  %v622_v8 = vld [vmem:[#allocation3 + $0x1080] sm:$0xff]  ;;  %v608_v9 = vld [vmem:[#allocation3 + $0x1010] sm:$0xff]  ;;  %v657_v15 = vld [vmem:[#allocation3 + $0x1198] sm:$0xff] }
  0x78   :  { %4868 = vmatprep.subr.bf16.mxu1 %v4867_v13  ;;  %v655_v13 = vld [vmem:[#allocation3 + $0x1188] sm:$0xff]  ;;  %v4697_v17 = vpack.c.bf16 %v622_v8, %v606_v7  ;;  %v4889_v18 = vpack.c.bf16 %v624_v11, %v608_v9  ;;  %v640_v23 = vld [vmem:[#allocation3 + $0x1110] sm:$0xff]  ;;  %v4891_v24 = vpack.c.bf16 %v657_v15, %v641_v14  ;;  %v673_v28 = vld [vmem:[#allocation3 + $0x1218] sm:$0xff] }
  0x79   :  { %v656_v25 = vld [vmem:[#allocation3 + $0x1190] sm:$0xff]  ;;  %v687_v27 = vld [vmem:[#allocation3 + $0x1288] sm:$0xff]  ;;  %v689_v29 = vld [vmem:[#allocation3 + $0x1298] sm:$0xff] }
  0x7a   :  { %4678 = vmatpush1.bf16.msra.mxu0 %v4677_v20  ;;  %v4699_v20 = vpack.c.bf16 %v655_v13, %v639_v12  ;;  %v4893_v31 = vpack.c.bf16 %v656_v25, %v640_v23  ;;  %v672_v35 = vld [vmem:[#allocation3 + $0x1210] sm:$0xff]  ;;  %v4895_v36 = vpack.c.bf16 %v689_v29, %v673_v28  ;;  %v719_v39 = vld [vmem:[#allocation3 + $0x1388] sm:$0xff]  ;;  %v705_v40 = vld [vmem:[#allocation3 + $0x1318] sm:$0xff] }
  0x7b   :  { %4870 = vmatpush1.bf16.msra.mxu1 %v4869_v21  ;;  %4680 = vmatprep.subr.bf16.mxu0 %v4679_v22  ;;  %v638_v21 = vld [vmem:[#allocation3 + $0x1100] sm:$0xff]  ;;  %v688_v37 = vld [vmem:[#allocation3 + $0x1290] sm:$0xff]  ;;  %v721_v41 = vld [vmem:[#allocation3 + $0x1398] sm:$0xff] }
  0x7c   :  { %4872 = vmatprep.subr.bf16.mxu1 %v4871_v26  ;;  %v654_v22 = vld [vmem:[#allocation3 + $0x1180] sm:$0xff]  ;;  %v671_v26 = vld [vmem:[#allocation3 + $0x1208] sm:$0xff]  ;;  %v4899_v47 = vpack.c.bf16 %v721_v41, %v705_v40  ;;  %v720_v48 = vld [vmem:[#allocation3 + $0x1390] sm:$0xff] }
  0x7d   :  { %v4701_v30 = vpack.c.bf16 %v654_v22, %v638_v21  ;;  %v735_v49 = vld [vmem:[#allocation3 + $0x1408] sm:$0xff]  ;;  %v737_v51 = vld [vmem:[#allocation3 + $0x1418] sm:$0xff]  ;;  %v752_v60 = vld [vmem:[#allocation3 + $0x1490] sm:$0xff] }
  0x7e   :  { %4682 = vmatpush1.bf16.msra.mxu0 %v4681_v32  ;;  %v4703_v32 = vpack.c.bf16 %v687_v27, %v671_v26  ;;  %v753_v52 = vld [vmem:[#allocation3 + $0x1498] sm:$0xff]  ;;  %v767_v61 = vld [vmem:[#allocation3 + $0x1508] sm:$0xff]  ;;  %v784_v8 = vld [vmem:[#allocation3 + $0x1590] sm:$0xff] }
  0x7f   :  { %4874 = vmatpush1.bf16.msra.mxu1 %v4873_v33  ;;  %4684 = vmatprep.subr.bf16.mxu0 %v4683_v34  ;;  %v670_v33 = vld [vmem:[#allocation3 + $0x1200] sm:$0xff]  ;;  %v4903_v59 = vpack.c.bf16 %v753_v52, %v737_v51  ;;  %v769_v63 = vld [vmem:[#allocation3 + $0x1518] sm:$0xff]  ;;  %v799_v9 = vld [vmem:[#allocation3 + $0x1608] sm:$0xff] }
  0x80   :  { %4876 = vmatprep.subr.bf16.mxu1 %v4875_v38  ;;  %v686_v34 = vld [vmem:[#allocation3 + $0x1280] sm:$0xff]  ;;  %v703_v38 = vld [vmem:[#allocation3 + $0x1308] sm:$0xff]  ;;  %v785_v0 = vld [vmem:[#allocation3 + $0x1598] sm:$0xff] }
  0x81   :  { %v4705_v42 = vpack.c.bf16 %v686_v34, %v670_v33  ;;  %v4707_v43 = vpack.c.bf16 %v719_v39, %v703_v38  ;;  %v4907_v7 = vpack.c.bf16 %v785_v0, %v769_v63  ;;  %v801_v11 = vld [vmem:[#allocation3 + $0x1618] sm:$0xff]  ;;  %v798_v14 = vld [vmem:[#allocation3 + $0x1600] sm:$0xff]  ;;  %v6677_v21 = vld [vmem:[%s6884_s0 + $0x8] sm:$0xff] }
  0x82   :  { %4686 = vmatpush1.bf16.msra.mxu0 %v4685_v44  ;;  %v702_v44 = vld [vmem:[#allocation3 + $0x1300] sm:$0xff]  ;;  %v817_v12 = vld [vmem:[#allocation3 + $0x1698] sm:$0xff]  ;;  %v816_v23 = vld [vmem:[#allocation3 + $0x1690] sm:$0xff]  ;;  %v6681_v26 = vcombine.high %v6677_v21, %v6677_v21 }
  0x83   :  { %4878 = vmatpush1.bf16.msra.mxu1 %v4877_v45  ;;  %4688 = vmatprep.subr.bf16.mxu0 %v4687_v46  ;;  %v718_v45 = vld [vmem:[#allocation3 + $0x1380] sm:$0xff]  ;;  %v704_v46 = vld [vmem:[#allocation3 + $0x1310] sm:$0xff]  ;;  %v4911_v22 = vpack.c.bf16 %v817_v12, %v801_v11  ;;  %v847_v25 = vld [vmem:[#allocation3 + $0x1788] sm:$0xff] }
  0x84   :  { %4880 = vmatprep.subr.bf16.mxu1 %v4879_v50  ;;  %v751_v50 = vld [vmem:[#allocation3 + $0x1488] sm:$0xff]  ;;  %v4709_v53 = vpack.c.bf16 %v718_v45, %v702_v44  ;;  %v4901_v54 = vpack.c.bf16 %v720_v48, %v704_v46  ;;  %v833_v27 = vld [vmem:[#allocation3 + $0x1718] sm:$0xff]  ;;  %v846_v33 = vld [vmem:[#allocation3 + $0x1780] sm:$0xff] }
  0x85   :  { %v4711_v55 = vpack.c.bf16 %v751_v50, %v735_v49  ;;  %v849_v28 = vld [vmem:[#allocation3 + $0x1798] sm:$0xff]  ;;  %v832_v34 = vld [vmem:[#allocation3 + $0x1710] sm:$0xff]  ;;  %v879_v38 = vld [vmem:[#allocation3 + $0x1888] sm:$0xff] }
  0x86   :  { %4690 = vmatpush1.bf16.msra.mxu0 %v4689_v56  ;;  %v734_v56 = vld [vmem:[#allocation3 + $0x1400] sm:$0xff]  ;;  %v865_v39 = vld [vmem:[#allocation3 + $0x1818] sm:$0xff]  ;;  %v864_v45 = vld [vmem:[#allocation3 + $0x1810] sm:$0xff] }
  0x87   :  { %4882 = vmatpush1.bf16.msra.mxu1 %v4881_v57  ;;  %4692 = vmatprep.subr.bf16.mxu0 %v4691_v58  ;;  %v750_v57 = vld [vmem:[#allocation3 + $0x1480] sm:$0xff]  ;;  %v736_v58 = vld [vmem:[#allocation3 + $0x1410] sm:$0xff]  ;;  %v881_v40 = vld [vmem:[#allocation3 + $0x1898] sm:$0xff] }
  0x88   :  { %4884 = vmatprep.subr.bf16.mxu1 %v4883_v62  ;;  %v783_v62 = vld [vmem:[#allocation3 + $0x1588] sm:$0xff]  ;;  %v4713_v1 = vpack.c.bf16 %v750_v57, %v734_v56  ;;  %v4905_v2 = vpack.c.bf16 %v752_v60, %v736_v58  ;;  %v878_v44 = vld [vmem:[#allocation3 + $0x1880] sm:$0xff]  ;;  %v4919_v46 = vpack.c.bf16 %v881_v40, %v865_v39  ;;  %v897_v50 = vld [vmem:[#allocation3 + $0x1918] sm:$0xff] }
  0x89   :  { %v4715_v3 = vpack.c.bf16 %v783_v62, %v767_v61  ;;  %v895_v48 = vld [vmem:[#allocation3 + $0x1908] sm:$0xff]  ;;  %v913_v51 = vld [vmem:[#allocation3 + $0x1998] sm:$0xff]  ;;  %v910_v56 = vld [vmem:[#allocation3 + $0x1980] sm:$0xff] }
  0x8a   :  { %4694 = vmatpush1.bf16.msra.mxu0 %v4693_v4  ;;  %v766_v4 = vld [vmem:[#allocation3 + $0x1500] sm:$0xff]  ;;  %v911_v49 = vld [vmem:[#allocation3 + $0x1988] sm:$0xff]  ;;  %v896_v57 = vld [vmem:[#allocation3 + $0x1910] sm:$0xff]  ;;  %v4923_v58 = vpack.c.bf16 %v913_v51, %v897_v50 }
  0x8b   :  { %4886 = vmatpush1.bf16.msra.mxu1 %v4885_v5  ;;  %4696 = vmatprep.subr.bf16.mxu0 %v4695_v6  ;;  %v782_v5 = vld [vmem:[#allocation3 + $0x1580] sm:$0xff]  ;;  %v768_v6 = vld [vmem:[#allocation3 + $0x1510] sm:$0xff]  ;;  %v927_v60 = vld [vmem:[#allocation3 + $0x1a08] sm:$0xff] }
  0x8c   :  { %4888 = vmatprep.subr.bf16.mxu1 %v4887_v10  ;;  %v815_v10 = vld [vmem:[#allocation3 + $0x1688] sm:$0xff]  ;;  %v4717_v13 = vpack.c.bf16 %v782_v5, %v766_v4  ;;  %v4909_v15 = vpack.c.bf16 %v784_v8, %v768_v6  ;;  %v929_v62 = vld [vmem:[#allocation3 + $0x1a18] sm:$0xff]  ;;  %v942_v4 = vld [vmem:[#allocation3 + $0x1a80] sm:$0xff] }
  0x8d   :  { %1704 = vmatmul.mubr.f32.vlgmr.msra.gmra.mrb[0].mxu0 %v6664_v16  ;;  %v943_v61 = vld [vmem:[#allocation3 + $0x1a88] sm:$0xff]  ;;  %v945_v63 = vld [vmem:[#allocation3 + $0x1a98] sm:$0xff]  ;;  %v928_v5 = vld [vmem:[#allocation3 + $0x1a10] sm:$0xff] }
  0x8e   :  { %4698 = vmatpush1.bf16.msra.mxu0 %v4697_v17  ;;  %1917 = vmatmul.mubr.f32.vlgmr.msra.gmra.mrb[0].mxu1 %v6664_v16  ;;  %v4897_v16 = vpack.c.bf16 %v688_v37, %v672_v35  ;;  %v4719_v17 = vpack.c.bf16 %v815_v10, %v799_v9  ;;  %v4915_v35 = vpack.c.bf16 %v849_v28, %v833_v27  ;;  %v863_v37 = vld [vmem:[#allocation3 + $0x1808] sm:$0xff]  ;;  %v961_v10 = vld [vmem:[#allocation3 + $0x1b18] sm:$0xff] }
  0x8f   :  { %4890 = vmatpush1.bf16.msra.mxu1 %v4889_v18  ;;  %4700 = vmatprep.subr.bf16.mxu0 %v4699_v20  ;;  %v814_v18 = vld [vmem:[#allocation3 + $0x1680] sm:$0xff]  ;;  %v800_v20 = vld [vmem:[#allocation3 + $0x1610] sm:$0xff]  ;;  %v4927_v6 = vpack.c.bf16 %v945_v63, %v929_v62  ;;  %v959_v8 = vld [vmem:[#allocation3 + $0x1b08] sm:$0xff] }
  0x90   :  { %4892 = vmatprep.subr.bf16.mxu1 %v4891_v24  ;;  %v831_v24 = vld [vmem:[#allocation3 + $0x1708] sm:$0xff]  ;;  %v4721_v29 = vpack.c.bf16 %v814_v18, %v798_v14  ;;  %1774 = vmatprep.mubr.f32.mxu0 %v6681_v26  ;;  %v977_v11 = vld [vmem:[#allocation3 + $0x1b98] sm:$0xff]  ;;  %v960_v18 = vld [vmem:[#allocation3 + $0x1b10] sm:$0xff] }
  0x91   :  { %1987 = vmatprep.mubr.f32.mxu1 %v6681_v26  ;;  %v975_v9 = vld [vmem:[#allocation3 + $0x1b88] sm:$0xff]  ;;  %v1009_v27 = vld [vmem:[#allocation3 + $0x1c98] sm:$0xff] }
  0x92   :  { %4702 = vmatpush1.bf16.msra.mxu0 %v4701_v30  ;;  %v4913_v30 = vpack.c.bf16 %v816_v23, %v800_v20  ;;  %v4739_v14 = vpack.c.bf16 %v975_v9, %v959_v8  ;;  %v4931_v20 = vpack.c.bf16 %v977_v11, %v961_v10  ;;  %v991_v23 = vld [vmem:[#allocation3 + $0x1c08] sm:$0xff]  ;;  %v1041_v39 = vld [vmem:[#allocation3 + $0x1d98] sm:$0xff] }
  0x93   :  { %4894 = vmatpush1.bf16.msra.mxu1 %v4893_v31  ;;  %4704 = vmatprep.subr.bf16.mxu0 %v4703_v32  ;;  %v4723_v31 = vpack.c.bf16 %v847_v25, %v831_v24  ;;  %v830_v32 = vld [vmem:[#allocation3 + $0x1700] sm:$0xff]  ;;  %v1007_v24 = vld [vmem:[#allocation3 + $0x1c88] sm:$0xff]  ;;  %v993_v25 = vld [vmem:[#allocation3 + $0x1c18] sm:$0xff] }
  0x94   :  { %4896 = vmatprep.subr.bf16.mxu1 %v4895_v36  ;;  %v848_v36 = vld [vmem:[#allocation3 + $0x1790] sm:$0xff]  ;;  %v4725_v41 = vpack.c.bf16 %v846_v33, %v830_v32  ;;  %v1006_v32 = vld [vmem:[#allocation3 + $0x1c80] sm:$0xff]  ;;  %v1073_v50 = vld [vmem:[#allocation3 + $0x1e98] sm:$0xff] }
  0x95   :  { %v992_v33 = vld [vmem:[#allocation3 + $0x1c10] sm:$0xff]  ;;  %v1105_v62 = vld [vmem:[#allocation3 + $0x1f98] sm:$0xff]  ;;  %v1135_v8 = vld [vmem:[#allocation3 + $0x2088] sm:$0xff] }
  0x96   :  { %4706 = vmatpush1.bf16.msra.mxu0 %v4705_v42  ;;  %v4917_v42 = vpack.c.bf16 %v848_v36, %v832_v34  ;;  %v4935_v34 = vpack.c.bf16 %v1009_v27, %v993_v25  ;;  %v1023_v36 = vld [vmem:[#allocation3 + $0x1d08] sm:$0xff]  ;;  %v1121_v9 = vld [vmem:[#allocation3 + $0x2018] sm:$0xff] }
  0x97   :  { %4898 = vmatpush1.bf16.msra.mxu1 %v4897_v16  ;;  %4708 = vmatprep.subr.bf16.mxu0 %v4707_v43  ;;  %v4727_v16 = vpack.c.bf16 %v879_v38, %v863_v37  ;;  %v862_v43 = vld [vmem:[#allocation3 + $0x1800] sm:$0xff]  ;;  %v1039_v37 = vld [vmem:[#allocation3 + $0x1d88] sm:$0xff]  ;;  %v1025_v38 = vld [vmem:[#allocation3 + $0x1d18] sm:$0xff] }
  0x98   :  { %4900 = vmatprep.subr.bf16.mxu1 %v4899_v47  ;;  %v880_v47 = vld [vmem:[#allocation3 + $0x1890] sm:$0xff]  ;;  %v4729_v52 = vpack.c.bf16 %v878_v44, %v862_v43  ;;  %v1038_v43 = vld [vmem:[#allocation3 + $0x1d80] sm:$0xff]  ;;  %v1137_v10 = vld [vmem:[#allocation3 + $0x2098] sm:$0xff] }
  0x99   :  { %v1024_v44 = vld [vmem:[#allocation3 + $0x1d10] sm:$0xff]  ;;  %v1169_v25 = vld [vmem:[#allocation3 + $0x2198] sm:$0xff] }
  0x9a   :  { %4710 = vmatpush1.bf16.msra.mxu0 %v4709_v53  ;;  %v4921_v53 = vpack.c.bf16 %v880_v47, %v864_v45  ;;  %v4939_v45 = vpack.c.bf16 %v1041_v39, %v1025_v38  ;;  %v1055_v47 = vld [vmem:[#allocation3 + $0x1e08] sm:$0xff]  ;;  %v1185_v39 = vld [vmem:[#allocation3 + $0x2218] sm:$0xff] }
  0x9b   :  { %4902 = vmatpush1.bf16.msra.mxu1 %v4901_v54  ;;  %4712 = vmatprep.subr.bf16.mxu0 %v4711_v55  ;;  %v4731_v54 = vpack.c.bf16 %v911_v49, %v895_v48  ;;  %v894_v55 = vld [vmem:[#allocation3 + $0x1900] sm:$0xff]  ;;  %v1071_v48 = vld [vmem:[#allocation3 + $0x1e88] sm:$0xff]  ;;  %v1057_v49 = vld [vmem:[#allocation3 + $0x1e18] sm:$0xff] }
  0x9c   :  { %4904 = vmatprep.subr.bf16.mxu1 %v4903_v59  ;;  %v912_v59 = vld [vmem:[#allocation3 + $0x1990] sm:$0xff]  ;;  %v4733_v0 = vpack.c.bf16 %v910_v56, %v894_v55  ;;  %v1070_v55 = vld [vmem:[#allocation3 + $0x1e80] sm:$0xff] }
  0x9d   :  { %v1056_v56 = vld [vmem:[#allocation3 + $0x1e10] sm:$0xff] }
  0x9e   :  { %4714 = vmatpush1.bf16.msra.mxu0 %v4713_v1  ;;  %v4925_v1 = vpack.c.bf16 %v912_v59, %v896_v57  ;;  %v4943_v57 = vpack.c.bf16 %v1073_v50, %v1057_v49  ;;  %v1087_v59 = vld [vmem:[#allocation3 + $0x1f08] sm:$0xff]  ;;  %v1217_v50 = vld [vmem:[#allocation3 + $0x2318] sm:$0xff] }
  0x9f   :  { %4906 = vmatpush1.bf16.msra.mxu1 %v4905_v2  ;;  %4716 = vmatprep.subr.bf16.mxu0 %v4715_v3  ;;  %v4735_v2 = vpack.c.bf16 %v943_v61, %v927_v60  ;;  %v926_v3 = vld [vmem:[#allocation3 + $0x1a00] sm:$0xff]  ;;  %v1103_v60 = vld [vmem:[#allocation3 + $0x1f88] sm:$0xff]  ;;  %v1089_v61 = vld [vmem:[#allocation3 + $0x1f18] sm:$0xff] }
  0xa0   :  { %4908 = vmatprep.subr.bf16.mxu1 %v4907_v7  ;;  %v944_v7 = vld [vmem:[#allocation3 + $0x1a90] sm:$0xff]  ;;  %v4737_v12 = vpack.c.bf16 %v942_v4, %v926_v3  ;;  %v1102_v3 = vld [vmem:[#allocation3 + $0x1f80] sm:$0xff]  ;;  %v1231_v49 = vld [vmem:[#allocation3 + $0x2388] sm:$0xff] }
  0xa1   :  { %v1088_v4 = vld [vmem:[#allocation3 + $0x1f10] sm:$0xff] }
  0xa2   :  { %4718 = vmatpush1.bf16.msra.mxu0 %v4717_v13  ;;  %v4929_v13 = vpack.c.bf16 %v944_v7, %v928_v5  ;;  %v4947_v5 = vpack.c.bf16 %v1105_v62, %v1089_v61  ;;  %v1119_v7 = vld [vmem:[#allocation3 + $0x2008] sm:$0xff]  ;;  %v1249_v61 = vld [vmem:[#allocation3 + $0x2418] sm:$0xff] }
  0xa3   :  { %4910 = vmatpush1.bf16.msra.mxu1 %v4909_v15  ;;  %4720 = vmatprep.subr.bf16.mxu0 %v4719_v17  ;;  %v958_v15 = vld [vmem:[#allocation3 + $0x1b00] sm:$0xff]  ;;  %v1265_v62 = vld [vmem:[#allocation3 + $0x2498] sm:$0xff] }
  0xa4   :  { %4912 = vmatprep.subr.bf16.mxu1 %v4911_v22  ;;  %v974_v17 = vld [vmem:[#allocation3 + $0x1b80] sm:$0xff]  ;;  %v976_v22 = vld [vmem:[#allocation3 + $0x1b90] sm:$0xff] }
  0xa5   :  { %v4741_v28 = vpack.c.bf16 %v974_v17, %v958_v15  ;;  %v1134_v15 = vld [vmem:[#allocation3 + $0x2080] sm:$0xff]  ;;  %v1120_v17 = vld [vmem:[#allocation3 + $0x2010] sm:$0xff] }
  0xa6   :  { %4722 = vmatpush1.bf16.msra.mxu0 %v4721_v29  ;;  %v4933_v29 = vpack.c.bf16 %v976_v22, %v960_v18  ;;  %v4951_v18 = vpack.c.bf16 %v1137_v10, %v1121_v9  ;;  %v1151_v22 = vld [vmem:[#allocation3 + $0x2108] sm:$0xff]  ;;  %v1281_v9 = vld [vmem:[#allocation3 + $0x2518] sm:$0xff] }
  0xa7   :  { %4914 = vmatpush1.bf16.msra.mxu1 %v4913_v30  ;;  %4724 = vmatprep.subr.bf16.mxu0 %v4723_v31  ;;  %v4743_v30 = vpack.c.bf16 %v1007_v24, %v991_v23  ;;  %v990_v31 = vld [vmem:[#allocation3 + $0x1c00] sm:$0xff]  ;;  %v1167_v23 = vld [vmem:[#allocation3 + $0x2188] sm:$0xff]  ;;  %v1153_v24 = vld [vmem:[#allocation3 + $0x2118] sm:$0xff] }
  0xa8   :  { %4916 = vmatprep.subr.bf16.mxu1 %v4915_v35  ;;  %v1008_v35 = vld [vmem:[#allocation3 + $0x1c90] sm:$0xff]  ;;  %v4745_v40 = vpack.c.bf16 %v1006_v32, %v990_v31  ;;  %v1150_v31 = vld [vmem:[#allocation3 + $0x2100] sm:$0xff]  ;;  %v1297_v10 = vld [vmem:[#allocation3 + $0x2598] sm:$0xff] }
  0xa9   :  { %v1166_v32 = vld [vmem:[#allocation3 + $0x2180] sm:$0xff] }
  0xaa   :  { %4726 = vmatpush1.bf16.msra.mxu0 %v4725_v41  ;;  %v4937_v41 = vpack.c.bf16 %v1008_v35, %v992_v33  ;;  %v1152_v33 = vld [vmem:[#allocation3 + $0x2110] sm:$0xff] }
  0xab   :  { %4918 = vmatpush1.bf16.msra.mxu1 %v4917_v42  ;;  %4728 = vmatprep.subr.bf16.mxu0 %v4727_v16  ;;  %v4747_v42 = vpack.c.bf16 %v1039_v37, %v1023_v36  ;;  %v1022_v16 = vld [vmem:[#allocation3 + $0x1d00] sm:$0xff]  ;;  %v1168_v35 = vld [vmem:[#allocation3 + $0x2190] sm:$0xff]  ;;  %v1183_v36 = vld [vmem:[#allocation3 + $0x2208] sm:$0xff] }
  0xac   :  { %4920 = vmatprep.subr.bf16.mxu1 %v4919_v46  ;;  %v1040_v46 = vld [vmem:[#allocation3 + $0x1d90] sm:$0xff]  ;;  %v4749_v51 = vpack.c.bf16 %v1038_v43, %v1022_v16  ;;  %v1199_v37 = vld [vmem:[#allocation3 + $0x2288] sm:$0xff]  ;;  %v1182_v43 = vld [vmem:[#allocation3 + $0x2200] sm:$0xff] }
  0xad   :  { %v4767_v16 = vpack.c.bf16 %v1199_v37, %v1183_v36  ;;  %v1343_v36 = vld [vmem:[#allocation3 + $0x2708] sm:$0xff] }
  0xae   :  { %4730 = vmatpush1.bf16.msra.mxu0 %v4729_v52  ;;  %v4941_v52 = vpack.c.bf16 %v1040_v46, %v1024_v44  ;;  %v1198_v44 = vld [vmem:[#allocation3 + $0x2280] sm:$0xff]  ;;  %v1359_v37 = vld [vmem:[#allocation3 + $0x2788] sm:$0xff] }
  0xaf   :  { %4922 = vmatpush1.bf16.msra.mxu1 %v4921_v53  ;;  %4732 = vmatprep.subr.bf16.mxu0 %v4731_v54  ;;  %v4751_v53 = vpack.c.bf16 %v1071_v48, %v1055_v47  ;;  %v1054_v54 = vld [vmem:[#allocation3 + $0x1e00] sm:$0xff]  ;;  %v1200_v47 = vld [vmem:[#allocation3 + $0x2290] sm:$0xff]  ;;  %v1215_v48 = vld [vmem:[#allocation3 + $0x2308] sm:$0xff] }
  0xb0   :  { %4924 = vmatprep.subr.bf16.mxu1 %v4923_v58  ;;  %v1072_v58 = vld [vmem:[#allocation3 + $0x1e90] sm:$0xff]  ;;  %v4753_v63 = vpack.c.bf16 %v1070_v55, %v1054_v54  ;;  %v1214_v54 = vld [vmem:[#allocation3 + $0x2300] sm:$0xff] }
  0xb1   :  { %v1230_v55 = vld [vmem:[#allocation3 + $0x2380] sm:$0xff] }
  0xb2   :  { %4734 = vmatpush1.bf16.msra.mxu0 %v4733_v0  ;;  %v4945_v0 = vpack.c.bf16 %v1072_v58, %v1056_v56  ;;  %v1216_v56 = vld [vmem:[#allocation3 + $0x2310] sm:$0xff] }
  0xb3   :  { %4926 = vmatpush1.bf16.msra.mxu1 %v4925_v1  ;;  %4736 = vmatprep.subr.bf16.mxu0 %v4735_v2  ;;  %v4755_v1 = vpack.c.bf16 %v1103_v60, %v1087_v59  ;;  %v1086_v2 = vld [vmem:[#allocation3 + $0x1f00] sm:$0xff]  ;;  %v1232_v58 = vld [vmem:[#allocation3 + $0x2390] sm:$0xff]  ;;  %v1247_v59 = vld [vmem:[#allocation3 + $0x2408] sm:$0xff] }
  0xb4   :  { %4928 = vmatprep.subr.bf16.mxu1 %v4927_v6  ;;  %v1104_v6 = vld [vmem:[#allocation3 + $0x1f90] sm:$0xff]  ;;  %v4757_v11 = vpack.c.bf16 %v1102_v3, %v1086_v2  ;;  %v1263_v60 = vld [vmem:[#allocation3 + $0x2488] sm:$0xff]  ;;  %v1246_v2 = vld [vmem:[#allocation3 + $0x2400] sm:$0xff] }
  0xb5   :  { %v1262_v3 = vld [vmem:[#allocation3 + $0x2480] sm:$0xff] }
  0xb6   :  { %4738 = vmatpush1.bf16.msra.mxu0 %v4737_v12  ;;  %v4949_v12 = vpack.c.bf16 %v1104_v6, %v1088_v4  ;;  %v1248_v4 = vld [vmem:[#allocation3 + $0x2410] sm:$0xff] }
  0xb7   :  { %4930 = vmatpush1.bf16.msra.mxu1 %v4929_v13  ;;  %4740 = vmatprep.subr.bf16.mxu0 %v4739_v14  ;;  %v4759_v13 = vpack.c.bf16 %v1135_v8, %v1119_v7  ;;  %v1118_v14 = vld [vmem:[#allocation3 + $0x2000] sm:$0xff]  ;;  %v1264_v6 = vld [vmem:[#allocation3 + $0x2490] sm:$0xff]  ;;  %v1279_v7 = vld [vmem:[#allocation3 + $0x2508] sm:$0xff] }
  0xb8   :  { %4932 = vmatprep.subr.bf16.mxu1 %v4931_v20  ;;  %v1136_v20 = vld [vmem:[#allocation3 + $0x2090] sm:$0xff]  ;;  %v4761_v27 = vpack.c.bf16 %v1134_v15, %v1118_v14  ;;  %v1295_v8 = vld [vmem:[#allocation3 + $0x2588] sm:$0xff]  ;;  %v1278_v14 = vld [vmem:[#allocation3 + $0x2500] sm:$0xff] }
  0xb9   :  { %v1294_v15 = vld [vmem:[#allocation3 + $0x2580] sm:$0xff] }
  0xba   :  { %4742 = vmatpush1.bf16.msra.mxu0 %v4741_v28  ;;  %v6688_v28 = vld [vmem:[%s6884_s0 + $0x10] sm:$0xff] }
  0xbb   :  { %4934 = vmatpush1.bf16.msra.mxu1 %v4933_v29  ;;  %4744 = vmatprep.subr.bf16.mxu0 %v4743_v30  ;;  %v4953_v29 = vpack.c.bf16 %v1136_v20, %v1120_v17  ;;  %v4763_v30 = vpack.c.bf16 %v1167_v23, %v1151_v22  ;;  %v6692_v38 = vcombine.high %v6688_v28, %v6688_v28  ;;  %v1280_v17 = vld [vmem:[#allocation3 + $0x2510] sm:$0xff]  ;;  %v1311_v22 = vld [vmem:[#allocation3 + $0x2608] sm:$0xff] }
  0xbc   :  { %4936 = vmatprep.subr.bf16.mxu1 %v4935_v34  ;;  %v4955_v34 = vpack.c.bf16 %v1169_v25, %v1153_v24  ;;  %v1296_v20 = vld [vmem:[#allocation3 + $0x2590] sm:$0xff]  ;;  %v1327_v23 = vld [vmem:[#allocation3 + $0x2688] sm:$0xff]  ;;  %v1313_v24 = vld [vmem:[#allocation3 + $0x2618] sm:$0xff] }
  0xbd   :  { %v1329_v25 = vld [vmem:[#allocation3 + $0x2698] sm:$0xff] }
  0xbe   :  { %4746 = vmatpush1.bf16.msra.mxu0 %v4745_v40  ;;  %v1201_v40 = vld [vmem:[#allocation3 + $0x2298] sm:$0xff] }
  0xbf   :  { %4938 = vmatpush1.bf16.msra.mxu1 %v4937_v41  ;;  %4748 = vmatprep.subr.bf16.mxu0 %v4747_v42  ;;  %v4765_v41 = vpack.c.bf16 %v1166_v32, %v1150_v31  ;;  %v4957_v42 = vpack.c.bf16 %v1168_v35, %v1152_v33  ;;  %v4959_v46 = vpack.c.bf16 %v1201_v40, %v1185_v39  ;;  %v1310_v31 = vld [vmem:[#allocation3 + $0x2600] sm:$0xff]  ;;  %v1312_v33 = vld [vmem:[#allocation3 + $0x2610] sm:$0xff]  ;;  %v1345_v39 = vld [vmem:[#allocation3 + $0x2718] sm:$0xff] }
  0xc0   :  { %4940 = vmatprep.subr.bf16.mxu1 %v4939_v45  ;;  %v1184_v45 = vld [vmem:[#allocation3 + $0x2210] sm:$0xff]  ;;  %v1326_v32 = vld [vmem:[#allocation3 + $0x2680] sm:$0xff]  ;;  %v1361_v40 = vld [vmem:[#allocation3 + $0x2798] sm:$0xff] }
  0xc1   :  { %v1328_v35 = vld [vmem:[#allocation3 + $0x2690] sm:$0xff] }
  0xc2   :  { %4750 = vmatpush1.bf16.msra.mxu0 %v4749_v51  ;;  %v1233_v51 = vld [vmem:[#allocation3 + $0x2398] sm:$0xff] }
  0xc3   :  { %4942 = vmatpush1.bf16.msra.mxu1 %v4941_v52  ;;  %4752 = vmatprep.subr.bf16.mxu0 %v4751_v53  ;;  %v4961_v52 = vpack.c.bf16 %v1200_v47, %v1184_v45  ;;  %v4771_v53 = vpack.c.bf16 %v1231_v49, %v1215_v48  ;;  %v1344_v45 = vld [vmem:[#allocation3 + $0x2710] sm:$0xff]  ;;  %v1375_v48 = vld [vmem:[#allocation3 + $0x2808] sm:$0xff] }
  0xc4   :  { %4944 = vmatprep.subr.bf16.mxu1 %v4943_v57  ;;  %v4963_v57 = vpack.c.bf16 %v1233_v51, %v1217_v50  ;;  %v1360_v47 = vld [vmem:[#allocation3 + $0x2790] sm:$0xff]  ;;  %v1391_v49 = vld [vmem:[#allocation3 + $0x2888] sm:$0xff]  ;;  %v1377_v50 = vld [vmem:[#allocation3 + $0x2818] sm:$0xff] }
  0xc5   :  { %v1393_v51 = vld [vmem:[#allocation3 + $0x2898] sm:$0xff] }
  0xc6   :  { %4754 = vmatpush1.bf16.msra.mxu0 %v4753_v63  ;;  %v4773_v63 = vpack.c.bf16 %v1230_v55, %v1214_v54  ;;  %v1374_v54 = vld [vmem:[#allocation3 + $0x2800] sm:$0xff] }
  0xc7   :  { %4946 = vmatpush1.bf16.msra.mxu1 %v4945_v0  ;;  %4756 = vmatprep.subr.bf16.mxu0 %v4755_v1  ;;  %v4965_v0 = vpack.c.bf16 %v1232_v58, %v1216_v56  ;;  %v4775_v1 = vpack.c.bf16 %v1263_v60, %v1247_v59  ;;  %v1390_v55 = vld [vmem:[#allocation3 + $0x2880] sm:$0xff]  ;;  %v1376_v56 = vld [vmem:[#allocation3 + $0x2810] sm:$0xff]  ;;  %v1407_v59 = vld [vmem:[#allocation3 + $0x2908] sm:$0xff] }
  0xc8   :  { %4948 = vmatprep.subr.bf16.mxu1 %v4947_v5  ;;  %v4967_v5 = vpack.c.bf16 %v1265_v62, %v1249_v61  ;;  %v1392_v58 = vld [vmem:[#allocation3 + $0x2890] sm:$0xff]  ;;  %v1423_v60 = vld [vmem:[#allocation3 + $0x2988] sm:$0xff]  ;;  %v1409_v61 = vld [vmem:[#allocation3 + $0x2918] sm:$0xff] }
  0xc9   :  { %v1425_v62 = vld [vmem:[#allocation3 + $0x2998] sm:$0xff] }
  0xca   :  { %4758 = vmatpush1.bf16.msra.mxu0 %v4757_v11  ;;  %v4777_v11 = vpack.c.bf16 %v1262_v3, %v1246_v2  ;;  %v1406_v2 = vld [vmem:[#allocation3 + $0x2900] sm:$0xff] }
  0xcb   :  { %4950 = vmatpush1.bf16.msra.mxu1 %v4949_v12  ;;  %4760 = vmatprep.subr.bf16.mxu0 %v4759_v13  ;;  %v4969_v12 = vpack.c.bf16 %v1264_v6, %v1248_v4  ;;  %v4779_v13 = vpack.c.bf16 %v1295_v8, %v1279_v7  ;;  %v1422_v3 = vld [vmem:[#allocation3 + $0x2980] sm:$0xff]  ;;  %v1408_v4 = vld [vmem:[#allocation3 + $0x2910] sm:$0xff]  ;;  %v1439_v7 = vld [vmem:[#allocation3 + $0x2a08] sm:$0xff] }
  0xcc   :  { %4952 = vmatprep.subr.bf16.mxu1 %v4951_v18  ;;  %v4971_v18 = vpack.c.bf16 %v1297_v10, %v1281_v9  ;;  %v1424_v6 = vld [vmem:[#allocation3 + $0x2990] sm:$0xff]  ;;  %v1455_v8 = vld [vmem:[#allocation3 + $0x2a88] sm:$0xff]  ;;  %v1441_v9 = vld [vmem:[#allocation3 + $0x2a18] sm:$0xff] }
  0xcd   :  { %1775 = vmatmul.mubr.f32.vlgmr.msra.gmra.mrb[0].mxu0 %v6677_v21  ;;  %v1457_v10 = vld [vmem:[#allocation3 + $0x2a98] sm:$0xff] }
  0xce   :  { %4762 = vmatpush1.bf16.msra.mxu0 %v4761_v27  ;;  %1988 = vmatmul.mubr.f32.vlgmr.msra.gmra.mrb[0].mxu1 %v6677_v21  ;;  %v4769_v21 = vpack.c.bf16 %v1198_v44, %v1182_v43  ;;  %v4781_v27 = vpack.c.bf16 %v1294_v15, %v1278_v14  ;;  %v1342_v43 = vld [vmem:[#allocation3 + $0x2700] sm:$0xff] }
  0xcf   :  { %4954 = vmatpush1.bf16.msra.mxu1 %v4953_v29  ;;  %4764 = vmatprep.subr.bf16.mxu0 %v4763_v30  ;;  %v4973_v29 = vpack.c.bf16 %v1296_v20, %v1280_v17  ;;  %v4783_v30 = vpack.c.bf16 %v1327_v23, %v1311_v22  ;;  %v1358_v44 = vld [vmem:[#allocation3 + $0x2780] sm:$0xff]  ;;  %v1440_v17 = vld [vmem:[#allocation3 + $0x2a10] sm:$0xff]  ;;  %v1471_v22 = vld [vmem:[#allocation3 + $0x2b08] sm:$0xff] }
  0xd0   :  { %4956 = vmatprep.subr.bf16.mxu1 %v4955_v34  ;;  %1845 = vmatprep.mubr.f32.mxu0 %v6692_v38  ;;  %v4975_v34 = vpack.c.bf16 %v1329_v25, %v1313_v24  ;;  %v1438_v14 = vld [vmem:[#allocation3 + $0x2a00] sm:$0xff]  ;;  %v1456_v20 = vld [vmem:[#allocation3 + $0x2a90] sm:$0xff]  ;;  %v1487_v23 = vld [vmem:[#allocation3 + $0x2b88] sm:$0xff] }
  0xd1   :  { %2058 = vmatprep.mubr.f32.mxu1 %v6692_v38  ;;  %v1454_v15 = vld [vmem:[#allocation3 + $0x2a80] sm:$0xff]  ;;  %v1473_v24 = vld [vmem:[#allocation3 + $0x2b18] sm:$0xff] }
  0xd2   :  { %4766 = vmatpush1.bf16.msra.mxu0 %v4765_v41  ;;  %v4785_v41 = vpack.c.bf16 %v1326_v32, %v1310_v31  ;;  %v1489_v25 = vld [vmem:[#allocation3 + $0x2b98] sm:$0xff]  ;;  %v1470_v31 = vld [vmem:[#allocation3 + $0x2b00] sm:$0xff] }
  0xd3   :  { %4958 = vmatpush1.bf16.msra.mxu1 %v4957_v42  ;;  %4768 = vmatprep.subr.bf16.mxu0 %v4767_v16  ;;  %v4977_v42 = vpack.c.bf16 %v1328_v35, %v1312_v33  ;;  %v4787_v16 = vpack.c.bf16 %v1359_v37, %v1343_v36  ;;  %v1486_v32 = vld [vmem:[#allocation3 + $0x2b80] sm:$0xff]  ;;  %v1472_v33 = vld [vmem:[#allocation3 + $0x2b10] sm:$0xff]  ;;  %v1503_v36 = vld [vmem:[#allocation3 + $0x2c08] sm:$0xff] }
  0xd4   :  { %4960 = vmatprep.subr.bf16.mxu1 %v4959_v46  ;;  %v4979_v46 = vpack.c.bf16 %v1361_v40, %v1345_v39  ;;  %v1488_v35 = vld [vmem:[#allocation3 + $0x2b90] sm:$0xff]  ;;  %v1519_v37 = vld [vmem:[#allocation3 + $0x2c88] sm:$0xff]  ;;  %v1505_v39 = vld [vmem:[#allocation3 + $0x2c18] sm:$0xff] }
  0xd5   :  { %v1521_v40 = vld [vmem:[#allocation3 + $0x2c98] sm:$0xff] }
  0xd6   :  { %4770 = vmatpush1.bf16.msra.mxu0 %v4769_v21  ;;  %v4789_v21 = vpack.c.bf16 %v1358_v44, %v1342_v43  ;;  %v1502_v43 = vld [vmem:[#allocation3 + $0x2c00] sm:$0xff] }
  0xd7   :  { %4962 = vmatpush1.bf16.msra.mxu1 %v4961_v52  ;;  %4772 = vmatprep.subr.bf16.mxu0 %v4771_v53  ;;  %v4981_v52 = vpack.c.bf16 %v1360_v47, %v1344_v45  ;;  %v4791_v53 = vpack.c.bf16 %v1391_v49, %v1375_v48  ;;  %v1518_v44 = vld [vmem:[#allocation3 + $0x2c80] sm:$0xff]  ;;  %v1504_v45 = vld [vmem:[#allocation3 + $0x2c10] sm:$0xff]  ;;  %v1535_v48 = vld [vmem:[#allocation3 + $0x2d08] sm:$0xff] }
  0xd8   :  { %4964 = vmatprep.subr.bf16.mxu1 %v4963_v57  ;;  %v4983_v57 = vpack.c.bf16 %v1393_v51, %v1377_v50  ;;  %v1520_v47 = vld [vmem:[#allocation3 + $0x2c90] sm:$0xff]  ;;  %v1551_v49 = vld [vmem:[#allocation3 + $0x2d88] sm:$0xff]  ;;  %v1537_v50 = vld [vmem:[#allocation3 + $0x2d18] sm:$0xff] }
  0xd9   :  { %v1553_v51 = vld [vmem:[#allocation3 + $0x2d98] sm:$0xff] }
  0xda   :  { %4774 = vmatpush1.bf16.msra.mxu0 %v4773_v63  ;;  %v4793_v63 = vpack.c.bf16 %v1390_v55, %v1374_v54  ;;  %v1534_v54 = vld [vmem:[#allocation3 + $0x2d00] sm:$0xff] }
  0xdb   :  { %4966 = vmatpush1.bf16.msra.mxu1 %v4965_v0  ;;  %4776 = vmatprep.subr.bf16.mxu0 %v4775_v1  ;;  %v4985_v0 = vpack.c.bf16 %v1392_v58, %v1376_v56  ;;  %v4795_v1 = vpack.c.bf16 %v1423_v60, %v1407_v59  ;;  %v1550_v55 = vld [vmem:[#allocation3 + $0x2d80] sm:$0xff]  ;;  %v1536_v56 = vld [vmem:[#allocation3 + $0x2d10] sm:$0xff]  ;;  %v1567_v59 = vld [vmem:[#allocation3 + $0x2e08] sm:$0xff] }
  0xdc   :  { %4968 = vmatprep.subr.bf16.mxu1 %v4967_v5  ;;  %v4987_v5 = vpack.c.bf16 %v1425_v62, %v1409_v61  ;;  %v1552_v58 = vld [vmem:[#allocation3 + $0x2d90] sm:$0xff]  ;;  %v1583_v60 = vld [vmem:[#allocation3 + $0x2e88] sm:$0xff]  ;;  %v1569_v61 = vld [vmem:[#allocation3 + $0x2e18] sm:$0xff] }
  0xdd   :  { %v1585_v62 = vld [vmem:[#allocation3 + $0x2e98] sm:$0xff] }
  0xde   :  { %4778 = vmatpush1.bf16.msra.mxu0 %v4777_v11  ;;  %v4797_v11 = vpack.c.bf16 %v1422_v3, %v1406_v2  ;;  %v1566_v2 = vld [vmem:[#allocation3 + $0x2e00] sm:$0xff] }
  0xdf   :  { %4970 = vmatpush1.bf16.msra.mxu1 %v4969_v12  ;;  %4780 = vmatprep.subr.bf16.mxu0 %v4779_v13  ;;  %v4989_v12 = vpack.c.bf16 %v1424_v6, %v1408_v4  ;;  %v4799_v13 = vpack.c.bf16 %v1455_v8, %v1439_v7  ;;  %v1582_v3 = vld [vmem:[#allocation3 + $0x2e80] sm:$0xff]  ;;  %v1568_v4 = vld [vmem:[#allocation3 + $0x2e10] sm:$0xff]  ;;  %v1599_v7 = vld [vmem:[#allocation3 + $0x2f08] sm:$0xff] }
  0xe0   :  { %4972 = vmatprep.subr.bf16.mxu1 %v4971_v18  ;;  %v4991_v18 = vpack.c.bf16 %v1457_v10, %v1441_v9  ;;  %v1584_v6 = vld [vmem:[#allocation3 + $0x2e90] sm:$0xff]  ;;  %v1615_v8 = vld [vmem:[#allocation3 + $0x2f88] sm:$0xff]  ;;  %v1601_v9 = vld [vmem:[#allocation3 + $0x2f18] sm:$0xff] }
  0xe1   :  { %v1617_v10 = vld [vmem:[#allocation3 + $0x2f98] sm:$0xff] }
  0xe2   :  { %4782 = vmatpush1.bf16.msra.mxu0 %v4781_v27  ;;  %v4801_v27 = vpack.c.bf16 %v1454_v15, %v1438_v14  ;;  %v1598_v14 = vld [vmem:[#allocation3 + $0x2f00] sm:$0xff] }
  0xe3   :  { %4974 = vmatpush1.bf16.msra.mxu1 %v4973_v29  ;;  %4784 = vmatprep.subr.bf16.mxu0 %v4783_v30  ;;  %v4993_v29 = vpack.c.bf16 %v1456_v20, %v1440_v17  ;;  %v4803_v30 = vpack.c.bf16 %v1487_v23, %v1471_v22  ;;  %v1614_v15 = vld [vmem:[#allocation3 + $0x2f80] sm:$0xff]  ;;  %v1600_v17 = vld [vmem:[#allocation3 + $0x2f10] sm:$0xff]  ;;  %v99_v22 = vld [vmem:[#allocation3 + $0x28] sm:$0xff] }
  0xe4   :  { %4976 = vmatprep.subr.bf16.mxu1 %v4975_v34  ;;  %v4995_v34 = vpack.c.bf16 %v1489_v25, %v1473_v24  ;;  %v1616_v20 = vld [vmem:[#allocation3 + $0x2f90] sm:$0xff]  ;;  %v115_v23 = vld [vmem:[#allocation3 + $0xa8] sm:$0xff]  ;;  %v101_v24 = vld [vmem:[#allocation3 + $0x38] sm:$0xff] }
  0xe5   :  { %v117_v25 = vld [vmem:[#allocation3 + $0xb8] sm:$0xff] }
  0xe6   :  { %4786 = vmatpush1.bf16.msra.mxu0 %v4785_v41  ;;  %v4805_v41 = vpack.c.bf16 %v1486_v32, %v1470_v31  ;;  %v98_v31 = vld [vmem:[#allocation3 + $0x20] sm:$0xff] }
  0xe7   :  { %4978 = vmatpush1.bf16.msra.mxu1 %v4977_v42  ;;  %4788 = vmatprep.subr.bf16.mxu0 %v4787_v16  ;;  %v4997_v42 = vpack.c.bf16 %v1488_v35, %v1472_v33  ;;  %v4807_v16 = vpack.c.bf16 %v1519_v37, %v1503_v36  ;;  %v114_v32 = vld [vmem:[#allocation3 + $0xa0] sm:$0xff]  ;;  %v100_v33 = vld [vmem:[#allocation3 + $0x30] sm:$0xff]  ;;  %v131_v36 = vld [vmem:[#allocation3 + $0x128] sm:$0xff] }
  0xe8   :  { %4980 = vmatprep.subr.bf16.mxu1 %v4979_v46  ;;  %v4999_v46 = vpack.c.bf16 %v1521_v40, %v1505_v39  ;;  %v116_v35 = vld [vmem:[#allocation3 + $0xb0] sm:$0xff]  ;;  %v147_v37 = vld [vmem:[#allocation3 + $0x1a8] sm:$0xff]  ;;  %v133_v39 = vld [vmem:[#allocation3 + $0x138] sm:$0xff] }
  0xe9   :  { %v149_v40 = vld [vmem:[#allocation3 + $0x1b8] sm:$0xff] }
  0xea   :  { %4790 = vmatpush1.bf16.msra.mxu0 %v4789_v21  ;;  %v4809_v21 = vpack.c.bf16 %v1518_v44, %v1502_v43  ;;  %v130_v43 = vld [vmem:[#allocation3 + $0x120] sm:$0xff] }
  0xeb   :  { %4982 = vmatpush1.bf16.msra.mxu1 %v4981_v52  ;;  %4792 = vmatprep.subr.bf16.mxu0 %v4791_v53  ;;  %v5001_v52 = vpack.c.bf16 %v1520_v47, %v1504_v45  ;;  %v4811_v53 = vpack.c.bf16 %v1551_v49, %v1535_v48  ;;  %v146_v44 = vld [vmem:[#allocation3 + $0x1a0] sm:$0xff]  ;;  %v132_v45 = vld [vmem:[#allocation3 + $0x130] sm:$0xff]  ;;  %v163_v48 = vld [vmem:[#allocation3 + $0x228] sm:$0xff] }
  0xec   :  { %4984 = vmatprep.subr.bf16.mxu1 %v4983_v57  ;;  %v5003_v57 = vpack.c.bf16 %v1553_v51, %v1537_v50  ;;  %v148_v47 = vld [vmem:[#allocation3 + $0x1b0] sm:$0xff]  ;;  %v179_v49 = vld [vmem:[#allocation3 + $0x2a8] sm:$0xff]  ;;  %v165_v50 = vld [vmem:[#allocation3 + $0x238] sm:$0xff] }
  0xed   :  { %v181_v51 = vld [vmem:[#allocation3 + $0x2b8] sm:$0xff] }
  0xee   :  { %4794 = vmatpush1.bf16.msra.mxu0 %v4793_v63  ;;  %v4813_v63 = vpack.c.bf16 %v1550_v55, %v1534_v54  ;;  %v162_v54 = vld [vmem:[#allocation3 + $0x220] sm:$0xff] }
  0xef   :  { %4986 = vmatpush1.bf16.msra.mxu1 %v4985_v0  ;;  %4796 = vmatprep.subr.bf16.mxu0 %v4795_v1  ;;  %v5005_v0 = vpack.c.bf16 %v1552_v58, %v1536_v56  ;;  %v4815_v1 = vpack.c.bf16 %v1583_v60, %v1567_v59  ;;  %v178_v55 = vld [vmem:[#allocation3 + $0x2a0] sm:$0xff]  ;;  %v164_v56 = vld [vmem:[#allocation3 + $0x230] sm:$0xff]  ;;  %v195_v59 = vld [vmem:[#allocation3 + $0x328] sm:$0xff] }
  0xf0   :  { %4988 = vmatprep.subr.bf16.mxu1 %v4987_v5  ;;  %v5007_v5 = vpack.c.bf16 %v1585_v62, %v1569_v61  ;;  %v180_v58 = vld [vmem:[#allocation3 + $0x2b0] sm:$0xff]  ;;  %v211_v60 = vld [vmem:[#allocation3 + $0x3a8] sm:$0xff]  ;;  %v197_v61 = vld [vmem:[#allocation3 + $0x338] sm:$0xff] }
  0xf1   :  { %v213_v62 = vld [vmem:[#allocation3 + $0x3b8] sm:$0xff] }
  0xf2   :  { %4798 = vmatpush1.bf16.msra.mxu0 %v4797_v11  ;;  %v4817_v11 = vpack.c.bf16 %v1582_v3, %v1566_v2  ;;  %v210_v2 = vld [vmem:[#allocation3 + $0x3a0] sm:$0xff]  ;;  %v196_v3 = vld [vmem:[#allocation3 + $0x330] sm:$0xff] }
  0xf3   :  { %4990 = vmatpush1.bf16.msra.mxu1 %v4989_v12  ;;  %4800 = vmatprep.subr.bf16.mxu0 %v4799_v13  ;;  %v5009_v12 = vpack.c.bf16 %v1584_v6, %v1568_v4  ;;  %v4819_v13 = vpack.c.bf16 %v1615_v8, %v1599_v7  ;;  %v5219_v4 = vpack.c.bf16 %v213_v62, %v197_v61  ;;  %v227_v6 = vld [vmem:[#allocation3 + $0x428] sm:$0xff]  ;;  %v229_v8 = vld [vmem:[#allocation3 + $0x438] sm:$0xff] }
  0xf4   :  { %4992 = vmatprep.subr.bf16.mxu1 %v4991_v18  ;;  %v5011_v18 = vpack.c.bf16 %v1617_v10, %v1601_v9  ;;  %v243_v7 = vld [vmem:[#allocation3 + $0x4a8] sm:$0xff]  ;;  %v245_v9 = vld [vmem:[#allocation3 + $0x4b8] sm:$0xff] }
  0xf5   :  { %v373_v61 = vld [vmem:[#allocation3 + $0x8b8] sm:$0xff] }
  0xf6   :  { %4802 = vmatpush1.bf16.msra.mxu0 %v4801_v27  ;;  %v4821_v27 = vpack.c.bf16 %v1614_v15, %v1598_v14  ;;  %v242_v14 = vld [vmem:[#allocation3 + $0x4a0] sm:$0xff]  ;;  %v228_v15 = vld [vmem:[#allocation3 + $0x430] sm:$0xff] }
  0xf7   :  { %4994 = vmatpush1.bf16.msra.mxu1 %v4993_v29  ;;  %4804 = vmatprep.subr.bf16.mxu0 %v4803_v30  ;;  %v5013_v29 = vpack.c.bf16 %v1616_v20, %v1600_v17  ;;  %v5015_v30 = vpack.c.bf16 %v115_v23, %v99_v22  ;;  %v5223_v17 = vpack.c.bf16 %v245_v9, %v229_v8  ;;  %v259_v20 = vld [vmem:[#allocation3 + $0x528] sm:$0xff]  ;;  %v261_v23 = vld [vmem:[#allocation3 + $0x538] sm:$0xff] }
  0xf8   :  { %4996 = vmatprep.subr.bf16.mxu1 %v4995_v34  ;;  %v5207_v34 = vpack.c.bf16 %v117_v25, %v101_v24  ;;  %v275_v22 = vld [vmem:[#allocation3 + $0x5a8] sm:$0xff]  ;;  %v277_v24 = vld [vmem:[#allocation3 + $0x5b8] sm:$0xff] }
  0xf9   :  { %v405_v8 = vld [vmem:[#allocation3 + $0x9b8] sm:$0xff] }
  0xfa   :  { %4806 = vmatpush1.bf16.msra.mxu0 %v4805_v41  ;;  %v5017_v41 = vpack.c.bf16 %v114_v32, %v98_v31  ;;  %v274_v31 = vld [vmem:[#allocation3 + $0x5a0] sm:$0xff]  ;;  %v260_v32 = vld [vmem:[#allocation3 + $0x530] sm:$0xff] }
  0xfb   :  { %4998 = vmatpush1.bf16.msra.mxu1 %v4997_v42  ;;  %4808 = vmatprep.subr.bf16.mxu0 %v4807_v16  ;;  %v5209_v42 = vpack.c.bf16 %v116_v35, %v100_v33  ;;  %v5019_v16 = vpack.c.bf16 %v147_v37, %v131_v36  ;;  %v5227_v33 = vpack.c.bf16 %v277_v24, %v261_v23  ;;  %v291_v35 = vld [vmem:[#allocation3 + $0x628] sm:$0xff]  ;;  %v293_v37 = vld [vmem:[#allocation3 + $0x638] sm:$0xff] }
  0xfc   :  { %5000 = vmatprep.subr.bf16.mxu1 %v4999_v46  ;;  %v5211_v46 = vpack.c.bf16 %v149_v40, %v133_v39  ;;  %v307_v36 = vld [vmem:[#allocation3 + $0x6a8] sm:$0xff]  ;;  %v309_v39 = vld [vmem:[#allocation3 + $0x6b8] sm:$0xff] }
  0xfd   :  { %v437_v23 = vld [vmem:[#allocation3 + $0xab8] sm:$0xff] }
  0xfe   :  { %4810 = vmatpush1.bf16.msra.mxu0 %v4809_v21  ;;  %v5021_v21 = vpack.c.bf16 %v146_v44, %v130_v43  ;;  %v306_v43 = vld [vmem:[#allocation3 + $0x6a0] sm:$0xff]  ;;  %v292_v44 = vld [vmem:[#allocation3 + $0x630] sm:$0xff] }
  0xff   :  { %5002 = vmatpush1.bf16.msra.mxu1 %v5001_v52  ;;  %4812 = vmatprep.subr.bf16.mxu0 %v4811_v53  ;;  %v5213_v52 = vpack.c.bf16 %v148_v47, %v132_v45  ;;  %v5023_v53 = vpack.c.bf16 %v179_v49, %v163_v48  ;;  %v5231_v45 = vpack.c.bf16 %v309_v39, %v293_v37  ;;  %v323_v47 = vld [vmem:[#allocation3 + $0x728] sm:$0xff]  ;;  %v325_v49 = vld [vmem:[#allocation3 + $0x738] sm:$0xff] }
 0x100   :  { %5004 = vmatprep.subr.bf16.mxu1 %v5003_v57  ;;  %v5215_v57 = vpack.c.bf16 %v181_v51, %v165_v50  ;;  %v339_v48 = vld [vmem:[#allocation3 + $0x7a8] sm:$0xff]  ;;  %v341_v50 = vld [vmem:[#allocation3 + $0x7b8] sm:$0xff] }
 0x101   :  { %v469_v37 = vld [vmem:[#allocation3 + $0xbb8] sm:$0xff] }
 0x102   :  { %4814 = vmatpush1.bf16.msra.mxu0 %v4813_v63  ;;  %v5217_v63 = vpack.c.bf16 %v180_v58, %v164_v56  ;;  %v5235_v56 = vpack.c.bf16 %v341_v50, %v325_v49  ;;  %v355_v58 = vld [vmem:[#allocation3 + $0x828] sm:$0xff]  ;;  %v501_v49 = vld [vmem:[#allocation3 + $0xcb8] sm:$0xff] }
 0x103   :  { %5006 = vmatpush1.bf16.msra.mxu1 %v5005_v0  ;;  %4816 = vmatprep.subr.bf16.mxu0 %v4815_v1  ;;  %v5027_v0 = vpack.c.bf16 %v211_v60, %v195_v59  ;;  %v194_v1 = vld [vmem:[#allocation3 + $0x320] sm:$0xff]  ;;  %v371_v59 = vld [vmem:[#allocation3 + $0x8a8] sm:$0xff]  ;;  %v357_v60 = vld [vmem:[#allocation3 + $0x838] sm:$0xff] }
 0x104   :  { %5008 = vmatprep.subr.bf16.mxu1 %v5007_v5  ;;  %v212_v5 = vld [vmem:[#allocation3 + $0x3b0] sm:$0xff]  ;;  %v5029_v10 = vpack.c.bf16 %v210_v2, %v194_v1  ;;  %v370_v1 = vld [vmem:[#allocation3 + $0x8a0] sm:$0xff] }
 0x105   :  { %v356_v2 = vld [vmem:[#allocation3 + $0x830] sm:$0xff] }
 0x106   :  { %4818 = vmatpush1.bf16.msra.mxu0 %v4817_v11  ;;  %v5221_v11 = vpack.c.bf16 %v212_v5, %v196_v3  ;;  %v5239_v3 = vpack.c.bf16 %v373_v61, %v357_v60  ;;  %v387_v5 = vld [vmem:[#allocation3 + $0x928] sm:$0xff]  ;;  %v533_v60 = vld [vmem:[#allocation3 + $0xdb8] sm:$0xff] }
 0x107   :  { %5010 = vmatpush1.bf16.msra.mxu1 %v5009_v12  ;;  %4820 = vmatprep.subr.bf16.mxu0 %v4819_v13  ;;  %v5031_v12 = vpack.c.bf16 %v243_v7, %v227_v6  ;;  %v226_v13 = vld [vmem:[#allocation3 + $0x420] sm:$0xff]  ;;  %v403_v6 = vld [vmem:[#allocation3 + $0x9a8] sm:$0xff]  ;;  %v389_v7 = vld [vmem:[#allocation3 + $0x938] sm:$0xff] }
 0x108   :  { %5012 = vmatprep.subr.bf16.mxu1 %v5011_v18  ;;  %v244_v18 = vld [vmem:[#allocation3 + $0x4b0] sm:$0xff]  ;;  %v5033_v25 = vpack.c.bf16 %v242_v14, %v226_v13  ;;  %v402_v13 = vld [vmem:[#allocation3 + $0x9a0] sm:$0xff] }
 0x109   :  { %v388_v14 = vld [vmem:[#allocation3 + $0x930] sm:$0xff] }
 0x10a   :  { %4822 = vmatpush1.bf16.msra.mxu0 %v4821_v27  ;;  %v5225_v27 = vpack.c.bf16 %v244_v18, %v228_v15  ;;  %v5243_v15 = vpack.c.bf16 %v405_v8, %v389_v7  ;;  %v419_v18 = vld [vmem:[#allocation3 + $0xa28] sm:$0xff]  ;;  %v565_v7 = vld [vmem:[#allocation3 + $0xeb8] sm:$0xff] }
 0x10b   :  { %5014 = vmatpush1.bf16.msra.mxu1 %v5013_v29  ;;  %5016 = vmatprep.subr.bf16.mxu0 %v5015_v30  ;;  %v5035_v29 = vpack.c.bf16 %v275_v22, %v259_v20  ;;  %v258_v30 = vld [vmem:[#allocation3 + $0x520] sm:$0xff]  ;;  %v435_v20 = vld [vmem:[#allocation3 + $0xaa8] sm:$0xff]  ;;  %v421_v22 = vld [vmem:[#allocation3 + $0xa38] sm:$0xff] }
 0x10c   :  { %5208 = vmatprep.subr.bf16.mxu1 %v5207_v34  ;;  %v276_v34 = vld [vmem:[#allocation3 + $0x5b0] sm:$0xff]  ;;  %v5037_v40 = vpack.c.bf16 %v274_v31, %v258_v30  ;;  %v434_v30 = vld [vmem:[#allocation3 + $0xaa0] sm:$0xff] }
 0x10d   :  { %1846 = vmatmul.mubr.f32.vlgmr.msra.gmra.mrb[0].mxu0 %v6688_v28  ;;  %v420_v31 = vld [vmem:[#allocation3 + $0xa30] sm:$0xff] }
 0x10e   :  { %2059 = vmatmul.mubr.f32.vlgmr.msra.gmra.mrb[0].mxu1 %v6688_v28  ;;  %5018 = vmatpush1.bf16.msra.mxu0 %v5017_v41  ;;  %v5025_v28 = vpack.c.bf16 %v178_v55, %v162_v54  ;;  %v5229_v41 = vpack.c.bf16 %v276_v34, %v260_v32  ;;  %v338_v54 = vld [vmem:[#allocation3 + $0x7a0] sm:$0xff]  ;;  %v324_v55 = vld [vmem:[#allocation3 + $0x730] sm:$0xff]  ;;  %v5247_v32 = vpack.c.bf16 %v437_v23, %v421_v22  ;;  %v451_v34 = vld [vmem:[#allocation3 + $0xb28] sm:$0xff] }
 0x10f   :  { %5210 = vmatpush1.bf16.msra.mxu1 %v5209_v42  ;;  %5020 = vmatprep.subr.bf16.mxu0 %v5019_v16  ;;  %v5039_v42 = vpack.c.bf16 %v307_v36, %v291_v35  ;;  %v290_v16 = vld [vmem:[#allocation3 + $0x620] sm:$0xff]  ;;  %v467_v35 = vld [vmem:[#allocation3 + $0xba8] sm:$0xff]  ;;  %v453_v36 = vld [vmem:[#allocation3 + $0xb38] sm:$0xff] }
 0x110   :  { %5212 = vmatprep.subr.bf16.mxu1 %v5211_v46  ;;  %2129 = vmatprep.mubr.f32.mxu0 %v6668_v19  ;;  %v308_v46 = vld [vmem:[#allocation3 + $0x6b0] sm:$0xff]  ;;  %v5041_v51 = vpack.c.bf16 %v306_v43, %v290_v16  ;;  %v466_v16 = vld [vmem:[#allocation3 + $0xba0] sm:$0xff]  ;;  %v597_v22 = vld [vmem:[#allocation3 + $0xfb8] sm:$0xff] }
 0x111   :  { %2342 = vmatprep.mubr.f32.mxu1 %v6668_v19  ;;  %v452_v43 = vld [vmem:[#allocation3 + $0xb30] sm:$0xff] }
 0x112   :  { %5022 = vmatpush1.bf16.msra.mxu0 %v5021_v21  ;;  %v5233_v21 = vpack.c.bf16 %v308_v46, %v292_v44  ;;  %v5251_v44 = vpack.c.bf16 %v469_v37, %v453_v36  ;;  %v483_v46 = vld [vmem:[#allocation3 + $0xc28] sm:$0xff]  ;;  %v629_v36 = vld [vmem:[#allocation3 + $0x10b8] sm:$0xff] }
 0x113   :  { %5214 = vmatpush1.bf16.msra.mxu1 %v5213_v52  ;;  %5024 = vmatprep.subr.bf16.mxu0 %v5023_v53  ;;  %v5043_v52 = vpack.c.bf16 %v339_v48, %v323_v47  ;;  %v322_v53 = vld [vmem:[#allocation3 + $0x720] sm:$0xff]  ;;  %v499_v47 = vld [vmem:[#allocation3 + $0xca8] sm:$0xff]  ;;  %v485_v48 = vld [vmem:[#allocation3 + $0xc38] sm:$0xff] }
 0x114   :  { %5216 = vmatprep.subr.bf16.mxu1 %v5215_v57  ;;  %v340_v57 = vld [vmem:[#allocation3 + $0x7b0] sm:$0xff]  ;;  %v5045_v62 = vpack.c.bf16 %v338_v54, %v322_v53  ;;  %v498_v53 = vld [vmem:[#allocation3 + $0xca0] sm:$0xff] }
 0x115   :  { %v484_v54 = vld [vmem:[#allocation3 + $0xc30] sm:$0xff] }
 0x116   :  { %5026 = vmatpush1.bf16.msra.mxu0 %v5025_v28  ;;  %v5237_v28 = vpack.c.bf16 %v340_v57, %v324_v55  ;;  %v5255_v55 = vpack.c.bf16 %v501_v49, %v485_v48  ;;  %v515_v57 = vld [vmem:[#allocation3 + $0xd28] sm:$0xff]  ;;  %v661_v48 = vld [vmem:[#allocation3 + $0x11b8] sm:$0xff] }
 0x117   :  { %5218 = vmatpush1.bf16.msra.mxu1 %v5217_v63  ;;  %5028 = vmatprep.subr.bf16.mxu0 %v5027_v0  ;;  %v5047_v63 = vpack.c.bf16 %v371_v59, %v355_v58  ;;  %v354_v0 = vld [vmem:[#allocation3 + $0x820] sm:$0xff]  ;;  %v531_v58 = vld [vmem:[#allocation3 + $0xda8] sm:$0xff]  ;;  %v517_v59 = vld [vmem:[#allocation3 + $0xd38] sm:$0xff] }
 0x118   :  { %5220 = vmatprep.subr.bf16.mxu1 %v5219_v4  ;;  %v372_v4 = vld [vmem:[#allocation3 + $0x8b0] sm:$0xff]  ;;  %v5049_v9 = vpack.c.bf16 %v370_v1, %v354_v0  ;;  %v530_v0 = vld [vmem:[#allocation3 + $0xda0] sm:$0xff] }
 0x119   :  { %v516_v1 = vld [vmem:[#allocation3 + $0xd30] sm:$0xff] }
 0x11a   :  { %5030 = vmatpush1.bf16.msra.mxu0 %v5029_v10  ;;  %v5241_v10 = vpack.c.bf16 %v372_v4, %v356_v2  ;;  %v5259_v2 = vpack.c.bf16 %v533_v60, %v517_v59  ;;  %v547_v4 = vld [vmem:[#allocation3 + $0xe28] sm:$0xff]  ;;  %v677_v59 = vld [vmem:[#allocation3 + $0x1238] sm:$0xff] }
 0x11b   :  { %5222 = vmatpush1.bf16.msra.mxu1 %v5221_v11  ;;  %5032 = vmatprep.subr.bf16.mxu0 %v5031_v12  ;;  %v5051_v11 = vpack.c.bf16 %v403_v6, %v387_v5  ;;  %v386_v12 = vld [vmem:[#allocation3 + $0x920] sm:$0xff]  ;;  %v563_v5 = vld [vmem:[#allocation3 + $0xea8] sm:$0xff]  ;;  %v549_v6 = vld [vmem:[#allocation3 + $0xe38] sm:$0xff] }
 0x11c   :  { %5224 = vmatprep.subr.bf16.mxu1 %v5223_v17  ;;  %v404_v17 = vld [vmem:[#allocation3 + $0x9b0] sm:$0xff]  ;;  %v5053_v24 = vpack.c.bf16 %v402_v13, %v386_v12  ;;  %v562_v12 = vld [vmem:[#allocation3 + $0xea0] sm:$0xff]  ;;  %v693_v60 = vld [vmem:[#allocation3 + $0x12b8] sm:$0xff] }
 0x11d   :  { %v548_v13 = vld [vmem:[#allocation3 + $0xe30] sm:$0xff] }
 0x11e   :  { %5034 = vmatpush1.bf16.msra.mxu0 %v5033_v25  ;;  %v5245_v25 = vpack.c.bf16 %v404_v17, %v388_v14  ;;  %v5263_v14 = vpack.c.bf16 %v565_v7, %v549_v6  ;;  %v579_v17 = vld [vmem:[#allocation3 + $0xf28] sm:$0xff]  ;;  %v709_v6 = vld [vmem:[#allocation3 + $0x1338] sm:$0xff] }
 0x11f   :  { %5226 = vmatpush1.bf16.msra.mxu1 %v5225_v27  ;;  %5036 = vmatprep.subr.bf16.mxu0 %v5035_v29  ;;  %v5055_v27 = vpack.c.bf16 %v435_v20, %v419_v18  ;;  %v418_v29 = vld [vmem:[#allocation3 + $0xa20] sm:$0xff]  ;;  %v595_v18 = vld [vmem:[#allocation3 + $0xfa8] sm:$0xff]  ;;  %v581_v20 = vld [vmem:[#allocation3 + $0xf38] sm:$0xff] }
 0x120   :  { %5228 = vmatprep.subr.bf16.mxu1 %v5227_v33  ;;  %v436_v33 = vld [vmem:[#allocation3 + $0xab0] sm:$0xff]  ;;  %v5057_v39 = vpack.c.bf16 %v434_v30, %v418_v29  ;;  %v594_v29 = vld [vmem:[#allocation3 + $0xfa0] sm:$0xff]  ;;  %v725_v7 = vld [vmem:[#allocation3 + $0x13b8] sm:$0xff] }
 0x121   :  { %v580_v30 = vld [vmem:[#allocation3 + $0xf30] sm:$0xff] }
 0x122   :  { %5038 = vmatpush1.bf16.msra.mxu0 %v5037_v40  ;;  %v5249_v40 = vpack.c.bf16 %v436_v33, %v420_v31  ;;  %v5267_v31 = vpack.c.bf16 %v597_v22, %v581_v20  ;;  %v611_v33 = vld [vmem:[#allocation3 + $0x1028] sm:$0xff]  ;;  %v741_v20 = vld [vmem:[#allocation3 + $0x1438] sm:$0xff] }
 0x123   :  { %5230 = vmatpush1.bf16.msra.mxu1 %v5229_v41  ;;  %5040 = vmatprep.subr.bf16.mxu0 %v5039_v42  ;;  %v5059_v41 = vpack.c.bf16 %v467_v35, %v451_v34  ;;  %v450_v42 = vld [vmem:[#allocation3 + $0xb20] sm:$0xff]  ;;  %v627_v34 = vld [vmem:[#allocation3 + $0x10a8] sm:$0xff]  ;;  %v613_v35 = vld [vmem:[#allocation3 + $0x1038] sm:$0xff] }
 0x124   :  { %5232 = vmatprep.subr.bf16.mxu1 %v5231_v45  ;;  %v468_v45 = vld [vmem:[#allocation3 + $0xbb0] sm:$0xff]  ;;  %v5061_v50 = vpack.c.bf16 %v466_v16, %v450_v42  ;;  %v626_v42 = vld [vmem:[#allocation3 + $0x10a0] sm:$0xff]  ;;  %v757_v22 = vld [vmem:[#allocation3 + $0x14b8] sm:$0xff] }
 0x125   :  { %v612_v16 = vld [vmem:[#allocation3 + $0x1030] sm:$0xff] }
 0x126   :  { %5042 = vmatpush1.bf16.msra.mxu0 %v5041_v51  ;;  %v5253_v51 = vpack.c.bf16 %v468_v45, %v452_v43  ;;  %v5271_v43 = vpack.c.bf16 %v629_v36, %v613_v35  ;;  %v643_v45 = vld [vmem:[#allocation3 + $0x1128] sm:$0xff]  ;;  %v773_v35 = vld [vmem:[#allocation3 + $0x1538] sm:$0xff] }
 0x127   :  { %5234 = vmatpush1.bf16.msra.mxu1 %v5233_v21  ;;  %5044 = vmatprep.subr.bf16.mxu0 %v5043_v52  ;;  %v5063_v21 = vpack.c.bf16 %v499_v47, %v483_v46  ;;  %v482_v52 = vld [vmem:[#allocation3 + $0xc20] sm:$0xff]  ;;  %v659_v46 = vld [vmem:[#allocation3 + $0x11a8] sm:$0xff]  ;;  %v645_v47 = vld [vmem:[#allocation3 + $0x1138] sm:$0xff] }
 0x128   :  { %5236 = vmatprep.subr.bf16.mxu1 %v5235_v56  ;;  %v500_v56 = vld [vmem:[#allocation3 + $0xcb0] sm:$0xff]  ;;  %v5065_v61 = vpack.c.bf16 %v498_v53, %v482_v52  ;;  %v658_v52 = vld [vmem:[#allocation3 + $0x11a0] sm:$0xff]  ;;  %v789_v36 = vld [vmem:[#allocation3 + $0x15b8] sm:$0xff] }
 0x129   :  { %v644_v53 = vld [vmem:[#allocation3 + $0x1130] sm:$0xff] }
 0x12a   :  { %5046 = vmatpush1.bf16.msra.mxu0 %v5045_v62  ;;  %v5257_v62 = vpack.c.bf16 %v500_v56, %v484_v54  ;;  %v5275_v54 = vpack.c.bf16 %v661_v48, %v645_v47  ;;  %v675_v56 = vld [vmem:[#allocation3 + $0x1228] sm:$0xff]  ;;  %v805_v47 = vld [vmem:[#allocation3 + $0x1638] sm:$0xff] }
 0x12b   :  { %5238 = vmatpush1.bf16.msra.mxu1 %v5237_v28  ;;  %5048 = vmatprep.subr.bf16.mxu0 %v5047_v63  ;;  %v5067_v28 = vpack.c.bf16 %v531_v58, %v515_v57  ;;  %v514_v63 = vld [vmem:[#allocation3 + $0xd20] sm:$0xff]  ;;  %v691_v57 = vld [vmem:[#allocation3 + $0x12a8] sm:$0xff]  ;;  %v821_v48 = vld [vmem:[#allocation3 + $0x16b8] sm:$0xff] }
 0x12c   :  { %5240 = vmatprep.subr.bf16.mxu1 %v5239_v3  ;;  %v532_v3 = vld [vmem:[#allocation3 + $0xdb0] sm:$0xff]  ;;  %v5069_v8 = vpack.c.bf16 %v530_v0, %v514_v63  ;;  %v6465_v58 = vld [vmem:[%s6884_s0] sm:$0xff] }
 0x12d   :  { %v674_v63 = vld [vmem:[#allocation3 + $0x1220] sm:$0xff] }
 0x12e   :  { %5050 = vmatpush1.bf16.msra.mxu0 %v5049_v9  ;;  %v5261_v9 = vpack.c.bf16 %v532_v3, %v516_v1  ;;  %v690_v0 = vld [vmem:[#allocation3 + $0x12a0] sm:$0xff]  ;;  %v676_v1 = vld [vmem:[#allocation3 + $0x1230] sm:$0xff] }
 0x12f   :  { %5242 = vmatpush1.bf16.msra.mxu1 %v5241_v10  ;;  %5052 = vmatprep.subr.bf16.mxu0 %v5051_v11  ;;  %v5071_v10 = vpack.c.bf16 %v563_v5, %v547_v4  ;;  %v546_v11 = vld [vmem:[#allocation3 + $0xe20] sm:$0xff]  ;;  %v692_v3 = vld [vmem:[#allocation3 + $0x12b0] sm:$0xff]  ;;  %v707_v4 = vld [vmem:[#allocation3 + $0x1328] sm:$0xff] }
 0x130   :  { %5244 = vmatprep.subr.bf16.mxu1 %v5243_v15  ;;  %v564_v15 = vld [vmem:[#allocation3 + $0xeb0] sm:$0xff]  ;;  %v5073_v23 = vpack.c.bf16 %v562_v12, %v546_v11  ;;  %v723_v5 = vld [vmem:[#allocation3 + $0x13a8] sm:$0xff]  ;;  %v706_v11 = vld [vmem:[#allocation3 + $0x1320] sm:$0xff] }
 0x131   :  { %v722_v12 = vld [vmem:[#allocation3 + $0x13a0] sm:$0xff] }
 0x132   :  { %5054 = vmatpush1.bf16.msra.mxu0 %v5053_v24  ;;  %v5265_v24 = vpack.c.bf16 %v564_v15, %v548_v13  ;;  %v708_v13 = vld [vmem:[#allocation3 + $0x1330] sm:$0xff] }
 0x133   :  { %5246 = vmatpush1.bf16.msra.mxu1 %v5245_v25  ;;  %5056 = vmatprep.subr.bf16.mxu0 %v5055_v27  ;;  %v5075_v25 = vpack.c.bf16 %v595_v18, %v579_v17  ;;  %v578_v27 = vld [vmem:[#allocation3 + $0xf20] sm:$0xff]  ;;  %v724_v15 = vld [vmem:[#allocation3 + $0x13b0] sm:$0xff]  ;;  %v739_v17 = vld [vmem:[#allocation3 + $0x1428] sm:$0xff] }
 0x134   :  { %5248 = vmatprep.subr.bf16.mxu1 %v5247_v32  ;;  %v596_v32 = vld [vmem:[#allocation3 + $0xfb0] sm:$0xff]  ;;  %v5077_v37 = vpack.c.bf16 %v594_v29, %v578_v27  ;;  %v755_v18 = vld [vmem:[#allocation3 + $0x14a8] sm:$0xff]  ;;  %v738_v27 = vld [vmem:[#allocation3 + $0x1420] sm:$0xff] }
 0x135   :  { %v754_v29 = vld [vmem:[#allocation3 + $0x14a0] sm:$0xff] }
 0x136   :  { %5058 = vmatpush1.bf16.msra.mxu0 %v5057_v39  ;;  %v5269_v39 = vpack.c.bf16 %v596_v32, %v580_v30  ;;  %v740_v30 = vld [vmem:[#allocation3 + $0x1430] sm:$0xff] }
 0x137   :  { %5250 = vmatpush1.bf16.msra.mxu1 %v5249_v40  ;;  %5060 = vmatprep.subr.bf16.mxu0 %v5059_v41  ;;  %v5079_v40 = vpack.c.bf16 %v627_v34, %v611_v33  ;;  %v610_v41 = vld [vmem:[#allocation3 + $0x1020] sm:$0xff]  ;;  %v756_v32 = vld [vmem:[#allocation3 + $0x14b0] sm:$0xff]  ;;  %v771_v33 = vld [vmem:[#allocation3 + $0x1528] sm:$0xff] }
 0x138   :  { %5252 = vmatprep.subr.bf16.mxu1 %v5251_v44  ;;  %v628_v44 = vld [vmem:[#allocation3 + $0x10b0] sm:$0xff]  ;;  %v5081_v49 = vpack.c.bf16 %v626_v42, %v610_v41  ;;  %v787_v34 = vld [vmem:[#allocation3 + $0x15a8] sm:$0xff]  ;;  %v770_v41 = vld [vmem:[#allocation3 + $0x1520] sm:$0xff] }
 0x139   :  { %v786_v42 = vld [vmem:[#allocation3 + $0x15a0] sm:$0xff] }
 0x13a   :  { %5062 = vmatpush1.bf16.msra.mxu0 %v5061_v50  ;;  %v5273_v50 = vpack.c.bf16 %v628_v44, %v612_v16  ;;  %v772_v16 = vld [vmem:[#allocation3 + $0x1530] sm:$0xff] }
 0x13b   :  { %5254 = vmatpush1.bf16.msra.mxu1 %v5253_v51  ;;  %5064 = vmatprep.subr.bf16.mxu0 %v5063_v21  ;;  %v5083_v51 = vpack.c.bf16 %v659_v46, %v643_v45  ;;  %v642_v21 = vld [vmem:[#allocation3 + $0x1120] sm:$0xff]  ;;  %v788_v44 = vld [vmem:[#allocation3 + $0x15b0] sm:$0xff]  ;;  %v803_v45 = vld [vmem:[#allocation3 + $0x1628] sm:$0xff] }
 0x13c   :  { %5256 = vmatprep.subr.bf16.mxu1 %v5255_v55  ;;  %v660_v55 = vld [vmem:[#allocation3 + $0x11b0] sm:$0xff]  ;;  %v819_v46 = vld [vmem:[#allocation3 + $0x16a8] sm:$0xff] }
 0x13e   :  { %5066 = vmatpush1.bf16.msra.mxu0 %v5065_v61  ;;  %v5085_v61 = vpack.c.bf16 %v658_v52, %v642_v21  ;;  %v802_v21 = vld [vmem:[#allocation3 + $0x1620] sm:$0xff] }
 0x13f   :  { %5258 = vmatpush1.bf16.msra.mxu1 %v5257_v62  ;;  %5068 = vmatprep.subr.bf16.mxu0 %v5067_v28  ;;  %v5277_v62 = vpack.c.bf16 %v660_v55, %v644_v53  ;;  %v5087_v28 = vpack.c.bf16 %v691_v57, %v675_v56  ;;  %v818_v52 = vld [vmem:[#allocation3 + $0x16a0] sm:$0xff]  ;;  %v804_v53 = vld [vmem:[#allocation3 + $0x1630] sm:$0xff]  ;;  %v835_v56 = vld [vmem:[#allocation3 + $0x1728] sm:$0xff] }
 0x140   :  { %5260 = vmatprep.subr.bf16.mxu1 %v5259_v2  ;;  %v5279_v2 = vpack.c.bf16 %v693_v60, %v677_v59  ;;  %v820_v55 = vld [vmem:[#allocation3 + $0x16b0] sm:$0xff]  ;;  %v851_v57 = vld [vmem:[#allocation3 + $0x17a8] sm:$0xff]  ;;  %v853_v59 = vld [vmem:[#allocation3 + $0x17b8] sm:$0xff]  ;;  %v5105_v60 = vpack.c.bf16 %v818_v52, %v802_v21 }
 0x141   :  { %v978_v21 = vld [vmem:[#allocation3 + $0x1ba0] sm:$0xff]  ;;  %v964_v52 = vld [vmem:[#allocation3 + $0x1b30] sm:$0xff] }
 0x142   :  { %5070 = vmatpush1.bf16.msra.mxu0 %v5069_v8  ;;  %v5089_v8 = vpack.c.bf16 %v690_v0, %v674_v63  ;;  %v850_v63 = vld [vmem:[#allocation3 + $0x17a0] sm:$0xff]  ;;  %v836_v0 = vld [vmem:[#allocation3 + $0x1730] sm:$0xff] }
 0x143   :  { %5262 = vmatpush1.bf16.msra.mxu1 %v5261_v9  ;;  %5072 = vmatprep.subr.bf16.mxu0 %v5071_v10  ;;  %v5281_v9 = vpack.c.bf16 %v692_v3, %v676_v1  ;;  %v5091_v10 = vpack.c.bf16 %v723_v5, %v707_v4  ;;  %v867_v3 = vld [vmem:[#allocation3 + $0x1828] sm:$0xff]  ;;  %v869_v5 = vld [vmem:[#allocation3 + $0x1838] sm:$0xff] }
 0x144   :  { %5264 = vmatprep.subr.bf16.mxu1 %v5263_v14  ;;  %v5283_v14 = vpack.c.bf16 %v725_v7, %v709_v6  ;;  %v883_v4 = vld [vmem:[#allocation3 + $0x18a8] sm:$0xff]  ;;  %v885_v6 = vld [vmem:[#allocation3 + $0x18b8] sm:$0xff] }
 0x146   :  { %5074 = vmatpush1.bf16.msra.mxu0 %v5073_v23  ;;  %v5093_v23 = vpack.c.bf16 %v722_v12, %v706_v11  ;;  %v882_v11 = vld [vmem:[#allocation3 + $0x18a0] sm:$0xff]  ;;  %v868_v12 = vld [vmem:[#allocation3 + $0x1830] sm:$0xff] }
 0x147   :  { %5266 = vmatpush1.bf16.msra.mxu1 %v5265_v24  ;;  %5076 = vmatprep.subr.bf16.mxu0 %v5075_v25  ;;  %v5285_v24 = vpack.c.bf16 %v724_v15, %v708_v13  ;;  %v5095_v25 = vpack.c.bf16 %v755_v18, %v739_v17  ;;  %v5303_v13 = vpack.c.bf16 %v885_v6, %v869_v5  ;;  %v899_v15 = vld [vmem:[#allocation3 + $0x1928] sm:$0xff]  ;;  %v901_v18 = vld [vmem:[#allocation3 + $0x1938] sm:$0xff] }
 0x148   :  { %5268 = vmatprep.subr.bf16.mxu1 %v5267_v31  ;;  %v5287_v31 = vpack.c.bf16 %v757_v22, %v741_v20  ;;  %v915_v17 = vld [vmem:[#allocation3 + $0x19a8] sm:$0xff]  ;;  %v917_v20 = vld [vmem:[#allocation3 + $0x19b8] sm:$0xff] }
 0x149   :  { %v1045_v5 = vld [vmem:[#allocation3 + $0x1db8] sm:$0xff] }
 0x14a   :  { %5078 = vmatpush1.bf16.msra.mxu0 %v5077_v37  ;;  %v5097_v37 = vpack.c.bf16 %v754_v29, %v738_v27  ;;  %v914_v27 = vld [vmem:[#allocation3 + $0x19a0] sm:$0xff]  ;;  %v900_v29 = vld [vmem:[#allocation3 + $0x1930] sm:$0xff] }
 0x14b   :  { %5270 = vmatpush1.bf16.msra.mxu1 %v5269_v39  ;;  %5080 = vmatprep.subr.bf16.mxu0 %v5079_v40  ;;  %v5289_v39 = vpack.c.bf16 %v756_v32, %v740_v30  ;;  %v5099_v40 = vpack.c.bf16 %v787_v34, %v771_v33  ;;  %v5307_v30 = vpack.c.bf16 %v917_v20, %v901_v18  ;;  %v931_v32 = vld [vmem:[#allocation3 + $0x1a28] sm:$0xff]  ;;  %v933_v34 = vld [vmem:[#allocation3 + $0x1a38] sm:$0xff] }
 0x14c   :  { %5272 = vmatprep.subr.bf16.mxu1 %v5271_v43  ;;  %v5291_v43 = vpack.c.bf16 %v789_v36, %v773_v35  ;;  %v947_v33 = vld [vmem:[#allocation3 + $0x1aa8] sm:$0xff]  ;;  %v949_v35 = vld [vmem:[#allocation3 + $0x1ab8] sm:$0xff] }
 0x14d   :  { %2130 = vmatmul.mubr.f32.vlgmr.msra.gmra.mrb[2].mxu0 %v6465_v58  ;;  %v1077_v18 = vld [vmem:[#allocation3 + $0x1eb8] sm:$0xff] }
 0x14e   :  { %5082 = vmatpush1.bf16.msra.mxu0 %v5081_v49  ;;  %2343 = vmatmul.mubr.f32.vlgmr.msra.gmra.mrb[2].mxu1 %v6465_v58  ;;  %v5101_v49 = vpack.c.bf16 %v786_v42, %v770_v41  ;;  %v837_v58 = vld [vmem:[#allocation3 + $0x1738] sm:$0xff]  ;;  %v946_v41 = vld [vmem:[#allocation3 + $0x1aa0] sm:$0xff]  ;;  %v932_v42 = vld [vmem:[#allocation3 + $0x1a30] sm:$0xff] }
 0x14f   :  { %5274 = vmatpush1.bf16.msra.mxu1 %v5273_v50  ;;  %5084 = vmatprep.subr.bf16.mxu0 %v5083_v51  ;;  %v5293_v50 = vpack.c.bf16 %v788_v44, %v772_v16  ;;  %v5103_v51 = vpack.c.bf16 %v819_v46, %v803_v45  ;;  %v5299_v1 = vpack.c.bf16 %v853_v59, %v837_v58  ;;  %v963_v44 = vld [vmem:[#allocation3 + $0x1b28] sm:$0xff]  ;;  %v965_v46 = vld [vmem:[#allocation3 + $0x1b38] sm:$0xff] }
 0x150   :  { %5276 = vmatprep.subr.bf16.mxu1 %v5275_v54  ;;  %2200 = vmatprep.mubr.f32.mxu0 %v6681_v26  ;;  %v5295_v54 = vpack.c.bf16 %v821_v48, %v805_v47  ;;  %v5311_v16 = vpack.c.bf16 %v949_v35, %v933_v34  ;;  %v979_v45 = vld [vmem:[#allocation3 + $0x1ba8] sm:$0xff]  ;;  %v981_v47 = vld [vmem:[#allocation3 + $0x1bb8] sm:$0xff] }
 0x151   :  { %2413 = vmatprep.mubr.f32.mxu1 %v6681_v26  ;;  %v1013_v58 = vld [vmem:[#allocation3 + $0x1cb8] sm:$0xff] }
 0x152   :  { %5086 = vmatpush1.bf16.msra.mxu0 %v5085_v61  ;;  %v5297_v61 = vpack.c.bf16 %v820_v55, %v804_v53  ;;  %v5315_v53 = vpack.c.bf16 %v981_v47, %v965_v46  ;;  %v995_v55 = vld [vmem:[#allocation3 + $0x1c28] sm:$0xff]  ;;  %v1109_v34 = vld [vmem:[#allocation3 + $0x1fb8] sm:$0xff] }
 0x153   :  { %5278 = vmatpush1.bf16.msra.mxu1 %v5277_v62  ;;  %5088 = vmatprep.subr.bf16.mxu0 %v5087_v28  ;;  %v5107_v62 = vpack.c.bf16 %v851_v57, %v835_v56  ;;  %v834_v28 = vld [vmem:[#allocation3 + $0x1720] sm:$0xff]  ;;  %v1011_v56 = vld [vmem:[#allocation3 + $0x1ca8] sm:$0xff]  ;;  %v997_v57 = vld [vmem:[#allocation3 + $0x1c38] sm:$0xff] }
 0x154   :  { %5280 = vmatprep.subr.bf16.mxu1 %v5279_v2  ;;  %v852_v2 = vld [vmem:[#allocation3 + $0x17b0] sm:$0xff]  ;;  %v5109_v7 = vpack.c.bf16 %v850_v63, %v834_v28  ;;  %v1010_v28 = vld [vmem:[#allocation3 + $0x1ca0] sm:$0xff]  ;;  %v1141_v46 = vld [vmem:[#allocation3 + $0x20b8] sm:$0xff] }
 0x155   :  { %v996_v63 = vld [vmem:[#allocation3 + $0x1c30] sm:$0xff] }
 0x156   :  { %5090 = vmatpush1.bf16.msra.mxu0 %v5089_v8  ;;  %v5301_v8 = vpack.c.bf16 %v852_v2, %v836_v0  ;;  %v5319_v0 = vpack.c.bf16 %v1013_v58, %v997_v57  ;;  %v1027_v2 = vld [vmem:[#allocation3 + $0x1d28] sm:$0xff]  ;;  %v1173_v57 = vld [vmem:[#allocation3 + $0x21b8] sm:$0xff] }
 0x157   :  { %5282 = vmatpush1.bf16.msra.mxu1 %v5281_v9  ;;  %5092 = vmatprep.subr.bf16.mxu0 %v5091_v10  ;;  %v5111_v9 = vpack.c.bf16 %v883_v4, %v867_v3  ;;  %v866_v10 = vld [vmem:[#allocation3 + $0x1820] sm:$0xff]  ;;  %v1043_v3 = vld [vmem:[#allocation3 + $0x1da8] sm:$0xff]  ;;  %v1029_v4 = vld [vmem:[#allocation3 + $0x1d38] sm:$0xff] }
 0x158   :  { %5284 = vmatprep.subr.bf16.mxu1 %v5283_v14  ;;  %v884_v14 = vld [vmem:[#allocation3 + $0x18b0] sm:$0xff]  ;;  %v5113_v22 = vpack.c.bf16 %v882_v11, %v866_v10  ;;  %v1042_v10 = vld [vmem:[#allocation3 + $0x1da0] sm:$0xff] }
 0x159   :  { %v1028_v11 = vld [vmem:[#allocation3 + $0x1d30] sm:$0xff] }
 0x15a   :  { %5094 = vmatpush1.bf16.msra.mxu0 %v5093_v23  ;;  %v5305_v23 = vpack.c.bf16 %v884_v14, %v868_v12  ;;  %v5323_v12 = vpack.c.bf16 %v1045_v5, %v1029_v4  ;;  %v1059_v14 = vld [vmem:[#allocation3 + $0x1e28] sm:$0xff]  ;;  %v1189_v4 = vld [vmem:[#allocation3 + $0x2238] sm:$0xff] }
 0x15b   :  { %5286 = vmatpush1.bf16.msra.mxu1 %v5285_v24  ;;  %5096 = vmatprep.subr.bf16.mxu0 %v5095_v25  ;;  %v5115_v24 = vpack.c.bf16 %v915_v17, %v899_v15  ;;  %v898_v25 = vld [vmem:[#allocation3 + $0x1920] sm:$0xff]  ;;  %v1075_v15 = vld [vmem:[#allocation3 + $0x1ea8] sm:$0xff]  ;;  %v1061_v17 = vld [vmem:[#allocation3 + $0x1e38] sm:$0xff] }
 0x15c   :  { %5288 = vmatprep.subr.bf16.mxu1 %v5287_v31  ;;  %v916_v31 = vld [vmem:[#allocation3 + $0x19b0] sm:$0xff]  ;;  %v5117_v36 = vpack.c.bf16 %v914_v27, %v898_v25  ;;  %v1074_v25 = vld [vmem:[#allocation3 + $0x1ea0] sm:$0xff]  ;;  %v1205_v5 = vld [vmem:[#allocation3 + $0x22b8] sm:$0xff] }
 0x15d   :  { %v1060_v27 = vld [vmem:[#allocation3 + $0x1e30] sm:$0xff] }
 0x15e   :  { %5098 = vmatpush1.bf16.msra.mxu0 %v5097_v37  ;;  %v5309_v37 = vpack.c.bf16 %v916_v31, %v900_v29  ;;  %v5327_v29 = vpack.c.bf16 %v1077_v18, %v1061_v17  ;;  %v1091_v31 = vld [vmem:[#allocation3 + $0x1f28] sm:$0xff]  ;;  %v1221_v17 = vld [vmem:[#allocation3 + $0x2338] sm:$0xff] }
 0x15f   :  { %5290 = vmatpush1.bf16.msra.mxu1 %v5289_v39  ;;  %5100 = vmatprep.subr.bf16.mxu0 %v5099_v40  ;;  %v5119_v39 = vpack.c.bf16 %v947_v33, %v931_v32  ;;  %v930_v40 = vld [vmem:[#allocation3 + $0x1a20] sm:$0xff]  ;;  %v1107_v32 = vld [vmem:[#allocation3 + $0x1fa8] sm:$0xff]  ;;  %v1093_v33 = vld [vmem:[#allocation3 + $0x1f38] sm:$0xff] }
 0x160   :  { %5292 = vmatprep.subr.bf16.mxu1 %v5291_v43  ;;  %v948_v43 = vld [vmem:[#allocation3 + $0x1ab0] sm:$0xff]  ;;  %v5121_v48 = vpack.c.bf16 %v946_v41, %v930_v40  ;;  %v1106_v40 = vld [vmem:[#allocation3 + $0x1fa0] sm:$0xff]  ;;  %v1237_v18 = vld [vmem:[#allocation3 + $0x23b8] sm:$0xff] }
 0x161   :  { %v1092_v41 = vld [vmem:[#allocation3 + $0x1f30] sm:$0xff] }
 0x162   :  { %5102 = vmatpush1.bf16.msra.mxu0 %v5101_v49  ;;  %v5313_v49 = vpack.c.bf16 %v948_v43, %v932_v42  ;;  %v5331_v42 = vpack.c.bf16 %v1109_v34, %v1093_v33  ;;  %v1123_v43 = vld [vmem:[#allocation3 + $0x2028] sm:$0xff]  ;;  %v1253_v33 = vld [vmem:[#allocation3 + $0x2438] sm:$0xff] }
 0x163   :  { %5294 = vmatpush1.bf16.msra.mxu1 %v5293_v50  ;;  %5104 = vmatprep.subr.bf16.mxu0 %v5103_v51  ;;  %v5123_v50 = vpack.c.bf16 %v979_v45, %v963_v44  ;;  %v962_v51 = vld [vmem:[#allocation3 + $0x1b20] sm:$0xff]  ;;  %v1139_v44 = vld [vmem:[#allocation3 + $0x20a8] sm:$0xff]  ;;  %v1125_v45 = vld [vmem:[#allocation3 + $0x2038] sm:$0xff] }
 0x164   :  { %5296 = vmatprep.subr.bf16.mxu1 %v5295_v54  ;;  %v980_v54 = vld [vmem:[#allocation3 + $0x1bb0] sm:$0xff]  ;;  %v5125_v59 = vpack.c.bf16 %v978_v21, %v962_v51  ;;  %v1138_v51 = vld [vmem:[#allocation3 + $0x20a0] sm:$0xff]  ;;  %v1269_v34 = vld [vmem:[#allocation3 + $0x24b8] sm:$0xff] }
 0x165   :  { %v1124_v21 = vld [vmem:[#allocation3 + $0x2030] sm:$0xff] }
 0x166   :  { %5106 = vmatpush1.bf16.msra.mxu0 %v5105_v60  ;;  %v5317_v60 = vpack.c.bf16 %v980_v54, %v964_v52  ;;  %v5335_v52 = vpack.c.bf16 %v1141_v46, %v1125_v45  ;;  %v1155_v54 = vld [vmem:[#allocation3 + $0x2128] sm:$0xff]  ;;  %v1285_v45 = vld [vmem:[#allocation3 + $0x2538] sm:$0xff] }
 0x167   :  { %5298 = vmatpush1.bf16.msra.mxu1 %v5297_v61  ;;  %5108 = vmatprep.subr.bf16.mxu0 %v5107_v62  ;;  %v5127_v61 = vpack.c.bf16 %v1011_v56, %v995_v55  ;;  %v994_v62 = vld [vmem:[#allocation3 + $0x1c20] sm:$0xff]  ;;  %v1171_v55 = vld [vmem:[#allocation3 + $0x21a8] sm:$0xff]  ;;  %v1157_v56 = vld [vmem:[#allocation3 + $0x2138] sm:$0xff] }
 0x168   :  { %5300 = vmatprep.subr.bf16.mxu1 %v5299_v1  ;;  %v1012_v1 = vld [vmem:[#allocation3 + $0x1cb0] sm:$0xff]  ;;  %v5129_v6 = vpack.c.bf16 %v1010_v28, %v994_v62  ;;  %v1170_v62 = vld [vmem:[#allocation3 + $0x21a0] sm:$0xff]  ;;  %v1301_v46 = vld [vmem:[#allocation3 + $0x25b8] sm:$0xff] }
 0x169   :  { %v1156_v28 = vld [vmem:[#allocation3 + $0x2130] sm:$0xff] }
 0x16a   :  { %5110 = vmatpush1.bf16.msra.mxu0 %v5109_v7  ;;  %v5321_v7 = vpack.c.bf16 %v1012_v1, %v996_v63  ;;  %v5339_v63 = vpack.c.bf16 %v1173_v57, %v1157_v56  ;;  %v1187_v1 = vld [vmem:[#allocation3 + $0x2228] sm:$0xff]  ;;  %v1317_v56 = vld [vmem:[#allocation3 + $0x2638] sm:$0xff] }
 0x16b   :  { %5302 = vmatpush1.bf16.msra.mxu1 %v5301_v8  ;;  %5112 = vmatprep.subr.bf16.mxu0 %v5111_v9  ;;  %v5131_v8 = vpack.c.bf16 %v1043_v3, %v1027_v2  ;;  %v1026_v9 = vld [vmem:[#allocation3 + $0x1d20] sm:$0xff]  ;;  %v1203_v2 = vld [vmem:[#allocation3 + $0x22a8] sm:$0xff]  ;;  %v1333_v57 = vld [vmem:[#allocation3 + $0x26b8] sm:$0xff] }
 0x16c   :  { %5304 = vmatprep.subr.bf16.mxu1 %v5303_v13  ;;  %v1044_v13 = vld [vmem:[#allocation3 + $0x1db0] sm:$0xff]  ;;  %v5133_v20 = vpack.c.bf16 %v1042_v10, %v1026_v9  ;;  %v6466_v3 = vld [vmem:[%s6884_s0 + $0x8] sm:$0xff]  ;;  %v1186_v9 = vld [vmem:[#allocation3 + $0x2220] sm:$0xff] }
 0x16d   :  { %v1202_v10 = vld [vmem:[#allocation3 + $0x22a0] sm:$0xff] }
 0x16e   :  { %5114 = vmatpush1.bf16.msra.mxu0 %v5113_v22  ;;  %v5325_v22 = vpack.c.bf16 %v1044_v13, %v1028_v11  ;;  %v1188_v11 = vld [vmem:[#allocation3 + $0x2230] sm:$0xff] }
 0x16f   :  { %5306 = vmatpush1.bf16.msra.mxu1 %v5305_v23  ;;  %5116 = vmatprep.subr.bf16.mxu0 %v5115_v24  ;;  %v5135_v23 = vpack.c.bf16 %v1075_v15, %v1059_v14  ;;  %v1058_v24 = vld [vmem:[#allocation3 + $0x1e20] sm:$0xff]  ;;  %v1204_v13 = vld [vmem:[#allocation3 + $0x22b0] sm:$0xff]  ;;  %v1219_v14 = vld [vmem:[#allocation3 + $0x2328] sm:$0xff] }
 0x170   :  { %5308 = vmatprep.subr.bf16.mxu1 %v5307_v30  ;;  %v1076_v30 = vld [vmem:[#allocation3 + $0x1eb0] sm:$0xff]  ;;  %v5137_v35 = vpack.c.bf16 %v1074_v25, %v1058_v24  ;;  %v1235_v15 = vld [vmem:[#allocation3 + $0x23a8] sm:$0xff]  ;;  %v1218_v24 = vld [vmem:[#allocation3 + $0x2320] sm:$0xff] }
 0x171   :  { %v1234_v25 = vld [vmem:[#allocation3 + $0x23a0] sm:$0xff] }
 0x172   :  { %5118 = vmatpush1.bf16.msra.mxu0 %v5117_v36  ;;  %v5329_v36 = vpack.c.bf16 %v1076_v30, %v1060_v27  ;;  %v1220_v27 = vld [vmem:[#allocation3 + $0x2330] sm:$0xff] }
 0x173   :  { %5310 = vmatpush1.bf16.msra.mxu1 %v5309_v37  ;;  %5120 = vmatprep.subr.bf16.mxu0 %v5119_v39  ;;  %v5139_v37 = vpack.c.bf16 %v1107_v32, %v1091_v31  ;;  %v1090_v39 = vld [vmem:[#allocation3 + $0x1f20] sm:$0xff]  ;;  %v1236_v30 = vld [vmem:[#allocation3 + $0x23b0] sm:$0xff]  ;;  %v1251_v31 = vld [vmem:[#allocation3 + $0x2428] sm:$0xff] }
 0x174   :  { %5312 = vmatprep.subr.bf16.mxu1 %v5311_v16  ;;  %v1108_v16 = vld [vmem:[#allocation3 + $0x1fb0] sm:$0xff]  ;;  %v5141_v47 = vpack.c.bf16 %v1106_v40, %v1090_v39  ;;  %v1267_v32 = vld [vmem:[#allocation3 + $0x24a8] sm:$0xff]  ;;  %v1250_v39 = vld [vmem:[#allocation3 + $0x2420] sm:$0xff] }
 0x175   :  { %v1266_v40 = vld [vmem:[#allocation3 + $0x24a0] sm:$0xff] }
 0x176   :  { %5122 = vmatpush1.bf16.msra.mxu0 %v5121_v48  ;;  %v5333_v48 = vpack.c.bf16 %v1108_v16, %v1092_v41  ;;  %v1252_v41 = vld [vmem:[#allocation3 + $0x2430] sm:$0xff] }
 0x177   :  { %5314 = vmatpush1.bf16.msra.mxu1 %v5313_v49  ;;  %5124 = vmatprep.subr.bf16.mxu0 %v5123_v50  ;;  %v5143_v49 = vpack.c.bf16 %v1139_v44, %v1123_v43  ;;  %v1122_v50 = vld [vmem:[#allocation3 + $0x2020] sm:$0xff]  ;;  %v1268_v16 = vld [vmem:[#allocation3 + $0x24b0] sm:$0xff]  ;;  %v1283_v43 = vld [vmem:[#allocation3 + $0x2528] sm:$0xff] }
 0x178   :  { %5316 = vmatprep.subr.bf16.mxu1 %v5315_v53  ;;  %v1140_v53 = vld [vmem:[#allocation3 + $0x20b0] sm:$0xff]  ;;  %v5145_v58 = vpack.c.bf16 %v1138_v51, %v1122_v50  ;;  %v1299_v44 = vld [vmem:[#allocation3 + $0x25a8] sm:$0xff]  ;;  %v1282_v50 = vld [vmem:[#allocation3 + $0x2520] sm:$0xff] }
 0x179   :  { %v1298_v51 = vld [vmem:[#allocation3 + $0x25a0] sm:$0xff] }
 0x17a   :  { %5126 = vmatpush1.bf16.msra.mxu0 %v5125_v59  ;;  %v5337_v59 = vpack.c.bf16 %v1140_v53, %v1124_v21  ;;  %v1284_v21 = vld [vmem:[#allocation3 + $0x2530] sm:$0xff] }
 0x17b   :  { %5318 = vmatpush1.bf16.msra.mxu1 %v5317_v60  ;;  %5128 = vmatprep.subr.bf16.mxu0 %v5127_v61  ;;  %v5147_v60 = vpack.c.bf16 %v1171_v55, %v1155_v54  ;;  %v1154_v61 = vld [vmem:[#allocation3 + $0x2120] sm:$0xff]  ;;  %v1300_v53 = vld [vmem:[#allocation3 + $0x25b0] sm:$0xff]  ;;  %v1315_v54 = vld [vmem:[#allocation3 + $0x2628] sm:$0xff] }
 0x17c   :  { %5320 = vmatprep.subr.bf16.mxu1 %v5319_v0  ;;  %v1172_v0 = vld [vmem:[#allocation3 + $0x21b0] sm:$0xff]  ;;  %v1331_v55 = vld [vmem:[#allocation3 + $0x26a8] sm:$0xff] }
 0x17e   :  { %5130 = vmatpush1.bf16.msra.mxu0 %v5129_v6  ;;  %v5149_v6 = vpack.c.bf16 %v1170_v62, %v1154_v61  ;;  %v1314_v61 = vld [vmem:[#allocation3 + $0x2620] sm:$0xff] }
 0x17f   :  { %5322 = vmatpush1.bf16.msra.mxu1 %v5321_v7  ;;  %5132 = vmatprep.subr.bf16.mxu0 %v5131_v8  ;;  %v5341_v7 = vpack.c.bf16 %v1172_v0, %v1156_v28  ;;  %v5151_v8 = vpack.c.bf16 %v1203_v2, %v1187_v1  ;;  %v1330_v62 = vld [vmem:[#allocation3 + $0x26a0] sm:$0xff]  ;;  %v1316_v28 = vld [vmem:[#allocation3 + $0x2630] sm:$0xff]  ;;  %v1347_v1 = vld [vmem:[#allocation3 + $0x2728] sm:$0xff] }
 0x180   :  { %5324 = vmatprep.subr.bf16.mxu1 %v5323_v12  ;;  %v5343_v12 = vpack.c.bf16 %v1205_v5, %v1189_v4  ;;  %v1332_v0 = vld [vmem:[#allocation3 + $0x26b0] sm:$0xff]  ;;  %v1363_v2 = vld [vmem:[#allocation3 + $0x27a8] sm:$0xff]  ;;  %v1365_v4 = vld [vmem:[#allocation3 + $0x27b8] sm:$0xff]  ;;  %v5169_v5 = vpack.c.bf16 %v1330_v62, %v1314_v61 }
 0x181   :  { %v1490_v61 = vld [vmem:[#allocation3 + $0x2ba0] sm:$0xff]  ;;  %v1476_v62 = vld [vmem:[#allocation3 + $0x2b30] sm:$0xff] }
 0x182   :  { %5134 = vmatpush1.bf16.msra.mxu0 %v5133_v20  ;;  %v5153_v20 = vpack.c.bf16 %v1202_v10, %v1186_v9  ;;  %v1362_v9 = vld [vmem:[#allocation3 + $0x27a0] sm:$0xff]  ;;  %v1348_v10 = vld [vmem:[#allocation3 + $0x2730] sm:$0xff] }
 0x183   :  { %5326 = vmatpush1.bf16.msra.mxu1 %v5325_v22  ;;  %5136 = vmatprep.subr.bf16.mxu0 %v5135_v23  ;;  %v5345_v22 = vpack.c.bf16 %v1204_v13, %v1188_v11  ;;  %v5155_v23 = vpack.c.bf16 %v1235_v15, %v1219_v14  ;;  %v1379_v13 = vld [vmem:[#allocation3 + $0x2828] sm:$0xff]  ;;  %v1381_v15 = vld [vmem:[#allocation3 + $0x2838] sm:$0xff] }
 0x184   :  { %5328 = vmatprep.subr.bf16.mxu1 %v5327_v29  ;;  %v5347_v29 = vpack.c.bf16 %v1237_v18, %v1221_v17  ;;  %v1395_v14 = vld [vmem:[#allocation3 + $0x28a8] sm:$0xff]  ;;  %v1397_v17 = vld [vmem:[#allocation3 + $0x28b8] sm:$0xff] }
 0x186   :  { %5138 = vmatpush1.bf16.msra.mxu0 %v5137_v35  ;;  %v5157_v35 = vpack.c.bf16 %v1234_v25, %v1218_v24  ;;  %v1394_v24 = vld [vmem:[#allocation3 + $0x28a0] sm:$0xff]  ;;  %v1380_v25 = vld [vmem:[#allocation3 + $0x2830] sm:$0xff] }
 0x187   :  { %5330 = vmatpush1.bf16.msra.mxu1 %v5329_v36  ;;  %5140 = vmatprep.subr.bf16.mxu0 %v5139_v37  ;;  %v5349_v36 = vpack.c.bf16 %v1236_v30, %v1220_v27  ;;  %v5159_v37 = vpack.c.bf16 %v1267_v32, %v1251_v31  ;;  %v5367_v27 = vpack.c.bf16 %v1397_v17, %v1381_v15  ;;  %v1411_v30 = vld [vmem:[#allocation3 + $0x2928] sm:$0xff]  ;;  %v1413_v32 = vld [vmem:[#allocation3 + $0x2938] sm:$0xff] }
 0x188   :  { %5332 = vmatprep.subr.bf16.mxu1 %v5331_v42  ;;  %v5351_v42 = vpack.c.bf16 %v1269_v34, %v1253_v33  ;;  %v1427_v31 = vld [vmem:[#allocation3 + $0x29a8] sm:$0xff]  ;;  %v1429_v33 = vld [vmem:[#allocation3 + $0x29b8] sm:$0xff] }
 0x189   :  { %v1557_v15 = vld [vmem:[#allocation3 + $0x2db8] sm:$0xff] }
 0x18a   :  { %5142 = vmatpush1.bf16.msra.mxu0 %v5141_v47  ;;  %v5161_v47 = vpack.c.bf16 %v1266_v40, %v1250_v39  ;;  %v1426_v39 = vld [vmem:[#allocation3 + $0x29a0] sm:$0xff]  ;;  %v1412_v40 = vld [vmem:[#allocation3 + $0x2930] sm:$0xff] }
 0x18b   :  { %5334 = vmatpush1.bf16.msra.mxu1 %v5333_v48  ;;  %5144 = vmatprep.subr.bf16.mxu0 %v5143_v49  ;;  %v5353_v48 = vpack.c.bf16 %v1268_v16, %v1252_v41  ;;  %v5163_v49 = vpack.c.bf16 %v1299_v44, %v1283_v43  ;;  %v5371_v41 = vpack.c.bf16 %v1429_v33, %v1413_v32  ;;  %v1443_v16 = vld [vmem:[#allocation3 + $0x2a28] sm:$0xff]  ;;  %v1445_v44 = vld [vmem:[#allocation3 + $0x2a38] sm:$0xff] }
 0x18c   :  { %5336 = vmatprep.subr.bf16.mxu1 %v5335_v52  ;;  %v5355_v52 = vpack.c.bf16 %v1301_v46, %v1285_v45  ;;  %v1459_v43 = vld [vmem:[#allocation3 + $0x2aa8] sm:$0xff]  ;;  %v1461_v45 = vld [vmem:[#allocation3 + $0x2ab8] sm:$0xff] }
 0x18d   :  { %2201 = vmatmul.mubr.f32.vlgmr.msra.gmra.mrb[2].mxu0 %v6466_v3  ;;  %v1589_v32 = vld [vmem:[#allocation3 + $0x2eb8] sm:$0xff] }
 0x18e   :  { %5146 = vmatpush1.bf16.msra.mxu0 %v5145_v58  ;;  %2414 = vmatmul.mubr.f32.vlgmr.msra.gmra.mrb[2].mxu1 %v6466_v3  ;;  %v5165_v58 = vpack.c.bf16 %v1298_v51, %v1282_v50  ;;  %v1349_v3 = vld [vmem:[#allocation3 + $0x2738] sm:$0xff]  ;;  %v1458_v50 = vld [vmem:[#allocation3 + $0x2aa0] sm:$0xff]  ;;  %v1444_v51 = vld [vmem:[#allocation3 + $0x2a30] sm:$0xff] }
 0x18f   :  { %5338 = vmatpush1.bf16.msra.mxu1 %v5337_v59  ;;  %5148 = vmatprep.subr.bf16.mxu0 %v5147_v60  ;;  %v5357_v59 = vpack.c.bf16 %v1300_v53, %v1284_v21  ;;  %v5167_v60 = vpack.c.bf16 %v1331_v55, %v1315_v54  ;;  %v5363_v11 = vpack.c.bf16 %v1365_v4, %v1349_v3  ;;  %v1475_v53 = vld [vmem:[#allocation3 + $0x2b28] sm:$0xff]  ;;  %v1477_v55 = vld [vmem:[#allocation3 + $0x2b38] sm:$0xff] }
 0x190   :  { %5340 = vmatprep.subr.bf16.mxu1 %v5339_v63  ;;  %2271 = vmatprep.mubr.f32.mxu0 %v6692_v38  ;;  %v5359_v63 = vpack.c.bf16 %v1333_v57, %v1317_v56  ;;  %v5375_v21 = vpack.c.bf16 %v1461_v45, %v1445_v44  ;;  %v1491_v54 = vld [vmem:[#allocation3 + $0x2ba8] sm:$0xff]  ;;  %v1493_v56 = vld [vmem:[#allocation3 + $0x2bb8] sm:$0xff] }
 0x191   :  { %2484 = vmatprep.mubr.f32.mxu1 %v6692_v38  ;;  %v1525_v3 = vld [vmem:[#allocation3 + $0x2cb8] sm:$0xff] }
 0x192   :  { %5150 = vmatpush1.bf16.msra.mxu0 %v5149_v6  ;;  %v5361_v6 = vpack.c.bf16 %v1332_v0, %v1316_v28  ;;  %v5379_v28 = vpack.c.bf16 %v1493_v56, %v1477_v55  ;;  %v1507_v0 = vld [vmem:[#allocation3 + $0x2c28] sm:$0xff]  ;;  %v1621_v44 = vld [vmem:[#allocation3 + $0x2fb8] sm:$0xff] }
 0x193   :  { %5342 = vmatpush1.bf16.msra.mxu1 %v5341_v7  ;;  %5152 = vmatprep.subr.bf16.mxu0 %v5151_v8  ;;  %v5171_v7 = vpack.c.bf16 %v1363_v2, %v1347_v1  ;;  %v1346_v8 = vld [vmem:[#allocation3 + $0x2720] sm:$0xff]  ;;  %v1523_v1 = vld [vmem:[#allocation3 + $0x2ca8] sm:$0xff]  ;;  %v1509_v2 = vld [vmem:[#allocation3 + $0x2c38] sm:$0xff] }
 0x194   :  { %5344 = vmatprep.subr.bf16.mxu1 %v5343_v12  ;;  %v1364_v12 = vld [vmem:[#allocation3 + $0x27b0] sm:$0xff]  ;;  %v5173_v18 = vpack.c.bf16 %v1362_v9, %v1346_v8  ;;  %v1522_v8 = vld [vmem:[#allocation3 + $0x2ca0] sm:$0xff]  ;;  %v121_v55 = vld [vmem:[#allocation3 + $0xd8] sm:$0xff] }
 0x195   :  { %v1508_v9 = vld [vmem:[#allocation3 + $0x2c30] sm:$0xff] }
 0x196   :  { %5154 = vmatpush1.bf16.msra.mxu0 %v5153_v20  ;;  %v5365_v20 = vpack.c.bf16 %v1364_v12, %v1348_v10  ;;  %v5383_v10 = vpack.c.bf16 %v1525_v3, %v1509_v2  ;;  %v1539_v12 = vld [vmem:[#allocation3 + $0x2d28] sm:$0xff]  ;;  %v153_v2 = vld [vmem:[#allocation3 + $0x1d8] sm:$0xff] }
 0x197   :  { %5346 = vmatpush1.bf16.msra.mxu1 %v5345_v22  ;;  %5156 = vmatprep.subr.bf16.mxu0 %v5155_v23  ;;  %v5175_v22 = vpack.c.bf16 %v1395_v14, %v1379_v13  ;;  %v1378_v23 = vld [vmem:[#allocation3 + $0x2820] sm:$0xff]  ;;  %v1555_v13 = vld [vmem:[#allocation3 + $0x2da8] sm:$0xff]  ;;  %v1541_v14 = vld [vmem:[#allocation3 + $0x2d38] sm:$0xff] }
 0x198   :  { %5348 = vmatprep.subr.bf16.mxu1 %v5347_v29  ;;  %v1396_v29 = vld [vmem:[#allocation3 + $0x28b0] sm:$0xff]  ;;  %v5177_v34 = vpack.c.bf16 %v1394_v24, %v1378_v23  ;;  %v1554_v23 = vld [vmem:[#allocation3 + $0x2da0] sm:$0xff] }
 0x199   :  { %v1540_v24 = vld [vmem:[#allocation3 + $0x2d30] sm:$0xff] }
 0x19a   :  { %5158 = vmatpush1.bf16.msra.mxu0 %v5157_v35  ;;  %v5369_v35 = vpack.c.bf16 %v1396_v29, %v1380_v25  ;;  %v5387_v25 = vpack.c.bf16 %v1557_v15, %v1541_v14  ;;  %v1571_v29 = vld [vmem:[#allocation3 + $0x2e28] sm:$0xff]  ;;  %v169_v14 = vld [vmem:[#allocation3 + $0x258] sm:$0xff] }
 0x19b   :  { %5350 = vmatpush1.bf16.msra.mxu1 %v5349_v36  ;;  %5160 = vmatprep.subr.bf16.mxu0 %v5159_v37  ;;  %v5179_v36 = vpack.c.bf16 %v1427_v31, %v1411_v30  ;;  %v1410_v37 = vld [vmem:[#allocation3 + $0x2920] sm:$0xff]  ;;  %v1587_v30 = vld [vmem:[#allocation3 + $0x2ea8] sm:$0xff]  ;;  %v1573_v31 = vld [vmem:[#allocation3 + $0x2e38] sm:$0xff] }
 0x19c   :  { %5352 = vmatprep.subr.bf16.mxu1 %v5351_v42  ;;  %v1428_v42 = vld [vmem:[#allocation3 + $0x29b0] sm:$0xff]  ;;  %v5181_v46 = vpack.c.bf16 %v1426_v39, %v1410_v37  ;;  %v1586_v37 = vld [vmem:[#allocation3 + $0x2ea0] sm:$0xff]  ;;  %v185_v15 = vld [vmem:[#allocation3 + $0x2d8] sm:$0xff] }
 0x19d   :  { %v1572_v39 = vld [vmem:[#allocation3 + $0x2e30] sm:$0xff] }
 0x19e   :  { %5162 = vmatpush1.bf16.msra.mxu0 %v5161_v47  ;;  %v5373_v47 = vpack.c.bf16 %v1428_v42, %v1412_v40  ;;  %v5391_v40 = vpack.c.bf16 %v1589_v32, %v1573_v31  ;;  %v1603_v42 = vld [vmem:[#allocation3 + $0x2f28] sm:$0xff]  ;;  %v201_v31 = vld [vmem:[#allocation3 + $0x358] sm:$0xff] }
 0x19f   :  { %5354 = vmatpush1.bf16.msra.mxu1 %v5353_v48  ;;  %5164 = vmatprep.subr.bf16.mxu0 %v5163_v49  ;;  %v5183_v48 = vpack.c.bf16 %v1459_v43, %v1443_v16  ;;  %v1442_v49 = vld [vmem:[#allocation3 + $0x2a20] sm:$0xff]  ;;  %v1619_v16 = vld [vmem:[#allocation3 + $0x2fa8] sm:$0xff]  ;;  %v1605_v43 = vld [vmem:[#allocation3 + $0x2f38] sm:$0xff] }
 0x1a0   :  { %5356 = vmatprep.subr.bf16.mxu1 %v5355_v52  ;;  %v1460_v52 = vld [vmem:[#allocation3 + $0x2ab0] sm:$0xff]  ;;  %v5185_v57 = vpack.c.bf16 %v1458_v50, %v1442_v49  ;;  %v1618_v49 = vld [vmem:[#allocation3 + $0x2fa0] sm:$0xff]  ;;  %v217_v32 = vld [vmem:[#allocation3 + $0x3d8] sm:$0xff] }
 0x1a1   :  { %v1604_v50 = vld [vmem:[#allocation3 + $0x2f30] sm:$0xff] }
 0x1a2   :  { %5166 = vmatpush1.bf16.msra.mxu0 %v5165_v58  ;;  %v5377_v58 = vpack.c.bf16 %v1460_v52, %v1444_v51  ;;  %v5395_v51 = vpack.c.bf16 %v1621_v44, %v1605_v43  ;;  %v103_v52 = vld [vmem:[#allocation3 + $0x48] sm:$0xff]  ;;  %v233_v43 = vld [vmem:[#allocation3 + $0x458] sm:$0xff] }
 0x1a3   :  { %5358 = vmatpush1.bf16.msra.mxu1 %v5357_v59  ;;  %5168 = vmatprep.subr.bf16.mxu0 %v5167_v60  ;;  %v5187_v59 = vpack.c.bf16 %v1491_v54, %v1475_v53  ;;  %v1474_v60 = vld [vmem:[#allocation3 + $0x2b20] sm:$0xff]  ;;  %v119_v53 = vld [vmem:[#allocation3 + $0xc8] sm:$0xff]  ;;  %v105_v54 = vld [vmem:[#allocation3 + $0x58] sm:$0xff] }
 0x1a4   :  { %5360 = vmatprep.subr.bf16.mxu1 %v5359_v63  ;;  %v1492_v63 = vld [vmem:[#allocation3 + $0x2bb0] sm:$0xff]  ;;  %v5189_v4 = vpack.c.bf16 %v1490_v61, %v1474_v60  ;;  %v118_v60 = vld [vmem:[#allocation3 + $0xc0] sm:$0xff]  ;;  %v249_v44 = vld [vmem:[#allocation3 + $0x4d8] sm:$0xff] }
 0x1a5   :  { %v104_v61 = vld [vmem:[#allocation3 + $0x50] sm:$0xff] }
 0x1a6   :  { %5170 = vmatpush1.bf16.msra.mxu0 %v5169_v5  ;;  %v5381_v5 = vpack.c.bf16 %v1492_v63, %v1476_v62  ;;  %v5591_v62 = vpack.c.bf16 %v121_v55, %v105_v54  ;;  %v135_v63 = vld [vmem:[#allocation3 + $0x148] sm:$0xff]  ;;  %v265_v54 = vld [vmem:[#allocation3 + $0x558] sm:$0xff] }
 0x1a7   :  { %5362 = vmatpush1.bf16.msra.mxu1 %v5361_v6  ;;  %5172 = vmatprep.subr.bf16.mxu0 %v5171_v7  ;;  %v5191_v6 = vpack.c.bf16 %v1523_v1, %v1507_v0  ;;  %v1506_v7 = vld [vmem:[#allocation3 + $0x2c20] sm:$0xff]  ;;  %v151_v0 = vld [vmem:[#allocation3 + $0x1c8] sm:$0xff]  ;;  %v137_v1 = vld [vmem:[#allocation3 + $0x158] sm:$0xff] }
 0x1a8   :  { %5364 = vmatprep.subr.bf16.mxu1 %v5363_v11  ;;  %v1524_v11 = vld [vmem:[#allocation3 + $0x2cb0] sm:$0xff]  ;;  %v5193_v17 = vpack.c.bf16 %v1522_v8, %v1506_v7  ;;  %v150_v7 = vld [vmem:[#allocation3 + $0x1c0] sm:$0xff]  ;;  %v281_v55 = vld [vmem:[#allocation3 + $0x5d8] sm:$0xff] }
 0x1a9   :  { %v136_v8 = vld [vmem:[#allocation3 + $0x150] sm:$0xff] }
 0x1aa   :  { %5174 = vmatpush1.bf16.msra.mxu0 %v5173_v18  ;;  %v5385_v18 = vpack.c.bf16 %v1524_v11, %v1508_v9  ;;  %v5595_v9 = vpack.c.bf16 %v153_v2, %v137_v1  ;;  %v167_v11 = vld [vmem:[#allocation3 + $0x248] sm:$0xff]  ;;  %v297_v1 = vld [vmem:[#allocation3 + $0x658] sm:$0xff] }
 0x1ab   :  { %5366 = vmatpush1.bf16.msra.mxu1 %v5365_v20  ;;  %5176 = vmatprep.subr.bf16.mxu0 %v5175_v22  ;;  %v5195_v20 = vpack.c.bf16 %v1555_v13, %v1539_v12  ;;  %v1538_v22 = vld [vmem:[#allocation3 + $0x2d20] sm:$0xff]  ;;  %v183_v12 = vld [vmem:[#allocation3 + $0x2c8] sm:$0xff]  ;;  %v6467_v13 = vld [vmem:[%s6884_s0 + $0x10] sm:$0xff] }
 0x1ac   :  { %5368 = vmatprep.subr.bf16.mxu1 %v5367_v27  ;;  %v1556_v27 = vld [vmem:[#allocation3 + $0x2db0] sm:$0xff]  ;;  %v5197_v33 = vpack.c.bf16 %v1554_v23, %v1538_v22  ;;  %v166_v22 = vld [vmem:[#allocation3 + $0x240] sm:$0xff]  ;;  %v313_v2 = vld [vmem:[#allocation3 + $0x6d8] sm:$0xff] }
 0x1ad   :  { %v182_v23 = vld [vmem:[#allocation3 + $0x2c0] sm:$0xff] }
 0x1ae   :  { %5178 = vmatpush1.bf16.msra.mxu0 %v5177_v34  ;;  %v5389_v34 = vpack.c.bf16 %v1556_v27, %v1540_v24  ;;  %v168_v24 = vld [vmem:[#allocation3 + $0x250] sm:$0xff] }
 0x1af   :  { %5370 = vmatpush1.bf16.msra.mxu1 %v5369_v35  ;;  %5180 = vmatprep.subr.bf16.mxu0 %v5179_v36  ;;  %v5199_v35 = vpack.c.bf16 %v1587_v30, %v1571_v29  ;;  %v1570_v36 = vld [vmem:[#allocation3 + $0x2e20] sm:$0xff]  ;;  %v184_v27 = vld [vmem:[#allocation3 + $0x2d0] sm:$0xff]  ;;  %v199_v29 = vld [vmem:[#allocation3 + $0x348] sm:$0xff] }
 0x1b0   :  { %5372 = vmatprep.subr.bf16.mxu1 %v5371_v41  ;;  %v1588_v41 = vld [vmem:[#allocation3 + $0x2eb0] sm:$0xff]  ;;  %v5201_v45 = vpack.c.bf16 %v1586_v37, %v1570_v36  ;;  %v215_v30 = vld [vmem:[#allocation3 + $0x3c8] sm:$0xff]  ;;  %v198_v36 = vld [vmem:[#allocation3 + $0x340] sm:$0xff] }
 0x1b1   :  { %v214_v37 = vld [vmem:[#allocation3 + $0x3c0] sm:$0xff] }
 0x1b2   :  { %5182 = vmatpush1.bf16.msra.mxu0 %v5181_v46  ;;  %v5393_v46 = vpack.c.bf16 %v1588_v41, %v1572_v39  ;;  %v200_v39 = vld [vmem:[#allocation3 + $0x350] sm:$0xff] }
 0x1b3   :  { %5374 = vmatpush1.bf16.msra.mxu1 %v5373_v47  ;;  %5184 = vmatprep.subr.bf16.mxu0 %v5183_v48  ;;  %v5203_v47 = vpack.c.bf16 %v1619_v16, %v1603_v42  ;;  %v1602_v48 = vld [vmem:[#allocation3 + $0x2f20] sm:$0xff]  ;;  %v216_v41 = vld [vmem:[#allocation3 + $0x3d0] sm:$0xff]  ;;  %v231_v42 = vld [vmem:[#allocation3 + $0x448] sm:$0xff] }
 0x1b4   :  { %5376 = vmatprep.subr.bf16.mxu1 %v5375_v21  ;;  %v1620_v21 = vld [vmem:[#allocation3 + $0x2fb0] sm:$0xff]  ;;  %v5205_v56 = vpack.c.bf16 %v1618_v49, %v1602_v48  ;;  %v247_v16 = vld [vmem:[#allocation3 + $0x4c8] sm:$0xff]  ;;  %v230_v48 = vld [vmem:[#allocation3 + $0x440] sm:$0xff] }
 0x1b5   :  { %v246_v49 = vld [vmem:[#allocation3 + $0x4c0] sm:$0xff] }
 0x1b6   :  { %5186 = vmatpush1.bf16.msra.mxu0 %v5185_v57  ;;  %v5397_v57 = vpack.c.bf16 %v1620_v21, %v1604_v50  ;;  %v232_v50 = vld [vmem:[#allocation3 + $0x450] sm:$0xff] }
 0x1b7   :  { %5378 = vmatpush1.bf16.msra.mxu1 %v5377_v58  ;;  %5188 = vmatprep.subr.bf16.mxu0 %v5187_v59  ;;  %v5399_v58 = vpack.c.bf16 %v119_v53, %v103_v52  ;;  %v102_v59 = vld [vmem:[#allocation3 + $0x40] sm:$0xff]  ;;  %v248_v21 = vld [vmem:[#allocation3 + $0x4d0] sm:$0xff]  ;;  %v263_v52 = vld [vmem:[#allocation3 + $0x548] sm:$0xff] }
 0x1b8   :  { %5380 = vmatprep.subr.bf16.mxu1 %v5379_v28  ;;  %v120_v28 = vld [vmem:[#allocation3 + $0xd0] sm:$0xff]  ;;  %v5401_v3 = vpack.c.bf16 %v118_v60, %v102_v59  ;;  %v279_v53 = vld [vmem:[#allocation3 + $0x5c8] sm:$0xff]  ;;  %v262_v59 = vld [vmem:[#allocation3 + $0x540] sm:$0xff] }
 0x1b9   :  { %v278_v60 = vld [vmem:[#allocation3 + $0x5c0] sm:$0xff] }
 0x1ba   :  { %5190 = vmatpush1.bf16.msra.mxu0 %v5189_v4  ;;  %v5593_v4 = vpack.c.bf16 %v120_v28, %v104_v61  ;;  %v264_v61 = vld [vmem:[#allocation3 + $0x550] sm:$0xff] }
 0x1bb   :  { %5382 = vmatpush1.bf16.msra.mxu1 %v5381_v5  ;;  %5192 = vmatprep.subr.bf16.mxu0 %v5191_v6  ;;  %v5403_v5 = vpack.c.bf16 %v151_v0, %v135_v63  ;;  %v134_v6 = vld [vmem:[#allocation3 + $0x140] sm:$0xff]  ;;  %v280_v28 = vld [vmem:[#allocation3 + $0x5d0] sm:$0xff]  ;;  %v295_v63 = vld [vmem:[#allocation3 + $0x648] sm:$0xff] }
 0x1bc   :  { %5384 = vmatprep.subr.bf16.mxu1 %v5383_v10  ;;  %v152_v10 = vld [vmem:[#allocation3 + $0x1d0] sm:$0xff]  ;;  %v311_v0 = vld [vmem:[#allocation3 + $0x6c8] sm:$0xff] }
 0x1be   :  { %5194 = vmatpush1.bf16.msra.mxu0 %v5193_v17  ;;  %v5405_v17 = vpack.c.bf16 %v150_v7, %v134_v6  ;;  %v294_v6 = vld [vmem:[#allocation3 + $0x640] sm:$0xff] }
 0x1bf   :  { %5386 = vmatpush1.bf16.msra.mxu1 %v5385_v18  ;;  %5196 = vmatprep.subr.bf16.mxu0 %v5195_v20  ;;  %v5597_v18 = vpack.c.bf16 %v152_v10, %v136_v8  ;;  %v5407_v20 = vpack.c.bf16 %v183_v12, %v167_v11  ;;  %v310_v7 = vld [vmem:[#allocation3 + $0x6c0] sm:$0xff]  ;;  %v296_v8 = vld [vmem:[#allocation3 + $0x650] sm:$0xff]  ;;  %v5615_v10 = vpack.c.bf16 %v313_v2, %v297_v1  ;;  %v327_v12 = vld [vmem:[#allocation3 + $0x748] sm:$0xff] }
 0x1c0   :  { %5388 = vmatprep.subr.bf16.mxu1 %v5387_v25  ;;  %v5599_v25 = vpack.c.bf16 %v185_v15, %v169_v14  ;;  %v312_v11 = vld [vmem:[#allocation3 + $0x6d0] sm:$0xff] }
 0x1c1   :  { %v424_v1 = vld [vmem:[#allocation3 + $0xa50] sm:$0xff] }
 0x1c2   :  { %5198 = vmatpush1.bf16.msra.mxu0 %v5197_v33  ;;  %v5409_v33 = vpack.c.bf16 %v182_v23, %v166_v22  ;;  %v5425_v23 = vpack.c.bf16 %v310_v7, %v294_v6  ;;  %v457_v6 = vld [vmem:[#allocation3 + $0xb58] sm:$0xff] }
 0x1c3   :  { %5390 = vmatpush1.bf16.msra.mxu1 %v5389_v34  ;;  %5200 = vmatprep.subr.bf16.mxu0 %v5199_v35  ;;  %v5601_v34 = vpack.c.bf16 %v184_v27, %v168_v24  ;;  %v5411_v35 = vpack.c.bf16 %v215_v30, %v199_v29  ;;  %v326_v29 = vld [vmem:[#allocation3 + $0x740] sm:$0xff]  ;;  %v473_v7 = vld [vmem:[#allocation3 + $0xbd8] sm:$0xff] }
 0x1c4   :  { %5392 = vmatprep.subr.bf16.mxu1 %v5391_v40  ;;  %v5603_v40 = vpack.c.bf16 %v217_v32, %v201_v31  ;;  %v342_v30 = vld [vmem:[#allocation3 + $0x7c0] sm:$0xff]  ;;  %v328_v31 = vld [vmem:[#allocation3 + $0x750] sm:$0xff] }
 0x1c6   :  { %5202 = vmatpush1.bf16.msra.mxu0 %v5201_v45  ;;  %v5413_v45 = vpack.c.bf16 %v214_v37, %v198_v36  ;;  %v361_v36 = vld [vmem:[#allocation3 + $0x858] sm:$0xff] }
 0x1c7   :  { %5394 = vmatpush1.bf16.msra.mxu1 %v5393_v46  ;;  %5204 = vmatprep.subr.bf16.mxu0 %v5203_v47  ;;  %v5605_v46 = vpack.c.bf16 %v216_v41, %v200_v39  ;;  %v5415_v47 = vpack.c.bf16 %v247_v16, %v231_v42  ;;  %v377_v37 = vld [vmem:[#allocation3 + $0x8d8] sm:$0xff]  ;;  %v5429_v39 = vpack.c.bf16 %v342_v30, %v326_v29  ;;  %v358_v42 = vld [vmem:[#allocation3 + $0x840] sm:$0xff] }
 0x1c8   :  { %5396 = vmatprep.subr.bf16.mxu1 %v5395_v51  ;;  %v5607_v51 = vpack.c.bf16 %v249_v44, %v233_v43  ;;  %v374_v16 = vld [vmem:[#allocation3 + $0x8c0] sm:$0xff]  ;;  %v360_v43 = vld [vmem:[#allocation3 + $0x850] sm:$0xff]  ;;  %v5623_v44 = vpack.c.bf16 %v377_v37, %v361_v36  ;;  %v489_v29 = vld [vmem:[#allocation3 + $0xc58] sm:$0xff] }
 0x1c9   :  { %v505_v30 = vld [vmem:[#allocation3 + $0xcd8] sm:$0xff]  ;;  %v488_v36 = vld [vmem:[#allocation3 + $0xc50] sm:$0xff] }
 0x1ca   :  { %5206 = vmatpush1.bf16.msra.mxu0 %v5205_v56  ;;  %v5417_v56 = vpack.c.bf16 %v246_v49, %v230_v48  ;;  %v393_v48 = vld [vmem:[#allocation3 + $0x958] sm:$0xff]  ;;  %v5639_v37 = vpack.c.bf16 %v505_v30, %v489_v29  ;;  %v616_v29 = vld [vmem:[#allocation3 + $0x1050] sm:$0xff] }
 0x1cb   :  { %5398 = vmatpush1.bf16.msra.mxu1 %v5397_v57  ;;  %5400 = vmatprep.subr.bf16.mxu0 %v5399_v58  ;;  %v5609_v57 = vpack.c.bf16 %v248_v21, %v232_v50  ;;  %v5419_v58 = vpack.c.bf16 %v279_v53, %v263_v52  ;;  %v409_v49 = vld [vmem:[#allocation3 + $0x9d8] sm:$0xff]  ;;  %v5433_v50 = vpack.c.bf16 %v374_v16, %v358_v42  ;;  %v390_v52 = vld [vmem:[#allocation3 + $0x940] sm:$0xff] }
 0x1cc   :  { %5592 = vmatprep.subr.bf16.mxu1 %v5591_v62  ;;  %v5611_v62 = vpack.c.bf16 %v281_v55, %v265_v54  ;;  %v406_v53 = vld [vmem:[#allocation3 + $0x9c0] sm:$0xff]  ;;  %v392_v54 = vld [vmem:[#allocation3 + $0x950] sm:$0xff]  ;;  %v5627_v55 = vpack.c.bf16 %v409_v49, %v393_v48  ;;  %v521_v42 = vld [vmem:[#allocation3 + $0xd58] sm:$0xff] }
 0x1cd   :  { %2272 = vmatmul.mubr.f32.vlgmr.msra.gmra.mrb[2].mxu0 %v6467_v13  ;;  %v537_v16 = vld [vmem:[#allocation3 + $0xdd8] sm:$0xff]  ;;  %v520_v48 = vld [vmem:[#allocation3 + $0xd50] sm:$0xff] }
 0x1ce   :  { %2485 = vmatmul.mubr.f32.vlgmr.msra.gmra.mrb[2].mxu1 %v6467_v13  ;;  %5402 = vmatpush1.bf16.msra.mxu0 %v5401_v3  ;;  %v5421_v3 = vpack.c.bf16 %v278_v60, %v262_v59  ;;  %v343_v13 = vld [vmem:[#allocation3 + $0x7c8] sm:$0xff]  ;;  %v425_v59 = vld [vmem:[#allocation3 + $0xa58] sm:$0xff]  ;;  %v5643_v49 = vpack.c.bf16 %v537_v16, %v521_v42  ;;  %v648_v42 = vld [vmem:[#allocation3 + $0x1150] sm:$0xff] }
 0x1cf   :  { %5594 = vmatpush1.bf16.msra.mxu1 %v5593_v4  ;;  %5404 = vmatprep.subr.bf16.mxu0 %v5403_v5  ;;  %v5613_v4 = vpack.c.bf16 %v280_v28, %v264_v61  ;;  %v5423_v5 = vpack.c.bf16 %v311_v0, %v295_v63  ;;  %v5427_v27 = vpack.c.bf16 %v343_v13, %v327_v12  ;;  %v441_v60 = vld [vmem:[#allocation3 + $0xad8] sm:$0xff]  ;;  %v422_v63 = vld [vmem:[#allocation3 + $0xa40] sm:$0xff] }
 0x1d0   :  { %5596 = vmatprep.subr.bf16.mxu1 %v5595_v9  ;;  %2555 = vmatprep.mubr.f32.mxu0 %v6668_v19  ;;  %v5437_v61 = vpack.c.bf16 %v406_v53, %v390_v52  ;;  %v438_v0 = vld [vmem:[#allocation3 + $0xac0] sm:$0xff]  ;;  %v5631_v2 = vpack.c.bf16 %v441_v60, %v425_v59  ;;  %v553_v52 = vld [vmem:[#allocation3 + $0xe58] sm:$0xff]  ;;  %v552_v59 = vld [vmem:[#allocation3 + $0xe50] sm:$0xff] }
 0x1d1   :  { %2768 = vmatprep.mubr.f32.mxu1 %v6668_v19  ;;  %v454_v12 = vld [vmem:[#allocation3 + $0xb40] sm:$0xff]  ;;  %v569_v53 = vld [vmem:[#allocation3 + $0xed8] sm:$0xff] }
 0x1d2   :  { %5406 = vmatpush1.bf16.msra.mxu0 %v5405_v17  ;;  %v329_v17 = vld [vmem:[#allocation3 + $0x758] sm:$0xff]  ;;  %v470_v13 = vld [vmem:[#allocation3 + $0xbc0] sm:$0xff]  ;;  %v5647_v60 = vpack.c.bf16 %v569_v53, %v553_v52  ;;  %v680_v53 = vld [vmem:[#allocation3 + $0x1250] sm:$0xff] }
 0x1d3   :  { %5598 = vmatpush1.bf16.msra.mxu1 %v5597_v18  ;;  %5408 = vmatprep.subr.bf16.mxu0 %v5407_v20  ;;  %v345_v18 = vld [vmem:[#allocation3 + $0x7d8] sm:$0xff]  ;;  %v694_v52 = vld [vmem:[#allocation3 + $0x12c0] sm:$0xff] }
 0x1d4   :  { %5600 = vmatprep.subr.bf16.mxu1 %v5599_v25  ;;  %v5617_v25 = vpack.c.bf16 %v312_v11, %v296_v8  ;;  %v5619_v32 = vpack.c.bf16 %v345_v18, %v329_v17  ;;  %v5441_v8 = vpack.c.bf16 %v438_v0, %v422_v63  ;;  %v456_v17 = vld [vmem:[#allocation3 + $0xb50] sm:$0xff]  ;;  %v5635_v18 = vpack.c.bf16 %v473_v7, %v457_v6  ;;  %v585_v63 = vld [vmem:[#allocation3 + $0xf58] sm:$0xff] }
 0x1d5   :  { %v601_v0 = vld [vmem:[#allocation3 + $0xfd8] sm:$0xff]  ;;  %v584_v6 = vld [vmem:[#allocation3 + $0xf50] sm:$0xff] }
 0x1d6   :  { %5410 = vmatpush1.bf16.msra.mxu0 %v5409_v33  ;;  %v344_v33 = vld [vmem:[#allocation3 + $0x7d0] sm:$0xff]  ;;  %v5651_v7 = vpack.c.bf16 %v601_v0, %v585_v63  ;;  %v726_v63 = vld [vmem:[#allocation3 + $0x13c0] sm:$0xff] }
 0x1d7   :  { %5602 = vmatpush1.bf16.msra.mxu1 %v5601_v34  ;;  %5412 = vmatprep.subr.bf16.mxu0 %v5411_v35  ;;  %v359_v34 = vld [vmem:[#allocation3 + $0x848] sm:$0xff]  ;;  %v712_v0 = vld [vmem:[#allocation3 + $0x1350] sm:$0xff] }
 0x1d8   :  { %5604 = vmatprep.subr.bf16.mxu1 %v5603_v40  ;;  %v375_v35 = vld [vmem:[#allocation3 + $0x8c8] sm:$0xff]  ;;  %v5621_v40 = vpack.c.bf16 %v344_v33, %v328_v31  ;;  %v5445_v31 = vpack.c.bf16 %v470_v13, %v454_v12  ;;  %v617_v12 = vld [vmem:[#allocation3 + $0x1058] sm:$0xff] }
 0x1d9   :  { %v5431_v41 = vpack.c.bf16 %v375_v35, %v359_v34  ;;  %v486_v34 = vld [vmem:[#allocation3 + $0xc40] sm:$0xff]  ;;  %v633_v13 = vld [vmem:[#allocation3 + $0x10d8] sm:$0xff] }
 0x1da   :  { %5414 = vmatpush1.bf16.msra.mxu0 %v5413_v45  ;;  %v376_v45 = vld [vmem:[#allocation3 + $0x8d0] sm:$0xff]  ;;  %v502_v35 = vld [vmem:[#allocation3 + $0xcc0] sm:$0xff]  ;;  %v5655_v30 = vpack.c.bf16 %v633_v13, %v617_v12 }
 0x1db   :  { %5606 = vmatpush1.bf16.msra.mxu1 %v5605_v46  ;;  %5416 = vmatprep.subr.bf16.mxu0 %v5415_v47  ;;  %v391_v46 = vld [vmem:[#allocation3 + $0x948] sm:$0xff]  ;;  %v758_v12 = vld [vmem:[#allocation3 + $0x14c0] sm:$0xff]  ;;  %v744_v13 = vld [vmem:[#allocation3 + $0x1450] sm:$0xff] }
 0x1dc   :  { %5608 = vmatprep.subr.bf16.mxu1 %v5607_v51  ;;  %v407_v47 = vld [vmem:[#allocation3 + $0x9c8] sm:$0xff]  ;;  %v5625_v51 = vpack.c.bf16 %v376_v45, %v360_v43  ;;  %v5449_v43 = vpack.c.bf16 %v502_v35, %v486_v34  ;;  %v649_v34 = vld [vmem:[#allocation3 + $0x1158] sm:$0xff] }
 0x1dd   :  { %v5435_v21 = vpack.c.bf16 %v407_v47, %v391_v46  ;;  %v518_v46 = vld [vmem:[#allocation3 + $0xd40] sm:$0xff]  ;;  %v665_v35 = vld [vmem:[#allocation3 + $0x11d8] sm:$0xff] }
 0x1de   :  { %5418 = vmatpush1.bf16.msra.mxu0 %v5417_v56  ;;  %v408_v56 = vld [vmem:[#allocation3 + $0x9d0] sm:$0xff]  ;;  %v534_v47 = vld [vmem:[#allocation3 + $0xdc0] sm:$0xff]  ;;  %v5659_v16 = vpack.c.bf16 %v665_v35, %v649_v34 }
 0x1df   :  { %5610 = vmatpush1.bf16.msra.mxu1 %v5609_v57  ;;  %5420 = vmatprep.subr.bf16.mxu0 %v5419_v58  ;;  %v423_v57 = vld [vmem:[#allocation3 + $0xa48] sm:$0xff]  ;;  %v790_v34 = vld [vmem:[#allocation3 + $0x15c0] sm:$0xff]  ;;  %v776_v35 = vld [vmem:[#allocation3 + $0x1550] sm:$0xff] }
 0x1e0   :  { %v6717_v9 = vpop.f32.mrb[0].mxu0  ;;  %5612 = vmatprep.subr.bf16.mxu1 %v5611_v62  ;;  %v439_v58 = vld [vmem:[#allocation3 + $0xac8] sm:$0xff]  ;;  %v5629_v62 = vpack.c.bf16 %v408_v56, %v392_v54  ;;  %v5453_v54 = vpack.c.bf16 %v534_v47, %v518_v46  ;;  %v6468_v46 = vld [vmem:[%s6884_s0] sm:$0xff]  ;;  %v681_v47 = vld [vmem:[#allocation3 + $0x1258] sm:$0xff] }
 0x1e1   :  { %v6719_v14 = vpop.f32.mrb[0].mxu1  ;;  %v6721_v15 = vpop.f32.mrb[1].mxu0  ;;  %v5439_v28 = vpack.c.bf16 %v439_v58, %v423_v57  ;;  %v550_v57 = vld [vmem:[#allocation3 + $0xe40] sm:$0xff] }
 0x1e2   :  { %v3359_v20 = vcombine.low %v6717_v9, %v6721_v15  ;;  %v6725_v22 = vpop.f32.mrb[1].mxu1  ;;  %5422 = vmatpush1.bf16.msra.mxu0 %v5421_v3  ;;  %v440_v3 = vld [vmem:[#allocation3 + $0xad0] sm:$0xff]  ;;  %v566_v58 = vld [vmem:[#allocation3 + $0xec0] sm:$0xff]  ;;  %v3529_v15 = vld [vmem:[#allocation7 + $0x118] sm:$0xff] }
 0x1e3   :  { %v3360_v24 = vcombine.low %v6719_v14, %v6725_v22  ;;  %5614 = vmatpush1.bf16.msra.mxu1 %v5613_v4  ;;  %5424 = vmatprep.subr.bf16.mxu0 %v5423_v5  ;;  %v455_v4 = vld [vmem:[#allocation3 + $0xb48] sm:$0xff]  ;;  %v6473_v14 = vld [vmem:[%s6884_s0 + $0x10] sm:$0xff] }
 0x1e4   :  { %5616 = vmatprep.subr.bf16.mxu1 %v5615_v10  ;;  %v471_v5 = vld [vmem:[#allocation3 + $0xbc8] sm:$0xff]  ;;  %v5633_v10 = vpack.c.bf16 %v440_v3, %v424_v1  ;;  %v5457_v1 = vpack.c.bf16 %v566_v58, %v550_v57  ;;  %v713_v58 = vld [vmem:[#allocation3 + $0x1358] sm:$0xff] }
 0x1e5   :  { %v5443_v11 = vpack.c.bf16 %v471_v5, %v455_v4  ;;  %v582_v4 = vld [vmem:[#allocation3 + $0xf40] sm:$0xff]  ;;  %v727_v57 = vld [vmem:[#allocation3 + $0x13c8] sm:$0xff] }
 0x1e6   :  { %5426 = vmatpush1.bf16.msra.mxu0 %v5425_v23  ;;  %v472_v23 = vld [vmem:[#allocation3 + $0xbd0] sm:$0xff]  ;;  %v598_v5 = vld [vmem:[#allocation3 + $0xfc0] sm:$0xff] }
 0x1e7   :  { %5618 = vmatpush1.bf16.msra.mxu1 %v5617_v25  ;;  %5428 = vmatprep.subr.bf16.mxu0 %v5427_v27  ;;  %v487_v25 = vld [vmem:[#allocation3 + $0xc48] sm:$0xff] }
 0x1e8   :  { %5620 = vmatprep.subr.bf16.mxu1 %v5619_v32  ;;  %v503_v27 = vld [vmem:[#allocation3 + $0xcc8] sm:$0xff]  ;;  %v5637_v32 = vpack.c.bf16 %v472_v23, %v456_v17  ;;  %v5461_v17 = vpack.c.bf16 %v598_v5, %v582_v4  ;;  %v745_v5 = vld [vmem:[#allocation3 + $0x1458] sm:$0xff] }
 0x1e9   :  { %v5447_v33 = vpack.c.bf16 %v503_v27, %v487_v25  ;;  %v614_v25 = vld [vmem:[#allocation3 + $0x1040] sm:$0xff]  ;;  %v759_v4 = vld [vmem:[#allocation3 + $0x14c8] sm:$0xff] }
 0x1ea   :  { %5430 = vmatpush1.bf16.msra.mxu0 %v5429_v39  ;;  %v504_v39 = vld [vmem:[#allocation3 + $0xcd0] sm:$0xff]  ;;  %v630_v27 = vld [vmem:[#allocation3 + $0x10c0] sm:$0xff] }
 0x1eb   :  { %5622 = vmatpush1.bf16.msra.mxu1 %v5621_v40  ;;  %5432 = vmatprep.subr.bf16.mxu0 %v5431_v41  ;;  %v519_v40 = vld [vmem:[#allocation3 + $0xd48] sm:$0xff] }
 0x1ec   :  { %5624 = vmatprep.subr.bf16.mxu1 %v5623_v44  ;;  %v535_v41 = vld [vmem:[#allocation3 + $0xdc8] sm:$0xff]  ;;  %v5641_v44 = vpack.c.bf16 %v504_v39, %v488_v36  ;;  %v5465_v36 = vpack.c.bf16 %v630_v27, %v614_v25  ;;  %v777_v27 = vld [vmem:[#allocation3 + $0x1558] sm:$0xff] }
 0x1ed   :  { %v5451_v45 = vpack.c.bf16 %v535_v41, %v519_v40  ;;  %v646_v40 = vld [vmem:[#allocation3 + $0x1140] sm:$0xff]  ;;  %v791_v25 = vld [vmem:[#allocation3 + $0x15c8] sm:$0xff] }
 0x1ee   :  { %5434 = vmatpush1.bf16.msra.mxu0 %v5433_v50  ;;  %v536_v50 = vld [vmem:[#allocation3 + $0xdd0] sm:$0xff]  ;;  %v662_v41 = vld [vmem:[#allocation3 + $0x11c0] sm:$0xff] }
 0x1ef   :  { %5626 = vmatpush1.bf16.msra.mxu1 %v5625_v51  ;;  %5436 = vmatprep.subr.bf16.mxu0 %v5435_v21  ;;  %v551_v51 = vld [vmem:[#allocation3 + $0xe48] sm:$0xff] }
 0x1f0   :  { %5628 = vmatprep.subr.bf16.mxu1 %v5627_v55  ;;  %v567_v21 = vld [vmem:[#allocation3 + $0xec8] sm:$0xff]  ;;  %v5645_v55 = vpack.c.bf16 %v536_v50, %v520_v48  ;;  %v697_v48 = vld [vmem:[#allocation3 + $0x12d8] sm:$0xff] }
 0x1f1   :  { %v5455_v56 = vpack.c.bf16 %v567_v21, %v551_v51  ;;  %v678_v21 = vld [vmem:[#allocation3 + $0x1240] sm:$0xff] }
 0x1f2   :  { %5438 = vmatpush1.bf16.msra.mxu0 %v5437_v61  ;;  %v568_v61 = vld [vmem:[#allocation3 + $0xed0] sm:$0xff] }
 0x1f3   :  { %5630 = vmatpush1.bf16.msra.mxu1 %v5629_v62  ;;  %5440 = vmatprep.subr.bf16.mxu0 %v5439_v28  ;;  %v583_v62 = vld [vmem:[#allocation3 + $0xf48] sm:$0xff] }
 0x1f4   :  { %5632 = vmatprep.subr.bf16.mxu1 %v5631_v2  ;;  %v599_v28 = vld [vmem:[#allocation3 + $0xfc8] sm:$0xff]  ;;  %v5649_v2 = vpack.c.bf16 %v568_v61, %v552_v59  ;;  %v729_v59 = vld [vmem:[#allocation3 + $0x13d8] sm:$0xff] }
 0x1f5   :  { %v5459_v3 = vpack.c.bf16 %v599_v28, %v583_v62  ;;  %v710_v28 = vld [vmem:[#allocation3 + $0x1340] sm:$0xff] }
 0x1f6   :  { %5442 = vmatpush1.bf16.msra.mxu0 %v5441_v8  ;;  %v600_v8 = vld [vmem:[#allocation3 + $0xfd0] sm:$0xff] }
 0x1f7   :  { %5634 = vmatpush1.bf16.msra.mxu1 %v5633_v10  ;;  %5444 = vmatprep.subr.bf16.mxu0 %v5443_v11  ;;  %v615_v10 = vld [vmem:[#allocation3 + $0x1048] sm:$0xff] }
 0x1f8   :  { %5636 = vmatprep.subr.bf16.mxu1 %v5635_v18  ;;  %v631_v11 = vld [vmem:[#allocation3 + $0x10c8] sm:$0xff]  ;;  %v5653_v18 = vpack.c.bf16 %v600_v8, %v584_v6  ;;  %v761_v6 = vld [vmem:[#allocation3 + $0x14d8] sm:$0xff] }
 0x1f9   :  { %v5463_v23 = vpack.c.bf16 %v631_v11, %v615_v10  ;;  %v742_v11 = vld [vmem:[#allocation3 + $0x1440] sm:$0xff] }
 0x1fa   :  { %5446 = vmatpush1.bf16.msra.mxu0 %v5445_v31  ;;  %v632_v31 = vld [vmem:[#allocation3 + $0x10d0] sm:$0xff] }
 0x1fb   :  { %5638 = vmatpush1.bf16.msra.mxu1 %v5637_v32  ;;  %5448 = vmatprep.subr.bf16.mxu0 %v5447_v33  ;;  %v647_v32 = vld [vmem:[#allocation3 + $0x1148] sm:$0xff] }
 0x1fc   :  { %5640 = vmatprep.subr.bf16.mxu1 %v5639_v37  ;;  %v663_v33 = vld [vmem:[#allocation3 + $0x11c8] sm:$0xff]  ;;  %v5657_v37 = vpack.c.bf16 %v632_v31, %v616_v29  ;;  %v793_v29 = vld [vmem:[#allocation3 + $0x15d8] sm:$0xff] }
 0x1fd   :  { %v5467_v39 = vpack.c.bf16 %v663_v33, %v647_v32  ;;  %v774_v33 = vld [vmem:[#allocation3 + $0x1540] sm:$0xff] }
 0x1fe   :  { %5450 = vmatpush1.bf16.msra.mxu0 %v5449_v43  ;;  %v664_v43 = vld [vmem:[#allocation3 + $0x11d0] sm:$0xff] }
 0x1ff   :  { %5642 = vmatpush1.bf16.msra.mxu1 %v5641_v44  ;;  %5452 = vmatprep.subr.bf16.mxu0 %v5451_v45  ;;  %v679_v44 = vld [vmem:[#allocation3 + $0x1248] sm:$0xff]  ;;  %v5661_v50 = vpack.c.bf16 %v664_v43, %v648_v42  ;;  %v825_v42 = vld [vmem:[#allocation3 + $0x16d8] sm:$0xff] }
 0x200   :  { %5644 = vmatprep.subr.bf16.mxu1 %v5643_v49  ;;  %v695_v45 = vld [vmem:[#allocation3 + $0x12c8] sm:$0xff]  ;;  %v5469_v49 = vpack.c.bf16 %v662_v41, %v646_v40  ;;  %v809_v41 = vld [vmem:[#allocation3 + $0x1658] sm:$0xff] }
 0x201   :  { %v5471_v51 = vpack.c.bf16 %v695_v45, %v679_v44  ;;  %v823_v40 = vld [vmem:[#allocation3 + $0x16c8] sm:$0xff]  ;;  %v806_v45 = vld [vmem:[#allocation3 + $0x1640] sm:$0xff] }
 0x202   :  { %5454 = vmatpush1.bf16.msra.mxu0 %v5453_v54  ;;  %v5663_v54 = vpack.c.bf16 %v697_v48, %v681_v47  ;;  %v808_v47 = vld [vmem:[#allocation3 + $0x1650] sm:$0xff]  ;;  %v5679_v48 = vpack.c.bf16 %v825_v42, %v809_v41 }
 0x203   :  { %5646 = vmatpush1.bf16.msra.mxu1 %v5645_v55  ;;  %5456 = vmatprep.subr.bf16.mxu0 %v5455_v56  ;;  %v696_v55 = vld [vmem:[#allocation3 + $0x12d0] sm:$0xff]  ;;  %v711_v56 = vld [vmem:[#allocation3 + $0x1348] sm:$0xff] }
 0x204   :  { %5648 = vmatprep.subr.bf16.mxu1 %v5647_v60  ;;  %v5473_v60 = vpack.c.bf16 %v694_v52, %v678_v21  ;;  %v5665_v61 = vpack.c.bf16 %v696_v55, %v680_v53  ;;  %v5475_v62 = vpack.c.bf16 %v727_v57, %v711_v56  ;;  %v841_v21 = vld [vmem:[#allocation3 + $0x1758] sm:$0xff]  ;;  %v838_v56 = vld [vmem:[#allocation3 + $0x1740] sm:$0xff]  ;;  %v936_v41 = vld [vmem:[#allocation3 + $0x1a50] sm:$0xff] }
 0x205   :  { %v857_v52 = vld [vmem:[#allocation3 + $0x17d8] sm:$0xff]  ;;  %v854_v57 = vld [vmem:[#allocation3 + $0x17c0] sm:$0xff] }
 0x206   :  { %5458 = vmatpush1.bf16.msra.mxu0 %v5457_v1  ;;  %v5667_v1 = vpack.c.bf16 %v729_v59, %v713_v58  ;;  %v840_v58 = vld [vmem:[#allocation3 + $0x1750] sm:$0xff]  ;;  %v5683_v59 = vpack.c.bf16 %v857_v52, %v841_v21 }
 0x207   :  { %5650 = vmatpush1.bf16.msra.mxu1 %v5649_v2  ;;  %5460 = vmatprep.subr.bf16.mxu0 %v5459_v3  ;;  %v728_v2 = vld [vmem:[#allocation3 + $0x13d0] sm:$0xff]  ;;  %v743_v3 = vld [vmem:[#allocation3 + $0x1448] sm:$0xff] }
 0x208   :  { %5652 = vmatprep.subr.bf16.mxu1 %v5651_v7  ;;  %v5477_v7 = vpack.c.bf16 %v726_v63, %v710_v28  ;;  %v5669_v8 = vpack.c.bf16 %v728_v2, %v712_v0  ;;  %v5479_v10 = vpack.c.bf16 %v759_v4, %v743_v3  ;;  %v873_v28 = vld [vmem:[#allocation3 + $0x1858] sm:$0xff]  ;;  %v5493_v0 = vpack.c.bf16 %v854_v57, %v838_v56  ;;  %v870_v3 = vld [vmem:[#allocation3 + $0x1840] sm:$0xff]  ;;  %v968_v21 = vld [vmem:[#allocation3 + $0x1b50] sm:$0xff] }
 0x209   :  { %v889_v63 = vld [vmem:[#allocation3 + $0x18d8] sm:$0xff]  ;;  %v886_v4 = vld [vmem:[#allocation3 + $0x18c0] sm:$0xff] }
 0x20a   :  { %5462 = vmatpush1.bf16.msra.mxu0 %v5461_v17  ;;  %v5671_v17 = vpack.c.bf16 %v761_v6, %v745_v5  ;;  %v872_v5 = vld [vmem:[#allocation3 + $0x1850] sm:$0xff]  ;;  %v5687_v6 = vpack.c.bf16 %v889_v63, %v873_v28  ;;  %v1001_v56 = vld [vmem:[#allocation3 + $0x1c58] sm:$0xff] }
 0x20b   :  { %5654 = vmatpush1.bf16.msra.mxu1 %v5653_v18  ;;  %5464 = vmatprep.subr.bf16.mxu0 %v5463_v23  ;;  %v760_v18 = vld [vmem:[#allocation3 + $0x14d0] sm:$0xff]  ;;  %v775_v23 = vld [vmem:[#allocation3 + $0x1548] sm:$0xff]  ;;  %v1017_v57 = vld [vmem:[#allocation3 + $0x1cd8] sm:$0xff] }
 0x20c   :  { %5656 = vmatprep.subr.bf16.mxu1 %v5655_v30  ;;  %v5481_v30 = vpack.c.bf16 %v758_v12, %v742_v11  ;;  %v5673_v31 = vpack.c.bf16 %v760_v18, %v744_v13  ;;  %v5483_v32 = vpack.c.bf16 %v791_v25, %v775_v23  ;;  %v905_v11 = vld [vmem:[#allocation3 + $0x1958] sm:$0xff]  ;;  %v5497_v13 = vpack.c.bf16 %v886_v4, %v870_v3  ;;  %v902_v23 = vld [vmem:[#allocation3 + $0x1940] sm:$0xff]  ;;  %v1000_v28 = vld [vmem:[#allocation3 + $0x1c50] sm:$0xff] }
 0x20d   :  { %2556 = vmatmul.mubr.f32.vlgmr.msra.gmra.mrb[4].mxu0 %v6468_v46  ;;  %v921_v12 = vld [vmem:[#allocation3 + $0x19d8] sm:$0xff]  ;;  %v918_v25 = vld [vmem:[#allocation3 + $0x19c0] sm:$0xff]  ;;  %v5703_v63 = vpack.c.bf16 %v1017_v57, %v1001_v56  ;;  %v1128_v56 = vld [vmem:[#allocation3 + $0x2050] sm:$0xff] }
 0x20e   :  { %5466 = vmatpush1.bf16.msra.mxu0 %v5465_v36  ;;  %2769 = vmatmul.mubr.f32.vlgmr.msra.gmra.mrb[4].mxu1 %v6468_v46  ;;  %v5675_v36 = vpack.c.bf16 %v793_v29, %v777_v27  ;;  %v822_v46 = vld [vmem:[#allocation3 + $0x16c0] sm:$0xff]  ;;  %v904_v27 = vld [vmem:[#allocation3 + $0x1950] sm:$0xff]  ;;  %v5691_v29 = vpack.c.bf16 %v921_v12, %v905_v11  ;;  %v1033_v3 = vld [vmem:[#allocation3 + $0x1d58] sm:$0xff] }
 0x20f   :  { %5658 = vmatpush1.bf16.msra.mxu1 %v5657_v37  ;;  %5468 = vmatprep.subr.bf16.mxu0 %v5467_v39  ;;  %v792_v37 = vld [vmem:[#allocation3 + $0x15d0] sm:$0xff]  ;;  %v807_v39 = vld [vmem:[#allocation3 + $0x1648] sm:$0xff]  ;;  %v5489_v53 = vpack.c.bf16 %v822_v46, %v806_v45  ;;  %v969_v45 = vld [vmem:[#allocation3 + $0x1b58] sm:$0xff] }
 0x210   :  { %5660 = vmatprep.subr.bf16.mxu1 %v5659_v16  ;;  %2626 = vmatprep.mubr.f32.mxu0 %v6681_v26  ;;  %v5485_v16 = vpack.c.bf16 %v790_v34, %v774_v33  ;;  %v5677_v43 = vpack.c.bf16 %v792_v37, %v776_v35  ;;  %v5487_v44 = vpack.c.bf16 %v823_v40, %v807_v39  ;;  %v937_v33 = vld [vmem:[#allocation3 + $0x1a58] sm:$0xff]  ;;  %v934_v39 = vld [vmem:[#allocation3 + $0x1a40] sm:$0xff]  ;;  %v1032_v11 = vld [vmem:[#allocation3 + $0x1d50] sm:$0xff] }
 0x211   :  { %2839 = vmatprep.mubr.f32.mxu1 %v6681_v26  ;;  %v953_v34 = vld [vmem:[#allocation3 + $0x1ad8] sm:$0xff]  ;;  %v5501_v35 = vpack.c.bf16 %v918_v25, %v902_v23  ;;  %v950_v40 = vld [vmem:[#allocation3 + $0x1ac0] sm:$0xff] }
 0x212   :  { %5470 = vmatpush1.bf16.msra.mxu0 %v5469_v49  ;;  %v824_v49 = vld [vmem:[#allocation3 + $0x16d0] sm:$0xff]  ;;  %v5695_v42 = vpack.c.bf16 %v953_v34, %v937_v33  ;;  %v985_v46 = vld [vmem:[#allocation3 + $0x1bd8] sm:$0xff] }
 0x213   :  { %5662 = vmatpush1.bf16.msra.mxu1 %v5661_v50  ;;  %5472 = vmatprep.subr.bf16.mxu0 %v5471_v51  ;;  %v839_v50 = vld [vmem:[#allocation3 + $0x1748] sm:$0xff]  ;;  %v5699_v52 = vpack.c.bf16 %v985_v46, %v969_v45  ;;  %v1049_v4 = vld [vmem:[#allocation3 + $0x1dd8] sm:$0xff]  ;;  %v1064_v33 = vld [vmem:[#allocation3 + $0x1e50] sm:$0xff] }
 0x214   :  { %5664 = vmatprep.subr.bf16.mxu1 %v5663_v54  ;;  %v855_v51 = vld [vmem:[#allocation3 + $0x17c8] sm:$0xff]  ;;  %v5681_v54 = vpack.c.bf16 %v824_v49, %v808_v47  ;;  %v5505_v47 = vpack.c.bf16 %v950_v40, %v934_v39  ;;  %v5707_v12 = vpack.c.bf16 %v1049_v4, %v1033_v3  ;;  %v1065_v23 = vld [vmem:[#allocation3 + $0x1e58] sm:$0xff]  ;;  %v1096_v45 = vld [vmem:[#allocation3 + $0x1f50] sm:$0xff] }
 0x215   :  { %v5491_v55 = vpack.c.bf16 %v855_v51, %v839_v50  ;;  %v966_v50 = vld [vmem:[#allocation3 + $0x1b40] sm:$0xff]  ;;  %v1081_v25 = vld [vmem:[#allocation3 + $0x1ed8] sm:$0xff]  ;;  %v1160_v3 = vld [vmem:[#allocation3 + $0x2150] sm:$0xff] }
 0x216   :  { %5474 = vmatpush1.bf16.msra.mxu0 %v5473_v60  ;;  %v856_v60 = vld [vmem:[#allocation3 + $0x17d0] sm:$0xff]  ;;  %v982_v51 = vld [vmem:[#allocation3 + $0x1bc0] sm:$0xff]  ;;  %v5711_v34 = vpack.c.bf16 %v1081_v25, %v1065_v23  ;;  %v1097_v39 = vld [vmem:[#allocation3 + $0x1f58] sm:$0xff] }
 0x217   :  { %5666 = vmatpush1.bf16.msra.mxu1 %v5665_v61  ;;  %5476 = vmatprep.subr.bf16.mxu0 %v5475_v62  ;;  %v871_v61 = vld [vmem:[#allocation3 + $0x1848] sm:$0xff]  ;;  %v1113_v40 = vld [vmem:[#allocation3 + $0x1fd8] sm:$0xff]  ;;  %v1206_v23 = vld [vmem:[#allocation3 + $0x22c0] sm:$0xff] }
 0x218   :  { %5668 = vmatprep.subr.bf16.mxu1 %v5667_v1  ;;  %v887_v62 = vld [vmem:[#allocation3 + $0x18c8] sm:$0xff]  ;;  %v5685_v1 = vpack.c.bf16 %v856_v60, %v840_v58  ;;  %v5509_v58 = vpack.c.bf16 %v982_v51, %v966_v50  ;;  %v5715_v46 = vpack.c.bf16 %v1113_v40, %v1097_v39  ;;  %v1129_v50 = vld [vmem:[#allocation3 + $0x2058] sm:$0xff]  ;;  %v1192_v25 = vld [vmem:[#allocation3 + $0x2250] sm:$0xff] }
 0x219   :  { %v5495_v2 = vpack.c.bf16 %v887_v62, %v871_v61  ;;  %v998_v61 = vld [vmem:[#allocation3 + $0x1c40] sm:$0xff]  ;;  %v1145_v51 = vld [vmem:[#allocation3 + $0x20d8] sm:$0xff]  ;;  %v1224_v40 = vld [vmem:[#allocation3 + $0x2350] sm:$0xff] }
 0x21a   :  { %5478 = vmatpush1.bf16.msra.mxu0 %v5477_v7  ;;  %v888_v7 = vld [vmem:[#allocation3 + $0x18d0] sm:$0xff]  ;;  %v1014_v62 = vld [vmem:[#allocation3 + $0x1cc0] sm:$0xff]  ;;  %v5719_v57 = vpack.c.bf16 %v1145_v51, %v1129_v50 }
 0x21b   :  { %5670 = vmatpush1.bf16.msra.mxu1 %v5669_v8  ;;  %5480 = vmatprep.subr.bf16.mxu0 %v5479_v10  ;;  %v903_v8 = vld [vmem:[#allocation3 + $0x1948] sm:$0xff]  ;;  %v1238_v39 = vld [vmem:[#allocation3 + $0x23c0] sm:$0xff]  ;;  %v1256_v51 = vld [vmem:[#allocation3 + $0x2450] sm:$0xff] }
 0x21c   :  { %5672 = vmatprep.subr.bf16.mxu1 %v5671_v17  ;;  %v919_v10 = vld [vmem:[#allocation3 + $0x19c8] sm:$0xff]  ;;  %v5689_v17 = vpack.c.bf16 %v888_v7, %v872_v5  ;;  %v5513_v5 = vpack.c.bf16 %v1014_v62, %v998_v61  ;;  %v1161_v61 = vld [vmem:[#allocation3 + $0x2158] sm:$0xff]  ;;  %v1270_v50 = vld [vmem:[#allocation3 + $0x24c0] sm:$0xff] }
 0x21d   :  { %v5499_v18 = vpack.c.bf16 %v919_v10, %v903_v8  ;;  %v1030_v8 = vld [vmem:[#allocation3 + $0x1d40] sm:$0xff]  ;;  %v1177_v62 = vld [vmem:[#allocation3 + $0x21d8] sm:$0xff] }
 0x21e   :  { %5482 = vmatpush1.bf16.msra.mxu0 %v5481_v30  ;;  %v920_v30 = vld [vmem:[#allocation3 + $0x19d0] sm:$0xff]  ;;  %v1046_v10 = vld [vmem:[#allocation3 + $0x1dc0] sm:$0xff]  ;;  %v5723_v4 = vpack.c.bf16 %v1177_v62, %v1161_v61 }
 0x21f   :  { %5674 = vmatpush1.bf16.msra.mxu1 %v5673_v31  ;;  %5484 = vmatprep.subr.bf16.mxu0 %v5483_v32  ;;  %v935_v31 = vld [vmem:[#allocation3 + $0x1a48] sm:$0xff]  ;;  %v1302_v61 = vld [vmem:[#allocation3 + $0x25c0] sm:$0xff]  ;;  %v1288_v62 = vld [vmem:[#allocation3 + $0x2550] sm:$0xff] }
 0x220   :  { %5676 = vmatprep.subr.bf16.mxu1 %v5675_v36  ;;  %v951_v32 = vld [vmem:[#allocation3 + $0x1ac8] sm:$0xff]  ;;  %v5693_v36 = vpack.c.bf16 %v920_v30, %v904_v27  ;;  %v5517_v27 = vpack.c.bf16 %v1046_v10, %v1030_v8  ;;  %v1193_v10 = vld [vmem:[#allocation3 + $0x2258] sm:$0xff] }
 0x221   :  { %v5503_v37 = vpack.c.bf16 %v951_v32, %v935_v31  ;;  %v1062_v31 = vld [vmem:[#allocation3 + $0x1e40] sm:$0xff]  ;;  %v6469_v8 = vld [vmem:[%s6884_s0 + $0x8] sm:$0xff] }
 0x222   :  { %5486 = vmatpush1.bf16.msra.mxu0 %v5485_v16  ;;  %v952_v16 = vld [vmem:[#allocation3 + $0x1ad0] sm:$0xff]  ;;  %v1078_v32 = vld [vmem:[#allocation3 + $0x1ec0] sm:$0xff] }
 0x223   :  { %5678 = vmatpush1.bf16.msra.mxu1 %v5677_v43  ;;  %5488 = vmatprep.subr.bf16.mxu0 %v5487_v44  ;;  %v967_v43 = vld [vmem:[#allocation3 + $0x1b48] sm:$0xff] }
 0x224   :  { %5680 = vmatprep.subr.bf16.mxu1 %v5679_v48  ;;  %v983_v44 = vld [vmem:[#allocation3 + $0x1bc8] sm:$0xff]  ;;  %v5697_v48 = vpack.c.bf16 %v952_v16, %v936_v41  ;;  %v5521_v41 = vpack.c.bf16 %v1078_v32, %v1062_v31  ;;  %v1225_v32 = vld [vmem:[#allocation3 + $0x2358] sm:$0xff] }
 0x225   :  { %v5507_v49 = vpack.c.bf16 %v983_v44, %v967_v43  ;;  %v1094_v43 = vld [vmem:[#allocation3 + $0x1f40] sm:$0xff]  ;;  %v1239_v31 = vld [vmem:[#allocation3 + $0x23c8] sm:$0xff] }
 0x226   :  { %5490 = vmatpush1.bf16.msra.mxu0 %v5489_v53  ;;  %v984_v53 = vld [vmem:[#allocation3 + $0x1bd0] sm:$0xff]  ;;  %v1110_v44 = vld [vmem:[#allocation3 + $0x1fc0] sm:$0xff] }
 0x227   :  { %5682 = vmatpush1.bf16.msra.mxu1 %v5681_v54  ;;  %5492 = vmatprep.subr.bf16.mxu0 %v5491_v55  ;;  %v999_v54 = vld [vmem:[#allocation3 + $0x1c48] sm:$0xff] }
 0x228   :  { %5684 = vmatprep.subr.bf16.mxu1 %v5683_v59  ;;  %v1015_v55 = vld [vmem:[#allocation3 + $0x1cc8] sm:$0xff]  ;;  %v5701_v59 = vpack.c.bf16 %v984_v53, %v968_v21  ;;  %v5525_v21 = vpack.c.bf16 %v1110_v44, %v1094_v43  ;;  %v1257_v44 = vld [vmem:[#allocation3 + $0x2458] sm:$0xff] }
 0x229   :  { %v5511_v60 = vpack.c.bf16 %v1015_v55, %v999_v54  ;;  %v1126_v54 = vld [vmem:[#allocation3 + $0x2040] sm:$0xff]  ;;  %v1271_v43 = vld [vmem:[#allocation3 + $0x24c8] sm:$0xff] }
 0x22a   :  { %5494 = vmatpush1.bf16.msra.mxu0 %v5493_v0  ;;  %v1016_v0 = vld [vmem:[#allocation3 + $0x1cd0] sm:$0xff]  ;;  %v1142_v55 = vld [vmem:[#allocation3 + $0x20c0] sm:$0xff] }
 0x22b   :  { %5686 = vmatpush1.bf16.msra.mxu1 %v5685_v1  ;;  %5496 = vmatprep.subr.bf16.mxu0 %v5495_v2  ;;  %v1031_v1 = vld [vmem:[#allocation3 + $0x1d48] sm:$0xff] }
 0x22c   :  { %5688 = vmatprep.subr.bf16.mxu1 %v5687_v6  ;;  %v1047_v2 = vld [vmem:[#allocation3 + $0x1dc8] sm:$0xff]  ;;  %v5705_v6 = vpack.c.bf16 %v1016_v0, %v1000_v28  ;;  %v5529_v28 = vpack.c.bf16 %v1142_v55, %v1126_v54  ;;  %v1289_v55 = vld [vmem:[#allocation3 + $0x2558] sm:$0xff] }
 0x22d   :  { %v5515_v7 = vpack.c.bf16 %v1047_v2, %v1031_v1  ;;  %v1158_v1 = vld [vmem:[#allocation3 + $0x2140] sm:$0xff]  ;;  %v1303_v54 = vld [vmem:[#allocation3 + $0x25c8] sm:$0xff] }
 0x22e   :  { %5498 = vmatpush1.bf16.msra.mxu0 %v5497_v13  ;;  %v1048_v13 = vld [vmem:[#allocation3 + $0x1dd0] sm:$0xff]  ;;  %v1174_v2 = vld [vmem:[#allocation3 + $0x21c0] sm:$0xff] }
 0x22f   :  { %5690 = vmatpush1.bf16.msra.mxu1 %v5689_v17  ;;  %5500 = vmatprep.subr.bf16.mxu0 %v5499_v18  ;;  %v1063_v17 = vld [vmem:[#allocation3 + $0x1e48] sm:$0xff] }
 0x230   :  { %5692 = vmatprep.subr.bf16.mxu1 %v5691_v29  ;;  %v1079_v18 = vld [vmem:[#allocation3 + $0x1ec8] sm:$0xff]  ;;  %v5709_v29 = vpack.c.bf16 %v1048_v13, %v1032_v11  ;;  %v1209_v11 = vld [vmem:[#allocation3 + $0x22d8] sm:$0xff] }
 0x231   :  { %v5519_v30 = vpack.c.bf16 %v1079_v18, %v1063_v17  ;;  %v1190_v18 = vld [vmem:[#allocation3 + $0x2240] sm:$0xff] }
 0x232   :  { %5502 = vmatpush1.bf16.msra.mxu0 %v5501_v35  ;;  %v1080_v35 = vld [vmem:[#allocation3 + $0x1ed0] sm:$0xff] }
 0x233   :  { %5694 = vmatpush1.bf16.msra.mxu1 %v5693_v36  ;;  %5504 = vmatprep.subr.bf16.mxu0 %v5503_v37  ;;  %v1095_v36 = vld [vmem:[#allocation3 + $0x1f48] sm:$0xff] }
 0x234   :  { %5696 = vmatprep.subr.bf16.mxu1 %v5695_v42  ;;  %v1111_v37 = vld [vmem:[#allocation3 + $0x1fc8] sm:$0xff]  ;;  %v5713_v42 = vpack.c.bf16 %v1080_v35, %v1064_v33  ;;  %v1241_v33 = vld [vmem:[#allocation3 + $0x23d8] sm:$0xff] }
 0x235   :  { %v5523_v16 = vpack.c.bf16 %v1111_v37, %v1095_v36  ;;  %v1222_v37 = vld [vmem:[#allocation3 + $0x2340] sm:$0xff] }
 0x236   :  { %5506 = vmatpush1.bf16.msra.mxu0 %v5505_v47  ;;  %v1112_v47 = vld [vmem:[#allocation3 + $0x1fd0] sm:$0xff] }
 0x237   :  { %5698 = vmatpush1.bf16.msra.mxu1 %v5697_v48  ;;  %5508 = vmatprep.subr.bf16.mxu0 %v5507_v49  ;;  %v1127_v48 = vld [vmem:[#allocation3 + $0x2048] sm:$0xff] }
 0x238   :  { %5700 = vmatprep.subr.bf16.mxu1 %v5699_v52  ;;  %v1143_v49 = vld [vmem:[#allocation3 + $0x20c8] sm:$0xff]  ;;  %v5717_v52 = vpack.c.bf16 %v1112_v47, %v1096_v45  ;;  %v1273_v45 = vld [vmem:[#allocation3 + $0x24d8] sm:$0xff] }
 0x239   :  { %v5527_v53 = vpack.c.bf16 %v1143_v49, %v1127_v48  ;;  %v1254_v49 = vld [vmem:[#allocation3 + $0x2440] sm:$0xff] }
 0x23a   :  { %5510 = vmatpush1.bf16.msra.mxu0 %v5509_v58  ;;  %v1144_v58 = vld [vmem:[#allocation3 + $0x20d0] sm:$0xff] }
 0x23b   :  { %5702 = vmatpush1.bf16.msra.mxu1 %v5701_v59  ;;  %5512 = vmatprep.subr.bf16.mxu0 %v5511_v60  ;;  %v1159_v59 = vld [vmem:[#allocation3 + $0x2148] sm:$0xff] }
 0x23c   :  { %5704 = vmatprep.subr.bf16.mxu1 %v5703_v63  ;;  %v1175_v60 = vld [vmem:[#allocation3 + $0x21c8] sm:$0xff]  ;;  %v5721_v63 = vpack.c.bf16 %v1144_v58, %v1128_v56  ;;  %v1305_v56 = vld [vmem:[#allocation3 + $0x25d8] sm:$0xff] }
 0x23d   :  { %v5531_v0 = vpack.c.bf16 %v1175_v60, %v1159_v59  ;;  %v1286_v60 = vld [vmem:[#allocation3 + $0x2540] sm:$0xff] }
 0x23e   :  { %5514 = vmatpush1.bf16.msra.mxu0 %v5513_v5  ;;  %v1176_v5 = vld [vmem:[#allocation3 + $0x21d0] sm:$0xff] }
 0x23f   :  { %5706 = vmatpush1.bf16.msra.mxu1 %v5705_v6  ;;  %5516 = vmatprep.subr.bf16.mxu0 %v5515_v7  ;;  %v1191_v6 = vld [vmem:[#allocation3 + $0x2248] sm:$0xff]  ;;  %v5725_v13 = vpack.c.bf16 %v1176_v5, %v1160_v3  ;;  %v1337_v3 = vld [vmem:[#allocation3 + $0x26d8] sm:$0xff] }
 0x240   :  { %5708 = vmatprep.subr.bf16.mxu1 %v5707_v12  ;;  %v1207_v7 = vld [vmem:[#allocation3 + $0x22c8] sm:$0xff]  ;;  %v5533_v12 = vpack.c.bf16 %v1174_v2, %v1158_v1  ;;  %v1321_v2 = vld [vmem:[#allocation3 + $0x2658] sm:$0xff] }
 0x241   :  { %v5535_v17 = vpack.c.bf16 %v1207_v7, %v1191_v6  ;;  %v1335_v1 = vld [vmem:[#allocation3 + $0x26c8] sm:$0xff]  ;;  %v1318_v7 = vld [vmem:[#allocation3 + $0x2640] sm:$0xff] }
 0x242   :  { %5518 = vmatpush1.bf16.msra.mxu0 %v5517_v27  ;;  %v5727_v27 = vpack.c.bf16 %v1209_v11, %v1193_v10  ;;  %v1320_v10 = vld [vmem:[#allocation3 + $0x2650] sm:$0xff]  ;;  %v5743_v11 = vpack.c.bf16 %v1337_v3, %v1321_v2 }
 0x243   :  { %5710 = vmatpush1.bf16.msra.mxu1 %v5709_v29  ;;  %5520 = vmatprep.subr.bf16.mxu0 %v5519_v30  ;;  %v1208_v29 = vld [vmem:[#allocation3 + $0x22d0] sm:$0xff]  ;;  %v1223_v30 = vld [vmem:[#allocation3 + $0x2348] sm:$0xff] }
 0x244   :  { %5712 = vmatprep.subr.bf16.mxu1 %v5711_v34  ;;  %v5537_v34 = vpack.c.bf16 %v1206_v23, %v1190_v18  ;;  %v5729_v35 = vpack.c.bf16 %v1208_v29, %v1192_v25  ;;  %v5539_v36 = vpack.c.bf16 %v1239_v31, %v1223_v30  ;;  %v1353_v18 = vld [vmem:[#allocation3 + $0x2758] sm:$0xff]  ;;  %v1350_v30 = vld [vmem:[#allocation3 + $0x2740] sm:$0xff]  ;;  %v1448_v2 = vld [vmem:[#allocation3 + $0x2a50] sm:$0xff] }
 0x245   :  { %v1369_v23 = vld [vmem:[#allocation3 + $0x27d8] sm:$0xff]  ;;  %v1366_v31 = vld [vmem:[#allocation3 + $0x27c0] sm:$0xff] }
 0x246   :  { %5522 = vmatpush1.bf16.msra.mxu0 %v5521_v41  ;;  %v5731_v41 = vpack.c.bf16 %v1241_v33, %v1225_v32  ;;  %v1352_v32 = vld [vmem:[#allocation3 + $0x2750] sm:$0xff]  ;;  %v5747_v33 = vpack.c.bf16 %v1369_v23, %v1353_v18 }
 0x247   :  { %5714 = vmatpush1.bf16.msra.mxu1 %v5713_v42  ;;  %5524 = vmatprep.subr.bf16.mxu0 %v5523_v16  ;;  %v1240_v42 = vld [vmem:[#allocation3 + $0x23d0] sm:$0xff]  ;;  %v1255_v16 = vld [vmem:[#allocation3 + $0x2448] sm:$0xff] }
 0x248   :  { %5716 = vmatprep.subr.bf16.mxu1 %v5715_v46  ;;  %v5541_v46 = vpack.c.bf16 %v1238_v39, %v1222_v37  ;;  %v5733_v47 = vpack.c.bf16 %v1240_v42, %v1224_v40  ;;  %v5543_v48 = vpack.c.bf16 %v1271_v43, %v1255_v16  ;;  %v1385_v37 = vld [vmem:[#allocation3 + $0x2858] sm:$0xff]  ;;  %v5557_v40 = vpack.c.bf16 %v1366_v31, %v1350_v30  ;;  %v1382_v16 = vld [vmem:[#allocation3 + $0x2840] sm:$0xff]  ;;  %v1480_v18 = vld [vmem:[#allocation3 + $0x2b50] sm:$0xff] }
 0x249   :  { %v1401_v39 = vld [vmem:[#allocation3 + $0x28d8] sm:$0xff]  ;;  %v1398_v43 = vld [vmem:[#allocation3 + $0x28c0] sm:$0xff] }
 0x24a   :  { %5526 = vmatpush1.bf16.msra.mxu0 %v5525_v21  ;;  %v5735_v21 = vpack.c.bf16 %v1273_v45, %v1257_v44  ;;  %v1384_v44 = vld [vmem:[#allocation3 + $0x2850] sm:$0xff]  ;;  %v5751_v45 = vpack.c.bf16 %v1401_v39, %v1385_v37  ;;  %v1513_v30 = vld [vmem:[#allocation3 + $0x2c58] sm:$0xff] }
 0x24b   :  { %5718 = vmatpush1.bf16.msra.mxu1 %v5717_v52  ;;  %5528 = vmatprep.subr.bf16.mxu0 %v5527_v53  ;;  %v1272_v52 = vld [vmem:[#allocation3 + $0x24d0] sm:$0xff]  ;;  %v1287_v53 = vld [vmem:[#allocation3 + $0x2548] sm:$0xff]  ;;  %v1529_v31 = vld [vmem:[#allocation3 + $0x2cd8] sm:$0xff] }
 0x24c   :  { %5720 = vmatprep.subr.bf16.mxu1 %v5719_v57  ;;  %v5545_v57 = vpack.c.bf16 %v1270_v50, %v1254_v49  ;;  %v5737_v58 = vpack.c.bf16 %v1272_v52, %v1256_v51  ;;  %v5547_v59 = vpack.c.bf16 %v1303_v54, %v1287_v53  ;;  %v1417_v49 = vld [vmem:[#allocation3 + $0x2958] sm:$0xff]  ;;  %v5561_v51 = vpack.c.bf16 %v1398_v43, %v1382_v16  ;;  %v1414_v53 = vld [vmem:[#allocation3 + $0x2940] sm:$0xff]  ;;  %v1512_v37 = vld [vmem:[#allocation3 + $0x2c50] sm:$0xff] }
 0x24d   :  { %2627 = vmatmul.mubr.f32.vlgmr.msra.gmra.mrb[4].mxu0 %v6469_v8  ;;  %v1433_v50 = vld [vmem:[#allocation3 + $0x29d8] sm:$0xff]  ;;  %v1430_v54 = vld [vmem:[#allocation3 + $0x29c0] sm:$0xff]  ;;  %v5767_v39 = vpack.c.bf16 %v1529_v31, %v1513_v30  ;;  %v108_v30 = vld [vmem:[#allocation3 + $0x70] sm:$0xff] }
 0x24e   :  { %5530 = vmatpush1.bf16.msra.mxu0 %v5529_v28  ;;  %2840 = vmatmul.mubr.f32.vlgmr.msra.gmra.mrb[4].mxu1 %v6469_v8  ;;  %v5739_v28 = vpack.c.bf16 %v1305_v56, %v1289_v55  ;;  %v1334_v8 = vld [vmem:[#allocation3 + $0x26c0] sm:$0xff]  ;;  %v1416_v55 = vld [vmem:[#allocation3 + $0x2950] sm:$0xff]  ;;  %v5755_v56 = vpack.c.bf16 %v1433_v50, %v1417_v49  ;;  %v1545_v16 = vld [vmem:[#allocation3 + $0x2d58] sm:$0xff] }
 0x24f   :  { %5722 = vmatpush1.bf16.msra.mxu1 %v5721_v63  ;;  %5532 = vmatprep.subr.bf16.mxu0 %v5531_v0  ;;  %v1304_v63 = vld [vmem:[#allocation3 + $0x25d0] sm:$0xff]  ;;  %v1319_v0 = vld [vmem:[#allocation3 + $0x2648] sm:$0xff]  ;;  %v5553_v25 = vpack.c.bf16 %v1334_v8, %v1318_v7  ;;  %v1481_v7 = vld [vmem:[#allocation3 + $0x2b58] sm:$0xff] }
 0x250   :  { %5724 = vmatprep.subr.bf16.mxu1 %v5723_v4  ;;  %2697 = vmatprep.mubr.f32.mxu0 %v6692_v38  ;;  %v5549_v4 = vpack.c.bf16 %v1302_v61, %v1286_v60  ;;  %v5741_v5 = vpack.c.bf16 %v1304_v63, %v1288_v62  ;;  %v5551_v6 = vpack.c.bf16 %v1335_v1, %v1319_v0  ;;  %v1449_v60 = vld [vmem:[#allocation3 + $0x2a58] sm:$0xff]  ;;  %v1446_v0 = vld [vmem:[#allocation3 + $0x2a40] sm:$0xff]  ;;  %v1544_v49 = vld [vmem:[#allocation3 + $0x2d50] sm:$0xff] }
 0x251   :  { %2910 = vmatprep.mubr.f32.mxu1 %v6692_v38  ;;  %v1465_v61 = vld [vmem:[#allocation3 + $0x2ad8] sm:$0xff]  ;;  %v5565_v62 = vpack.c.bf16 %v1430_v54, %v1414_v53  ;;  %v1462_v1 = vld [vmem:[#allocation3 + $0x2ac0] sm:$0xff] }
 0x252   :  { %5534 = vmatpush1.bf16.msra.mxu0 %v5533_v12  ;;  %v1336_v12 = vld [vmem:[#allocation3 + $0x26d0] sm:$0xff]  ;;  %v5759_v3 = vpack.c.bf16 %v1465_v61, %v1449_v60  ;;  %v1497_v8 = vld [vmem:[#allocation3 + $0x2bd8] sm:$0xff] }
 0x253   :  { %5726 = vmatpush1.bf16.msra.mxu1 %v5725_v13  ;;  %5536 = vmatprep.subr.bf16.mxu0 %v5535_v17  ;;  %v1351_v13 = vld [vmem:[#allocation3 + $0x2748] sm:$0xff]  ;;  %v5763_v23 = vpack.c.bf16 %v1497_v8, %v1481_v7  ;;  %v1561_v43 = vld [vmem:[#allocation3 + $0x2dd8] sm:$0xff]  ;;  %v1576_v60 = vld [vmem:[#allocation3 + $0x2e50] sm:$0xff] }
 0x254   :  { %5728 = vmatprep.subr.bf16.mxu1 %v5727_v27  ;;  %v1367_v17 = vld [vmem:[#allocation3 + $0x27c8] sm:$0xff]  ;;  %v5745_v27 = vpack.c.bf16 %v1336_v12, %v1320_v10  ;;  %v5569_v10 = vpack.c.bf16 %v1462_v1, %v1446_v0  ;;  %v5771_v50 = vpack.c.bf16 %v1561_v43, %v1545_v16  ;;  %v1577_v53 = vld [vmem:[#allocation3 + $0x2e58] sm:$0xff]  ;;  %v1608_v7 = vld [vmem:[#allocation3 + $0x2f50] sm:$0xff] }
 0x255   :  { %v5555_v29 = vpack.c.bf16 %v1367_v17, %v1351_v13  ;;  %v1478_v13 = vld [vmem:[#allocation3 + $0x2b40] sm:$0xff]  ;;  %v1593_v54 = vld [vmem:[#allocation3 + $0x2ed8] sm:$0xff]  ;;  %v140_v16 = vld [vmem:[#allocation3 + $0x170] sm:$0xff] }
 0x256   :  { %5538 = vmatpush1.bf16.msra.mxu0 %v5537_v34  ;;  %v1368_v34 = vld [vmem:[#allocation3 + $0x27d0] sm:$0xff]  ;;  %v1494_v17 = vld [vmem:[#allocation3 + $0x2bc0] sm:$0xff]  ;;  %v5775_v61 = vpack.c.bf16 %v1593_v54, %v1577_v53  ;;  %v1609_v0 = vld [vmem:[#allocation3 + $0x2f58] sm:$0xff] }
 0x257   :  { %5730 = vmatpush1.bf16.msra.mxu1 %v5729_v35  ;;  %5540 = vmatprep.subr.bf16.mxu0 %v5539_v36  ;;  %v1383_v35 = vld [vmem:[#allocation3 + $0x2848] sm:$0xff]  ;;  %v1625_v1 = vld [vmem:[#allocation3 + $0x2fd8] sm:$0xff]  ;;  %v186_v53 = vld [vmem:[#allocation3 + $0x2e0] sm:$0xff] }
 0x258   :  { %5732 = vmatprep.subr.bf16.mxu1 %v5731_v41  ;;  %v1399_v36 = vld [vmem:[#allocation3 + $0x28c8] sm:$0xff]  ;;  %v5749_v41 = vpack.c.bf16 %v1368_v34, %v1352_v32  ;;  %v5573_v32 = vpack.c.bf16 %v1494_v17, %v1478_v13  ;;  %v5779_v8 = vpack.c.bf16 %v1625_v1, %v1609_v0  ;;  %v109_v13 = vld [vmem:[#allocation3 + $0x78] sm:$0xff]  ;;  %v172_v54 = vld [vmem:[#allocation3 + $0x270] sm:$0xff] }
 0x259   :  { %v5559_v42 = vpack.c.bf16 %v1399_v36, %v1383_v35  ;;  %v1510_v35 = vld [vmem:[#allocation3 + $0x2c40] sm:$0xff]  ;;  %v125_v17 = vld [vmem:[#allocation3 + $0xf8] sm:$0xff]  ;;  %v204_v1 = vld [vmem:[#allocation3 + $0x370] sm:$0xff] }
 0x25a   :  { %5542 = vmatpush1.bf16.msra.mxu0 %v5541_v46  ;;  %v1400_v46 = vld [vmem:[#allocation3 + $0x28d0] sm:$0xff]  ;;  %v1526_v36 = vld [vmem:[#allocation3 + $0x2cc0] sm:$0xff]  ;;  %v5975_v31 = vpack.c.bf16 %v125_v17, %v109_v13 }
 0x25b   :  { %5734 = vmatpush1.bf16.msra.mxu1 %v5733_v47  ;;  %5544 = vmatprep.subr.bf16.mxu0 %v5543_v48  ;;  %v1415_v47 = vld [vmem:[#allocation3 + $0x2948] sm:$0xff]  ;;  %v218_v0 = vld [vmem:[#allocation3 + $0x3e0] sm:$0xff]  ;;  %v236_v13 = vld [vmem:[#allocation3 + $0x470] sm:$0xff] }
 0x25c   :  { %5736 = vmatprep.subr.bf16.mxu1 %v5735_v21  ;;  %v1431_v48 = vld [vmem:[#allocation3 + $0x29c8] sm:$0xff]  ;;  %v5753_v21 = vpack.c.bf16 %v1400_v46, %v1384_v44  ;;  %v5577_v44 = vpack.c.bf16 %v1526_v36, %v1510_v35  ;;  %v141_v35 = vld [vmem:[#allocation3 + $0x178] sm:$0xff] }
 0x25d   :  { %v5563_v52 = vpack.c.bf16 %v1431_v48, %v1415_v47  ;;  %v1542_v47 = vld [vmem:[#allocation3 + $0x2d40] sm:$0xff]  ;;  %v157_v36 = vld [vmem:[#allocation3 + $0x1f8] sm:$0xff] }
 0x25e   :  { %5546 = vmatpush1.bf16.msra.mxu0 %v5545_v57  ;;  %v1432_v57 = vld [vmem:[#allocation3 + $0x29d0] sm:$0xff]  ;;  %v1558_v48 = vld [vmem:[#allocation3 + $0x2dc0] sm:$0xff]  ;;  %v5979_v43 = vpack.c.bf16 %v157_v36, %v141_v35 }
 0x25f   :  { %5738 = vmatpush1.bf16.msra.mxu1 %v5737_v58  ;;  %5548 = vmatprep.subr.bf16.mxu0 %v5547_v59  ;;  %v1447_v58 = vld [vmem:[#allocation3 + $0x2a48] sm:$0xff]  ;;  %v268_v35 = vld [vmem:[#allocation3 + $0x570] sm:$0xff] }
 0x260   :  { %5740 = vmatprep.subr.bf16.mxu1 %v5739_v28  ;;  %v1463_v59 = vld [vmem:[#allocation3 + $0x2ac8] sm:$0xff]  ;;  %v5757_v28 = vpack.c.bf16 %v1432_v57, %v1416_v55  ;;  %v5581_v55 = vpack.c.bf16 %v1558_v48, %v1542_v47  ;;  %v6470_v47 = vld [vmem:[%s6884_s0 + $0x10] sm:$0xff]  ;;  %v173_v48 = vld [vmem:[#allocation3 + $0x278] sm:$0xff] }
 0x261   :  { %v5567_v63 = vpack.c.bf16 %v1463_v59, %v1447_v58  ;;  %v1574_v58 = vld [vmem:[#allocation3 + $0x2e40] sm:$0xff] }
 0x262   :  { %5550 = vmatpush1.bf16.msra.mxu0 %v5549_v4  ;;  %v1464_v4 = vld [vmem:[#allocation3 + $0x2ad0] sm:$0xff]  ;;  %v1590_v59 = vld [vmem:[#allocation3 + $0x2ec0] sm:$0xff] }
 0x263   :  { %5742 = vmatpush1.bf16.msra.mxu1 %v5741_v5  ;;  %5552 = vmatprep.subr.bf16.mxu0 %v5551_v6  ;;  %v1479_v5 = vld [vmem:[#allocation3 + $0x2b48] sm:$0xff] }
 0x264   :  { %5744 = vmatprep.subr.bf16.mxu1 %v5743_v11  ;;  %v1495_v6 = vld [vmem:[#allocation3 + $0x2bc8] sm:$0xff]  ;;  %v5761_v11 = vpack.c.bf16 %v1464_v4, %v1448_v2  ;;  %v5585_v2 = vpack.c.bf16 %v1590_v59, %v1574_v58  ;;  %v205_v59 = vld [vmem:[#allocation3 + $0x378] sm:$0xff] }
 0x265   :  { %v5571_v12 = vpack.c.bf16 %v1495_v6, %v1479_v5  ;;  %v1606_v5 = vld [vmem:[#allocation3 + $0x2f40] sm:$0xff]  ;;  %v219_v58 = vld [vmem:[#allocation3 + $0x3e8] sm:$0xff] }
 0x266   :  { %5554 = vmatpush1.bf16.msra.mxu0 %v5553_v25  ;;  %v1496_v25 = vld [vmem:[#allocation3 + $0x2bd0] sm:$0xff]  ;;  %v1622_v6 = vld [vmem:[#allocation3 + $0x2fc0] sm:$0xff] }
 0x267   :  { %5746 = vmatpush1.bf16.msra.mxu1 %v5745_v27  ;;  %5556 = vmatprep.subr.bf16.mxu0 %v5555_v29  ;;  %v1511_v27 = vld [vmem:[#allocation3 + $0x2c48] sm:$0xff] }
 0x268   :  { %5748 = vmatprep.subr.bf16.mxu1 %v5747_v33  ;;  %v1527_v29 = vld [vmem:[#allocation3 + $0x2cc8] sm:$0xff]  ;;  %v5765_v33 = vpack.c.bf16 %v1496_v25, %v1480_v18  ;;  %v5589_v18 = vpack.c.bf16 %v1622_v6, %v1606_v5  ;;  %v237_v6 = vld [vmem:[#allocation3 + $0x478] sm:$0xff] }
 0x269   :  { %v5575_v34 = vpack.c.bf16 %v1527_v29, %v1511_v27  ;;  %v106_v27 = vld [vmem:[#allocation3 + $0x60] sm:$0xff]  ;;  %v251_v5 = vld [vmem:[#allocation3 + $0x4e8] sm:$0xff] }
 0x26a   :  { %5558 = vmatpush1.bf16.msra.mxu0 %v5557_v40  ;;  %v1528_v40 = vld [vmem:[#allocation3 + $0x2cd0] sm:$0xff]  ;;  %v122_v29 = vld [vmem:[#allocation3 + $0xe0] sm:$0xff] }
 0x26b   :  { %5750 = vmatpush1.bf16.msra.mxu1 %v5749_v41  ;;  %5560 = vmatprep.subr.bf16.mxu0 %v5559_v42  ;;  %v1543_v41 = vld [vmem:[#allocation3 + $0x2d48] sm:$0xff] }
 0x26c   :  { %5752 = vmatprep.subr.bf16.mxu1 %v5751_v45  ;;  %v1559_v42 = vld [vmem:[#allocation3 + $0x2dc8] sm:$0xff]  ;;  %v5769_v45 = vpack.c.bf16 %v1528_v40, %v1512_v37  ;;  %v5785_v37 = vpack.c.bf16 %v122_v29, %v106_v27  ;;  %v269_v27 = vld [vmem:[#allocation3 + $0x578] sm:$0xff] }
 0x26d   :  { %v5579_v46 = vpack.c.bf16 %v1559_v42, %v1543_v41  ;;  %v138_v41 = vld [vmem:[#allocation3 + $0x160] sm:$0xff]  ;;  %v285_v29 = vld [vmem:[#allocation3 + $0x5f8] sm:$0xff] }
 0x26e   :  { %5562 = vmatpush1.bf16.msra.mxu0 %v5561_v51  ;;  %v1560_v51 = vld [vmem:[#allocation3 + $0x2dd0] sm:$0xff]  ;;  %v154_v42 = vld [vmem:[#allocation3 + $0x1e0] sm:$0xff]  ;;  %v5995_v36 = vpack.c.bf16 %v285_v29, %v269_v27 }
 0x26f   :  { %5754 = vmatpush1.bf16.msra.mxu1 %v5753_v21  ;;  %5564 = vmatprep.subr.bf16.mxu0 %v5563_v52  ;;  %v1575_v21 = vld [vmem:[#allocation3 + $0x2e48] sm:$0xff] }
 0x270   :  { %5756 = vmatprep.subr.bf16.mxu1 %v5755_v56  ;;  %v1591_v52 = vld [vmem:[#allocation3 + $0x2ec8] sm:$0xff]  ;;  %v5773_v56 = vpack.c.bf16 %v1560_v51, %v1544_v49  ;;  %v189_v49 = vld [vmem:[#allocation3 + $0x2f8] sm:$0xff] }
 0x271   :  { %v5583_v57 = vpack.c.bf16 %v1591_v52, %v1575_v21  ;;  %v170_v52 = vld [vmem:[#allocation3 + $0x260] sm:$0xff] }
 0x272   :  { %5566 = vmatpush1.bf16.msra.mxu0 %v5565_v62  ;;  %v1592_v62 = vld [vmem:[#allocation3 + $0x2ed0] sm:$0xff] }
 0x273   :  { %5758 = vmatpush1.bf16.msra.mxu1 %v5757_v28  ;;  %5568 = vmatprep.subr.bf16.mxu0 %v5567_v63  ;;  %v1607_v28 = vld [vmem:[#allocation3 + $0x2f48] sm:$0xff] }
 0x274   :  { %5760 = vmatprep.subr.bf16.mxu1 %v5759_v3  ;;  %v1623_v63 = vld [vmem:[#allocation3 + $0x2fc8] sm:$0xff]  ;;  %v5777_v3 = vpack.c.bf16 %v1592_v62, %v1576_v60  ;;  %v221_v60 = vld [vmem:[#allocation3 + $0x3f8] sm:$0xff] }
 0x275   :  { %v5587_v4 = vpack.c.bf16 %v1623_v63, %v1607_v28  ;;  %v202_v63 = vld [vmem:[#allocation3 + $0x360] sm:$0xff] }
 0x276   :  { %5570 = vmatpush1.bf16.msra.mxu0 %v5569_v10  ;;  %v1624_v10 = vld [vmem:[#allocation3 + $0x2fd0] sm:$0xff] }
 0x277   :  { %5762 = vmatpush1.bf16.msra.mxu1 %v5761_v11  ;;  %5572 = vmatprep.subr.bf16.mxu0 %v5571_v12  ;;  %v107_v11 = vld [vmem:[#allocation3 + $0x68] sm:$0xff] }
 0x278   :  { %5764 = vmatprep.subr.bf16.mxu1 %v5763_v23  ;;  %v123_v12 = vld [vmem:[#allocation3 + $0xe8] sm:$0xff]  ;;  %v5781_v23 = vpack.c.bf16 %v1624_v10, %v1608_v7  ;;  %v253_v7 = vld [vmem:[#allocation3 + $0x4f8] sm:$0xff] }
 0x279   :  { %v5783_v25 = vpack.c.bf16 %v123_v12, %v107_v11  ;;  %v234_v11 = vld [vmem:[#allocation3 + $0x460] sm:$0xff]  ;;  %v5991_v17 = vpack.c.bf16 %v253_v7, %v237_v6 }
 0x27a   :  { %5574 = vmatpush1.bf16.msra.mxu0 %v5573_v32  ;;  %v124_v32 = vld [vmem:[#allocation3 + $0xf0] sm:$0xff]  ;;  %v250_v12 = vld [vmem:[#allocation3 + $0x4e0] sm:$0xff] }
 0x27b   :  { %5766 = vmatpush1.bf16.msra.mxu1 %v5765_v33  ;;  %5576 = vmatprep.subr.bf16.mxu0 %v5575_v34  ;;  %v139_v33 = vld [vmem:[#allocation3 + $0x168] sm:$0xff] }
 0x27c   :  { %5768 = vmatprep.subr.bf16.mxu1 %v5767_v39  ;;  %v155_v34 = vld [vmem:[#allocation3 + $0x1e8] sm:$0xff]  ;;  %v5977_v39 = vpack.c.bf16 %v124_v32, %v108_v30  ;;  %v5801_v30 = vpack.c.bf16 %v250_v12, %v234_v11  ;;  %v364_v11 = vld [vmem:[#allocation3 + $0x870] sm:$0xff] }
 0x27d   :  { %v5787_v40 = vpack.c.bf16 %v155_v34, %v139_v33  ;;  %v266_v33 = vld [vmem:[#allocation3 + $0x560] sm:$0xff] }
 0x27e   :  { %5578 = vmatpush1.bf16.msra.mxu0 %v5577_v44  ;;  %v156_v44 = vld [vmem:[#allocation3 + $0x1f0] sm:$0xff]  ;;  %v282_v34 = vld [vmem:[#allocation3 + $0x5e0] sm:$0xff] }
 0x27f   :  { %5770 = vmatpush1.bf16.msra.mxu1 %v5769_v45  ;;  %5580 = vmatprep.subr.bf16.mxu0 %v5579_v46  ;;  %v171_v45 = vld [vmem:[#allocation3 + $0x268] sm:$0xff]  ;;  %v5981_v51 = vpack.c.bf16 %v156_v44, %v140_v16  ;;  %v5805_v16 = vpack.c.bf16 %v282_v34, %v266_v33  ;;  %v396_v33 = vld [vmem:[#allocation3 + $0x970] sm:$0xff] }
 0x280   :  { %5772 = vmatprep.subr.bf16.mxu1 %v5771_v50  ;;  %v187_v46 = vld [vmem:[#allocation3 + $0x2e8] sm:$0xff]  ;;  %v5789_v50 = vpack.c.bf16 %v154_v42, %v138_v41  ;;  %v301_v41 = vld [vmem:[#allocation3 + $0x678] sm:$0xff] }
 0x281   :  { %v5791_v21 = vpack.c.bf16 %v187_v46, %v171_v45  ;;  %v317_v42 = vld [vmem:[#allocation3 + $0x6f8] sm:$0xff]  ;;  %v298_v45 = vld [vmem:[#allocation3 + $0x660] sm:$0xff] }
 0x282   :  { %5582 = vmatpush1.bf16.msra.mxu0 %v5581_v55  ;;  %v5983_v55 = vpack.c.bf16 %v189_v49, %v173_v48  ;;  %v314_v46 = vld [vmem:[#allocation3 + $0x6e0] sm:$0xff]  ;;  %v5999_v49 = vpack.c.bf16 %v317_v42, %v301_v41 }
 0x283   :  { %5774 = vmatpush1.bf16.msra.mxu1 %v5773_v56  ;;  %5584 = vmatprep.subr.bf16.mxu0 %v5583_v57  ;;  %v188_v56 = vld [vmem:[#allocation3 + $0x2f0] sm:$0xff]  ;;  %v203_v57 = vld [vmem:[#allocation3 + $0x368] sm:$0xff] }
 0x284   :  { %5776 = vmatprep.subr.bf16.mxu1 %v5775_v61  ;;  %v5793_v61 = vpack.c.bf16 %v186_v53, %v170_v52  ;;  %v5985_v62 = vpack.c.bf16 %v188_v56, %v172_v54  ;;  %v5795_v28 = vpack.c.bf16 %v219_v58, %v203_v57  ;;  %v333_v54 = vld [vmem:[#allocation3 + $0x778] sm:$0xff]  ;;  %v5809_v58 = vpack.c.bf16 %v314_v46, %v298_v45  ;;  %v428_v45 = vld [vmem:[#allocation3 + $0xa70] sm:$0xff] }
 0x286   :  { %5586 = vmatpush1.bf16.msra.mxu0 %v5585_v2  ;;  %v5987_v2 = vpack.c.bf16 %v221_v60, %v205_v59 }
 0x287   :  { %5778 = vmatpush1.bf16.msra.mxu1 %v5777_v3  ;;  %5588 = vmatprep.subr.bf16.mxu0 %v5587_v4  ;;  %v220_v3 = vld [vmem:[#allocation3 + $0x3f0] sm:$0xff]  ;;  %v235_v4 = vld [vmem:[#allocation3 + $0x468] sm:$0xff] }
 0x288   :  { %5780 = vmatprep.subr.bf16.mxu1 %v5779_v8  ;;  %v5797_v8 = vpack.c.bf16 %v218_v0, %v202_v63  ;;  %v5799_v10 = vpack.c.bf16 %v251_v5, %v235_v4  ;;  %v332_v63 = vld [vmem:[#allocation3 + $0x770] sm:$0xff]  ;;  %v365_v4 = vld [vmem:[#allocation3 + $0x878] sm:$0xff] }
 0x289   :  { %v381_v5 = vld [vmem:[#allocation3 + $0x8f8] sm:$0xff] }
 0x28a   :  { %5590 = vmatpush1.bf16.msra.mxu0 %v5589_v18  ;;  %v252_v18 = vld [vmem:[#allocation3 + $0x4f0] sm:$0xff]  ;;  %v6007_v12 = vpack.c.bf16 %v381_v5, %v365_v4 }
 0x28b   :  { %5782 = vmatpush1.bf16.msra.mxu1 %v5781_v23  ;;  %5784 = vmatprep.subr.bf16.mxu0 %v5783_v25  ;;  %v267_v23 = vld [vmem:[#allocation3 + $0x568] sm:$0xff] }
 0x28c   :  { %5976 = vmatprep.subr.bf16.mxu1 %v5975_v31  ;;  %v283_v25 = vld [vmem:[#allocation3 + $0x5e8] sm:$0xff]  ;;  %v5993_v31 = vpack.c.bf16 %v252_v18, %v236_v13  ;;  %v380_v13 = vld [vmem:[#allocation3 + $0x8f0] sm:$0xff] }
 0x28d   :  { %2698 = vmatmul.mubr.f32.vlgmr.msra.gmra.mrb[4].mxu0 %v6470_v47  ;;  %v5803_v32 = vpack.c.bf16 %v283_v25, %v267_v23  ;;  %v411_v18 = vld [vmem:[#allocation3 + $0x9e8] sm:$0xff]  ;;  %v397_v23 = vld [vmem:[#allocation3 + $0x978] sm:$0xff]  ;;  %v6009_v29 = vpack.c.bf16 %v380_v13, %v364_v11  ;;  %v508_v11 = vld [vmem:[#allocation3 + $0xcf0] sm:$0xff] }
 0x28e   :  { %2911 = vmatmul.mubr.f32.vlgmr.msra.gmra.mrb[4].mxu1 %v6470_v47  ;;  %5786 = vmatpush1.bf16.msra.mxu0 %v5785_v37  ;;  %v284_v37 = vld [vmem:[#allocation3 + $0x5f0] sm:$0xff]  ;;  %v413_v25 = vld [vmem:[#allocation3 + $0x9f8] sm:$0xff]  ;;  %v539_v13 = vld [vmem:[#allocation3 + $0xde8] sm:$0xff] }
 0x28f   :  { %5978 = vmatpush1.bf16.msra.mxu1 %v5977_v39  ;;  %5788 = vmatprep.subr.bf16.mxu0 %v5787_v40  ;;  %v299_v39 = vld [vmem:[#allocation3 + $0x668] sm:$0xff]  ;;  %v300_v47 = vld [vmem:[#allocation3 + $0x670] sm:$0xff]  ;;  %v6011_v34 = vpack.c.bf16 %v413_v25, %v397_v23 }
 0x290   :  { %5980 = vmatprep.subr.bf16.mxu1 %v5979_v43  ;;  %2981 = vmatprep.mubr.f32.mxu0 %v6668_v19  ;;  %v315_v40 = vld [vmem:[#allocation3 + $0x6e8] sm:$0xff]  ;;  %v5997_v43 = vpack.c.bf16 %v284_v37, %v268_v35  ;;  %v412_v35 = vld [vmem:[#allocation3 + $0x9f0] sm:$0xff] }
 0x291   :  { %3194 = vmatprep.mubr.f32.mxu1 %v6668_v19  ;;  %v5989_v19 = vpack.c.bf16 %v220_v3, %v204_v1  ;;  %v5807_v44 = vpack.c.bf16 %v315_v40, %v299_v39  ;;  %v348_v1 = vld [vmem:[#allocation3 + $0x7f0] sm:$0xff]  ;;  %v379_v3 = vld [vmem:[#allocation3 + $0x8e8] sm:$0xff]  ;;  %v429_v39 = vld [vmem:[#allocation3 + $0xa78] sm:$0xff]  ;;  %v6013_v42 = vpack.c.bf16 %v412_v35, %v396_v33 }
 0x292   :  { %5790 = vmatpush1.bf16.msra.mxu0 %v5789_v50  ;;  %v316_v50 = vld [vmem:[#allocation3 + $0x6f0] sm:$0xff]  ;;  %v6005_v7 = vpack.c.bf16 %v348_v1, %v332_v63  ;;  %v443_v37 = vld [vmem:[#allocation3 + $0xae8] sm:$0xff]  ;;  %v445_v40 = vld [vmem:[#allocation3 + $0xaf8] sm:$0xff] }
 0x293   :  { %5982 = vmatpush1.bf16.msra.mxu1 %v5981_v51  ;;  %5792 = vmatprep.subr.bf16.mxu0 %v5791_v21  ;;  %v331_v51 = vld [vmem:[#allocation3 + $0x768] sm:$0xff]  ;;  %v6001_v60 = vpack.c.bf16 %v316_v50, %v300_v47  ;;  %v6015_v46 = vpack.c.bf16 %v445_v40, %v429_v39  ;;  %v444_v47 = vld [vmem:[#allocation3 + $0xaf0] sm:$0xff] }
 0x294   :  { %5984 = vmatprep.subr.bf16.mxu1 %v5983_v55  ;;  %v347_v21 = vld [vmem:[#allocation3 + $0x7e8] sm:$0xff]  ;;  %v349_v55 = vld [vmem:[#allocation3 + $0x7f8] sm:$0xff]  ;;  %v476_v63 = vld [vmem:[#allocation3 + $0xbf0] sm:$0xff] }
 0x295   :  { %v6003_v0 = vpack.c.bf16 %v349_v55, %v333_v54  ;;  %v475_v50 = vld [vmem:[#allocation3 + $0xbe8] sm:$0xff]  ;;  %v6017_v55 = vpack.c.bf16 %v444_v47, %v428_v45  ;;  %v540_v33 = vld [vmem:[#allocation3 + $0xdf0] sm:$0xff] }
 0x296   :  { %5794 = vmatpush1.bf16.msra.mxu0 %v5793_v61  ;;  %v5811_v61 = vpack.c.bf16 %v347_v21, %v331_v51  ;;  %v461_v51 = vld [vmem:[#allocation3 + $0xb78] sm:$0xff]  ;;  %v507_v1 = vld [vmem:[#allocation3 + $0xce8] sm:$0xff]  ;;  %v572_v45 = vld [vmem:[#allocation3 + $0xef0] sm:$0xff] }
 0x297   :  { %5986 = vmatpush1.bf16.msra.mxu1 %v5985_v62  ;;  %5796 = vmatprep.subr.bf16.mxu0 %v5795_v28  ;;  %v330_v62 = vld [vmem:[#allocation3 + $0x760] sm:$0xff]  ;;  %v477_v21 = vld [vmem:[#allocation3 + $0xbf8] sm:$0xff]  ;;  %v571_v35 = vld [vmem:[#allocation3 + $0xee8] sm:$0xff] }
 0x298   :  { %5988 = vmatprep.subr.bf16.mxu1 %v5987_v2  ;;  %v346_v28 = vld [vmem:[#allocation3 + $0x7e0] sm:$0xff]  ;;  %v363_v2 = vld [vmem:[#allocation3 + $0x868] sm:$0xff] }
 0x299   :  { %v5813_v6 = vpack.c.bf16 %v346_v28, %v330_v62  ;;  %v460_v62 = vld [vmem:[#allocation3 + $0xb70] sm:$0xff]  ;;  %v6019_v28 = vpack.c.bf16 %v477_v21, %v461_v51  ;;  %v603_v47 = vld [vmem:[#allocation3 + $0xfe8] sm:$0xff] }
 0x29a   :  { %5798 = vmatpush1.bf16.msra.mxu0 %v5797_v8  ;;  %v5815_v8 = vpack.c.bf16 %v379_v3, %v363_v2  ;;  %v493_v2 = vld [vmem:[#allocation3 + $0xc78] sm:$0xff]  ;;  %v6021_v5 = vpack.c.bf16 %v476_v63, %v460_v62  ;;  %v604_v62 = vld [vmem:[#allocation3 + $0xff0] sm:$0xff]  ;;  %v635_v63 = vld [vmem:[#allocation3 + $0x10e8] sm:$0xff] }
 0x29b   :  { %5990 = vmatpush1.bf16.msra.mxu1 %v5989_v19  ;;  %5800 = vmatprep.subr.bf16.mxu0 %v5799_v10  ;;  %v362_v19 = vld [vmem:[#allocation3 + $0x860] sm:$0xff]  ;;  %v509_v3 = vld [vmem:[#allocation3 + $0xcf8] sm:$0xff] }
 0x29c   :  { %5992 = vmatprep.subr.bf16.mxu1 %v5991_v17  ;;  %v378_v10 = vld [vmem:[#allocation3 + $0x8e0] sm:$0xff]  ;;  %v395_v17 = vld [vmem:[#allocation3 + $0x968] sm:$0xff] }
 0x29d   :  { %v5817_v27 = vpack.c.bf16 %v378_v10, %v362_v19  ;;  %v492_v19 = vld [vmem:[#allocation3 + $0xc70] sm:$0xff]  ;;  %v6023_v10 = vpack.c.bf16 %v509_v3, %v493_v2 }
 0x29e   :  { %5802 = vmatpush1.bf16.msra.mxu0 %v5801_v30  ;;  %v5819_v30 = vpack.c.bf16 %v411_v18, %v395_v17  ;;  %v525_v17 = vld [vmem:[#allocation3 + $0xd78] sm:$0xff]  ;;  %v6025_v25 = vpack.c.bf16 %v508_v11, %v492_v19  ;;  %v636_v19 = vld [vmem:[#allocation3 + $0x10f0] sm:$0xff]  ;;  %v667_v11 = vld [vmem:[#allocation3 + $0x11e8] sm:$0xff] }
 0x29f   :  { %5994 = vmatpush1.bf16.msra.mxu1 %v5993_v31  ;;  %5804 = vmatprep.subr.bf16.mxu0 %v5803_v32  ;;  %v394_v31 = vld [vmem:[#allocation3 + $0x960] sm:$0xff]  ;;  %v541_v18 = vld [vmem:[#allocation3 + $0xdf8] sm:$0xff] }
 0x2a0   :  { %v6744_v48 = vpop.f32.mrb[2].mxu0  ;;  %5996 = vmatprep.subr.bf16.mxu1 %v5995_v36  ;;  %v410_v32 = vld [vmem:[#allocation3 + $0x9e0] sm:$0xff]  ;;  %v427_v36 = vld [vmem:[#allocation3 + $0xa68] sm:$0xff] }
 0x2a1   :  { %v6746_v52 = vpop.f32.mrb[2].mxu1  ;;  %v6748_v53 = vpop.f32.mrb[3].mxu0  ;;  %v5821_v41 = vpack.c.bf16 %v410_v32, %v394_v31  ;;  %v524_v31 = vld [vmem:[#allocation3 + $0xd70] sm:$0xff]  ;;  %v6027_v32 = vpack.c.bf16 %v541_v18, %v525_v17 }
 0x2a2   :  { %v3361_v56 = vcombine.low %v6744_v48, %v6748_v53  ;;  %v6752_v57 = vpop.f32.mrb[3].mxu1  ;;  %5806 = vmatpush1.bf16.msra.mxu0 %v5805_v16  ;;  %v5823_v16 = vpack.c.bf16 %v443_v37, %v427_v36  ;;  %v557_v36 = vld [vmem:[#allocation3 + $0xe78] sm:$0xff]  ;;  %v6029_v40 = vpack.c.bf16 %v540_v33, %v524_v31  ;;  %v668_v31 = vld [vmem:[#allocation3 + $0x11f0] sm:$0xff]  ;;  %v699_v33 = vld [vmem:[#allocation3 + $0x12e8] sm:$0xff] }
 0x2a3   :  { %v3362_v59 = vcombine.low %v6746_v52, %v6752_v57  ;;  %5998 = vmatpush1.bf16.msra.mxu1 %v5997_v43  ;;  %5808 = vmatprep.subr.bf16.mxu0 %v5807_v44  ;;  %v426_v43 = vld [vmem:[#allocation3 + $0xa60] sm:$0xff]  ;;  %v573_v37 = vld [vmem:[#allocation3 + $0xef8] sm:$0xff]  ;;  %v3593_v53 = vld [vmem:[#allocation7 + $0x318] sm:$0xff] }
 0x2a4   :  { %6000 = vmatprep.subr.bf16.mxu1 %v5999_v49  ;;  %v442_v44 = vld [vmem:[#allocation3 + $0xae0] sm:$0xff]  ;;  %v459_v49 = vld [vmem:[#allocation3 + $0xb68] sm:$0xff] }
 0x2a5   :  { %v5825_v54 = vpack.c.bf16 %v442_v44, %v426_v43  ;;  %v556_v43 = vld [vmem:[#allocation3 + $0xe70] sm:$0xff]  ;;  %v6031_v44 = vpack.c.bf16 %v573_v37, %v557_v36  ;;  %v701_v36 = vld [vmem:[#allocation3 + $0x12f8] sm:$0xff] }
 0x2a6   :  { %5810 = vmatpush1.bf16.msra.mxu0 %v5809_v58  ;;  %v5827_v58 = vpack.c.bf16 %v475_v50, %v459_v49  ;;  %v589_v49 = vld [vmem:[#allocation3 + $0xf78] sm:$0xff]  ;;  %v6033_v21 = vpack.c.bf16 %v572_v45, %v556_v43  ;;  %v715_v45 = vld [vmem:[#allocation3 + $0x1368] sm:$0xff] }
 0x2a7   :  { %6002 = vmatpush1.bf16.msra.mxu1 %v6001_v60  ;;  %5812 = vmatprep.subr.bf16.mxu0 %v5811_v61  ;;  %v458_v60 = vld [vmem:[#allocation3 + $0xb60] sm:$0xff]  ;;  %v605_v50 = vld [vmem:[#allocation3 + $0xff8] sm:$0xff] }
 0x2a8   :  { %6004 = vmatprep.subr.bf16.mxu1 %v6003_v0  ;;  %v474_v61 = vld [vmem:[#allocation3 + $0xbe0] sm:$0xff]  ;;  %v491_v0 = vld [vmem:[#allocation3 + $0xc68] sm:$0xff] }
 0x2a9   :  { %v5829_v4 = vpack.c.bf16 %v474_v61, %v458_v60  ;;  %v588_v60 = vld [vmem:[#allocation3 + $0xf70] sm:$0xff]  ;;  %v6035_v61 = vpack.c.bf16 %v605_v50, %v589_v49  ;;  %v733_v49 = vld [vmem:[#allocation3 + $0x13f8] sm:$0xff] }
 0x2aa   :  { %5814 = vmatpush1.bf16.msra.mxu0 %v5813_v6  ;;  %v5831_v6 = vpack.c.bf16 %v507_v1, %v491_v0  ;;  %v621_v0 = vld [vmem:[#allocation3 + $0x1078] sm:$0xff]  ;;  %v6037_v3 = vpack.c.bf16 %v604_v62, %v588_v60  ;;  %v747_v62 = vld [vmem:[#allocation3 + $0x1468] sm:$0xff] }
 0x2ab   :  { %6006 = vmatpush1.bf16.msra.mxu1 %v6005_v7  ;;  %5816 = vmatprep.subr.bf16.mxu0 %v5815_v8  ;;  %v490_v7 = vld [vmem:[#allocation3 + $0xc60] sm:$0xff]  ;;  %v637_v1 = vld [vmem:[#allocation3 + $0x10f8] sm:$0xff] }
 0x2ac   :  { %6008 = vmatprep.subr.bf16.mxu1 %v6007_v12  ;;  %v506_v8 = vld [vmem:[#allocation3 + $0xce0] sm:$0xff]  ;;  %v523_v12 = vld [vmem:[#allocation3 + $0xd68] sm:$0xff] }
 0x2ad   :  { %v5833_v23 = vpack.c.bf16 %v506_v8, %v490_v7  ;;  %v620_v7 = vld [vmem:[#allocation3 + $0x1070] sm:$0xff]  ;;  %v6039_v8 = vpack.c.bf16 %v637_v1, %v621_v0  ;;  %v765_v0 = vld [vmem:[#allocation3 + $0x14f8] sm:$0xff] }
 0x2ae   :  { %5818 = vmatpush1.bf16.msra.mxu0 %v5817_v27  ;;  %v5835_v27 = vpack.c.bf16 %v539_v13, %v523_v12  ;;  %v653_v12 = vld [vmem:[#allocation3 + $0x1178] sm:$0xff]  ;;  %v6041_v18 = vpack.c.bf16 %v636_v19, %v620_v7  ;;  %v779_v19 = vld [vmem:[#allocation3 + $0x1568] sm:$0xff] }
 0x2af   :  { %6010 = vmatpush1.bf16.msra.mxu1 %v6009_v29  ;;  %5820 = vmatprep.subr.bf16.mxu0 %v5819_v30  ;;  %v522_v29 = vld [vmem:[#allocation3 + $0xd60] sm:$0xff]  ;;  %v669_v13 = vld [vmem:[#allocation3 + $0x11f8] sm:$0xff] }
 0x2b0   :  { %6012 = vmatprep.subr.bf16.mxu1 %v6011_v34  ;;  %v538_v30 = vld [vmem:[#allocation3 + $0xde0] sm:$0xff]  ;;  %v555_v34 = vld [vmem:[#allocation3 + $0xe68] sm:$0xff] }
 0x2b1   :  { %v5837_v39 = vpack.c.bf16 %v538_v30, %v522_v29  ;;  %v652_v29 = vld [vmem:[#allocation3 + $0x1170] sm:$0xff]  ;;  %v6043_v30 = vpack.c.bf16 %v669_v13, %v653_v12  ;;  %v797_v12 = vld [vmem:[#allocation3 + $0x15f8] sm:$0xff] }
 0x2b2   :  { %5822 = vmatpush1.bf16.msra.mxu0 %v5821_v41  ;;  %v5839_v41 = vpack.c.bf16 %v571_v35, %v555_v34  ;;  %v6471_v34 = vld [vmem:[%s6884_s0] sm:$0xff]  ;;  %v685_v35 = vld [vmem:[#allocation3 + $0x1278] sm:$0xff] }
 0x2b3   :  { %6014 = vmatpush1.bf16.msra.mxu1 %v6013_v42  ;;  %5824 = vmatprep.subr.bf16.mxu0 %v5823_v16  ;;  %v554_v42 = vld [vmem:[#allocation3 + $0xe60] sm:$0xff]  ;;  %v6047_v43 = vpack.c.bf16 %v701_v36, %v685_v35  ;;  %v829_v35 = vld [vmem:[#allocation3 + $0x16f8] sm:$0xff] }
 0x2b4   :  { %6016 = vmatprep.subr.bf16.mxu1 %v6015_v46  ;;  %v570_v16 = vld [vmem:[#allocation3 + $0xee0] sm:$0xff]  ;;  %v587_v46 = vld [vmem:[#allocation3 + $0xf68] sm:$0xff] }
 0x2b5   :  { %v5841_v51 = vpack.c.bf16 %v570_v16, %v554_v42  ;;  %v698_v42 = vld [vmem:[#allocation3 + $0x12e0] sm:$0xff]  ;;  %v684_v16 = vld [vmem:[#allocation3 + $0x1270] sm:$0xff] }
 0x2b6   :  { %5826 = vmatpush1.bf16.msra.mxu0 %v5825_v54  ;;  %v5843_v54 = vpack.c.bf16 %v603_v47, %v587_v46  ;;  %v731_v46 = vld [vmem:[#allocation3 + $0x13e8] sm:$0xff]  ;;  %v717_v47 = vld [vmem:[#allocation3 + $0x1378] sm:$0xff] }
 0x2b7   :  { %6018 = vmatpush1.bf16.msra.mxu1 %v6017_v55  ;;  %5828 = vmatprep.subr.bf16.mxu0 %v5827_v58  ;;  %v586_v55 = vld [vmem:[#allocation3 + $0xf60] sm:$0xff]  ;;  %v6051_v60 = vpack.c.bf16 %v733_v49, %v717_v47  ;;  %v828_v47 = vld [vmem:[#allocation3 + $0x16f0] sm:$0xff]  ;;  %v843_v49 = vld [vmem:[#allocation3 + $0x1768] sm:$0xff] }
 0x2b8   :  { %6020 = vmatprep.subr.bf16.mxu1 %v6019_v28  ;;  %v602_v58 = vld [vmem:[#allocation3 + $0xfe0] sm:$0xff]  ;;  %v619_v28 = vld [vmem:[#allocation3 + $0x1068] sm:$0xff] }
 0x2b9   :  { %v5845_v2 = vpack.c.bf16 %v602_v58, %v586_v55  ;;  %v730_v55 = vld [vmem:[#allocation3 + $0x13e0] sm:$0xff]  ;;  %v716_v58 = vld [vmem:[#allocation3 + $0x1370] sm:$0xff] }
 0x2ba   :  { %5830 = vmatpush1.bf16.msra.mxu0 %v5829_v4  ;;  %v5847_v4 = vpack.c.bf16 %v635_v63, %v619_v28  ;;  %v763_v28 = vld [vmem:[#allocation3 + $0x14e8] sm:$0xff]  ;;  %v749_v63 = vld [vmem:[#allocation3 + $0x1478] sm:$0xff] }
 0x2bb   :  { %6022 = vmatpush1.bf16.msra.mxu1 %v6021_v5  ;;  %5832 = vmatprep.subr.bf16.mxu0 %v5831_v6  ;;  %v618_v5 = vld [vmem:[#allocation3 + $0x1060] sm:$0xff]  ;;  %v6055_v7 = vpack.c.bf16 %v765_v0, %v749_v63 }
 0x2bc   :  { %6024 = vmatprep.subr.bf16.mxu1 %v6023_v10  ;;  %v634_v6 = vld [vmem:[#allocation3 + $0x10e0] sm:$0xff]  ;;  %v651_v10 = vld [vmem:[#allocation3 + $0x1168] sm:$0xff] }
 0x2bd   :  { %v5849_v17 = vpack.c.bf16 %v634_v6, %v618_v5  ;;  %v762_v5 = vld [vmem:[#allocation3 + $0x14e0] sm:$0xff]  ;;  %v748_v6 = vld [vmem:[#allocation3 + $0x1470] sm:$0xff] }
 0x2be   :  { %5834 = vmatpush1.bf16.msra.mxu0 %v5833_v23  ;;  %v5851_v23 = vpack.c.bf16 %v667_v11, %v651_v10  ;;  %v795_v10 = vld [vmem:[#allocation3 + $0x15e8] sm:$0xff]  ;;  %v781_v11 = vld [vmem:[#allocation3 + $0x1578] sm:$0xff]  ;;  %v842_v0 = vld [vmem:[#allocation3 + $0x1760] sm:$0xff] }
 0x2bf   :  { %6026 = vmatpush1.bf16.msra.mxu1 %v6025_v25  ;;  %5836 = vmatprep.subr.bf16.mxu0 %v5835_v27  ;;  %v650_v25 = vld [vmem:[#allocation3 + $0x1160] sm:$0xff] }
 0x2c0   :  { %6028 = vmatprep.subr.bf16.mxu1 %v6027_v32  ;;  %v666_v27 = vld [vmem:[#allocation3 + $0x11e0] sm:$0xff]  ;;  %v683_v32 = vld [vmem:[#allocation3 + $0x1268] sm:$0xff] }
 0x2c1   :  { %v5853_v37 = vpack.c.bf16 %v666_v27, %v650_v25  ;;  %v778_v25 = vld [vmem:[#allocation3 + $0x1560] sm:$0xff] }
 0x2c2   :  { %5838 = vmatpush1.bf16.msra.mxu0 %v5837_v39  ;;  %v6045_v39 = vpack.c.bf16 %v668_v31, %v652_v29  ;;  %v794_v27 = vld [vmem:[#allocation3 + $0x15e0] sm:$0xff]  ;;  %v780_v29 = vld [vmem:[#allocation3 + $0x1570] sm:$0xff] }
 0x2c3   :  { %6030 = vmatpush1.bf16.msra.mxu1 %v6029_v40  ;;  %5840 = vmatprep.subr.bf16.mxu0 %v5839_v41  ;;  %v5855_v40 = vpack.c.bf16 %v699_v33, %v683_v32  ;;  %v682_v41 = vld [vmem:[#allocation3 + $0x1260] sm:$0xff]  ;;  %v796_v31 = vld [vmem:[#allocation3 + $0x15f0] sm:$0xff]  ;;  %v811_v32 = vld [vmem:[#allocation3 + $0x1668] sm:$0xff]  ;;  %v5869_v36 = vpack.c.bf16 %v794_v27, %v778_v25 }
 0x2c4   :  { %6032 = vmatprep.subr.bf16.mxu1 %v6031_v44  ;;  %v700_v44 = vld [vmem:[#allocation3 + $0x12f0] sm:$0xff]  ;;  %v5857_v50 = vpack.c.bf16 %v698_v42, %v682_v41  ;;  %v827_v33 = vld [vmem:[#allocation3 + $0x16e8] sm:$0xff]  ;;  %v6061_v41 = vpack.c.bf16 %v796_v31, %v780_v29  ;;  %v909_v31 = vld [vmem:[#allocation3 + $0x1978] sm:$0xff] }
 0x2c5   :  { %v5871_v42 = vpack.c.bf16 %v827_v33, %v811_v32  ;;  %v892_v27 = vld [vmem:[#allocation3 + $0x18f0] sm:$0xff]  ;;  %v907_v29 = vld [vmem:[#allocation3 + $0x1968] sm:$0xff]  ;;  %v925_v32 = vld [vmem:[#allocation3 + $0x19f8] sm:$0xff] }
 0x2c6   :  { %5842 = vmatpush1.bf16.msra.mxu0 %v5841_v51  ;;  %v6049_v51 = vpack.c.bf16 %v700_v44, %v684_v16  ;;  %v812_v16 = vld [vmem:[#allocation3 + $0x1670] sm:$0xff] }
 0x2c7   :  { %6034 = vmatpush1.bf16.msra.mxu1 %v6033_v21  ;;  %5844 = vmatprep.subr.bf16.mxu0 %v5843_v54  ;;  %v5859_v21 = vpack.c.bf16 %v731_v46, %v715_v45  ;;  %v714_v54 = vld [vmem:[#allocation3 + $0x1360] sm:$0xff] }
 0x2c8   :  { %6036 = vmatprep.subr.bf16.mxu1 %v6035_v61  ;;  %v732_v61 = vld [vmem:[#allocation3 + $0x13f0] sm:$0xff]  ;;  %v5861_v1 = vpack.c.bf16 %v730_v55, %v714_v54  ;;  %v861_v54 = vld [vmem:[#allocation3 + $0x17f8] sm:$0xff]  ;;  %v3403_v55 = vld [vmem:[#allocation5 + $0x8] sm:$0xff] }
 0x2ca   :  { %5846 = vmatpush1.bf16.msra.mxu0 %v5845_v2  ;;  %v3406_v2 = vlaneseq }
 0x2cb   :  { %6038 = vmatpush1.bf16.msra.mxu1 %v6037_v3  ;;  %5848 = vmatprep.subr.bf16.mxu0 %v5847_v4  ;;  %v5863_v3 = vpack.c.bf16 %v763_v28, %v747_v62  ;;  %v746_v4 = vld [vmem:[#allocation3 + $0x1460] sm:$0xff]  ;;  %v6065_v28 = vpack.c.bf16 %v828_v47, %v812_v16  ;;  %v939_v16 = vld [vmem:[#allocation3 + $0x1a68] sm:$0xff]  ;;  %v941_v47 = vld [vmem:[#allocation3 + $0x1a78] sm:$0xff] }
 0x2cc   :  { %6040 = vmatprep.subr.bf16.mxu1 %v6039_v8  ;;  %v764_v8 = vld [vmem:[#allocation3 + $0x14f0] sm:$0xff]  ;;  %v5865_v13 = vpack.c.bf16 %v762_v5, %v746_v4  ;;  %v875_v4 = vld [vmem:[#allocation3 + $0x1868] sm:$0xff] }
 0x2cd   :  { %2982 = vmatmul.mubr.f32.vlgmr.msra.gmra.mrb[6].mxu0 %v6471_v34  ;;  %v891_v5 = vld [vmem:[#allocation3 + $0x18e8] sm:$0xff] }
 0x2ce   :  { %5850 = vmatpush1.bf16.msra.mxu0 %v5849_v17  ;;  %3195 = vmatmul.mubr.f32.vlgmr.msra.gmra.mrb[6].mxu1 %v6471_v34  ;;  %v6761_v17 = vshrl.u32 %v3406_v2, 7  ;;  %v813_v34 = vld [vmem:[#allocation3 + $0x1678] sm:$0xff]  ;;  %v844_v2 = vld [vmem:[#allocation3 + $0x1770] sm:$0xff] }
 0x2cf   :  { %6042 = vmatpush1.bf16.msra.mxu1 %v6041_v18  ;;  %5852 = vmatprep.subr.bf16.mxu0 %v5851_v23  ;;  %v6057_v18 = vpack.c.bf16 %v764_v8, %v748_v6  ;;  %v5867_v23 = vpack.c.bf16 %v795_v10, %v779_v19  ;;  %v6063_v46 = vpack.c.bf16 %v829_v35, %v813_v34  ;;  %v877_v8 = vld [vmem:[#allocation3 + $0x1878] sm:$0xff] }
 0x2d0   :  { %6044 = vmatprep.subr.bf16.mxu1 %v6043_v30  ;;  %3052 = vmatprep.mubr.f32.mxu0 %v6681_v26  ;;  %v6059_v30 = vpack.c.bf16 %v797_v12, %v781_v11  ;;  %v3416_v44 = vsub.s32 2, %v6761_v17  ;;  %v3420_v45 = vsub.s32 3, %v6761_v17  ;;  %v893_v19 = vld [vmem:[#allocation3 + $0x18f8] sm:$0xff]  ;;  %v5879_v12 = vpack.c.bf16 %v891_v5, %v875_v4 }
 0x2d1   :  { %3265 = vmatprep.mubr.f32.mxu1 %v6681_v26  ;;  %v6053_v26 = vpack.c.bf16 %v732_v61, %v716_v58  ;;  %v6071_v25 = vpack.c.bf16 %v893_v19, %v877_v8  ;;  %v970_v19 = vld [vmem:[#allocation3 + $0x1b60] sm:$0xff] }
 0x2d2   :  { %5854 = vmatpush1.bf16.msra.mxu0 %v5853_v37  ;;  %v810_v37 = vld [vmem:[#allocation3 + $0x1660] sm:$0xff]  ;;  %v6777_v61 = vrot.slane %v3403_v55, %v3416_v44  ;;  %v6781_v62 = vrot.slane %v3403_v55, %v3420_v45 }
 0x2d3   :  { %6046 = vmatpush1.bf16.msra.mxu1 %v6045_v39  ;;  %5856 = vmatprep.subr.bf16.mxu0 %v5855_v40  ;;  %v826_v39 = vld [vmem:[#allocation3 + $0x16e0] sm:$0xff]  ;;  %v3408_v40 = vsub.s32 0, %v6761_v17 }
 0x2d4   :  { %6048 = vmatprep.subr.bf16.mxu1 %v6047_v43  ;;  %v3412_v43 = vsub.s32 1, %v6761_v17 }
 0x2d5   :  { %v6769_v58 = vrot.slane %v3403_v55, %v3408_v40 }
 0x2d6   :  { %5858 = vmatpush1.bf16.msra.mxu0 %v5857_v50  ;;  %v859_v50 = vld [vmem:[#allocation3 + $0x17e8] sm:$0xff] }
 0x2d7   :  { %6050 = vmatpush1.bf16.msra.mxu1 %v6049_v51  ;;  %5860 = vmatprep.subr.bf16.mxu0 %v5859_v21  ;;  %v5873_v51 = vpack.c.bf16 %v826_v39, %v810_v37  ;;  %v845_v21 = vld [vmem:[#allocation3 + $0x1778] sm:$0xff]  ;;  %v5875_v63 = vpack.c.bf16 %v859_v50, %v843_v49  ;;  %v922_v37 = vld [vmem:[#allocation3 + $0x19e0] sm:$0xff]  ;;  %v908_v39 = vld [vmem:[#allocation3 + $0x1970] sm:$0xff] }
 0x2d8   :  { %6052 = vmatprep.subr.bf16.mxu1 %v6051_v60  ;;  %v6773_v60 = vrot.slane %v3403_v55, %v3412_v43  ;;  %v957_v49 = vld [vmem:[#allocation3 + $0x1af8] sm:$0xff]  ;;  %v954_v55 = vld [vmem:[#allocation3 + $0x1ae0] sm:$0xff] }
 0x2da   :  { %5862 = vmatpush1.bf16.msra.mxu0 %v5861_v1  ;;  %v858_v1 = vld [vmem:[#allocation3 + $0x17e0] sm:$0xff]  ;;  %v3474_v6 = vcombine.low %v6769_v58, %v6773_v60 }
 0x2db   :  { %6054 = vmatpush1.bf16.msra.mxu1 %v6053_v26  ;;  %5864 = vmatprep.subr.bf16.mxu0 %v5863_v3  ;;  %v6067_v26 = vpack.c.bf16 %v861_v54, %v845_v21  ;;  %v860_v3 = vld [vmem:[#allocation3 + $0x17f0] sm:$0xff]  ;;  %v5877_v10 = vpack.c.bf16 %v858_v1, %v842_v0  ;;  %v938_v54 = vld [vmem:[#allocation3 + $0x1a60] sm:$0xff]  ;;  %v971_v1 = vld [vmem:[#allocation3 + $0x1b68] sm:$0xff] }
 0x2dc   :  { %6056 = vmatprep.subr.bf16.mxu1 %v6055_v7  ;;  %v3475_v7 = vcombine.low %v6777_v61, %v6781_v62  ;;  %v6069_v11 = vpack.c.bf16 %v860_v3, %v844_v2  ;;  %v956_v0 = vld [vmem:[#allocation3 + $0x1af0] sm:$0xff]  ;;  %v987_v2 = vld [vmem:[#allocation3 + $0x1be8] sm:$0xff]  ;;  %v989_v3 = vld [vmem:[#allocation3 + $0x1bf8] sm:$0xff]  ;;  %v5889_v4 = vpack.c.bf16 %v954_v55, %v938_v54 }
 0x2dd   :  { %v5891_v8 = vpack.c.bf16 %v987_v2, %v971_v1  ;;  %v1052_v54 = vld [vmem:[#allocation3 + $0x1df0] sm:$0xff]  ;;  %v1067_v55 = vld [vmem:[#allocation3 + $0x1e68] sm:$0xff]  ;;  %v3576_v62 = vld [vmem:[#allocation7 + $0x290] sm:$0xff] }
 0x2de   :  { %5866 = vmatpush1.bf16.msra.mxu0 %v5865_v13  ;;  %v874_v13 = vld [vmem:[#allocation3 + $0x1860] sm:$0xff] }
 0x2df   :  { %6058 = vmatpush1.bf16.msra.mxu1 %v6057_v18  ;;  %5868 = vmatprep.subr.bf16.mxu0 %v5867_v23  ;;  %v890_v18 = vld [vmem:[#allocation3 + $0x18e0] sm:$0xff]  ;;  %v876_v23 = vld [vmem:[#allocation3 + $0x1870] sm:$0xff] }
 0x2e0   :  { %6060 = vmatprep.subr.bf16.mxu1 %v6059_v30  ;;  %v923_v30 = vld [vmem:[#allocation3 + $0x19e8] sm:$0xff]  ;;  %v5881_v33 = vpack.c.bf16 %v890_v18, %v874_v13  ;;  %v6073_v34 = vpack.c.bf16 %v892_v27, %v876_v23  ;;  %v988_v13 = vld [vmem:[#allocation3 + $0x1bf0] sm:$0xff]  ;;  %v1021_v27 = vld [vmem:[#allocation3 + $0x1cf8] sm:$0xff] }
 0x2e1   :  { %v5883_v35 = vpack.c.bf16 %v923_v30, %v907_v29  ;;  %v1003_v18 = vld [vmem:[#allocation3 + $0x1c68] sm:$0xff] }
 0x2e2   :  { %5870 = vmatpush1.bf16.msra.mxu0 %v5869_v36  ;;  %v906_v36 = vld [vmem:[#allocation3 + $0x1960] sm:$0xff]  ;;  %v1019_v23 = vld [vmem:[#allocation3 + $0x1ce8] sm:$0xff] }
 0x2e3   :  { %6062 = vmatpush1.bf16.msra.mxu1 %v6061_v41  ;;  %5872 = vmatprep.subr.bf16.mxu0 %v5871_v42  ;;  %v6075_v41 = vpack.c.bf16 %v925_v32, %v909_v31  ;;  %v924_v42 = vld [vmem:[#allocation3 + $0x19f0] sm:$0xff]  ;;  %v5885_v50 = vpack.c.bf16 %v922_v37, %v906_v36  ;;  %v5895_v31 = vpack.c.bf16 %v1019_v23, %v1003_v18  ;;  %v1002_v32 = vld [vmem:[#allocation3 + $0x1c60] sm:$0xff]  ;;  %v1035_v37 = vld [vmem:[#allocation3 + $0x1d68] sm:$0xff] }
 0x2e4   :  { %6064 = vmatprep.subr.bf16.mxu1 %v6063_v46  ;;  %v955_v46 = vld [vmem:[#allocation3 + $0x1ae8] sm:$0xff]  ;;  %v1020_v36 = vld [vmem:[#allocation3 + $0x1cf0] sm:$0xff] }
 0x2e5   :  { %v5887_v21 = vpack.c.bf16 %v955_v46, %v939_v16 }
 0x2e6   :  { %5874 = vmatpush1.bf16.msra.mxu0 %v5873_v51  ;;  %v6077_v51 = vpack.c.bf16 %v924_v42, %v908_v39  ;;  %v1051_v39 = vld [vmem:[#allocation3 + $0x1de8] sm:$0xff]  ;;  %v1053_v42 = vld [vmem:[#allocation3 + $0x1df8] sm:$0xff] }
 0x2e7   :  { %6066 = vmatpush1.bf16.msra.mxu1 %v6065_v28  ;;  %5876 = vmatprep.subr.bf16.mxu0 %v5875_v63  ;;  %v940_v28 = vld [vmem:[#allocation3 + $0x1a70] sm:$0xff]  ;;  %v6079_v63 = vpack.c.bf16 %v957_v49, %v941_v47  ;;  %v5899_v47 = vpack.c.bf16 %v1051_v39, %v1035_v37  ;;  %v1034_v49 = vld [vmem:[#allocation3 + $0x1d60] sm:$0xff] }
 0x2e8   :  { %6068 = vmatprep.subr.bf16.mxu1 %v6067_v26  ;;  %v973_v26 = vld [vmem:[#allocation3 + $0x1b78] sm:$0xff]  ;;  %v6081_v5 = vpack.c.bf16 %v956_v0, %v940_v28  ;;  %v1083_v28 = vld [vmem:[#allocation3 + $0x1ee8] sm:$0xff] }
 0x2e9   :  { %v1085_v0 = vld [vmem:[#allocation3 + $0x1ef8] sm:$0xff] }
 0x2ea   :  { %5878 = vmatpush1.bf16.msra.mxu0 %v5877_v10  ;;  %v986_v10 = vld [vmem:[#allocation3 + $0x1be0] sm:$0xff] }
 0x2eb   :  { %6070 = vmatpush1.bf16.msra.mxu1 %v6069_v11  ;;  %5880 = vmatprep.subr.bf16.mxu0 %v5879_v12  ;;  %v972_v11 = vld [vmem:[#allocation3 + $0x1b70] sm:$0xff]  ;;  %v6083_v12 = vpack.c.bf16 %v989_v3, %v973_v26  ;;  %v5893_v29 = vpack.c.bf16 %v986_v10, %v970_v19  ;;  %v5903_v26 = vpack.c.bf16 %v1083_v28, %v1067_v55  ;;  %v1066_v3 = vld [vmem:[#allocation3 + $0x1e60] sm:$0xff]  ;;  %v1099_v10 = vld [vmem:[#allocation3 + $0x1f68] sm:$0xff] }
 0x2ec   :  { %6072 = vmatprep.subr.bf16.mxu1 %v6071_v25  ;;  %v1005_v25 = vld [vmem:[#allocation3 + $0x1c78] sm:$0xff]  ;;  %v6085_v30 = vpack.c.bf16 %v988_v13, %v972_v11  ;;  %v1084_v19 = vld [vmem:[#allocation3 + $0x1ef0] sm:$0xff]  ;;  %v1115_v11 = vld [vmem:[#allocation3 + $0x1fe8] sm:$0xff] }
 0x2ed   :  { %v1117_v13 = vld [vmem:[#allocation3 + $0x1ff8] sm:$0xff] }
 0x2ee   :  { %5882 = vmatpush1.bf16.msra.mxu0 %v5881_v33  ;;  %v1018_v33 = vld [vmem:[#allocation3 + $0x1ce0] sm:$0xff] }
 0x2ef   :  { %6074 = vmatpush1.bf16.msra.mxu1 %v6073_v34  ;;  %5884 = vmatprep.subr.bf16.mxu0 %v5883_v35  ;;  %v1004_v34 = vld [vmem:[#allocation3 + $0x1c70] sm:$0xff]  ;;  %v6087_v35 = vpack.c.bf16 %v1021_v27, %v1005_v25  ;;  %v5897_v16 = vpack.c.bf16 %v1018_v33, %v1002_v32  ;;  %v5907_v25 = vpack.c.bf16 %v1115_v11, %v1099_v10  ;;  %v1098_v27 = vld [vmem:[#allocation3 + $0x1f60] sm:$0xff]  ;;  %v1131_v33 = vld [vmem:[#allocation3 + $0x2068] sm:$0xff] }
 0x2f0   :  { %6076 = vmatprep.subr.bf16.mxu1 %v6075_v41  ;;  %v1037_v41 = vld [vmem:[#allocation3 + $0x1d78] sm:$0xff]  ;;  %v6089_v46 = vpack.c.bf16 %v1020_v36, %v1004_v34  ;;  %v1116_v32 = vld [vmem:[#allocation3 + $0x1ff0] sm:$0xff]  ;;  %v1147_v34 = vld [vmem:[#allocation3 + $0x20e8] sm:$0xff] }
 0x2f1   :  { %v1149_v36 = vld [vmem:[#allocation3 + $0x20f8] sm:$0xff] }
 0x2f2   :  { %5886 = vmatpush1.bf16.msra.mxu0 %v5885_v50  ;;  %v1050_v50 = vld [vmem:[#allocation3 + $0x1de0] sm:$0xff]  ;;  %v1213_v10 = vld [vmem:[#allocation3 + $0x22f8] sm:$0xff] }
 0x2f3   :  { %6078 = vmatpush1.bf16.msra.mxu1 %v6077_v51  ;;  %5888 = vmatprep.subr.bf16.mxu0 %v5887_v21  ;;  %v1036_v51 = vld [vmem:[#allocation3 + $0x1d70] sm:$0xff]  ;;  %v6091_v21 = vpack.c.bf16 %v1053_v42, %v1037_v41  ;;  %v5901_v1 = vpack.c.bf16 %v1050_v50, %v1034_v49  ;;  %v5911_v41 = vpack.c.bf16 %v1147_v34, %v1131_v33  ;;  %v1130_v42 = vld [vmem:[#allocation3 + $0x2060] sm:$0xff]  ;;  %v1163_v50 = vld [vmem:[#allocation3 + $0x2168] sm:$0xff] }
 0x2f4   :  { %6080 = vmatprep.subr.bf16.mxu1 %v6079_v63  ;;  %v1069_v63 = vld [vmem:[#allocation3 + $0x1e78] sm:$0xff]  ;;  %v6093_v2 = vpack.c.bf16 %v1052_v54, %v1036_v51  ;;  %v1148_v49 = vld [vmem:[#allocation3 + $0x20f0] sm:$0xff]  ;;  %v1179_v51 = vld [vmem:[#allocation3 + $0x21e8] sm:$0xff] }
 0x2f5   :  { %v1181_v54 = vld [vmem:[#allocation3 + $0x21f8] sm:$0xff] }
 0x2f6   :  { %5890 = vmatpush1.bf16.msra.mxu0 %v5889_v4  ;;  %v1082_v4 = vld [vmem:[#allocation3 + $0x1ee0] sm:$0xff]  ;;  %v1245_v33 = vld [vmem:[#allocation3 + $0x23f8] sm:$0xff] }
 0x2f7   :  { %6082 = vmatpush1.bf16.msra.mxu1 %v6081_v5  ;;  %5892 = vmatprep.subr.bf16.mxu0 %v5891_v8  ;;  %v1068_v5 = vld [vmem:[#allocation3 + $0x1e70] sm:$0xff]  ;;  %v6095_v8 = vpack.c.bf16 %v1085_v0, %v1069_v63  ;;  %v5905_v18 = vpack.c.bf16 %v1082_v4, %v1066_v3  ;;  %v5915_v63 = vpack.c.bf16 %v1179_v51, %v1163_v50  ;;  %v1162_v0 = vld [vmem:[#allocation3 + $0x2160] sm:$0xff]  ;;  %v1195_v4 = vld [vmem:[#allocation3 + $0x2268] sm:$0xff] }
 0x2f8   :  { %6084 = vmatprep.subr.bf16.mxu1 %v6083_v12  ;;  %v1101_v12 = vld [vmem:[#allocation3 + $0x1f78] sm:$0xff]  ;;  %v6097_v23 = vpack.c.bf16 %v1084_v19, %v1068_v5  ;;  %v1180_v3 = vld [vmem:[#allocation3 + $0x21f0] sm:$0xff]  ;;  %v1211_v5 = vld [vmem:[#allocation3 + $0x22e8] sm:$0xff] }
 0x2f9   :  { %v1197_v19 = vld [vmem:[#allocation3 + $0x2278] sm:$0xff] }
 0x2fa   :  { %5894 = vmatpush1.bf16.msra.mxu0 %v5893_v29  ;;  %v1114_v29 = vld [vmem:[#allocation3 + $0x1fe0] sm:$0xff]  ;;  %v1277_v50 = vld [vmem:[#allocation3 + $0x24f8] sm:$0xff] }
 0x2fb   :  { %6086 = vmatpush1.bf16.msra.mxu1 %v6085_v30  ;;  %5896 = vmatprep.subr.bf16.mxu0 %v5895_v31  ;;  %v1100_v30 = vld [vmem:[#allocation3 + $0x1f70] sm:$0xff]  ;;  %v6099_v31 = vpack.c.bf16 %v1117_v13, %v1101_v12  ;;  %v5909_v37 = vpack.c.bf16 %v1114_v29, %v1098_v27  ;;  %v5919_v13 = vpack.c.bf16 %v1211_v5, %v1195_v4 }
 0x2fc   :  { %6088 = vmatprep.subr.bf16.mxu1 %v6087_v35  ;;  %v1133_v35 = vld [vmem:[#allocation3 + $0x2078] sm:$0xff]  ;;  %v6101_v39 = vpack.c.bf16 %v1116_v32, %v1100_v30  ;;  %v6111_v27 = vpack.c.bf16 %v1213_v10, %v1197_v19  ;;  %v1212_v29 = vld [vmem:[#allocation3 + $0x22f0] sm:$0xff]  ;;  %v1227_v30 = vld [vmem:[#allocation3 + $0x2368] sm:$0xff] }
 0x2fd   :  { %v1229_v32 = vld [vmem:[#allocation3 + $0x2378] sm:$0xff]  ;;  %v1290_v19 = vld [vmem:[#allocation3 + $0x2560] sm:$0xff] }
 0x2fe   :  { %5898 = vmatpush1.bf16.msra.mxu0 %v5897_v16  ;;  %v1146_v16 = vld [vmem:[#allocation3 + $0x20e0] sm:$0xff] }
 0x2ff   :  { %6090 = vmatpush1.bf16.msra.mxu1 %v6089_v46  ;;  %5900 = vmatprep.subr.bf16.mxu0 %v5899_v47  ;;  %v1132_v46 = vld [vmem:[#allocation3 + $0x2070] sm:$0xff]  ;;  %v6103_v47 = vpack.c.bf16 %v1149_v36, %v1133_v35  ;;  %v5913_v55 = vpack.c.bf16 %v1146_v16, %v1130_v42  ;;  %v6115_v42 = vpack.c.bf16 %v1245_v33, %v1229_v32  ;;  %v1306_v10 = vld [vmem:[#allocation3 + $0x25e0] sm:$0xff] }
 0x300   :  { %6092 = vmatprep.subr.bf16.mxu1 %v6091_v21  ;;  %v1165_v21 = vld [vmem:[#allocation3 + $0x2178] sm:$0xff]  ;;  %v6105_v28 = vpack.c.bf16 %v1148_v49, %v1132_v46  ;;  %v1244_v16 = vld [vmem:[#allocation3 + $0x23f0] sm:$0xff]  ;;  %v1259_v46 = vld [vmem:[#allocation3 + $0x2468] sm:$0xff] }
 0x301   :  { %v1261_v49 = vld [vmem:[#allocation3 + $0x2478] sm:$0xff]  ;;  %v1322_v32 = vld [vmem:[#allocation3 + $0x2660] sm:$0xff] }
 0x302   :  { %5902 = vmatpush1.bf16.msra.mxu0 %v5901_v1  ;;  %v1178_v1 = vld [vmem:[#allocation3 + $0x21e0] sm:$0xff] }
 0x303   :  { %6094 = vmatpush1.bf16.msra.mxu1 %v6093_v2  ;;  %5904 = vmatprep.subr.bf16.mxu0 %v5903_v26  ;;  %v1164_v2 = vld [vmem:[#allocation3 + $0x2170] sm:$0xff]  ;;  %v6107_v26 = vpack.c.bf16 %v1181_v54, %v1165_v21  ;;  %v5917_v11 = vpack.c.bf16 %v1178_v1, %v1162_v0  ;;  %v1258_v54 = vld [vmem:[#allocation3 + $0x2460] sm:$0xff]  ;;  %v1291_v1 = vld [vmem:[#allocation3 + $0x2568] sm:$0xff] }
 0x304   :  { %6096 = vmatprep.subr.bf16.mxu1 %v6095_v8  ;;  %v6472_v8 = vld [vmem:[%s6884_s0 + $0x8] sm:$0xff]  ;;  %v6109_v12 = vpack.c.bf16 %v1180_v3, %v1164_v2  ;;  %v1276_v0 = vld [vmem:[#allocation3 + $0x24f0] sm:$0xff]  ;;  %v1309_v3 = vld [vmem:[#allocation3 + $0x25f8] sm:$0xff] }
 0x305   :  { %v1307_v2 = vld [vmem:[#allocation3 + $0x25e8] sm:$0xff]  ;;  %v1338_v33 = vld [vmem:[#allocation3 + $0x26e0] sm:$0xff] }
 0x306   :  { %5906 = vmatpush1.bf16.msra.mxu0 %v5905_v18  ;;  %v1194_v18 = vld [vmem:[#allocation3 + $0x2260] sm:$0xff] }
 0x307   :  { %6098 = vmatpush1.bf16.msra.mxu1 %v6097_v23  ;;  %5908 = vmatprep.subr.bf16.mxu0 %v5907_v25  ;;  %v1210_v23 = vld [vmem:[#allocation3 + $0x22e0] sm:$0xff]  ;;  %v1196_v25 = vld [vmem:[#allocation3 + $0x2270] sm:$0xff] }
 0x308   :  { %6100 = vmatprep.subr.bf16.mxu1 %v6099_v31  ;;  %v1243_v31 = vld [vmem:[#allocation3 + $0x23e8] sm:$0xff]  ;;  %v5921_v34 = vpack.c.bf16 %v1210_v23, %v1194_v18  ;;  %v6113_v35 = vpack.c.bf16 %v1212_v29, %v1196_v25  ;;  %v1325_v25 = vld [vmem:[#allocation3 + $0x2678] sm:$0xff]  ;;  %v5933_v29 = vpack.c.bf16 %v1306_v10, %v1290_v19 }
 0x309   :  { %v5923_v36 = vpack.c.bf16 %v1243_v31, %v1227_v30  ;;  %v1323_v18 = vld [vmem:[#allocation3 + $0x2668] sm:$0xff] }
 0x30a   :  { %5910 = vmatpush1.bf16.msra.mxu0 %v5909_v37  ;;  %v1226_v37 = vld [vmem:[#allocation3 + $0x2360] sm:$0xff]  ;;  %v1339_v23 = vld [vmem:[#allocation3 + $0x26e8] sm:$0xff] }
 0x30b   :  { %6102 = vmatpush1.bf16.msra.mxu1 %v6101_v39  ;;  %5912 = vmatprep.subr.bf16.mxu0 %v5911_v41  ;;  %v1242_v39 = vld [vmem:[#allocation3 + $0x23e0] sm:$0xff]  ;;  %v1228_v41 = vld [vmem:[#allocation3 + $0x2370] sm:$0xff]  ;;  %v5935_v31 = vpack.c.bf16 %v1339_v23, %v1323_v18  ;;  %v1419_v19 = vld [vmem:[#allocation3 + $0x2968] sm:$0xff] }
 0x30c   :  { %6104 = vmatprep.subr.bf16.mxu1 %v6103_v47  ;;  %v1275_v47 = vld [vmem:[#allocation3 + $0x24e8] sm:$0xff]  ;;  %v5925_v51 = vpack.c.bf16 %v1242_v39, %v1226_v37 }
 0x30d   :  { %3053 = vmatmul.mubr.f32.vlgmr.msra.gmra.mrb[6].mxu0 %v6472_v8  ;;  %v5927_v21 = vpack.c.bf16 %v1275_v47, %v1259_v46  ;;  %v1355_v37 = vld [vmem:[#allocation3 + $0x2768] sm:$0xff] }
 0x30e   :  { %5914 = vmatpush1.bf16.msra.mxu0 %v5913_v55  ;;  %3266 = vmatmul.mubr.f32.vlgmr.msra.gmra.mrb[6].mxu1 %v6472_v8  ;;  %v1274_v55 = vld [vmem:[#allocation3 + $0x24e0] sm:$0xff]  ;;  %v5931_v8 = vpack.c.bf16 %v1307_v2, %v1291_v1  ;;  %v1371_v39 = vld [vmem:[#allocation3 + $0x27e8] sm:$0xff] }
 0x30f   :  { %6106 = vmatpush1.bf16.msra.mxu1 %v6105_v28  ;;  %5916 = vmatprep.subr.bf16.mxu0 %v5915_v63  ;;  %v1260_v28 = vld [vmem:[#allocation3 + $0x2470] sm:$0xff]  ;;  %v6119_v63 = vpack.c.bf16 %v1277_v50, %v1261_v49  ;;  %v5929_v4 = vpack.c.bf16 %v1274_v55, %v1258_v54  ;;  %v5939_v47 = vpack.c.bf16 %v1371_v39, %v1355_v37  ;;  %v1354_v49 = vld [vmem:[#allocation3 + $0x2760] sm:$0xff]  ;;  %v1387_v54 = vld [vmem:[#allocation3 + $0x2868] sm:$0xff] }
 0x310   :  { %6108 = vmatprep.subr.bf16.mxu1 %v6107_v26  ;;  %3123 = vmatprep.mubr.f32.mxu0 %v6692_v38  ;;  %v1293_v26 = vld [vmem:[#allocation3 + $0x2578] sm:$0xff]  ;;  %v6121_v5 = vpack.c.bf16 %v1276_v0, %v1260_v28  ;;  %v1370_v50 = vld [vmem:[#allocation3 + $0x27e0] sm:$0xff]  ;;  %v1403_v55 = vld [vmem:[#allocation3 + $0x28e8] sm:$0xff] }
 0x311   :  { %3336 = vmatprep.mubr.f32.mxu1 %v6692_v38  ;;  %v6117_v38 = vpack.c.bf16 %v1244_v16, %v1228_v41  ;;  %v1357_v41 = vld [vmem:[#allocation3 + $0x2778] sm:$0xff]  ;;  %v5937_v16 = vpack.c.bf16 %v1338_v33, %v1322_v32  ;;  %v5941_v0 = vpack.c.bf16 %v1370_v50, %v1354_v49  ;;  %v5943_v2 = vpack.c.bf16 %v1403_v55, %v1387_v54  ;;  %v1435_v10 = vld [vmem:[#allocation3 + $0x29e8] sm:$0xff] }
 0x312   :  { %5918 = vmatpush1.bf16.msra.mxu0 %v5917_v11  ;;  %v1292_v11 = vld [vmem:[#allocation3 + $0x2570] sm:$0xff]  ;;  %v1389_v28 = vld [vmem:[#allocation3 + $0x2878] sm:$0xff]  ;;  %v5947_v23 = vpack.c.bf16 %v1435_v10, %v1419_v19  ;;  %v1451_v32 = vld [vmem:[#allocation3 + $0x2a68] sm:$0xff] }
 0x313   :  { %6110 = vmatpush1.bf16.msra.mxu1 %v6109_v12  ;;  %5920 = vmatprep.subr.bf16.mxu0 %v5919_v13  ;;  %v6123_v12 = vpack.c.bf16 %v1309_v3, %v1293_v26  ;;  %v1308_v13 = vld [vmem:[#allocation3 + $0x25f0] sm:$0xff]  ;;  %v1386_v26 = vld [vmem:[#allocation3 + $0x2860] sm:$0xff]  ;;  %v1467_v33 = vld [vmem:[#allocation3 + $0x2ae8] sm:$0xff] }
 0x314   :  { %6112 = vmatprep.subr.bf16.mxu1 %v6111_v27  ;;  %v1341_v27 = vld [vmem:[#allocation3 + $0x26f8] sm:$0xff]  ;;  %v6125_v30 = vpack.c.bf16 %v1308_v13, %v1292_v11  ;;  %v1402_v3 = vld [vmem:[#allocation3 + $0x28e0] sm:$0xff]  ;;  %v5951_v39 = vpack.c.bf16 %v1467_v33, %v1451_v32  ;;  %v1483_v49 = vld [vmem:[#allocation3 + $0x2b68] sm:$0xff] }
 0x315   :  { %v1421_v11 = vld [vmem:[#allocation3 + $0x2978] sm:$0xff]  ;;  %v5945_v13 = vpack.c.bf16 %v1402_v3, %v1386_v26  ;;  %v1499_v50 = vld [vmem:[#allocation3 + $0x2be8] sm:$0xff] }
 0x316   :  { %5922 = vmatpush1.bf16.msra.mxu0 %v5921_v34  ;;  %v1324_v34 = vld [vmem:[#allocation3 + $0x2670] sm:$0xff]  ;;  %v5955_v55 = vpack.c.bf16 %v1499_v50, %v1483_v49  ;;  %v1515_v26 = vld [vmem:[#allocation3 + $0x2c68] sm:$0xff] }
 0x317   :  { %6114 = vmatpush1.bf16.msra.mxu1 %v6113_v35  ;;  %5924 = vmatprep.subr.bf16.mxu0 %v5923_v36  ;;  %v6127_v35 = vpack.c.bf16 %v1341_v27, %v1325_v25  ;;  %v1340_v36 = vld [vmem:[#allocation3 + $0x26f0] sm:$0xff]  ;;  %v1418_v25 = vld [vmem:[#allocation3 + $0x2960] sm:$0xff]  ;;  %v1531_v3 = vld [vmem:[#allocation3 + $0x2ce8] sm:$0xff] }
 0x318   :  { %6116 = vmatprep.subr.bf16.mxu1 %v6115_v42  ;;  %v1373_v42 = vld [vmem:[#allocation3 + $0x27f8] sm:$0xff]  ;;  %v6129_v46 = vpack.c.bf16 %v1340_v36, %v1324_v34  ;;  %v1434_v27 = vld [vmem:[#allocation3 + $0x29e0] sm:$0xff]  ;;  %v5959_v10 = vpack.c.bf16 %v1531_v3, %v1515_v26 }
 0x319   :  { %v1453_v34 = vld [vmem:[#allocation3 + $0x2a78] sm:$0xff]  ;;  %v5949_v36 = vpack.c.bf16 %v1434_v27, %v1418_v25  ;;  %v1547_v25 = vld [vmem:[#allocation3 + $0x2d68] sm:$0xff] }
 0x31a   :  { %5926 = vmatpush1.bf16.msra.mxu0 %v5925_v51  ;;  %v1356_v51 = vld [vmem:[#allocation3 + $0x2770] sm:$0xff]  ;;  %v1563_v27 = vld [vmem:[#allocation3 + $0x2de8] sm:$0xff]  ;;  %v1613_v26 = vld [vmem:[#allocation3 + $0x2f78] sm:$0xff] }
 0x31b   :  { %6118 = vmatpush1.bf16.msra.mxu1 %v6117_v38  ;;  %5928 = vmatprep.subr.bf16.mxu0 %v5927_v21  ;;  %v6131_v38 = vpack.c.bf16 %v1373_v42, %v1357_v41  ;;  %v1372_v21 = vld [vmem:[#allocation3 + $0x27f0] sm:$0xff]  ;;  %v1450_v41 = vld [vmem:[#allocation3 + $0x2a60] sm:$0xff]  ;;  %v5963_v33 = vpack.c.bf16 %v1563_v27, %v1547_v25  ;;  %v1629_v3 = vld [vmem:[#allocation3 + $0x2ff8] sm:$0xff] }
 0x31c   :  { %6120 = vmatprep.subr.bf16.mxu1 %v6119_v63  ;;  %v1405_v63 = vld [vmem:[#allocation3 + $0x28f8] sm:$0xff]  ;;  %v6133_v1 = vpack.c.bf16 %v1372_v21, %v1356_v51  ;;  %v1466_v42 = vld [vmem:[#allocation3 + $0x2ae0] sm:$0xff] }
 0x31d   :  { %v1485_v51 = vld [vmem:[#allocation3 + $0x2b78] sm:$0xff]  ;;  %v5953_v21 = vpack.c.bf16 %v1466_v42, %v1450_v41  ;;  %v1579_v41 = vld [vmem:[#allocation3 + $0x2e68] sm:$0xff] }
 0x31e   :  { %5930 = vmatpush1.bf16.msra.mxu0 %v5929_v4  ;;  %v1388_v4 = vld [vmem:[#allocation3 + $0x2870] sm:$0xff]  ;;  %v1595_v42 = vld [vmem:[#allocation3 + $0x2ee8] sm:$0xff]  ;;  %v3543_v27 = vld [vmem:[#allocation7 + $0x188] sm:$0xff] }
 0x31f   :  { %6122 = vmatpush1.bf16.msra.mxu1 %v6121_v5  ;;  %5932 = vmatprep.subr.bf16.mxu0 %v5931_v8  ;;  %v6135_v5 = vpack.c.bf16 %v1405_v63, %v1389_v28  ;;  %v1404_v8 = vld [vmem:[#allocation3 + $0x28f0] sm:$0xff]  ;;  %v1482_v28 = vld [vmem:[#allocation3 + $0x2b60] sm:$0xff] }
 0x320   :  { %6124 = vmatprep.subr.bf16.mxu1 %v6123_v12  ;;  %v1437_v12 = vld [vmem:[#allocation3 + $0x29f8] sm:$0xff]  ;;  %v6137_v18 = vpack.c.bf16 %v1404_v8, %v1388_v4  ;;  %v1498_v63 = vld [vmem:[#allocation3 + $0x2be0] sm:$0xff] }
 0x321   :  { %v1517_v4 = vld [vmem:[#allocation3 + $0x2c78] sm:$0xff]  ;;  %v5957_v8 = vpack.c.bf16 %v1498_v63, %v1482_v28  ;;  %v1596_v28 = vld [vmem:[#allocation3 + $0x2ef0] sm:$0xff]  ;;  %v1611_v63 = vld [vmem:[#allocation3 + $0x2f68] sm:$0xff] }
 0x322   :  { %5934 = vmatpush1.bf16.msra.mxu0 %v5933_v29  ;;  %v1420_v29 = vld [vmem:[#allocation3 + $0x2970] sm:$0xff] }
 0x323   :  { %6126 = vmatpush1.bf16.msra.mxu1 %v6125_v30  ;;  %5936 = vmatprep.subr.bf16.mxu0 %v5935_v31  ;;  %v6139_v30 = vpack.c.bf16 %v1437_v12, %v1421_v11  ;;  %v1436_v31 = vld [vmem:[#allocation3 + $0x29f0] sm:$0xff]  ;;  %v1514_v11 = vld [vmem:[#allocation3 + $0x2c60] sm:$0xff] }
 0x324   :  { %6128 = vmatprep.subr.bf16.mxu1 %v6127_v35  ;;  %v1469_v35 = vld [vmem:[#allocation3 + $0x2af8] sm:$0xff]  ;;  %v6141_v37 = vpack.c.bf16 %v1436_v31, %v1420_v29  ;;  %v1530_v12 = vld [vmem:[#allocation3 + $0x2ce0] sm:$0xff] }
 0x325   :  { %v1549_v29 = vld [vmem:[#allocation3 + $0x2d78] sm:$0xff]  ;;  %v5961_v31 = vpack.c.bf16 %v1530_v12, %v1514_v11  ;;  %v1626_v11 = vld [vmem:[#allocation3 + $0x2fe0] sm:$0xff]  ;;  %v1612_v12 = vld [vmem:[#allocation3 + $0x2f70] sm:$0xff] }
 0x326   :  { %5938 = vmatpush1.bf16.msra.mxu0 %v5937_v16  ;;  %v1452_v16 = vld [vmem:[#allocation3 + $0x2a70] sm:$0xff] }
 0x327   :  { %6130 = vmatpush1.bf16.msra.mxu1 %v6129_v46  ;;  %5940 = vmatprep.subr.bf16.mxu0 %v5939_v47  ;;  %v6143_v46 = vpack.c.bf16 %v1469_v35, %v1453_v34  ;;  %v1468_v47 = vld [vmem:[#allocation3 + $0x2af0] sm:$0xff]  ;;  %v1546_v34 = vld [vmem:[#allocation3 + $0x2d60] sm:$0xff] }
 0x328   :  { %6132 = vmatprep.subr.bf16.mxu1 %v6131_v38  ;;  %v1501_v38 = vld [vmem:[#allocation3 + $0x2bf8] sm:$0xff]  ;;  %v6145_v54 = vpack.c.bf16 %v1468_v47, %v1452_v16  ;;  %v1562_v35 = vld [vmem:[#allocation3 + $0x2de0] sm:$0xff] }
 0x329   :  { %v1581_v16 = vld [vmem:[#allocation3 + $0x2e78] sm:$0xff]  ;;  %v6792_v47 = vld [vmem:[#allocation5] sm:$0xff]  ;;  %v5965_v49 = vpack.c.bf16 %v1562_v35, %v1546_v34  ;;  %v3526_v35 = vld [vmem:[#allocation7 + $0x100] sm:$0xff] }
 0x32a   :  { %5942 = vmatpush1.bf16.msra.mxu0 %v5941_v0  ;;  %v1484_v0 = vld [vmem:[#allocation3 + $0x2b70] sm:$0xff] }
 0x32b   :  { %6134 = vmatpush1.bf16.msra.mxu1 %v6133_v1  ;;  %5944 = vmatprep.subr.bf16.mxu0 %v5943_v2  ;;  %v6147_v1 = vpack.c.bf16 %v1501_v38, %v1485_v51  ;;  %v1500_v2 = vld [vmem:[#allocation3 + $0x2bf0] sm:$0xff]  ;;  %v5967_v51 = vpack.c.bf16 %v1595_v42, %v1579_v41  ;;  %v1578_v38 = vld [vmem:[#allocation3 + $0x2e60] sm:$0xff]  ;;  %v3513_v41 = vld [vmem:[#allocation7 + $0x98] sm:$0xff] }
 0x32c   :  { %6136 = vmatprep.subr.bf16.mxu1 %v6135_v5  ;;  %v1533_v5 = vld [vmem:[#allocation3 + $0x2cf8] sm:$0xff]  ;;  %v6149_v19 = vpack.c.bf16 %v1500_v2, %v1484_v0  ;;  %v1627_v0 = vld [vmem:[#allocation3 + $0x2fe8] sm:$0xff]  ;;  %v3413_v2 = vrot.slane %v6792_v47, %v3412_v43  ;;  %v6163_v43 = vpack.c.bf16 %v1629_v3, %v1613_v26  ;;  %v3498_v26 = vld [vmem:[#allocation7 + $0x20] sm:$0xff] }
 0x32d   :  { %v3499_v3 = vld [vmem:[#allocation7 + $0x28] sm:$0xff] }
 0x32e   :  { %5946 = vmatpush1.bf16.msra.mxu0 %v5945_v13  ;;  %v1516_v13 = vld [vmem:[#allocation3 + $0x2c70] sm:$0xff] }
 0x32f   :  { %6138 = vmatpush1.bf16.msra.mxu1 %v6137_v18  ;;  %5948 = vmatprep.subr.bf16.mxu0 %v5947_v23  ;;  %v6151_v18 = vpack.c.bf16 %v1533_v5, %v1517_v4  ;;  %v1532_v23 = vld [vmem:[#allocation3 + $0x2cf0] sm:$0xff]  ;;  %v3417_v4 = vrot.slane %v6792_v47, %v3416_v44  ;;  %v3421_v5 = vrot.slane %v6792_v47, %v3420_v45 }
 0x330   :  { %6140 = vmatprep.subr.bf16.mxu1 %v6139_v30  ;;  %v1565_v30 = vld [vmem:[#allocation3 + $0x2df8] sm:$0xff]  ;;  %v6153_v32 = vpack.c.bf16 %v1532_v23, %v1516_v13  ;;  %v1628_v13 = vld [vmem:[#allocation3 + $0x2ff0] sm:$0xff] }
 0x331   :  { %v3511_v23 = vld [vmem:[#allocation7 + $0x88] sm:$0xff]  ;;  %v3542_v44 = vld [vmem:[#allocation7 + $0x180] sm:$0xff] }
 0x332   :  { %5950 = vmatpush1.bf16.msra.mxu0 %v5949_v36  ;;  %v1548_v36 = vld [vmem:[#allocation3 + $0x2d70] sm:$0xff]  ;;  %v6199_v34 = vpack.c.bf16 %v3543_v27, %v3542_v44  ;;  %v3533_v27 = vld [vmem:[#allocation7 + $0x138] sm:$0xff] }
 0x333   :  { %6142 = vmatpush1.bf16.msra.mxu1 %v6141_v37  ;;  %5952 = vmatprep.subr.bf16.mxu0 %v5951_v39  ;;  %v6155_v37 = vpack.c.bf16 %v1565_v30, %v1549_v29  ;;  %v1564_v39 = vld [vmem:[#allocation3 + $0x2df0] sm:$0xff]  ;;  %v3471_v29 = vcombine.low %v3417_v4, %v3421_v5  ;;  %v6165_v30 = vpack.c.bf16 %v1628_v13, %v1612_v12 }
 0x334   :  { %6144 = vmatprep.subr.bf16.mxu1 %v6143_v46  ;;  %v1597_v46 = vld [vmem:[#allocation3 + $0x2ef8] sm:$0xff]  ;;  %v6157_v50 = vpack.c.bf16 %v1564_v39, %v1548_v36  ;;  %v3512_v39 = vld [vmem:[#allocation7 + $0x90] sm:$0xff]  ;;  %v3530_v4 = vld [vmem:[#allocation7 + $0x120] sm:$0xff]  ;;  %v6177_v12 = vpack.c.bf16 %v3499_v3, %v3498_v26  ;;  %v3436_v26 = vsub.s32 7, %v6761_v17 }
 0x335   :  { %v3527_v36 = vld [vmem:[#allocation7 + $0x108] sm:$0xff]  ;;  %v6814_v42 = vadd.f32 %v3471_v29, %v3360_v24  ;;  %v6171_v9 = vpack.c.bf16 %v3513_v41, %v3512_v39  ;;  %v3518_v29 = vld [vmem:[#allocation7 + $0xc0] sm:$0xff] }
 0x336   :  { %5954 = vmatpush1.bf16.msra.mxu0 %v5953_v21  ;;  %v1594_v21 = vld [vmem:[#allocation3 + $0x2ee0] sm:$0xff]  ;;  %v3534_v39 = vld [vmem:[#allocation7 + $0x140] sm:$0xff] }
 0x337   :  { %6146 = vmatpush1.bf16.msra.mxu1 %v6145_v54  ;;  %5956 = vmatprep.subr.bf16.mxu0 %v5955_v55  ;;  %v1580_v54 = vld [vmem:[#allocation3 + $0x2e70] sm:$0xff]  ;;  %v6159_v55 = vpack.c.bf16 %v1597_v46, %v1581_v16  ;;  %v3544_v46 = vld [vmem:[#allocation7 + $0x190] sm:$0xff] }
 0x338   :  { %6148 = vmatprep.subr.bf16.mxu1 %v6147_v1  ;;  %v3409_v1 = vrot.slane %v6792_v47, %v3408_v40  ;;  %v5971_v40 = vpack.c.bf16 %v1627_v0, %v1611_v63  ;;  %v3766_v63 = vcombine.high %v6814_v42, %v6814_v42 }
 0x33a   :  { %5958 = vmatpush1.bf16.msra.mxu0 %v5957_v8  ;;  %v5969_v8 = vpack.c.bf16 %v1594_v21, %v1578_v38  ;;  %v3470_v25 = vcombine.low %v3409_v1, %v3413_v2  ;;  %v3497_v38 = vld [vmem:[#allocation7 + $0x18] sm:$0xff]  ;;  %v3528_v21 = vld [vmem:[#allocation7 + $0x110] sm:$0xff] }
 0x33b   :  { %6150 = vmatpush1.bf16.msra.mxu1 %v6149_v19  ;;  %5960 = vmatprep.subr.bf16.mxu0 %v5959_v10  ;;  %v6161_v19 = vpack.c.bf16 %v1596_v28, %v1580_v54  ;;  %v1610_v10 = vld [vmem:[#allocation3 + $0x2f60] sm:$0xff]  ;;  %v3515_v54 = vld [vmem:[#allocation7 + $0xa8] sm:$0xff]  ;;  %v6205_v1 = vpack.c.bf16 %v3529_v15, %v3528_v21 }
 0x33c   :  { %6152 = vmatprep.subr.bf16.mxu1 %v6151_v18  ;;  %v3510_v18 = vld [vmem:[#allocation7 + $0x80] sm:$0xff]  ;;  %v5973_v45 = vpack.c.bf16 %v1626_v11, %v1610_v10  ;;  %v3547_v28 = vld [vmem:[#allocation7 + $0x1a8] sm:$0xff]  ;;  %v3548_v10 = vld [vmem:[#allocation7 + $0x1b0] sm:$0xff] }
 0x33d   :  { %v3549_v11 = vld [vmem:[#allocation7 + $0x1b8] sm:$0xff]  ;;  %v3504_v15 = vld [vmem:[#allocation7 + $0x50] sm:$0xff] }
 0x33e   :  { %5962 = vmatpush1.bf16.msra.mxu0 %v5961_v31  ;;  %v6167_v31 = vpack.c.bf16 %v3511_v23, %v3510_v18  ;;  %v3500_v18 = vld [vmem:[#allocation7 + $0x30] sm:$0xff]  ;;  %v3501_v23 = vld [vmem:[#allocation7 + $0x38] sm:$0xff]  ;;  %v6211_v44 = vpack.c.bf16 %v3549_v11, %v3548_v10 }
 0x33f   :  { %6154 = vmatpush1.bf16.msra.mxu1 %v6153_v32  ;;  %5964 = vmatprep.subr.bf16.mxu0 %v5963_v33  ;;  %v3494_v32 = vld [vmem:[#allocation7] sm:$0xff]  ;;  %v3495_v33 = vld [vmem:[#allocation7 + $0x8] sm:$0xff] }
 0x340   :  { %6156 = vmatprep.subr.bf16.mxu1 %v6155_v37  ;;  %v6809_v37 = vadd.f32 %v3470_v25, %v3359_v20  ;;  %v6169_v16 = vpack.c.bf16 %v3495_v33, %v3494_v32  ;;  %v3514_v20 = vld [vmem:[#allocation7 + $0xa0] sm:$0xff]  ;;  %v3532_v25 = vld [vmem:[#allocation7 + $0x130] sm:$0xff]  ;;  %v6181_v32 = vpack.c.bf16 %v3501_v23, %v3500_v18 }
 0x341   :  { %v6175_v2 = vpack.c.bf16 %v3515_v54, %v3514_v20  ;;  %v6213_v33 = vpack.c.bf16 %v3533_v27, %v3532_v25  ;;  %v3505_v20 = vld [vmem:[#allocation7 + $0x58] sm:$0xff]  ;;  %v3536_v54 = vld [vmem:[#allocation7 + $0x150] sm:$0xff] }
 0x342   :  { %5966 = vmatpush1.bf16.msra.mxu0 %v5965_v49  ;;  %v3545_v49 = vld [vmem:[#allocation7 + $0x198] sm:$0xff]  ;;  %v3765_v22 = vcombine.high %v6809_v37, %v6809_v37  ;;  %v6189_v3 = vpack.c.bf16 %v3505_v20, %v3504_v15  ;;  %v3556_v27 = vld [vmem:[#allocation7 + $0x1f0] sm:$0xff]  ;;  %v3607_v15 = vld [vmem:[#allocation7 + $0x388] sm:$0xff] }
 0x343   :  { %6158 = vmatpush1.bf16.msra.mxu1 %v6157_v50  ;;  %5968 = vmatprep.subr.bf16.mxu0 %v5967_v51  ;;  %v6201_v50 = vpack.c.bf16 %v3527_v36, %v3526_v35  ;;  %v3496_v51 = vld [vmem:[#allocation7 + $0x10] sm:$0xff]  ;;  %v6203_v24 = vpack.c.bf16 %v3545_v49, %v3544_v46  ;;  %v3502_v35 = vld [vmem:[#allocation7 + $0x40] sm:$0xff]  ;;  %v3503_v36 = vld [vmem:[#allocation7 + $0x48] sm:$0xff] }
 0x344   :  { %6160 = vmatprep.subr.bf16.mxu1 %v6159_v55  ;;  %v3546_v55 = vld [vmem:[#allocation7 + $0x1a0] sm:$0xff]  ;;  %v6173_v0 = vpack.c.bf16 %v3497_v38, %v3496_v51  ;;  %v3520_v46 = vld [vmem:[#allocation7 + $0xd0] sm:$0xff]  ;;  %v3521_v49 = vld [vmem:[#allocation7 + $0xd8] sm:$0xff]  ;;  %v6185_v38 = vpack.c.bf16 %v3503_v36, %v3502_v35 }
 0x345   :  { %v6207_v5 = vpack.c.bf16 %v3547_v28, %v3546_v55  ;;  %v3553_v51 = vld [vmem:[#allocation7 + $0x1d8] sm:$0xff]  ;;  %v3523_v55 = vld [vmem:[#allocation7 + $0xe8] sm:$0xff]  ;;  %v3424_v28 = vsub.s32 4, %v6761_v17 }
 0x346   :  { %5970 = vmatpush1.bf16.msra.mxu0 %v5969_v8  ;;  %v3531_v8 = vld [vmem:[#allocation7 + $0x128] sm:$0xff] }
 0x347   :  { %6162 = vmatpush1.bf16.msra.mxu1 %v6161_v19  ;;  %5972 = vmatprep.subr.bf16.mxu0 %v5971_v40  ;;  %v3516_v19 = vld [vmem:[#allocation7 + $0xb0] sm:$0xff]  ;;  %v3517_v40 = vld [vmem:[#allocation7 + $0xb8] sm:$0xff]  ;;  %v3425_v18 = vrot.slane %v6792_v47, %v3424_v28 }
 0x348   :  { %6164 = vmatprep.subr.bf16.mxu1 %v6163_v43  ;;  %v6209_v43 = vpack.c.bf16 %v3531_v8, %v3530_v4  ;;  %v6179_v13 = vpack.c.bf16 %v3517_v40, %v3516_v19  ;;  %v3506_v8 = vld [vmem:[#allocation7 + $0x60] sm:$0xff]  ;;  %v3507_v19 = vld [vmem:[#allocation7 + $0x68] sm:$0xff] }
 0x349   :  { %v3538_v40 = vld [vmem:[#allocation7 + $0x160] sm:$0xff] }
 0x34a   :  { %5974 = vmatpush1.bf16.msra.mxu0 %v5973_v45  ;;  %v3519_v45 = vld [vmem:[#allocation7 + $0xc8] sm:$0xff] }
 0x34b   :  { %6166 = vmatpush1.bf16.msra.mxu1 %v6165_v30  ;;  %6168 = vmatprep.subr.bf16.mxu0 %v6167_v31  ;;  %v3550_v30 = vld [vmem:[#allocation7 + $0x1c0] sm:$0xff]  ;;  %v3551_v31 = vld [vmem:[#allocation7 + $0x1c8] sm:$0xff] }
 0x34c   :  { %6200 = vmatprep.subr.bf16.mxu1 %v6199_v34  ;;  %v6183_v34 = vpack.c.bf16 %v3519_v45, %v3518_v29  ;;  %v6215_v41 = vpack.c.bf16 %v3551_v31, %v3550_v30  ;;  %v3557_v29 = vld [vmem:[#allocation7 + $0x1f8] sm:$0xff]  ;;  %v3437_v30 = vrot.slane %v6792_v47, %v3436_v26 }
 0x34d   :  { %3124 = vmatmul.mubr.f32.vlgmr.msra.gmra.mrb[6].mxu0 %v6473_v14 }
 0x34e   :  { %3337 = vmatmul.mubr.f32.vlgmr.msra.gmra.mrb[6].mxu1 %v6473_v14  ;;  %6170 = vmatpush3.bf16.msra.mxu0 %v6169_v16  ;;  %v3535_v16 = vld [vmem:[#allocation7 + $0x148] sm:$0xff] }
 0x34f   :  { %3845 = vmatprep.mubr.f32.mxu0 %v3765_v22  ;;  %6202 = vmatpush3.bf16.msra.mxu1 %v6201_v50  ;;  %v3552_v50 = vld [vmem:[#allocation7 + $0x1d0] sm:$0xff]  ;;  %v6217_v21 = vpack.c.bf16 %v3535_v16, %v3534_v39  ;;  %v3537_v22 = vld [vmem:[#allocation7 + $0x158] sm:$0xff] }
 0x350   :  { %3915 = vmatprep.mubr.f32.mxu1 %v3766_v63  ;;  %6172 = vmatprep.subr.bf16.mxu0 %v6171_v9  ;;  %v6187_v9 = vpack.c.bf16 %v3521_v49, %v3520_v46  ;;  %v6219_v14 = vpack.c.bf16 %v3553_v51, %v3552_v50  ;;  %v3428_v63 = vsub.s32 5, %v6761_v17  ;;  %v6221_v4 = vpack.c.bf16 %v3537_v22, %v3536_v54  ;;  %v3508_v39 = vld [vmem:[#allocation7 + $0x70] sm:$0xff]  ;;  %v3574_v50 = vld [vmem:[#allocation7 + $0x280] sm:$0xff]  ;;  %v3575_v51 = vld [vmem:[#allocation7 + $0x288] sm:$0xff] }
 0x351   :  { %6204 = vmatprep.subr.bf16.mxu1 %v6203_v24  ;;  %v3522_v24 = vld [vmem:[#allocation7 + $0xe0] sm:$0xff]  ;;  %v3540_v16 = vld [vmem:[#allocation7 + $0x170] sm:$0xff]  ;;  %v6227_v49 = vpack.c.bf16 %v3557_v29, %v3556_v27  ;;  %v6231_v60 = vpack.c.bf16 %v3575_v51, %v3574_v50  ;;  %v3595_v27 = vld [vmem:[#allocation7 + $0x328] sm:$0xff] }
 0x352   :  { %6174 = vmatpush3.bf16.msra.mxu0 %v6173_v0  ;;  %v3554_v0 = vld [vmem:[#allocation7 + $0x1e0] sm:$0xff]  ;;  %v3429_v23 = vrot.slane %v6792_v47, %v3428_v63  ;;  %v3580_v29 = vld [vmem:[#allocation7 + $0x2b0] sm:$0xff]  ;;  %v3615_v50 = vld [vmem:[#allocation7 + $0x3c8] sm:$0xff] }
 0x353   :  { %6206 = vmatpush3.bf16.msra.mxu1 %v6205_v1  ;;  %6176 = vmatprep.subr.bf16.mxu0 %v6175_v2  ;;  %v3555_v1 = vld [vmem:[#allocation7 + $0x1e8] sm:$0xff]  ;;  %v3432_v2 = vsub.s32 6, %v6761_v17  ;;  %v4350_v17 = vld [vmem:[#allocation8] ss:$0 sm:$0xff] }
 0x354   :  { %6208 = vmatprep.subr.bf16.mxu1 %v6207_v5  ;;  %v6191_v5 = vpack.c.bf16 %v3523_v55, %v3522_v24  ;;  %v6223_v11 = vpack.c.bf16 %v3555_v1, %v3554_v0  ;;  %v3590_v24 = vld [vmem:[#allocation7 + $0x300] sm:$0xff]  ;;  %v3591_v55 = vld [vmem:[#allocation7 + $0x308] sm:$0xff] }
 0x355   :  { %v3433_v45 = vrot.slane %v6792_v47, %v3432_v2  ;;  %v3541_v47 = vld [vmem:[#allocation7 + $0x178] sm:$0xff] }
 0x356   :  { %6178 = vmatpush3.bf16.msra.mxu0 %v6177_v12  ;;  %v3539_v12 = vld [vmem:[#allocation7 + $0x168] sm:$0xff]  ;;  %v6229_v58 = vpack.c.bf16 %v3541_v47, %v3540_v16  ;;  %v3582_v16 = vld [vmem:[#allocation7 + $0x2c0] sm:$0xff] }
 0x357   :  { %6210 = vmatpush3.bf16.msra.mxu1 %v6209_v43  ;;  %6180 = vmatprep.subr.bf16.mxu0 %v6179_v13  ;;  %v3524_v43 = vld [vmem:[#allocation7 + $0xf0] sm:$0xff]  ;;  %v3525_v13 = vld [vmem:[#allocation7 + $0xf8] sm:$0xff]  ;;  %v6225_v35 = vpack.c.bf16 %v3539_v12, %v3538_v40  ;;  %v3473_v20 = vcombine.low %v3433_v45, %v3437_v30  ;;  %v3614_v47 = vld [vmem:[#allocation7 + $0x3c0] sm:$0xff] }
 0x358   :  { %6212 = vmatprep.subr.bf16.mxu1 %v6211_v44  ;;  %v6195_v36 = vpack.c.bf16 %v3525_v13, %v3524_v43  ;;  %v3592_v40 = vld [vmem:[#allocation7 + $0x310] sm:$0xff]  ;;  %v3581_v45 = vld [vmem:[#allocation7 + $0x2b8] sm:$0xff] }
 0x359   :  { %v6857_v0 = vadd.f32 %v3473_v20, %v3362_v59  ;;  %v3610_v59 = vld [vmem:[#allocation7 + $0x3a0] sm:$0xff]  ;;  %v6269_v13 = vpack.c.bf16 %v3593_v53, %v3592_v40  ;;  %v3613_v30 = vld [vmem:[#allocation7 + $0x3b8] sm:$0xff]  ;;  %v3567_v20 = vld [vmem:[#allocation7 + $0x248] sm:$0xff] }
 0x35a   :  { %6182 = vmatpush3.bf16.msra.mxu0 %v6181_v32  ;;  %v3587_v40 = vld [vmem:[#allocation7 + $0x2e8] sm:$0xff] }
 0x35b   :  { %6214 = vmatpush3.bf16.msra.mxu1 %v6213_v33  ;;  %6184 = vmatprep.subr.bf16.mxu0 %v6183_v34  ;;  %v6193_v33 = vpack.c.bf16 %v3507_v19, %v3506_v8  ;;  %v3560_v8 = vld [vmem:[#allocation7 + $0x210] sm:$0xff]  ;;  %v3561_v19 = vld [vmem:[#allocation7 + $0x218] sm:$0xff]  ;;  %v3768_v12 = vcombine.high %v6857_v0, %v6857_v0  ;;  %v3619_v53 = vld [vmem:[#allocation7 + $0x3e8] sm:$0xff] }
 0x35c   :  { %6216 = vmatprep.subr.bf16.mxu1 %v6215_v41  ;;  %v3509_v41 = vld [vmem:[#allocation7 + $0x78] sm:$0xff]  ;;  %v6237_v43 = vpack.c.bf16 %v3561_v19, %v3560_v8  ;;  %v3586_v19 = vld [vmem:[#allocation7 + $0x2e0] sm:$0xff] }
 0x35d   :  { %v6197_v54 = vpack.c.bf16 %v3509_v41, %v3508_v39  ;;  %v3597_v41 = vld [vmem:[#allocation7 + $0x338] sm:$0xff] }
 0x35e   :  { %6186 = vmatpush3.bf16.msra.mxu0 %v6185_v38  ;;  %v3472_v38 = vcombine.low %v3425_v18, %v3429_v23  ;;  %v3562_v23 = vld [vmem:[#allocation7 + $0x220] sm:$0xff]  ;;  %v3601_v8 = vld [vmem:[#allocation7 + $0x358] sm:$0xff] }
 0x35f   :  { %6218 = vmatpush3.bf16.msra.mxu1 %v6217_v21  ;;  %6188 = vmatprep.subr.bf16.mxu0 %v6187_v9  ;;  %v3606_v9 = vld [vmem:[#allocation7 + $0x380] sm:$0xff] }
 0x360   :  { %v2699_v10 = vpop.f32.mrb[4].mxu0  ;;  %6220 = vmatprep.subr.bf16.mxu1 %v6219_v14  ;;  %v3559_v14 = vld [vmem:[#allocation7 + $0x208] sm:$0xff]  ;;  %v6263_v22 = vpack.c.bf16 %v3607_v15, %v3606_v9  ;;  %v6852_v61 = vadd.f32 %v3472_v38, %v3361_v56  ;;  %v3578_v56 = vld [vmem:[#allocation7 + $0x2a0] sm:$0xff] }
 0x361   :  { %v2912_v25 = vpop.f32.mrb[4].mxu1  ;;  %v2701_v44 = vpop.f32.mrb[5].mxu0  ;;  %v3566_v15 = vld [vmem:[#allocation7 + $0x240] sm:$0xff] }
 0x362   :  { %v3363_v31 = vcombine.low %v2699_v10, %v2701_v44  ;;  %v2914_v32 = vpop.f32.mrb[5].mxu1  ;;  %6190 = vmatpush3.bf16.msra.mxu0 %v6189_v3  ;;  %v3608_v3 = vld [vmem:[#allocation7 + $0x390] sm:$0xff]  ;;  %v3579_v10 = vld [vmem:[#allocation7 + $0x2a8] sm:$0xff]  ;;  %v3767_v52 = vcombine.high %v6852_v61, %v6852_v61 }
 0x363   :  { %v3364_v34 = vcombine.low %v2912_v25, %v2914_v32  ;;  %6222 = vmatpush3.bf16.msra.mxu1 %v6221_v4  ;;  %6192 = vmatprep.subr.bf16.mxu0 %v6191_v5  ;;  %v3609_v4 = vld [vmem:[#allocation7 + $0x398] sm:$0xff]  ;;  %v6265_v5 = vpack.c.bf16 %v3591_v55, %v3590_v24  ;;  %v6239_v18 = vpack.c.bf16 %v3579_v10, %v3578_v56  ;;  %v3563_v25 = vld [vmem:[#allocation7 + $0x228] sm:$0xff] }
 0x364   :  { %v6842_v46 = vadd.f32 %v3474_v6, %v3363_v31  ;;  %6224 = vmatprep.subr.bf16.mxu1 %v6223_v11  ;;  %v3558_v6 = vld [vmem:[#allocation7 + $0x200] sm:$0xff]  ;;  %v6267_v57 = vpack.c.bf16 %v3609_v4, %v3608_v3  ;;  %v3611_v11 = vld [vmem:[#allocation7 + $0x3a8] sm:$0xff]  ;;  %v6241_v31 = vpack.c.bf16 %v3563_v25, %v3562_v23  ;;  %v3617_v24 = vld [vmem:[#allocation7 + $0x3d8] sm:$0xff]  ;;  %v6249_v55 = vpack.c.bf16 %v3567_v20, %v3566_v15 }
 0x365   :  { %v6847_v21 = vadd.f32 %v3475_v7, %v3364_v34  ;;  %v3577_v7 = vld [vmem:[#allocation7 + $0x298] sm:$0xff]  ;;  %v6233_v1 = vpack.c.bf16 %v3559_v14, %v3558_v6  ;;  %v6271_v44 = vpack.c.bf16 %v3611_v11, %v3610_v59  ;;  %v3564_v34 = vld [vmem:[#allocation7 + $0x230] sm:$0xff]  ;;  %v3571_v59 = vld [vmem:[#allocation7 + $0x268] sm:$0xff] }
 0x366   :  { %6194 = vmatpush3.bf16.msra.mxu0 %v6193_v33  ;;  %v6235_v48 = vpack.c.bf16 %v3577_v7, %v3576_v62  ;;  %v6243_v33 = vpack.c.bf16 %v3581_v45, %v3580_v29  ;;  %v3584_v6 = vld [vmem:[#allocation7 + $0x2d0] sm:$0xff]  ;;  %v3585_v14 = vld [vmem:[#allocation7 + $0x2d8] sm:$0xff]  ;;  %v3602_v11 = vld [vmem:[#allocation7 + $0x360] sm:$0xff] }
 0x367   :  { %6226 = vmatpush3.bf16.msra.mxu1 %v6225_v35  ;;  %6196 = vmatprep.subr.bf16.mxu0 %v6195_v36  ;;  %v3565_v35 = vld [vmem:[#allocation7 + $0x238] sm:$0xff]  ;;  %v3596_v36 = vld [vmem:[#allocation7 + $0x330] sm:$0xff]  ;;  %v6251_v7 = vpack.c.bf16 %v3585_v14, %v3584_v6 }
 0x368   :  { %6228 = vmatprep.subr.bf16.mxu1 %v6227_v49  ;;  %v3583_v49 = vld [vmem:[#allocation7 + $0x2c8] sm:$0xff]  ;;  %v6245_v51 = vpack.c.bf16 %v3565_v35, %v3564_v34  ;;  %v6277_v38 = vpack.c.bf16 %v3597_v41, %v3596_v36  ;;  %v3569_v3 = vld [vmem:[#allocation7 + $0x258] sm:$0xff]  ;;  %v3600_v4 = vld [vmem:[#allocation7 + $0x350] sm:$0xff] }
 0x369   :  { %v6247_v9 = vpack.c.bf16 %v3583_v49, %v3582_v16  ;;  %v6285_v10 = vpack.c.bf16 %v3601_v8, %v3600_v4  ;;  %v3620_v23 = vld [vmem:[#allocation7 + $0x3f0] sm:$0xff]  ;;  %v3621_v25 = vld [vmem:[#allocation7 + $0x3f8] sm:$0xff]  ;;  %v3670_v34 = vld [vmem:[#allocation7 + $0x580] sm:$0xff] }
 0x36a   :  { %6198 = vmatpush3.bf16.msra.mxu0 %v6197_v54  ;;  %v3598_v54 = vld [vmem:[#allocation7 + $0x340] sm:$0xff]  ;;  %v3572_v29 = vld [vmem:[#allocation7 + $0x270] sm:$0xff]  ;;  %v3573_v45 = vld [vmem:[#allocation7 + $0x278] sm:$0xff] }
 0x36b   :  { %6230 = vmatpush3.bf16.msra.mxu1 %v6229_v58  ;;  %6232 = vmatprep.subr.bf16.mxu0 %v6231_v60  ;;  %v6279_v58 = vpack.c.bf16 %v3615_v50, %v3614_v47  ;;  %v3599_v60 = vld [vmem:[#allocation7 + $0x348] sm:$0xff]  ;;  %v6261_v36 = vpack.c.bf16 %v3573_v45, %v3572_v29  ;;  %v3622_v16 = vld [vmem:[#allocation7 + $0x400] sm:$0xff]  ;;  %v3672_v20 = vld [vmem:[#allocation7 + $0x590] sm:$0xff] }
 0x36c   :  { %6264 = vmatprep.subr.bf16.mxu1 %v6263_v22  ;;  %v3616_v22 = vld [vmem:[#allocation7 + $0x3d0] sm:$0xff]  ;;  %v6281_v62 = vpack.c.bf16 %v3599_v60, %v3598_v54  ;;  %v3671_v35 = vld [vmem:[#allocation7 + $0x588] sm:$0xff]  ;;  %v3654_v50 = vld [vmem:[#allocation7 + $0x500] sm:$0xff] }
 0x36d   :  { %3846 = vmatmul.mubr.f32.vlgmr.msra.gmra.mrb[8].mxu0 %v6809_v37  ;;  %v3594_v37 = vld [vmem:[#allocation7 + $0x320] sm:$0xff]  ;;  %v3623_v49 = vld [vmem:[#allocation7 + $0x408] sm:$0xff]  ;;  %v6327_v47 = vpack.c.bf16 %v3671_v35, %v3670_v34  ;;  %v3673_v54 = vld [vmem:[#allocation7 + $0x598] sm:$0xff] }
 0x36e   :  { %3916 = vmatmul.mubr.f32.vlgmr.msra.gmra.mrb[8].mxu1 %v6814_v42  ;;  %6234 = vmatpush3.bf16.msra.mxu0 %v6233_v1  ;;  %v3612_v42 = vld [vmem:[#allocation7 + $0x3b0] sm:$0xff]  ;;  %v6273_v32 = vpack.c.bf16 %v3595_v27, %v3594_v37  ;;  %v6297_v15 = vpack.c.bf16 %v3623_v49, %v3622_v16  ;;  %v3625_v6 = vld [vmem:[#allocation7 + $0x418] sm:$0xff]  ;;  %v3675_v4 = vld [vmem:[#allocation7 + $0x5a8] sm:$0xff] }
 0x36f   :  { %3985 = vmatprep.mubr.f32.mxu0 %v3767_v52  ;;  %6266 = vmatpush3.bf16.msra.mxu1 %v6265_v5  ;;  %v6275_v39 = vpack.c.bf16 %v3613_v30, %v3612_v42  ;;  %v3568_v1 = vld [vmem:[#allocation7 + $0x250] sm:$0xff]  ;;  %v6283_v5 = vpack.c.bf16 %v3617_v24, %v3616_v22  ;;  %v6255_v52 = vpack.c.bf16 %v3587_v40, %v3586_v19  ;;  %v3657_v24 = vld [vmem:[#allocation7 + $0x518] sm:$0xff]  ;;  %v3678_v29 = vld [vmem:[#allocation7 + $0x5c0] sm:$0xff] }
 0x370   :  { %4055 = vmatprep.mubr.f32.mxu1 %v3768_v12  ;;  %6236 = vmatprep.subr.bf16.mxu0 %v6235_v48  ;;  %v3618_v48 = vld [vmem:[#allocation7 + $0x3e0] sm:$0xff]  ;;  %v6253_v56 = vpack.c.bf16 %v3569_v3, %v3568_v1  ;;  %v3604_v42 = vld [vmem:[#allocation7 + $0x370] sm:$0xff]  ;;  %v6291_v30 = vpack.c.bf16 %v3621_v25, %v3620_v23  ;;  %v6331_v1 = vpack.c.bf16 %v3673_v54, %v3672_v20  ;;  %v3679_v45 = vld [vmem:[#allocation7 + $0x5c8] sm:$0xff] }
 0x371   :  { %6268 = vmatprep.subr.bf16.mxu1 %v6267_v57  ;;  %v3570_v57 = vld [vmem:[#allocation7 + $0x260] sm:$0xff]  ;;  %v6287_v12 = vpack.c.bf16 %v3619_v53, %v3618_v48  ;;  %v3624_v60 = vld [vmem:[#allocation7 + $0x410] sm:$0xff]  ;;  %v3627_v53 = vld [vmem:[#allocation7 + $0x428] sm:$0xff]  ;;  %v6343_v35 = vpack.c.bf16 %v3679_v45, %v3678_v29 }
 0x372   :  { %6238 = vmatpush3.bf16.msra.mxu0 %v6237_v43  ;;  %v3603_v43 = vld [vmem:[#allocation7 + $0x368] sm:$0xff]  ;;  %v6257_v37 = vpack.c.bf16 %v3571_v59, %v3570_v57  ;;  %v3656_v14 = vld [vmem:[#allocation7 + $0x510] sm:$0xff]  ;;  %v3674_v3 = vld [vmem:[#allocation7 + $0x5a0] sm:$0xff]  ;;  %v6301_v8 = vpack.c.bf16 %v3625_v6, %v3624_v60 }
 0x373   :  { %6270 = vmatpush3.bf16.msra.mxu1 %v6269_v13  ;;  %6240 = vmatprep.subr.bf16.mxu0 %v6239_v18  ;;  %v3588_v13 = vld [vmem:[#allocation7 + $0x2f0] sm:$0xff]  ;;  %v3589_v18 = vld [vmem:[#allocation7 + $0x2f8] sm:$0xff]  ;;  %v6333_v19 = vpack.c.bf16 %v3657_v24, %v3656_v14  ;;  %v3626_v48 = vld [vmem:[#allocation7 + $0x420] sm:$0xff] }
 0x374   :  { %6272 = vmatprep.subr.bf16.mxu1 %v6271_v44  ;;  %v6289_v44 = vpack.c.bf16 %v3603_v43, %v3602_v11  ;;  %v6259_v27 = vpack.c.bf16 %v3589_v18, %v3588_v13  ;;  %v3645_v57 = vld [vmem:[#allocation7 + $0x4b8] sm:$0xff]  ;;  %v6305_v11 = vpack.c.bf16 %v3627_v53, %v3626_v48  ;;  %v3628_v13 = vld [vmem:[#allocation7 + $0x430] sm:$0xff]  ;;  %v3662_v34 = vld [vmem:[#allocation7 + $0x540] sm:$0xff] }
 0x375   :  { %v3677_v59 = vld [vmem:[#allocation7 + $0x5b8] sm:$0xff]  ;;  %v3660_v23 = vld [vmem:[#allocation7 + $0x530] sm:$0xff]  ;;  %v3651_v60 = vld [vmem:[#allocation7 + $0x4e8] sm:$0xff] }
 0x376   :  { %6242 = vmatpush3.bf16.msra.mxu0 %v6241_v31  ;;  %v3605_v31 = vld [vmem:[#allocation7 + $0x378] sm:$0xff]  ;;  %v3680_v16 = vld [vmem:[#allocation7 + $0x5d0] sm:$0xff]  ;;  %v3682_v6 = vld [vmem:[#allocation7 + $0x5e0] sm:$0xff] }
 0x377   :  { %6274 = vmatpush3.bf16.msra.mxu1 %v6273_v32  ;;  %6244 = vmatprep.subr.bf16.mxu0 %v6243_v33  ;;  %v3638_v32 = vld [vmem:[#allocation7 + $0x480] sm:$0xff]  ;;  %v3639_v33 = vld [vmem:[#allocation7 + $0x488] sm:$0xff]  ;;  %v3629_v18 = vld [vmem:[#allocation7 + $0x438] sm:$0xff] }
 0x378   :  { %6276 = vmatprep.subr.bf16.mxu1 %v6275_v39  ;;  %v6293_v39 = vpack.c.bf16 %v3605_v31, %v3604_v42  ;;  %v6295_v41 = vpack.c.bf16 %v3639_v33, %v3638_v32  ;;  %v6309_v42 = vpack.c.bf16 %v3629_v18, %v3628_v13  ;;  %v3630_v32 = vld [vmem:[#allocation7 + $0x440] sm:$0xff]  ;;  %v3631_v33 = vld [vmem:[#allocation7 + $0x448] sm:$0xff]  ;;  %v3681_v49 = vld [vmem:[#allocation7 + $0x5d8] sm:$0xff] }
 0x379   :  { %v6347_v20 = vpack.c.bf16 %v3681_v49, %v3680_v16  ;;  %v3665_v54 = vld [vmem:[#allocation7 + $0x558] sm:$0xff]  ;;  %v3683_v14 = vld [vmem:[#allocation7 + $0x5e8] sm:$0xff]  ;;  %v3704_v45 = vld [vmem:[#allocation7 + $0x690] sm:$0xff] }
 0x37a   :  { %6246 = vmatpush3.bf16.msra.mxu0 %v6245_v51  ;;  %v3655_v51 = vld [vmem:[#allocation7 + $0x508] sm:$0xff]  ;;  %v3721_v16 = vld [vmem:[#allocation7 + $0x718] sm:$0xff]  ;;  %v3706_v49 = vld [vmem:[#allocation7 + $0x6a0] sm:$0xff] }
 0x37b   :  { %6278 = vmatpush3.bf16.msra.mxu1 %v6277_v38  ;;  %6248 = vmatprep.subr.bf16.mxu0 %v6247_v9  ;;  %v3640_v38 = vld [vmem:[#allocation7 + $0x490] sm:$0xff]  ;;  %v3641_v9 = vld [vmem:[#allocation7 + $0x498] sm:$0xff]  ;;  %v3719_v29 = vld [vmem:[#allocation7 + $0x708] sm:$0xff] }
 0x37c   :  { %6280 = vmatprep.subr.bf16.mxu1 %v6279_v58  ;;  %v6329_v58 = vpack.c.bf16 %v3655_v51, %v3654_v50  ;;  %v6299_v22 = vpack.c.bf16 %v3641_v9, %v3640_v38  ;;  %v3632_v38 = vld [vmem:[#allocation7 + $0x450] sm:$0xff]  ;;  %v3633_v9 = vld [vmem:[#allocation7 + $0x458] sm:$0xff] }
 0x37e   :  { %6250 = vmatpush3.bf16.msra.mxu0 %v6249_v55  ;;  %v3642_v55 = vld [vmem:[#allocation7 + $0x4a0] sm:$0xff] }
 0x37f   :  { %6282 = vmatpush3.bf16.msra.mxu1 %v6281_v62  ;;  %6252 = vmatprep.subr.bf16.mxu0 %v6251_v7  ;;  %v3643_v62 = vld [vmem:[#allocation7 + $0x4a8] sm:$0xff]  ;;  %v3769_v7 = vcombine.high %v6842_v46, %v6842_v46 }
 0x380   :  { %6284 = vmatprep.subr.bf16.mxu1 %v6283_v5  ;;  %v3770_v5 = vcombine.high %v6847_v21, %v6847_v21  ;;  %v6303_v40 = vpack.c.bf16 %v3643_v62, %v3642_v55  ;;  %v3634_v62 = vld [vmem:[#allocation7 + $0x460] sm:$0xff] }
 0x382   :  { %6254 = vmatpush3.bf16.msra.mxu0 %v6253_v56  ;;  %v6335_v56 = vpack.c.bf16 %v3675_v4, %v3674_v3  ;;  %v6351_v3 = vpack.c.bf16 %v3683_v14, %v3682_v6  ;;  %v3667_v4 = vld [vmem:[#allocation7 + $0x568] sm:$0xff]  ;;  %v3708_v14 = vld [vmem:[#allocation7 + $0x6b0] sm:$0xff] }
 0x383   :  { %6286 = vmatpush3.bf16.msra.mxu1 %v6285_v10  ;;  %6256 = vmatprep.subr.bf16.mxu0 %v6255_v52  ;;  %v3659_v10 = vld [vmem:[#allocation7 + $0x528] sm:$0xff]  ;;  %v3644_v52 = vld [vmem:[#allocation7 + $0x4b0] sm:$0xff] }
 0x384   :  { %6288 = vmatprep.subr.bf16.mxu1 %v6287_v12  ;;  %v6307_v43 = vpack.c.bf16 %v3645_v57, %v3644_v52  ;;  %v3668_v52 = vld [vmem:[#allocation7 + $0x570] sm:$0xff]  ;;  %v3723_v6 = vld [vmem:[#allocation7 + $0x728] sm:$0xff] }
 0x386   :  { %6258 = vmatpush3.bf16.msra.mxu0 %v6257_v37  ;;  %v3661_v37 = vld [vmem:[#allocation7 + $0x538] sm:$0xff] }
 0x387   :  { %6290 = vmatpush3.bf16.msra.mxu1 %v6289_v44  ;;  %6260 = vmatprep.subr.bf16.mxu0 %v6259_v27  ;;  %v3646_v44 = vld [vmem:[#allocation7 + $0x4c0] sm:$0xff]  ;;  %v3647_v27 = vld [vmem:[#allocation7 + $0x4c8] sm:$0xff] }
 0x388   :  { %6292 = vmatprep.subr.bf16.mxu1 %v6291_v30  ;;  %v6341_v30 = vpack.c.bf16 %v3661_v37, %v3660_v23  ;;  %v6311_v31 = vpack.c.bf16 %v3647_v27, %v3646_v44  ;;  %v3687_v37 = vld [vmem:[#allocation7 + $0x608] sm:$0xff]  ;;  %v3718_v44 = vld [vmem:[#allocation7 + $0x700] sm:$0xff] }
 0x38a   :  { %6262 = vmatpush3.bf16.msra.mxu0 %v6261_v36  ;;  %v3663_v36 = vld [vmem:[#allocation7 + $0x548] sm:$0xff] }
 0x38b   :  { %6294 = vmatpush3.bf16.msra.mxu1 %v6293_v39  ;;  %6296 = vmatprep.subr.bf16.mxu0 %v6295_v41  ;;  %v3648_v39 = vld [vmem:[#allocation7 + $0x4d0] sm:$0xff]  ;;  %v3649_v41 = vld [vmem:[#allocation7 + $0x4d8] sm:$0xff]  ;;  %v6345_v50 = vpack.c.bf16 %v3663_v36, %v3662_v34 }
 0x38c   :  { %6328 = vmatprep.subr.bf16.mxu1 %v6327_v47  ;;  %v6313_v47 = vpack.c.bf16 %v3631_v33, %v3630_v32  ;;  %v6315_v51 = vpack.c.bf16 %v3649_v41, %v3648_v39  ;;  %v6393_v33 = vpack.c.bf16 %v3719_v29, %v3718_v44  ;;  %v3689_v36 = vld [vmem:[#allocation7 + $0x618] sm:$0xff]  ;;  %v3720_v39 = vld [vmem:[#allocation7 + $0x710] sm:$0xff] }
 0x38d   :  { %3986 = vmatmul.mubr.f32.vlgmr.msra.gmra.mrb[10].mxu0 %v6852_v61  ;;  %v3658_v61 = vld [vmem:[#allocation7 + $0x520] sm:$0xff]  ;;  %v3697_v44 = vld [vmem:[#allocation7 + $0x658] sm:$0xff] }
 0x38e   :  { %4056 = vmatmul.mubr.f32.vlgmr.msra.gmra.mrb[10].mxu1 %v6857_v0  ;;  %6298 = vmatpush3.bf16.msra.mxu0 %v6297_v15  ;;  %v3676_v0 = vld [vmem:[#allocation7 + $0x5b0] sm:$0xff]  ;;  %v6337_v12 = vpack.c.bf16 %v3659_v10, %v3658_v61  ;;  %v3637_v10 = vld [vmem:[#allocation7 + $0x478] sm:$0xff] }
 0x38f   :  { %4125 = vmatprep.mubr.f32.mxu0 %v3769_v7  ;;  %6330 = vmatpush3.bf16.msra.mxu1 %v6329_v58  ;;  %v6339_v25 = vpack.c.bf16 %v3677_v59, %v3676_v0  ;;  %v3664_v15 = vld [vmem:[#allocation7 + $0x550] sm:$0xff]  ;;  %v3650_v58 = vld [vmem:[#allocation7 + $0x4e0] sm:$0xff]  ;;  %v3635_v7 = vld [vmem:[#allocation7 + $0x468] sm:$0xff] }
 0x390   :  { %4195 = vmatprep.mubr.f32.mxu1 %v3770_v5  ;;  %6300 = vmatprep.subr.bf16.mxu0 %v6299_v22  ;;  %v6317_v22 = vpack.c.bf16 %v3633_v9, %v3632_v38  ;;  %v6349_v24 = vpack.c.bf16 %v3665_v54, %v3664_v15  ;;  %v6319_v55 = vpack.c.bf16 %v3651_v60, %v3650_v58  ;;  %v3652_v5 = vld [vmem:[#allocation7 + $0x4f0] sm:$0xff]  ;;  %v3669_v0 = vld [vmem:[#allocation7 + $0x578] sm:$0xff]  ;;  %v3702_v59 = vld [vmem:[#allocation7 + $0x680] sm:$0xff] }
 0x391   :  { %6332 = vmatprep.subr.bf16.mxu1 %v6331_v1  ;;  %v3666_v1 = vld [vmem:[#allocation7 + $0x560] sm:$0xff]  ;;  %v6321_v48 = vpack.c.bf16 %v3635_v7, %v3634_v62  ;;  %v6357_v18 = vpack.c.bf16 %v3669_v0, %v3668_v52  ;;  %v6397_v9 = vpack.c.bf16 %v3721_v16, %v3720_v39  ;;  %v3691_v54 = vld [vmem:[#allocation7 + $0x628] sm:$0xff]  ;;  %v3692_v7 = vld [vmem:[#allocation7 + $0x630] sm:$0xff] }
 0x392   :  { %6302 = vmatpush3.bf16.msra.mxu0 %v6301_v8  ;;  %v3653_v8 = vld [vmem:[#allocation7 + $0x4f8] sm:$0xff]  ;;  %v6353_v53 = vpack.c.bf16 %v3667_v4, %v3666_v1  ;;  %v3722_v58 = vld [vmem:[#allocation7 + $0x720] sm:$0xff]  ;;  %v3695_v52 = vld [vmem:[#allocation7 + $0x648] sm:$0xff] }
 0x393   :  { %6334 = vmatpush3.bf16.msra.mxu1 %v6333_v19  ;;  %6304 = vmatprep.subr.bf16.mxu0 %v6303_v40  ;;  %v3684_v19 = vld [vmem:[#allocation7 + $0x5f0] sm:$0xff]  ;;  %v3685_v40 = vld [vmem:[#allocation7 + $0x5f8] sm:$0xff]  ;;  %v6323_v61 = vpack.c.bf16 %v3653_v8, %v3652_v5  ;;  %v3710_v8 = vld [vmem:[#allocation7 + $0x6c0] sm:$0xff] }
 0x394   :  { %6336 = vmatprep.subr.bf16.mxu1 %v6335_v56  ;;  %v3636_v56 = vld [vmem:[#allocation7 + $0x470] sm:$0xff]  ;;  %v6355_v57 = vpack.c.bf16 %v3685_v40, %v3684_v19  ;;  %v3693_v1 = vld [vmem:[#allocation7 + $0x638] sm:$0xff]  ;;  %v3711_v19 = vld [vmem:[#allocation7 + $0x6c8] sm:$0xff] }
 0x395   :  { %v6325_v13 = vpack.c.bf16 %v3637_v10, %v3636_v56  ;;  %v3725_v5 = vld [vmem:[#allocation7 + $0x738] sm:$0xff]  ;;  %v3742_v40 = vld [vmem:[#allocation7 + $0x7c0] sm:$0xff]  ;;  %v6375_v56 = vpack.c.bf16 %v3711_v19, %v3710_v8  ;;  %v3699_v39 = vld [vmem:[#allocation7 + $0x668] sm:$0xff] }
 0x396   :  { %6306 = vmatpush3.bf16.msra.mxu0 %v6305_v11  ;;  %v3703_v11 = vld [vmem:[#allocation7 + $0x688] sm:$0xff]  ;;  %v3694_v10 = vld [vmem:[#allocation7 + $0x640] sm:$0xff] }
 0x397   :  { %6338 = vmatpush3.bf16.msra.mxu1 %v6337_v12  ;;  %6308 = vmatprep.subr.bf16.mxu0 %v6307_v43  ;;  %v3734_v12 = vld [vmem:[#allocation7 + $0x780] sm:$0xff]  ;;  %v3735_v43 = vld [vmem:[#allocation7 + $0x788] sm:$0xff]  ;;  %v6359_v23 = vpack.c.bf16 %v3703_v11, %v3702_v59  ;;  %v3712_v11 = vld [vmem:[#allocation7 + $0x6d0] sm:$0xff] }
 0x398   :  { %6340 = vmatprep.subr.bf16.mxu1 %v6339_v25  ;;  %v3686_v25 = vld [vmem:[#allocation7 + $0x600] sm:$0xff]  ;;  %v6391_v27 = vpack.c.bf16 %v3735_v43, %v3734_v12  ;;  %v3727_v59 = vld [vmem:[#allocation7 + $0x748] sm:$0xff]  ;;  %v3713_v12 = vld [vmem:[#allocation7 + $0x6d8] sm:$0xff] }
 0x399   :  { %v6361_v32 = vpack.c.bf16 %v3687_v37, %v3686_v25  ;;  %v3744_v43 = vld [vmem:[#allocation7 + $0x7d0] sm:$0xff]  ;;  %v6379_v25 = vpack.c.bf16 %v3713_v12, %v3712_v11 }
 0x39a   :  { %6310 = vmatpush3.bf16.msra.mxu0 %v6309_v42  ;;  %v3705_v42 = vld [vmem:[#allocation7 + $0x698] sm:$0xff]  ;;  %v3696_v37 = vld [vmem:[#allocation7 + $0x650] sm:$0xff] }
 0x39b   :  { %6342 = vmatpush3.bf16.msra.mxu1 %v6341_v30  ;;  %6312 = vmatprep.subr.bf16.mxu0 %v6311_v31  ;;  %v3736_v30 = vld [vmem:[#allocation7 + $0x790] sm:$0xff]  ;;  %v3737_v31 = vld [vmem:[#allocation7 + $0x798] sm:$0xff]  ;;  %v6363_v34 = vpack.c.bf16 %v3705_v42, %v3704_v45  ;;  %v3714_v42 = vld [vmem:[#allocation7 + $0x6e0] sm:$0xff] }
 0x39c   :  { %6344 = vmatprep.subr.bf16.mxu1 %v6343_v35  ;;  %v3688_v35 = vld [vmem:[#allocation7 + $0x610] sm:$0xff]  ;;  %v6395_v41 = vpack.c.bf16 %v3737_v31, %v3736_v30  ;;  %v3729_v45 = vld [vmem:[#allocation7 + $0x758] sm:$0xff]  ;;  %v3715_v30 = vld [vmem:[#allocation7 + $0x6e8] sm:$0xff] }
 0x39d   :  { %v6365_v38 = vpack.c.bf16 %v3689_v36, %v3688_v35  ;;  %v3746_v31 = vld [vmem:[#allocation7 + $0x7e0] sm:$0xff]  ;;  %v6383_v35 = vpack.c.bf16 %v3715_v30, %v3714_v42 }
 0x39e   :  { %6314 = vmatpush3.bf16.msra.mxu0 %v6313_v47  ;;  %v3707_v47 = vld [vmem:[#allocation7 + $0x6a8] sm:$0xff]  ;;  %v3698_v36 = vld [vmem:[#allocation7 + $0x660] sm:$0xff] }
 0x39f   :  { %6346 = vmatpush3.bf16.msra.mxu1 %v6345_v50  ;;  %6316 = vmatprep.subr.bf16.mxu0 %v6315_v51  ;;  %v3738_v50 = vld [vmem:[#allocation7 + $0x7a0] sm:$0xff]  ;;  %v3739_v51 = vld [vmem:[#allocation7 + $0x7a8] sm:$0xff]  ;;  %v6367_v15 = vpack.c.bf16 %v3707_v47, %v3706_v49  ;;  %v3716_v47 = vld [vmem:[#allocation7 + $0x6f0] sm:$0xff] }
 0x3a0   :  { %6348 = vmatprep.subr.bf16.mxu1 %v6347_v20  ;;  %v3690_v20 = vld [vmem:[#allocation7 + $0x620] sm:$0xff]  ;;  %v6399_v60 = vpack.c.bf16 %v3739_v51, %v3738_v50  ;;  %v3731_v49 = vld [vmem:[#allocation7 + $0x768] sm:$0xff]  ;;  %v3717_v50 = vld [vmem:[#allocation7 + $0x6f8] sm:$0xff] }
 0x3a1   :  { %v3748_v51 = vld [vmem:[#allocation7 + $0x7f0] sm:$0xff] }
 0x3a2   :  { %6318 = vmatpush3.bf16.msra.mxu0 %v6317_v22  ;;  %v3709_v22 = vld [vmem:[#allocation7 + $0x6b8] sm:$0xff] }
 0x3a3   :  { %6350 = vmatpush3.bf16.msra.mxu1 %v6349_v24  ;;  %6320 = vmatprep.subr.bf16.mxu0 %v6319_v55  ;;  %v3740_v24 = vld [vmem:[#allocation7 + $0x7b0] sm:$0xff]  ;;  %v6369_v55 = vpack.c.bf16 %v3691_v54, %v3690_v20  ;;  %v6371_v62 = vpack.c.bf16 %v3709_v22, %v3708_v14  ;;  %v6387_v20 = vpack.c.bf16 %v3717_v50, %v3716_v47  ;;  %v3733_v14 = vld [vmem:[#allocation7 + $0x778] sm:$0xff] }
 0x3a4   :  { %6352 = vmatprep.subr.bf16.mxu1 %v6351_v3  ;;  %v3724_v3 = vld [vmem:[#allocation7 + $0x730] sm:$0xff] }
 0x3a5   :  { %v3700_v54 = vld [vmem:[#allocation7 + $0x670] sm:$0xff] }
 0x3a6   :  { %6322 = vmatpush3.bf16.msra.mxu0 %v6321_v48  ;;  %v3743_v48 = vld [vmem:[#allocation7 + $0x7c8] sm:$0xff] }
 0x3a7   :  { %6354 = vmatpush3.bf16.msra.mxu1 %v6353_v53  ;;  %6324 = vmatprep.subr.bf16.mxu0 %v6323_v61  ;;  %v6373_v53 = vpack.c.bf16 %v3693_v1, %v3692_v7  ;;  %v6405_v61 = vpack.c.bf16 %v3725_v5, %v3724_v3  ;;  %v6407_v0 = vpack.c.bf16 %v3743_v48, %v3742_v40 }
 0x3a8   :  { %6356 = vmatprep.subr.bf16.mxu1 %v6355_v57  ;;  %v3726_v57 = vld [vmem:[#allocation7 + $0x740] sm:$0xff] }
 0x3aa   :  { %6326 = vmatpush3.bf16.msra.mxu0 %v6325_v13  ;;  %v3745_v13 = vld [vmem:[#allocation7 + $0x7d8] sm:$0xff] }
 0x3ab   :  { %6358 = vmatpush3.bf16.msra.mxu1 %v6357_v18  ;;  %6360 = vmatprep.subr.bf16.mxu0 %v6359_v23  ;;  %v6377_v18 = vpack.c.bf16 %v3695_v52, %v3694_v10  ;;  %v6409_v23 = vpack.c.bf16 %v3727_v59, %v3726_v57  ;;  %v6411_v29 = vpack.c.bf16 %v3745_v13, %v3744_v43 }
 0x3ac   :  { %6392 = vmatprep.subr.bf16.mxu1 %v6391_v27  ;;  %v3728_v27 = vld [vmem:[#allocation7 + $0x750] sm:$0xff] }
 0x3ad   :  { %4126 = vmatmul.mubr.f32.vlgmr.msra.gmra.mrb[12].mxu0 %v6842_v46  ;;  %v3741_v46 = vld [vmem:[#allocation7 + $0x7b8] sm:$0xff] }
 0x3ae   :  { %4196 = vmatmul.mubr.f32.vlgmr.msra.gmra.mrb[12].mxu1 %v6847_v21  ;;  %6362 = vmatpush3.bf16.msra.mxu0 %v6361_v32  ;;  %v6401_v21 = vpack.c.bf16 %v3723_v6, %v3722_v58  ;;  %v6403_v4 = vpack.c.bf16 %v3741_v46, %v3740_v24  ;;  %v3747_v32 = vld [vmem:[#allocation7 + $0x7e8] sm:$0xff]  ;;  %v3701_v58 = vld [vmem:[#allocation7 + $0x678] sm:$0xff]  ;;  %v3732_v6 = vld [vmem:[#allocation7 + $0x770] sm:$0xff] }
 0x3af   :  { %6394 = vmatpush3.bf16.msra.mxu1 %v6393_v33  ;;  %6364 = vmatprep.subr.bf16.mxu0 %v6363_v34  ;;  %v6381_v33 = vpack.c.bf16 %v3697_v44, %v3696_v37  ;;  %v6413_v34 = vpack.c.bf16 %v3729_v45, %v3728_v27  ;;  %v6415_v16 = vpack.c.bf16 %v3747_v32, %v3746_v31  ;;  %v6474_v46 = vld [vmem:[#allocation5 + $0x8] sm:$0xff] }
 0x3b0   :  { %6396 = vmatprep.subr.bf16.mxu1 %v6395_v41  ;;  %v3730_v41 = vld [vmem:[#allocation7 + $0x760] sm:$0xff]  ;;  %v6389_v22 = vpack.c.bf16 %v3701_v58, %v3700_v54  ;;  %v6421_v24 = vpack.c.bf16 %v3733_v14, %v3732_v6  ;;  %v3469_v7 = vrot.slane %v6474_v46, %v3436_v26 }
 0x3b2   :  { %6366 = vmatpush3.bf16.msra.mxu0 %v6365_v38  ;;  %v3749_v38 = vld [vmem:[#allocation7 + $0x7f8] sm:$0xff] }
 0x3b3   :  { %6398 = vmatpush3.bf16.msra.mxu1 %v6397_v9  ;;  %6368 = vmatprep.subr.bf16.mxu0 %v6367_v15  ;;  %v6385_v9 = vpack.c.bf16 %v3699_v39, %v3698_v36  ;;  %v6417_v15 = vpack.c.bf16 %v3731_v49, %v3730_v41 }
 0x3b4   :  { %6400 = vmatprep.subr.bf16.mxu1 %v6399_v60  ;;  %v6419_v60 = vpack.c.bf16 %v3749_v38, %v3748_v51 }
 0x3b6   :  { %6370 = vmatpush3.bf16.msra.mxu0 %v6369_v55  ;;  %v3457_v55 = vrot.slane %v6474_v46, %v3424_v28 }
 0x3b7   :  { %6402 = vmatpush3.bf16.msra.mxu1 %v6401_v21  ;;  %6372 = vmatprep.subr.bf16.mxu0 %v6371_v62  ;;  %v3461_v21 = vrot.slane %v6474_v46, %v3428_v63  ;;  %v3465_v62 = vrot.slane %v6474_v46, %v3432_v2 }
 0x3b8   :  { %6404 = vmatprep.subr.bf16.mxu1 %v6403_v4 }
 0x3b9   :  { %v3476_v3 = vcombine.low %v3457_v55, %v3461_v21  ;;  %v3477_v8 = vcombine.low %v3465_v62, %v3469_v7 }
 0x3ba   :  { %6374 = vmatpush3.bf16.msra.mxu0 %v6373_v53 }
 0x3bb   :  { %6406 = vmatpush3.bf16.msra.mxu1 %v6405_v61  ;;  %6376 = vmatprep.subr.bf16.mxu0 %v6375_v56 }
 0x3bc   :  { %6408 = vmatprep.subr.bf16.mxu1 %v6407_v0 }
 0x3be   :  { %6378 = vmatpush3.bf16.msra.mxu0 %v6377_v18 }
 0x3bf   :  { %6410 = vmatpush3.bf16.msra.mxu1 %v6409_v23  ;;  %6380 = vmatprep.subr.bf16.mxu0 %v6379_v25 }
 0x3c0   :  { %6412 = vmatprep.subr.bf16.mxu1 %v6411_v29 }
 0x3c2   :  { %6382 = vmatpush3.bf16.msra.mxu0 %v6381_v33 }
 0x3c3   :  { %6414 = vmatpush3.bf16.msra.mxu1 %v6413_v34  ;;  %6384 = vmatprep.subr.bf16.mxu0 %v6383_v35 }
 0x3c4   :  { %6416 = vmatprep.subr.bf16.mxu1 %v6415_v16 }
 0x3c6   :  { %6386 = vmatpush3.bf16.msra.mxu0 %v6385_v9 }
 0x3c7   :  { %6418 = vmatpush3.bf16.msra.mxu1 %v6417_v15  ;;  %6388 = vmatprep.subr.bf16.mxu0 %v6387_v20 }
 0x3c8   :  { %6420 = vmatprep.subr.bf16.mxu1 %v6419_v60 }
 0x3ca   :  { %6390 = vmatpush3.bf16.msra.mxu0 %v6389_v22 }
 0x3cb   :  { %6422 = vmatpush3.bf16.msra.mxu1 %v6421_v24 }
 0x420   :  { %v3125_v1 = vpop.f32.mrb[6].mxu0 }
 0x421   :  { %v3338_v4 = vpop.f32.mrb[6].mxu1  ;;  %v3127_v5 = vpop.f32.mrb[7].mxu0 }
 0x422   :  { %v3365_v19 = vcombine.low %v3125_v1, %v3127_v5  ;;  %v3340_v40 = vpop.f32.mrb[7].mxu1 }
 0x423   :  { %v3366_v48 = vcombine.low %v3338_v4, %v3340_v40 }
 0x424   :  { %v3492_v53 = vadd.f32 %v3476_v3, %v3365_v19 }
 0x425   :  { %v3493_v61 = vadd.f32 %v3477_v8, %v3366_v48 }
 0x426   :  { %v3771_v28 = vcombine.high %v3492_v53, %v3492_v53 }
 0x427   :  { %v3772_v56 = vcombine.high %v3493_v61, %v3493_v61 }
 0x428   :  { %4265 = vmatprep.mubr.f32.mxu0 %v3771_v28 }
 0x429   :  { %4335 = vmatprep.mubr.f32.mxu1 %v3772_v56  ;;  %4266 = vmatmul.mubr.f32.vlgmr.msra.gmra.mrb[14].mxu0 %v3492_v53 }
 0x42a   :  { %4336 = vmatmul.mubr.f32.vlgmr.msra.gmra.mrb[14].mxu1 %v3493_v61 }
 0x440   :  { %v4383_v63 = vpop.f32.mrb[8].mxu0 }
 0x441   :  { %v4418_v2 = vpop.f32.mrb[8].mxu1  ;;  %v4384_v26 = vpop.f32.mrb[9].mxu0 }
 0x442   :  { %v4385_v10 = vadd.f32 %v4384_v26, %v4383_v63  ;;  %v4419_v52 = vpop.f32.mrb[9].mxu1 }
 0x443   :  { %v4420_v57 = vadd.f32 %v4419_v52, %v4418_v2 }
 0x444   :  { %v3848_v0 = vadd.f32 %v4385_v10, %v4350_v17 }
 0x446   :  { %v3918_v59 = vadd.f32 %v4420_v57, %v3848_v0 }
 0x460   :  { %v4453_v11 = vpop.f32.mrb[10].mxu0 }
 0x461   :  { %v4488_v12 = vpop.f32.mrb[10].mxu1  ;;  %v4454_v43 = vpop.f32.mrb[11].mxu0 }
 0x462   :  { %v4455_v13 = vadd.f32 %v4454_v43, %v4453_v11  ;;  %v4489_v18 = vpop.f32.mrb[11].mxu1 }
 0x463   :  { %v4490_v23 = vadd.f32 %v4489_v18, %v4488_v12 }
 0x464   :  { %v3988_v25 = vadd.f32 %v4455_v13, %v3918_v59 }
 0x466   :  { %v4058_v37 = vadd.f32 %v4490_v23, %v3988_v25 }
 0x480   :  { %v4523_v44 = vpop.f32.mrb[12].mxu0 }
 0x481   :  { %v4558_v27 = vpop.f32.mrb[12].mxu1  ;;  %v4524_v29 = vpop.f32.mrb[13].mxu0 }
 0x482   :  { %v4525_v45 = vadd.f32 %v4524_v29, %v4523_v44  ;;  %v4559_v42 = vpop.f32.mrb[13].mxu1 }
 0x483   :  { %v4560_v30 = vadd.f32 %v4559_v42, %v4558_v27 }
 0x484   :  { %v4128_v31 = vadd.f32 %v4525_v45, %v4058_v37 }
 0x486   :  { %v4198_v32 = vadd.f32 %v4560_v30, %v4128_v31 }
 0x4fc   :  { %v4593_v33 = vpop.f32.mrb[14].mxu0 }
 0x4fd   :  { %v4628_v34 = vpop.f32.mrb[14].mxu1  ;;  %v4594_v35 = vpop.f32.mrb[15].mxu0 }
 0x4fe   :  { %v4595_v36 = vadd.f32 %v4594_v35, %v4593_v33  ;;  %v4629_v39 = vpop.f32.mrb[15].mxu1 }
 0x4ff   :  { %v4630_v41 = vadd.f32 %v4629_v39, %v4628_v34 }
 0x500   :  { %v4268_v16 = vadd.f32 %v4595_v36, %v4198_v32 }
 0x502   :  { %v4338_v49 = vadd.f32 %v4630_v41, %v4268_v16 }
 0x504   :  { %v4341_v47 = vmax.f32 %v4338_v49, 0.0 }
 0x506   :  { %4342 = vst [vmem:[%s6889_s5] sm:$0xf] %v4341_v47 }
 0x507   :  { %4347 = vsyncpa [#allocation4], 1 }
 0x508   :  { %4348 = vsyncpa [#allocation6], 1 }
 0x509   :  { %4349 = vsyncpa [#allocation9], 1 }

</bundles_post_ra>
